<compile_context>
chip_gen: v6e
topology: v6e:2x2x1
jax: 0.10.0
libtpu: 0.0.40
codegen_flags: <defaults>
</compile_context>

<pallas_src>
import math

import jax
import jax.numpy as jnp
from jax.experimental import pallas as pl
from jax.experimental.pallas import tpu as pltpu

BN_EPS = 1e-5


# ---------------------------------------------------------------------------
# capability probes / hardware limits
# ---------------------------------------------------------------------------

def _probe_single_buffered_weights():
    """True iff this JAX/Mosaic accepts pipeline_mode=pl.Buffered(1) specs."""
    if not hasattr(pl, "Buffered"):
        return False

    def _k(w_ref, x_ref, o_ref, scratch):
        scratch[...] = x_ref[0] + w_ref[0]
        o_ref[0] = scratch[...]

    try:
        fn = pl.pallas_call(
            _k,
            out_shape=jax.ShapeDtypeStruct((2, 8, 128), jnp.float32),
            grid_spec=pltpu.PrefetchScalarGridSpec(
                num_scalar_prefetch=0,
                grid=(2,),
                in_specs=[pl.BlockSpec((1, 8, 128), lambda i: (0, 0, 0),
                                       pipeline_mode=pl.Buffered(1)),
                          pl.BlockSpec((1, 8, 128), lambda i: (i, 0, 0))],
                out_specs=pl.BlockSpec((1, 8, 128), lambda i: (i, 0, 0)),
                scratch_shapes=[pltpu.VMEM((8, 128), jnp.float32)]),
            compiler_params=pltpu.CompilerParams(
                dimension_semantics=("parallel",)),
        )
        jax.block_until_ready(fn(jnp.zeros((1, 8, 128), jnp.float32),
                                 jnp.ones((2, 8, 128), jnp.float32)))
        return True
    except Exception:
        return False


_SINGLE_BUFFER_WEIGHTS = _probe_single_buffered_weights()


def _round_up(x, m):
    return -(-x // m) * m


def _vmem_cap_bytes():
    """Physical per-core VMEM minus headroom (generation-aware: 64 MiB on v7x)."""
    cap = 64 << 20                              # conservative default
    try:
        info = pltpu.get_tpu_info()
        cap = int(getattr(info, "vmem_capacity_bytes", cap))
    except Exception:
        pass
    return cap - (8 << 20)                      # headroom for Mosaic scratch


def _vmem_budget(H, W, C, B, x_bytes, out_bytes, with_residual):
    """Explicit per-call VMEM budget, capped by the device's physical VMEM."""
    HW = H * W
    lanes = _round_up(C, 128)
    sub = _round_up(C, 16)
    act = B * HW * lanes
    est = 2 * act * x_bytes                                   # input (2 bufs)
    est += 2 * act * out_bytes                                # output (2 bufs)
    if with_residual:
        est += 2 * act * 4                                    # residual f32
    est += (1 if _SINGLE_BUFFER_WEIGHTS else 2) * 9 * sub * lanes * 2   # weights
    est += _round_up((H + 2) * W + 32, 16) * lanes * 2        # bf16 halo buffer
    est += HW * lanes * 4                                     # f32 accumulator
    est += 64 * lanes * 4                                     # mean/istd/stats
    est = int(1.3 * est) + (2 << 20)
    cap = _vmem_cap_bytes()
    return max(min(est, cap), min(32 << 20, cap))


def _images_per_block(N, HW):
    """Pack several small images per grid step (target ~512 matmul rows) while
    keeping >= 2 grid steps so both TensorCores stay busy, and bounding unroll."""
    best = 1
    for b in range(1, N + 1):
        if N % b:
            continue
        if b > 1 and (b * HW > 512 or b > 8 or N // b < 2):
            break
        best = b
    return best


def _pad_offset(W):
    """Leading offset so the interior write lands sublane-aligned (bf16, 16)."""
    r = W % 16
    return 16 - r if r else 16


# ---------------------------- Pallas kernels ----------------------------

def _make_stats_kernel(B):
    """Per-block partial per-channel sum / sum-of-squares (grid over N // B)."""
    def kernel(x_ref, sum_ref, sq_ref):
        s = jnp.zeros((1, x_ref.shape[-1]), jnp.float32)
        q = jnp.zeros_like(s)
        for b in range(B):
            x = x_ref[b].astype(jnp.float32)            # (HW, C)
            s = s + jnp.sum(x, axis=0, keepdims=True)
            q = q + jnp.sum(x * x, axis=0, keepdims=True)
        sum_ref[0] = s
        sq_ref[0] = q
    return kernel


def _make_conv_kernel(H, W, C, B, ofs, R, with_residual, emit_stats):
    """Fused  bn -> relu -> 3x3 conv(pad=1)  [-> +residual] [-> stats(out)]."""
    HW = H * W
    top = ofs + W                # first interior row of the height-padded buffer
    bot = ofs + (H + 1) * W      # first bottom-padding row

    def kernel(*refs):
        it = iter(refs)
        mean_ref = next(it)                               # (1, C)       f32
        istd_ref = next(it)                               # (1, C)       f32
        x_ref = next(it)                                  # (B, HW, C)   f32/bf16
        w_ref = next(it)                                  # (9, C, C)    bf16
        res_ref = next(it) if with_residual else None     # (B, HW, C)   f32
        o_ref = next(it)                                  # (B, HW, C)
        sum_ref = next(it) if emit_stats else None        # (1, 1, C)    f32
        sq_ref = next(it) if emit_stats else None         # (1, 1, C)    f32
        buf_ref = next(it)                                # (R, C)       bf16
        acc_ref = next(it)                                # (HW, C)      f32

        mean = mean_ref[...]
        istd = istd_ref[...]

        # Output-column index of every flattened output row.  The kx=0 / kx=2
        # tap groups wrap around the row boundary of the flat buffer, so their
        # first / last output column must be zeroed (the true contribution
        # there is the zero width-padding).
        col = jax.lax.broadcasted_iota(jnp.int32, (HW, 1), 0) % W
        not_first_col = col != 0
        not_last_col = col != (W - 1)

        # Zero ONLY the top / bottom halo strips; the interior is fully
        # overwritten below every grid step (never a one-time program_id==0
        # init: scratch is per-core under "parallel" semantics).
        buf_ref[0:top, :] = jnp.zeros((top, C), jnp.bfloat16)
        buf_ref[bot:R, :] = jnp.zeros((R - bot, C), jnp.bfloat16)

        stat_sum = jnp.zeros((1, C), jnp.float32) if emit_stats else None
        stat_sq = jnp.zeros((1, C), jnp.float32) if emit_stats else None

        for b in range(B):
            # BatchNorm (no affine) + ReLU applied once per element, written as
            # ONE contiguous bf16 slab into the height-padded buffer.
            a = jnp.maximum((x_ref[b].astype(jnp.float32) - mean) * istd, 0.0)
            buf_ref[top:top + HW, :] = a.astype(jnp.bfloat16)

            # 3x3 conv (padding=1): 9 MXU dots whose LHS are contiguous slices
            # of the flat buffer, grouped by kx -> only 3 accumulator updates.
            for kx in range(3):
                g = None
                for ky in range(3):
                    start = ofs + ky * W + kx - 1
                    patch = buf_ref[start:start + HW, :]          # (HW, C) bf16
                    d = jnp.dot(patch, w_ref[3 * ky + kx],
                                preferred_element_type=jnp.float32)
                    g = d if g is None else g + d
                if kx == 0:
                    acc_ref[...] = jnp.where(not_first_col, g, 0.0)
                elif kx == 2:
                    acc_ref[...] += jnp.where(not_last_col, g, 0.0)
                else:
                    acc_ref[...] += g

            h = acc_ref[...]                                       # (HW, C) f32
            if with_residual:
                h = h + res_ref[b].astype(jnp.float32)
            if emit_stats:
                # Fused partial BN stats of this kernel's output (for the next
                # BatchNorm) - saves a full extra HBM pass over it.
                stat_sum = stat_sum + jnp.sum(h, axis=0, keepdims=True)
                stat_sq = stat_sq + jnp.sum(h * h, axis=0, keepdims=True)
            o_ref[b] = h.astype(o_ref.dtype)

        if emit_stats:
            sum_ref[0] = stat_sum
            sq_ref[0] = stat_sq

    return kernel


# ---------------------------- wrappers ----------------------------

def _finish_stats(sum_c, sq_c, M):
    """(1, C) sums -> per-channel mean and inv_std (biased var, PyTorch BN)."""
    # NOTE: E[x^2] - E[x]^2 in f32; fine at BN activation scales.
    # TODO(synk): switch to a shifted/two-pass variance if M or |mean| grows.
    mean = sum_c / M
    var = jnp.maximum(sq_c / M - mean * mean, 0.0)
    return mean, jax.lax.rsqrt(var + BN_EPS)


def _channel_stats(x_flat, H, W):
    """Per-channel (mean, inv_std) over all pixels of x_flat (N, H*W, C)."""
    N, HW, C = x_flat.shape
    B = _images_per_block(N, HW)
    G = N // B
    x_bytes = jnp.dtype(x_flat.dtype).itemsize
    sums, sqs = pl.pallas_call(
        _make_stats_kernel(B),
        out_shape=(jax.ShapeDtypeStruct((G, 1, C), jnp.float32),
                   jax.ShapeDtypeStruct((G, 1, C), jnp.float32)),
        grid_spec=pltpu.PrefetchScalarGridSpec(
            num_scalar_prefetch=0,
            grid=(G,),
            in_specs=[pl.BlockSpec((B, HW, C), lambda n: (n, 0, 0))],
            out_specs=(pl.BlockSpec((1, 1, C), lambda n: (n, 0, 0)),
                       pl.BlockSpec((1, 1, C), lambda n: (n, 0, 0)))),
        compiler_params=pltpu.CompilerParams(
            dimension_semantics=("parallel",),
            vmem_limit_bytes=_vmem_budget(H, W, C, B, x_bytes, 4, False)),
    )(x_flat)
    return _finish_stats(jnp.sum(sums, axis=0), jnp.sum(sqs, axis=0), N * HW)


def _weight_spec(C):
    if _SINGLE_BUFFER_WEIGHTS:
        # Constant index_map -> never re-DMA'd; single-buffer to halve its VMEM
        # (matters under the 64 MiB v7x cap for wide layers).
        return pl.BlockSpec((9, C, C), lambda n: (0, 0, 0),
                            pipeline_mode=pl.Buffered(1))
    return pl.BlockSpec((9, C, C), lambda n: (0, 0, 0))


def _bn_relu_conv(x_flat, mean, istd, w9, H, W, residual=None, emit_stats=False,
                  out_dtype=jnp.float32):
    """out = conv2d(relu((x-mean)*istd), w, pad=1) [+ residual] [, stats(out)]."""
    N, HW, C = x_flat.shape
    B = _images_per_block(N, HW)
    G = N // B
    ofs = _pad_offset(W)
    R = _round_up(ofs + (H + 2) * W + 1, 16)
    kernel = _make_conv_kernel(H, W, C, B, ofs, R, residual is not None,
                               emit_stats)

    in_specs = [
        pl.BlockSpec((1, C), lambda n: (0, 0)),            # mean    (broadcast)
        pl.BlockSpec((1, C), lambda n: (0, 0)),            # inv_std (broadcast)
        pl.BlockSpec((B, HW, C), lambda n: (n, 0, 0)),     # B images per step
        _weight_spec(C),                                   # resident weights
    ]
    args = [mean, istd, x_flat, w9]
    if residual is not None:
        in_specs.append(pl.BlockSpec((B, HW, C), lambda n: (n, 0, 0)))
        args.append(residual)

    out_shapes = [jax.ShapeDtypeStruct((N, HW, C), out_dtype)]
    out_specs = [pl.BlockSpec((B, HW, C), lambda n: (n, 0, 0))]
    if emit_stats:
        out_shapes += [jax.ShapeDtypeStruct((G, 1, C), jnp.float32)] * 2
        out_specs += [pl.BlockSpec((1, 1, C), lambda n: (n, 0, 0))] * 2

    x_bytes = jnp.dtype(x_flat.dtype).itemsize
    o_bytes = jnp.dtype(out_dtype).itemsize

    # TODO(synk): for C < 128 (narrow stems) the lane axis is mostly idle; pack
    # channel-groups x spatial onto the 128 lanes (or use the XLA conv) there.

    out = pl.pallas_call(
        kernel,
        out_shape=tuple(out_shapes),
        grid_spec=pltpu.PrefetchScalarGridSpec(
            num_scalar_prefetch=0,
            grid=(G,),
            in_specs=in_specs,
            out_specs=tuple(out_specs),
            scratch_shapes=[pltpu.VMEM((R, C), jnp.bfloat16),
                            pltpu.VMEM((HW, C), jnp.float32)]),
        compiler_params=pltpu.CompilerParams(
            dimension_semantics=("parallel",),
            vmem_limit_bytes=_vmem_budget(H, W, C, B, x_bytes, o_bytes,
                                          residual is not None)),
    )(*args)
    return out if emit_stats else out[0]


def _effective_weight(w, binarize):
    if binarize:   # ForwardSign.forward: sqrt(2 / (Cin*3*3)) * sign(w)
        fan_in = w.shape[1] * w.shape[2] * w.shape[3]
        return math.sqrt(2.0 / fan_in) * jnp.sign(w)
    return w


def _to_matmul(w):
    # (Cout, Cin, 3, 3) -> (9, Cin, Cout) bf16, tap order (ky, kx)
    return (jnp.transpose(w, (2, 3, 1, 0))
            .reshape(9, w.shape[1], w.shape[0]).astype(jnp.bfloat16))


def block_forward_flat(x_flat, conv0, conv1, H, W, binarize=False,
                       bn0_stats=None, return_out_stats=False):
    """NHWC-flat block forward.  x_flat: (N, H*W, C), channels on lanes.

    Multi-block networks should stay in this layout end-to-end and chain
    `bn0_stats` from the previous block's `return_out_stats=True` output, so
    the standalone stats pass and the NCHW<->NHWC transposes are paid once.
    """
    N, HW, C = x_flat.shape
    M = N * HW
    x_f32 = x_flat.astype(jnp.float32)

    w0 = _to_matmul(_effective_weight(conv0, binarize))
    w1 = _to_matmul(_effective_weight(conv1, binarize))

    # stage 0: h = conv2d(relu(bn0(x)), conv0, padding=1)   (+ fused stats of h)
    if bn0_stats is None:
        mean0, istd0 = _channel_stats(x_f32, H, W)
    else:
        mean0, istd0 = bn0_stats
    h_flat, h_sum, h_sq = _bn_relu_conv(x_f32, mean0, istd0, w0, H, W,
                                        residual=None, emit_stats=True,
                                        out_dtype=jnp.bfloat16)

    # stage 1: out = x + conv2d(relu(bn1(h)), conv1, padding=1)
    mean1, istd1 = _finish_stats(jnp.sum(h_sum, axis=0),
                                 jnp.sum(h_sq, axis=0), M)
    if return_out_stats:
        out_flat, o_sum, o_sq = _bn_relu_conv(h_flat, mean1, istd1, w1, H, W,
                                              residual=x_f32, emit_stats=True,
                                              out_dtype=jnp.float32)
        out_stats = _finish_stats(jnp.sum(o_sum, axis=0),
                                  jnp.sum(o_sq, axis=0), M)
        return out_flat, out_stats
    out_flat = _bn_relu_conv(h_flat, mean1, istd1, w1, H, W,
                             residual=x_f32, emit_stats=False,
                             out_dtype=jnp.float32)
    return out_flat, None


def block_forward(x_nchw, conv0, conv1, binarize=False, bn0_stats=None):
    """Forward pass of Block.  x_nchw: (N, C, H, W) f32; conv*: (C, C, 3, 3)."""
    N, C, H, W = x_nchw.shape
    x_flat = (jnp.transpose(x_nchw, (0, 2, 3, 1))
              .astype(jnp.float32).reshape(N, H * W, C))
    out_flat, _ = block_forward_flat(x_flat, conv0, conv1, H, W,
                                     binarize=binarize, bn0_stats=bn0_stats)
    out = out_flat.reshape(N, H, W, C)
    return jnp.transpose(out, (0, 3, 1, 2)).astype(x_nchw.dtype)


@jax.jit
def _block_forward_jit(x, c0, c1):
    return block_forward(x, c0, c1, binarize=False)


# ------------------- reference (pure JAX, for verification) -------------------

def _reference_block(x, conv0, conv1):
    def bn_relu(v):
        mean = jnp.mean(v, axis=(0, 2, 3), keepdims=True)
        var = jnp.mean((v - mean) ** 2, axis=(0, 2, 3), keepdims=True)
        return jax.nn.relu((v - mean) * jax.lax.rsqrt(var + BN_EPS))

    def conv(v, w):
        return jax.lax.conv_general_dilated(
            v, w, window_strides=(1, 1), padding=((1, 1), (1, 1)),
            dimension_numbers=('NCHW', 'OIHW', 'NCHW'))

    h = conv(bn_relu(x), conv0)
    h = conv(bn_relu(h), conv1)
    return x + h


if __name__ == "__main__":
    key = jax.random.PRNGKey(0)
    N, C, H, W = 2, 16, 16, 16
    kx, k0, k1 = jax.random.split(key, 3)
    x = jax.random.normal(kx, (N, C, H, W), jnp.float32)

    # kaiming_normal_(mode='fan_out', nonlinearity='relu'): std = sqrt(2/(Cout*9))
    std = math.sqrt(2.0 / (C * 3 * 3))
    conv0 = std * jax.random.normal(k0, (C, C, 3, 3), jnp.float32)
    conv1 = std * jax.random.normal(k1, (C, C, 3, 3), jnp.float32)

    out = jax.block_until_ready(_block_forward_jit(x, conv0, conv1))
    ref = _reference_block(x, conv0, conv1)

    assert out.shape == x.shape and out.dtype == x.dtype
    max_err = float(jnp.max(jnp.abs(out - ref)))
    # bf16 MXU inputs + bf16-stored intermediate h (f32 accumulation): allow a
    # bf16-scale error budget vs the pure-f32 reference.
    assert jnp.allclose(out, ref, atol=4e-2, rtol=4e-2), f"max abs err {max_err}"
    print("KERNEL_OK")
</pallas_src>

<mosaic_0001>
module attributes {stable_mosaic.version = 11 : i64} {
  func.func @_k(%arg0: i32, %arg1: memref<1x8x128xf32, #tpu.memory_space<vmem>>, %arg2: memref<1x8x128xf32, #tpu.memory_space<vmem>>, %arg3: memref<1x8x128xf32, #tpu.memory_space<vmem>>, %arg4: memref<8x128xf32, #tpu.memory_space<vmem>>) attributes {dimension_semantics = [#tpu.dimension_semantics<parallel>], iteration_bounds = array<i64: 2>, scalar_prefetch = 0 : i64, scratch_operands = 1 : i64, tpu.core_type = #tpu.core_type<tc>, window_params = [{pipeline_mode = #tpu.pipeline_mode<synchronous>, transform_indices = @transform_0, window_bounds = array<i64: 1, 8, 128>}, {transform_indices = @transform_1, window_bounds = array<i64: 1, 8, 128>}, {transform_indices = @transform_2, window_bounds = array<i64: 1, 8, 128>}]} {
    %c0 = arith.constant 0 : index
    %c0_0 = arith.constant 0 : index
    %c0_1 = arith.constant 0 : index
    %0 = vector.load %arg2[%c0, %c0_0, %c0_1] : memref<1x8x128xf32, #tpu.memory_space<vmem>>, vector<1x8x128xf32>
    %1 = vector.shape_cast %0 : vector<1x8x128xf32> to vector<8x128xf32>
    %c0_2 = arith.constant 0 : index
    %c0_3 = arith.constant 0 : index
    %c0_4 = arith.constant 0 : index
    %2 = vector.load %arg1[%c0_2, %c0_3, %c0_4] : memref<1x8x128xf32, #tpu.memory_space<vmem>>, vector<1x8x128xf32>
    %3 = vector.shape_cast %2 : vector<1x8x128xf32> to vector<8x128xf32>
    %4 = arith.addf %1, %3 : vector<8x128xf32>
    %c0_5 = arith.constant 0 : index
    %c0_6 = arith.constant 0 : index
    %5 = vector.load %arg4[%c0_5, %c0_6] : memref<8x128xf32, #tpu.memory_space<vmem>>, vector<8x128xf32>
    tpu.vector_store %arg4[%c0_5, %c0_6], %4 {strides = array<i32>} : memref<8x128xf32, #tpu.memory_space<vmem>>, vector<8x128xf32>,
    %c0_7 = arith.constant 0 : index
    %c0_8 = arith.constant 0 : index
    %6 = vector.load %arg4[%c0_7, %c0_8] : memref<8x128xf32, #tpu.memory_space<vmem>>, vector<8x128xf32>
    %c0_9 = arith.constant 0 : index
    %c0_10 = arith.constant 0 : index
    %c0_11 = arith.constant 0 : index
    %7 = vector.load %arg3[%c0_9, %c0_10, %c0_11] : memref<1x8x128xf32, #tpu.memory_space<vmem>>, vector<1x8x128xf32>
    %8 = vector.shape_cast %7 : vector<1x8x128xf32> to vector<8x128xf32>
    %9 = vector.shape_cast %6 : vector<8x128xf32> to vector<1x8x128xf32>
    tpu.vector_store %arg3[%c0_9, %c0_10, %c0_11], %9 {strides = array<i32>} : memref<1x8x128xf32, #tpu.memory_space<vmem>>, vector<1x8x128xf32>,
    return
  }
  func.func @transform_0(%arg0: i32) -> (i32, i32, i32) {
    %c0_i32 = arith.constant 0 : i32
    %c0_i32_0 = arith.constant 0 : i32
    %c0_i32_1 = arith.constant 0 : i32
    %c0_i32_2 = arith.constant 0 : i32
    return %c0_i32, %c0_i32_0, %c0_i32_1 : i32, i32, i32
  }
  func.func @transform_1(%arg0: i32) -> (i32, i32, i32) {
    %c0_i32 = arith.constant 0 : i32
    %c0_i32_0 = arith.constant 0 : i32
    %c0_i32_1 = arith.constant 0 : i32
    return %arg0, %c0_i32, %c0_i32_0 : i32, i32, i32
  }
  func.func @transform_2(%arg0: i32) -> (i32, i32, i32) {
    %c0_i32 = arith.constant 0 : i32
    %c0_i32_0 = arith.constant 0 : i32
    %c0_i32_1 = arith.constant 0 : i32
    return %arg0, %c0_i32, %c0_i32_0 : i32, i32, i32
  }
}

module attributes {stable_mosaic.version = 11 : i64} {
  func.func @kernel(%arg0: i32, %arg1: memref<1x256x16xf32, #tpu.memory_space<vmem>>, %arg2: memref<1x1x16xf32, #tpu.memory_space<vmem>>, %arg3: memref<1x1x16xf32, #tpu.memory_space<vmem>>) attributes {dimension_semantics = [#tpu.dimension_semantics<parallel>], iteration_bounds = array<i64: 2>, scalar_prefetch = 0 : i64, scratch_operands = 0 : i64, tpu.core_type = #tpu.core_type<tc>, window_params = [{transform_indices = @transform_0, window_bounds = array<i64: 1, 256, 16>}, {transform_indices = @transform_1, window_bounds = array<i64: 1, 1, 16>}, {transform_indices = @transform_2, window_bounds = array<i64: 1, 1, 16>}]} {
    %cst = arith.constant 0.000000e+00 : f32
    %0 = vector.broadcast %cst : f32 to vector<1x16xf32>
    %cst_0 = arith.constant 0.000000e+00 : f32
    %1 = vector.broadcast %cst_0 : f32 to vector<1x16xf32>
    %c0 = arith.constant 0 : index
    %c0_1 = arith.constant 0 : index
    %c0_2 = arith.constant 0 : index
    %2 = vector.load %arg1[%c0, %c0_1, %c0_2] : memref<1x256x16xf32, #tpu.memory_space<vmem>>, vector<1x256x16xf32>
    %3 = vector.shape_cast %2 : vector<1x256x16xf32> to vector<256x16xf32>
    %cst_3 = arith.constant dense<0.000000e+00> : vector<16xf32>
    %4 = vector.multi_reduction <add>, %3, %cst_3 [0] : vector<256x16xf32> to vector<16xf32>
    %5 = vector.shape_cast %4 : vector<16xf32> to vector<1x16xf32>
    %6 = arith.addf %0, %5 : vector<1x16xf32>
    %7 = arith.mulf %3, %3 : vector<256x16xf32>
    %cst_4 = arith.constant dense<0.000000e+00> : vector<16xf32>
    %8 = vector.multi_reduction <add>, %7, %cst_4 [0] : vector<256x16xf32> to vector<16xf32>
    %9 = vector.shape_cast %8 : vector<16xf32> to vector<1x16xf32>
    %10 = arith.addf %1, %9 : vector<1x16xf32>
    %c0_5 = arith.constant 0 : index
    %c0_6 = arith.constant 0 : index
    %c0_7 = arith.constant 0 : index
    %11 = vector.load %arg2[%c0_5, %c0_6, %c0_7] : memref<1x1x16xf32, #tpu.memory_space<vmem>>, vector<1x1x16xf32>
    %12 = vector.shape_cast %11 : vector<1x1x16xf32> to vector<1x16xf32>
    %13 = vector.shape_cast %6 : vector<1x16xf32> to vector<1x1x16xf32>
    tpu.vector_store %arg2[%c0_5, %c0_6, %c0_7], %13 {strides = array<i32>} : memref<1x1x16xf32, #tpu.memory_space<vmem>>, vector<1x1x16xf32>,
    %c0_8 = arith.constant 0 : index
    %c0_9 = arith.constant 0 : index
    %c0_10 = arith.constant 0 : index
    %14 = vector.load %arg3[%c0_8, %c0_9, %c0_10] : memref<1x1x16xf32, #tpu.memory_space<vmem>>, vector<1x1x16xf32>
    %15 = vector.shape_cast %14 : vector<1x1x16xf32> to vector<1x16xf32>
    %16 = vector.shape_cast %10 : vector<1x16xf32> to vector<1x1x16xf32>
    tpu.vector_store %arg3[%c0_8, %c0_9, %c0_10], %16 {strides = array<i32>} : memref<1x1x16xf32, #tpu.memory_space<vmem>>, vector<1x1x16xf32>,
    return
  }
  func.func @transform_0(%arg0: i32) -> (i32, i32, i32) {
    %c0_i32 = arith.constant 0 : i32
    %c0_i32_0 = arith.constant 0 : i32
    %c0_i32_1 = arith.constant 0 : i32
    return %arg0, %c0_i32, %c0_i32_0 : i32, i32, i32
  }
  func.func @transform_1(%arg0: i32) -> (i32, i32, i32) {
    %c0_i32 = arith.constant 0 : i32
    %c0_i32_0 = arith.constant 0 : i32
    %c0_i32_1 = arith.constant 0 : i32
    return %arg0, %c0_i32, %c0_i32_0 : i32, i32, i32
  }
  func.func @transform_2(%arg0: i32) -> (i32, i32, i32) {
    %c0_i32 = arith.constant 0 : i32
    %c0_i32_0 = arith.constant 0 : i32
    %c0_i32_1 = arith.constant 0 : i32
    return %arg0, %c0_i32, %c0_i32_0 : i32, i32, i32
  }
}

module attributes {stable_mosaic.version = 11 : i64} {
  func.func @kernel(%arg0: i32, %arg1: memref<1x16xf32, #tpu.memory_space<vmem>>, %arg2: memref<1x16xf32, #tpu.memory_space<vmem>>, %arg3: memref<1x256x16xbf16, #tpu.memory_space<vmem>>, %arg4: memref<9x16x16xbf16, #tpu.memory_space<vmem>>, %arg5: memref<1x256x16xf32, #tpu.memory_space<vmem>>, %arg6: memref<1x256x16xf32, #tpu.memory_space<vmem>>, %arg7: memref<320x16xbf16, #tpu.memory_space<vmem>>, %arg8: memref<256x16xf32, #tpu.memory_space<vmem>>) attributes {dimension_semantics = [#tpu.dimension_semantics<parallel>], iteration_bounds = array<i64: 2>, scalar_prefetch = 0 : i64, scratch_operands = 2 : i64, tpu.core_type = #tpu.core_type<tc>, window_params = [{pipeline_mode = #tpu.pipeline_mode<synchronous>, transform_indices = @transform_0, window_bounds = array<i64: 1, 16>}, {pipeline_mode = #tpu.pipeline_mode<synchronous>, transform_indices = @transform_1, window_bounds = array<i64: 1, 16>}, {transform_indices = @transform_2, window_bounds = array<i64: 1, 256, 16>}, {pipeline_mode = #tpu.pipeline_mode<synchronous>, transform_indices = @transform_3, window_bounds = array<i64: 9, 16, 16>}, {transform_indices = @transform_4, window_bounds = array<i64: 1, 256, 16>}, {transform_indices = @transform_5, window_bounds = array<i64: 1, 256, 16>}]} {
    %c0 = arith.constant 0 : index
    %c0_0 = arith.constant 0 : index
    %0 = vector.load %arg1[%c0, %c0_0] : memref<1x16xf32, #tpu.memory_space<vmem>>, vector<1x16xf32>
    %c0_1 = arith.constant 0 : index
    %c0_2 = arith.constant 0 : index
    %1 = vector.load %arg2[%c0_1, %c0_2] : memref<1x16xf32, #tpu.memory_space<vmem>>, vector<1x16xf32>
    %2 = tpu.iota {dimensions = array<i32: 0>} : vector<256x1xi32>
    %c16_i32 = arith.constant 16 : i32
    %c0_i32 = arith.constant 0 : i32
    %3 = arith.cmpi eq, %c16_i32, %c0_i32 : i32
    %c1_i32 = arith.constant 1 : i32
    %4 = arith.select %3, %c1_i32, %c16_i32 : i32
    %5 = vector.broadcast %4 : i32 to vector<256x1xi32>
    %6 = arith.remsi %2, %5 : vector<256x1xi32>
    %c0_i32_3 = arith.constant 0 : i32
    %7 = vector.broadcast %c0_i32_3 : i32 to vector<256x1xi32>
    %8 = arith.cmpi ne, %6, %7 : vector<256x1xi32>
    %c0_i32_4 = arith.constant 0 : i32
    %9 = vector.broadcast %c0_i32_4 : i32 to vector<256x1xi32>
    %10 = arith.cmpi slt, %6, %9 : vector<256x1xi32>
    %c0_i32_5 = arith.constant 0 : i32
    %11 = arith.cmpi slt, %4, %c0_i32_5 : i32
    %12 = vector.broadcast %11 : i1 to vector<256x1xi1>
    %13 = vector.broadcast %12 : vector<256x1xi1> to vector<256x1xi1>
    %14 = arith.xori %10, %13 : vector<256x1xi1>
    %15 = arith.andi %14, %8 : vector<256x1xi1>
    %16 = vector.broadcast %4 : i32 to vector<256x1xi32>
    %17 = arith.addi %6, %16 : vector<256x1xi32>
    %18 = arith.select %15, %17, %6 : vector<256x1xi1>, vector<256x1xi32>
    %c0_i32_6 = arith.constant 0 : i32
    %19 = vector.broadcast %c0_i32_6 : i32 to vector<256x1xi32>
    %20 = arith.cmpi ne, %18, %19 : vector<256x1xi32>
    %c15_i32 = arith.constant 15 : i32
    %21 = vector.broadcast %c15_i32 : i32 to vector<256x1xi32>
    %22 = arith.cmpi ne, %18, %21 : vector<256x1xi32>
    %cst = arith.constant 0.000000e+00 : bf16
    %23 = vector.broadcast %cst : bf16 to vector<32x16xbf16>
    %c0_7 = arith.constant 0 : index
    %c0_8 = arith.constant 0 : index
    %24 = vector.load %arg7[%c0_7, %c0_8] : memref<320x16xbf16, #tpu.memory_space<vmem>>, vector<32x16xbf16>
    tpu.vector_store %arg7[%c0_7, %c0_8], %23 {strides = array<i32>} : memref<320x16xbf16, #tpu.memory_space<vmem>>, vector<32x16xbf16>,
    %cst_9 = arith.constant 0.000000e+00 : bf16
    %25 = vector.broadcast %cst_9 : bf16 to vector<32x16xbf16>
    %c288 = arith.constant 288 : index
    %c0_10 = arith.constant 0 : index
    %26 = vector.load %arg7[%c288, %c0_10] : memref<320x16xbf16, #tpu.memory_space<vmem>>, vector<32x16xbf16>
    tpu.vector_store %arg7[%c288, %c0_10], %25 {strides = array<i32>} : memref<320x16xbf16, #tpu.memory_space<vmem>>, vector<32x16xbf16>,
    %c0_11 = arith.constant 0 : index
    %c0_12 = arith.constant 0 : index
    %c0_13 = arith.constant 0 : index
    %27 = vector.load %arg3[%c0_11, %c0_12, %c0_13] : memref<1x256x16xbf16, #tpu.memory_space<vmem>>, vector<1x256x16xbf16>
    %28 = vector.shape_cast %27 : vector<1x256x16xbf16> to vector<256x16xbf16>
    %29 = arith.extf %28 : vector<256x16xbf16> to vector<256x16xf32>
    %30 = vector.broadcast %0 : vector<1x16xf32> to vector<256x16xf32>
    %31 = arith.subf %29, %30 : vector<256x16xf32>
    %32 = vector.broadcast %1 : vector<1x16xf32> to vector<256x16xf32>
    %33 = arith.mulf %31, %32 : vector<256x16xf32>
    %cst_14 = arith.constant 0.000000e+00 : f32
    %34 = vector.broadcast %cst_14 : f32 to vector<256x16xf32>
    %35 = arith.maximumf %33, %34 : vector<256x16xf32>
    %36 = arith.truncf %35 : vector<256x16xf32> to vector<256x16xbf16>
    %c32 = arith.constant 32 : index
    %c0_15 = arith.constant 0 : index
    %37 = vector.load %arg7[%c32, %c0_15] : memref<320x16xbf16, #tpu.memory_space<vmem>>, vector<256x16xbf16>
    tpu.vector_store %arg7[%c32, %c0_15], %36 {strides = array<i32>} : memref<320x16xbf16, #tpu.memory_space<vmem>>, vector<256x16xbf16>,
    %c15 = arith.constant 15 : index
    %c0_16 = arith.constant 0 : index
    %38 = vector.load %arg7[%c15, %c0_16] : memref<320x16xbf16, #tpu.memory_space<vmem>>, vector<256x16xbf16>
    %c0_17 = arith.constant 0 : index
    %c0_18 = arith.constant 0 : index
    %c0_19 = arith.constant 0 : index
    %39 = vector.load %arg4[%c0_17, %c0_18, %c0_19] : memref<9x16x16xbf16, #tpu.memory_space<vmem>>, vector<1x16x16xbf16>
    %40 = vector.shape_cast %39 : vector<1x16x16xbf16> to vector<16x16xbf16>
    %cst_20 = arith.constant dense<0.000000e+00> : vector<256x16xf32>
    %41 = tpu.matmul %38, %40, %cst_20 {dimension_numbers = #tpu.dot_dimension_numbers<[1], [0], [0], [1], [0, 0, 1, 1], [], []>} : vector<256x16xbf16>, vector<16x16xbf16>, vector<256x16xf32> -> vector<256x16xf32>
    %c31 = arith.constant 31 : index
    %c0_21 = arith.constant 0 : index
    %42 = vector.load %arg7[%c31, %c0_21] : memref<320x16xbf16, #tpu.memory_space<vmem>>, vector<256x16xbf16>
    %c3 = arith.constant 3 : index
    %c0_22 = arith.constant 0 : index
    %c0_23 = arith.constant 0 : index
    %43 = vector.load %arg4[%c3, %c0_22, %c0_23] : memref<9x16x16xbf16, #tpu.memory_space<vmem>>, vector<1x16x16xbf16>
    %44 = vector.shape_cast %43 : vector<1x16x16xbf16> to vector<16x16xbf16>
    %cst_24 = arith.constant dense<0.000000e+00> : vector<256x16xf32>
    %45 = tpu.matmul %42, %44, %cst_24 {dimension_numbers = #tpu.dot_dimension_numbers<[1], [0], [0], [1], [0, 0, 1, 1], [], []>} : vector<256x16xbf16>, vector<16x16xbf16>, vector<256x16xf32> -> vector<256x16xf32>
    %46 = arith.addf %41, %45 : vector<256x16xf32>
    %c47 = arith.constant 47 : index
    %c0_25 = arith.constant 0 : index
    %47 = vector.load %arg7[%c47, %c0_25] : memref<320x16xbf16, #tpu.memory_space<vmem>>, vector<256x16xbf16>
    %c6 = arith.constant 6 : index
    %c0_26 = arith.constant 0 : index
    %c0_27 = arith.constant 0 : index
    %48 = vector.load %arg4[%c6, %c0_26, %c0_27] : memref<9x16x16xbf16, #tpu.memory_space<vmem>>, vector<1x16x16xbf16>
    %49 = vector.shape_cast %48 : vector<1x16x16xbf16> to vector<16x16xbf16>
    %cst_28 = arith.constant dense<0.000000e+00> : vector<256x16xf32>
    %50 = tpu.matmul %47, %49, %cst_28 {dimension_numbers = #tpu.dot_dimension_numbers<[1], [0], [0], [1], [0, 0, 1, 1], [], []>} : vector<256x16xbf16>, vector<16x16xbf16>, vector<256x16xf32> -> vector<256x16xf32>
    %51 = arith.addf %46, %50 : vector<256x16xf32>
    %cst_29 = arith.constant 0.000000e+00 : f32
    %52 = vector.shape_cast %20 : vector<256x1xi1> to vector<256x1xi1>
    %53 = vector.broadcast %52 : vector<256x1xi1> to vector<256x16xi1>
    %54 = vector.broadcast %cst_29 : f32 to vector<256x16xf32>
    %55 = arith.select %53, %51, %54 : vector<256x16xi1>, vector<256x16xf32>
    %c0_30 = arith.constant 0 : index
    %c0_31 = arith.constant 0 : index
    %56 = vector.load %arg8[%c0_30, %c0_31] : memref<256x16xf32, #tpu.memory_space<vmem>>, vector<256x16xf32>
    tpu.vector_store %arg8[%c0_30, %c0_31], %55 {strides = array<i32>} : memref<256x16xf32, #tpu.memory_space<vmem>>, vector<256x16xf32>,
    %c16 = arith.constant 16 : index
    %c0_32 = arith.constant 0 : index
    %57 = vector.load %arg7[%c16, %c0_32] : memref<320x16xbf16, #tpu.memory_space<vmem>>, vector<256x16xbf16>
    %c1 = arith.constant 1 : index
    %c0_33 = arith.constant 0 : index
    %c0_34 = arith.constant 0 : index
    %58 = vector.load %arg4[%c1, %c0_33, %c0_34] : memref<9x16x16xbf16, #tpu.memory_space<vmem>>, vector<1x16x16xbf16>
    %59 = vector.shape_cast %58 : vector<1x16x16xbf16> to vector<16x16xbf16>
    %cst_35 = arith.constant dense<0.000000e+00> : vector<256x16xf32>
    %60 = tpu.matmul %57, %59, %cst_35 {dimension_numbers = #tpu.dot_dimension_numbers<[1], [0], [0], [1], [0, 0, 1, 1], [], []>} : vector<256x16xbf16>, vector<16x16xbf16>, vector<256x16xf32> -> vector<256x16xf32>
    %c32_36 = arith.constant 32 : index
    %c0_37 = arith.constant 0 : index
    %61 = vector.load %arg7[%c32_36, %c0_37] : memref<320x16xbf16, #tpu.memory_space<vmem>>, vector<256x16xbf16>
    %c4 = arith.constant 4 : index
    %c0_38 = arith.constant 0 : index
    %c0_39 = arith.constant 0 : index
    %62 = vector.load %arg4[%c4, %c0_38, %c0_39] : memref<9x16x16xbf16, #tpu.memory_space<vmem>>, vector<1x16x16xbf16>
    %63 = vector.shape_cast %62 : vector<1x16x16xbf16> to vector<16x16xbf16>
    %cst_40 = arith.constant dense<0.000000e+00> : vector<256x16xf32>
    %64 = tpu.matmul %61, %63, %cst_40 {dimension_numbers = #tpu.dot_dimension_numbers<[1], [0], [0], [1], [0, 0, 1, 1], [], []>} : vector<256x16xbf16>, vector<16x16xbf16>, vector<256x16xf32> -> vector<256x16xf32>
    %65 = arith.addf %60, %64 : vector<256x16xf32>
    %c48 = arith.constant 48 : index
    %c0_41 = arith.constant 0 : index
    %66 = vector.load %arg7[%c48, %c0_41] : memref<320x16xbf16, #tpu.memory_space<vmem>>, vector<256x16xbf16>
    %c7 = arith.constant 7 : index
    %c0_42 = arith.constant 0 : index
    %c0_43 = arith.constant 0 : index
    %67 = vector.load %arg4[%c7, %c0_42, %c0_43] : memref<9x16x16xbf16, #tpu.memory_space<vmem>>, vector<1x16x16xbf16>
    %68 = vector.shape_cast %67 : vector<1x16x16xbf16> to vector<16x16xbf16>
    %cst_44 = arith.constant dense<0.000000e+00> : vector<256x16xf32>
    %69 = tpu.matmul %66, %68, %cst_44 {dimension_numbers = #tpu.dot_dimension_numbers<[1], [0], [0], [1], [0, 0, 1, 1], [], []>} : vector<256x16xbf16>, vector<16x16xbf16>, vector<256x16xf32> -> vector<256x16xf32>
    %70 = arith.addf %65, %69 : vector<256x16xf32>
    %c0_45 = arith.constant 0 : index
    %c0_46 = arith.constant 0 : index
    %71 = vector.load %arg8[%c0_45, %c0_46] : memref<256x16xf32, #tpu.memory_space<vmem>>, vector<256x16xf32>
    %72 = arith.addf %71, %70 : vector<256x16xf32>
    %c0_47 = arith.constant 0 : index
    %c0_48 = arith.constant 0 : index
    %73 = vector.load %arg8[%c0_47, %c0_48] : memref<256x16xf32, #tpu.memory_space<vmem>>, vector<256x16xf32>
    tpu.vector_store %arg8[%c0_47, %c0_48], %72 {strides = array<i32>} : memref<256x16xf32, #tpu.memory_space<vmem>>, vector<256x16xf32>,
    %c17 = arith.constant 17 : index
    %c0_49 = arith.constant 0 : index
    %74 = vector.load %arg7[%c17, %c0_49] : memref<320x16xbf16, #tpu.memory_space<vmem>>, vector<256x16xbf16>
    %c2 = arith.constant 2 : index
    %c0_50 = arith.constant 0 : index
    %c0_51 = arith.constant 0 : index
    %75 = vector.load %arg4[%c2, %c0_50, %c0_51] : memref<9x16x16xbf16, #tpu.memory_space<vmem>>, vector<1x16x16xbf16>
    %76 = vector.shape_cast %75 : vector<1x16x16xbf16> to vector<16x16xbf16>
    %cst_52 = arith.constant dense<0.000000e+00> : vector<256x16xf32>
    %77 = tpu.matmul %74, %76, %cst_52 {dimension_numbers = #tpu.dot_dimension_numbers<[1], [0], [0], [1], [0, 0, 1, 1], [], []>} : vector<256x16xbf16>, vector<16x16xbf16>, vector<256x16xf32> -> vector<256x16xf32>
    %c33 = arith.constant 33 : index
    %c0_53 = arith.constant 0 : index
    %78 = vector.load %arg7[%c33, %c0_53] : memref<320x16xbf16, #tpu.memory_space<vmem>>, vector<256x16xbf16>
    %c5 = arith.constant 5 : index
    %c0_54 = arith.constant 0 : index
    %c0_55 = arith.constant 0 : index
    %79 = vector.load %arg4[%c5, %c0_54, %c0_55] : memref<9x16x16xbf16, #tpu.memory_space<vmem>>, vector<1x16x16xbf16>
    %80 = vector.shape_cast %79 : vector<1x16x16xbf16> to vector<16x16xbf16>
    %cst_56 = arith.constant dense<0.000000e+00> : vector<256x16xf32>
    %81 = tpu.matmul %78, %80, %cst_56 {dimension_numbers = #tpu.dot_dimension_numbers<[1], [0], [0], [1], [0, 0, 1, 1], [], []>} : vector<256x16xbf16>, vector<16x16xbf16>, vector<256x16xf32> -> vector<256x16xf32>
    %82 = arith.addf %77, %81 : vector<256x16xf32>
    %c49 = arith.constant 49 : index
    %c0_57 = arith.constant 0 : index
    %83 = vector.load %arg7[%c49, %c0_57] : memref<320x16xbf16, #tpu.memory_space<vmem>>, vector<256x16xbf16>
    %c8 = arith.constant 8 : index
    %c0_58 = arith.constant 0 : index
    %c0_59 = arith.constant 0 : index
    %84 = vector.load %arg4[%c8, %c0_58, %c0_59] : memref<9x16x16xbf16, #tpu.memory_space<vmem>>, vector<1x16x16xbf16>
    %85 = vector.shape_cast %84 : vector<1x16x16xbf16> to vector<16x16xbf16>
    %cst_60 = arith.constant dense<0.000000e+00> : vector<256x16xf32>
    %86 = tpu.matmul %83, %85, %cst_60 {dimension_numbers = #tpu.dot_dimension_numbers<[1], [0], [0], [1], [0, 0, 1, 1], [], []>} : vector<256x16xbf16>, vector<16x16xbf16>, vector<256x16xf32> -> vector<256x16xf32>
    %87 = arith.addf %82, %86 : vector<256x16xf32>
    %c0_61 = arith.constant 0 : index
    %c0_62 = arith.constant 0 : index
    %88 = vector.load %arg8[%c0_61, %c0_62] : memref<256x16xf32, #tpu.memory_space<vmem>>, vector<256x16xf32>
    %cst_63 = arith.constant 0.000000e+00 : f32
    %89 = vector.shape_cast %22 : vector<256x1xi1> to vector<256x1xi1>
    %90 = vector.broadcast %89 : vector<256x1xi1> to vector<256x16xi1>
    %91 = vector.broadcast %cst_63 : f32 to vector<256x16xf32>
    %92 = arith.select %90, %87, %91 : vector<256x16xi1>, vector<256x16xf32>
    %93 = arith.addf %88, %92 : vector<256x16xf32>
    %c0_64 = arith.constant 0 : index
    %c0_65 = arith.constant 0 : index
    %94 = vector.load %arg8[%c0_64, %c0_65] : memref<256x16xf32, #tpu.memory_space<vmem>>, vector<256x16xf32>
    tpu.vector_store %arg8[%c0_64, %c0_65], %93 {strides = array<i32>} : memref<256x16xf32, #tpu.memory_space<vmem>>, vector<256x16xf32>,
    %c0_66 = arith.constant 0 : index
    %c0_67 = arith.constant 0 : index
    %95 = vector.load %arg8[%c0_66, %c0_67] : memref<256x16xf32, #tpu.memory_space<vmem>>, vector<256x16xf32>
    %c0_68 = arith.constant 0 : index
    %c0_69 = arith.constant 0 : index
    %c0_70 = arith.constant 0 : index
    %96 = vector.load %arg5[%c0_68, %c0_69, %c0_70] : memref<1x256x16xf32, #tpu.memory_space<vmem>>, vector<1x256x16xf32>
    %97 = vector.shape_cast %96 : vector<1x256x16xf32> to vector<256x16xf32>
    %98 = arith.addf %95, %97 : vector<256x16xf32>
    %c0_71 = arith.constant 0 : index
    %c0_72 = arith.constant 0 : index
    %c0_73 = arith.constant 0 : index
    %99 = vector.load %arg6[%c0_71, %c0_72, %c0_73] : memref<1x256x16xf32, #tpu.memory_space<vmem>>, vector<1x256x16xf32>
    %100 = vector.shape_cast %99 : vector<1x256x16xf32> to vector<256x16xf32>
    %101 = vector.shape_cast %98 : vector<256x16xf32> to vector<1x256x16xf32>
    tpu.vector_store %arg6[%c0_71, %c0_72, %c0_73], %101 {strides = array<i32>} : memref<1x256x16xf32, #tpu.memory_space<vmem>>, vector<1x256x16xf32>,
    return
  }
  func.func @transform_0(%arg0: i32) -> (i32, i32) {
    %c0_i32 = arith.constant 0 : i32
    %c0_i32_0 = arith.constant 0 : i32
    %c0_i32_1 = arith.constant 0 : i32
    return %c0_i32, %c0_i32_0 : i32, i32
  }
  func.func @transform_1(%arg0: i32) -> (i32, i32) {
    %c0_i32 = arith.constant 0 : i32
    %c0_i32_0 = arith.constant 0 : i32
    %c0_i32_1 = arith.constant 0 : i32
    return %c0_i32, %c0_i32_0 : i32, i32
  }
  func.func @transform_2(%arg0: i32) -> (i32, i32, i32) {
    %c0_i32 = arith.constant 0 : i32
    %c0_i32_0 = arith.constant 0 : i32
    %c0_i32_1 = arith.constant 0 : i32
    return %arg0, %c0_i32, %c0_i32_0 : i32, i32, i32
  }
  func.func @transform_3(%arg0: i32) -> (i32, i32, i32) {
    %c0_i32 = arith.constant 0 : i32
    %c0_i32_0 = arith.constant 0 : i32
    %c0_i32_1 = arith.constant 0 : i32
    %c0_i32_2 = arith.constant 0 : i32
    return %c0_i32, %c0_i32_0, %c0_i32_1 : i32, i32, i32
  }
  func.func @transform_4(%arg0: i32) -> (i32, i32, i32) {
    %c0_i32 = arith.constant 0 : i32
    %c0_i32_0 = arith.constant 0 : i32
    %c0_i32_1 = arith.constant 0 : i32
    return %arg0, %c0_i32, %c0_i32_0 : i32, i32, i32
  }
  func.func @transform_5(%arg0: i32) -> (i32, i32, i32) {
    %c0_i32 = arith.constant 0 : i32
    %c0_i32_0 = arith.constant 0 : i32
    %c0_i32_1 = arith.constant 0 : i32
    return %arg0, %c0_i32, %c0_i32_0 : i32, i32, i32
  }
}

module attributes {stable_mosaic.version = 11 : i64} {
  func.func @kernel(%arg0: i32, %arg1: memref<1x16xf32, #tpu.memory_space<vmem>>, %arg2: memref<1x16xf32, #tpu.memory_space<vmem>>, %arg3: memref<1x256x16xf32, #tpu.memory_space<vmem>>, %arg4: memref<9x16x16xbf16, #tpu.memory_space<vmem>>, %arg5: memref<1x256x16xbf16, #tpu.memory_space<vmem>>, %arg6: memref<1x1x16xf32, #tpu.memory_space<vmem>>, %arg7: memref<1x1x16xf32, #tpu.memory_space<vmem>>, %arg8: memref<320x16xbf16, #tpu.memory_space<vmem>>, %arg9: memref<256x16xf32, #tpu.memory_space<vmem>>) attributes {dimension_semantics = [#tpu.dimension_semantics<parallel>], iteration_bounds = array<i64: 2>, scalar_prefetch = 0 : i64, scratch_operands = 2 : i64, tpu.core_type = #tpu.core_type<tc>, window_params = [{pipeline_mode = #tpu.pipeline_mode<synchronous>, transform_indices = @transform_0, window_bounds = array<i64: 1, 16>}, {pipeline_mode = #tpu.pipeline_mode<synchronous>, transform_indices = @transform_1, window_bounds = array<i64: 1, 16>}, {transform_indices = @transform_2, window_bounds = array<i64: 1, 256, 16>}, {pipeline_mode = #tpu.pipeline_mode<synchronous>, transform_indices = @transform_3, window_bounds = array<i64: 9, 16, 16>}, {transform_indices = @transform_4, window_bounds = array<i64: 1, 256, 16>}, {transform_indices = @transform_5, window_bounds = array<i64: 1, 1, 16>}, {transform_indices = @transform_6, window_bounds = array<i64: 1, 1, 16>}]} {
    %c0 = arith.constant 0 : index
    %c0_0 = arith.constant 0 : index
    %0 = vector.load %arg1[%c0, %c0_0] : memref<1x16xf32, #tpu.memory_space<vmem>>, vector<1x16xf32>
    %c0_1 = arith.constant 0 : index
    %c0_2 = arith.constant 0 : index
    %1 = vector.load %arg2[%c0_1, %c0_2] : memref<1x16xf32, #tpu.memory_space<vmem>>, vector<1x16xf32>
    %2 = tpu.iota {dimensions = array<i32: 0>} : vector<256x1xi32>
    %c16_i32 = arith.constant 16 : i32
    %c0_i32 = arith.constant 0 : i32
    %3 = arith.cmpi eq, %c16_i32, %c0_i32 : i32
    %c1_i32 = arith.constant 1 : i32
    %4 = arith.select %3, %c1_i32, %c16_i32 : i32
    %5 = vector.broadcast %4 : i32 to vector<256x1xi32>
    %6 = arith.remsi %2, %5 : vector<256x1xi32>
    %c0_i32_3 = arith.constant 0 : i32
    %7 = vector.broadcast %c0_i32_3 : i32 to vector<256x1xi32>
    %8 = arith.cmpi ne, %6, %7 : vector<256x1xi32>
    %c0_i32_4 = arith.constant 0 : i32
    %9 = vector.broadcast %c0_i32_4 : i32 to vector<256x1xi32>
    %10 = arith.cmpi slt, %6, %9 : vector<256x1xi32>
    %c0_i32_5 = arith.constant 0 : i32
    %11 = arith.cmpi slt, %4, %c0_i32_5 : i32
    %12 = vector.broadcast %11 : i1 to vector<256x1xi1>
    %13 = vector.broadcast %12 : vector<256x1xi1> to vector<256x1xi1>
    %14 = arith.xori %10, %13 : vector<256x1xi1>
    %15 = arith.andi %14, %8 : vector<256x1xi1>
    %16 = vector.broadcast %4 : i32 to vector<256x1xi32>
    %17 = arith.addi %6, %16 : vector<256x1xi32>
    %18 = arith.select %15, %17, %6 : vector<256x1xi1>, vector<256x1xi32>
    %c0_i32_6 = arith.constant 0 : i32
    %19 = vector.broadcast %c0_i32_6 : i32 to vector<256x1xi32>
    %20 = arith.cmpi ne, %18, %19 : vector<256x1xi32>
    %c15_i32 = arith.constant 15 : i32
    %21 = vector.broadcast %c15_i32 : i32 to vector<256x1xi32>
    %22 = arith.cmpi ne, %18, %21 : vector<256x1xi32>
    %cst = arith.constant 0.000000e+00 : bf16
    %23 = vector.broadcast %cst : bf16 to vector<32x16xbf16>
    %c0_7 = arith.constant 0 : index
    %c0_8 = arith.constant 0 : index
    %24 = vector.load %arg8[%c0_7, %c0_8] : memref<320x16xbf16, #tpu.memory_space<vmem>>, vector<32x16xbf16>
    tpu.vector_store %arg8[%c0_7, %c0_8], %23 {strides = array<i32>} : memref<320x16xbf16, #tpu.memory_space<vmem>>, vector<32x16xbf16>,
    %cst_9 = arith.constant 0.000000e+00 : bf16
    %25 = vector.broadcast %cst_9 : bf16 to vector<32x16xbf16>
    %c288 = arith.constant 288 : index
    %c0_10 = arith.constant 0 : index
    %26 = vector.load %arg8[%c288, %c0_10] : memref<320x16xbf16, #tpu.memory_space<vmem>>, vector<32x16xbf16>
    tpu.vector_store %arg8[%c288, %c0_10], %25 {strides = array<i32>} : memref<320x16xbf16, #tpu.memory_space<vmem>>, vector<32x16xbf16>,
    %cst_11 = arith.constant 0.000000e+00 : f32
    %27 = vector.broadcast %cst_11 : f32 to vector<1x16xf32>
    %cst_12 = arith.constant 0.000000e+00 : f32
    %28 = vector.broadcast %cst_12 : f32 to vector<1x16xf32>
    %c0_13 = arith.constant 0 : index
    %c0_14 = arith.constant 0 : index
    %c0_15 = arith.constant 0 : index
    %29 = vector.load %arg3[%c0_13, %c0_14, %c0_15] : memref<1x256x16xf32, #tpu.memory_space<vmem>>, vector<1x256x16xf32>
    %30 = vector.shape_cast %29 : vector<1x256x16xf32> to vector<256x16xf32>
    %31 = vector.broadcast %0 : vector<1x16xf32> to vector<256x16xf32>
    %32 = arith.subf %30, %31 : vector<256x16xf32>
    %33 = vector.broadcast %1 : vector<1x16xf32> to vector<256x16xf32>
    %34 = arith.mulf %32, %33 : vector<256x16xf32>
    %cst_16 = arith.constant 0.000000e+00 : f32
    %35 = vector.broadcast %cst_16 : f32 to vector<256x16xf32>
    %36 = arith.maximumf %34, %35 : vector<256x16xf32>
    %37 = arith.truncf %36 : vector<256x16xf32> to vector<256x16xbf16>
    %c32 = arith.constant 32 : index
    %c0_17 = arith.constant 0 : index
    %38 = vector.load %arg8[%c32, %c0_17] : memref<320x16xbf16, #tpu.memory_space<vmem>>, vector<256x16xbf16>
    tpu.vector_store %arg8[%c32, %c0_17], %37 {strides = array<i32>} : memref<320x16xbf16, #tpu.memory_space<vmem>>, vector<256x16xbf16>,
    %c15 = arith.constant 15 : index
    %c0_18 = arith.constant 0 : index
    %39 = vector.load %arg8[%c15, %c0_18] : memref<320x16xbf16, #tpu.memory_space<vmem>>, vector<256x16xbf16>
    %c0_19 = arith.constant 0 : index
    %c0_20 = arith.constant 0 : index
    %c0_21 = arith.constant 0 : index
    %40 = vector.load %arg4[%c0_19, %c0_20, %c0_21] : memref<9x16x16xbf16, #tpu.memory_space<vmem>>, vector<1x16x16xbf16>
    %41 = vector.shape_cast %40 : vector<1x16x16xbf16> to vector<16x16xbf16>
    %cst_22 = arith.constant dense<0.000000e+00> : vector<256x16xf32>
    %42 = tpu.matmul %39, %41, %cst_22 {dimension_numbers = #tpu.dot_dimension_numbers<[1], [0], [0], [1], [0, 0, 1, 1], [], []>} : vector<256x16xbf16>, vector<16x16xbf16>, vector<256x16xf32> -> vector<256x16xf32>
    %c31 = arith.constant 31 : index
    %c0_23 = arith.constant 0 : index
    %43 = vector.load %arg8[%c31, %c0_23] : memref<320x16xbf16, #tpu.memory_space<vmem>>, vector<256x16xbf16>
    %c3 = arith.constant 3 : index
    %c0_24 = arith.constant 0 : index
    %c0_25 = arith.constant 0 : index
    %44 = vector.load %arg4[%c3, %c0_24, %c0_25] : memref<9x16x16xbf16, #tpu.memory_space<vmem>>, vector<1x16x16xbf16>
    %45 = vector.shape_cast %44 : vector<1x16x16xbf16> to vector<16x16xbf16>
    %cst_26 = arith.constant dense<0.000000e+00> : vector<256x16xf32>
    %46 = tpu.matmul %43, %45, %cst_26 {dimension_numbers = #tpu.dot_dimension_numbers<[1], [0], [0], [1], [0, 0, 1, 1], [], []>} : vector<256x16xbf16>, vector<16x16xbf16>, vector<256x16xf32> -> vector<256x16xf32>
    %47 = arith.addf %42, %46 : vector<256x16xf32>
    %c47 = arith.constant 47 : index
    %c0_27 = arith.constant 0 : index
    %48 = vector.load %arg8[%c47, %c0_27] : memref<320x16xbf16, #tpu.memory_space<vmem>>, vector<256x16xbf16>
    %c6 = arith.constant 6 : index
    %c0_28 = arith.constant 0 : index
    %c0_29 = arith.constant 0 : index
    %49 = vector.load %arg4[%c6, %c0_28, %c0_29] : memref<9x16x16xbf16, #tpu.memory_space<vmem>>, vector<1x16x16xbf16>
    %50 = vector.shape_cast %49 : vector<1x16x16xbf16> to vector<16x16xbf16>
    %cst_30 = arith.constant dense<0.000000e+00> : vector<256x16xf32>
    %51 = tpu.matmul %48, %50, %cst_30 {dimension_numbers = #tpu.dot_dimension_numbers<[1], [0], [0], [1], [0, 0, 1, 1], [], []>} : vector<256x16xbf16>, vector<16x16xbf16>, vector<256x16xf32> -> vector<256x16xf32>
    %52 = arith.addf %47, %51 : vector<256x16xf32>
    %cst_31 = arith.constant 0.000000e+00 : f32
    %53 = vector.shape_cast %20 : vector<256x1xi1> to vector<256x1xi1>
    %54 = vector.broadcast %53 : vector<256x1xi1> to vector<256x16xi1>
    %55 = vector.broadcast %cst_31 : f32 to vector<256x16xf32>
    %56 = arith.select %54, %52, %55 : vector<256x16xi1>, vector<256x16xf32>
    %c0_32 = arith.constant 0 : index
    %c0_33 = arith.constant 0 : index
    %57 = vector.load %arg9[%c0_32, %c0_33] : memref<256x16xf32, #tpu.memory_space<vmem>>, vector<256x16xf32>
    tpu.vector_store %arg9[%c0_32, %c0_33], %56 {strides = array<i32>} : memref<256x16xf32, #tpu.memory_space<vmem>>, vector<256x16xf32>,
    %c16 = arith.constant 16 : index
    %c0_34 = arith.constant 0 : index
    %58 = vector.load %arg8[%c16, %c0_34] : memref<320x16xbf16, #tpu.memory_space<vmem>>, vector<256x16xbf16>
    %c1 = arith.constant 1 : index
    %c0_35 = arith.constant 0 : index
    %c0_36 = arith.constant 0 : index
    %59 = vector.load %arg4[%c1, %c0_35, %c0_36] : memref<9x16x16xbf16, #tpu.memory_space<vmem>>, vector<1x16x16xbf16>
    %60 = vector.shape_cast %59 : vector<1x16x16xbf16> to vector<16x16xbf16>
    %cst_37 = arith.constant dense<0.000000e+00> : vector<256x16xf32>
    %61 = tpu.matmul %58, %60, %cst_37 {dimension_numbers = #tpu.dot_dimension_numbers<[1], [0], [0], [1], [0, 0, 1, 1], [], []>} : vector<256x16xbf16>, vector<16x16xbf16>, vector<256x16xf32> -> vector<256x16xf32>
    %c32_38 = arith.constant 32 : index
    %c0_39 = arith.constant 0 : index
    %62 = vector.load %arg8[%c32_38, %c0_39] : memref<320x16xbf16, #tpu.memory_space<vmem>>, vector<256x16xbf16>
    %c4 = arith.constant 4 : index
    %c0_40 = arith.constant 0 : index
    %c0_41 = arith.constant 0 : index
    %63 = vector.load %arg4[%c4, %c0_40, %c0_41] : memref<9x16x16xbf16, #tpu.memory_space<vmem>>, vector<1x16x16xbf16>
    %64 = vector.shape_cast %63 : vector<1x16x16xbf16> to vector<16x16xbf16>
    %cst_42 = arith.constant dense<0.000000e+00> : vector<256x16xf32>
    %65 = tpu.matmul %62, %64, %cst_42 {dimension_numbers = #tpu.dot_dimension_numbers<[1], [0], [0], [1], [0, 0, 1, 1], [], []>} : vector<256x16xbf16>, vector<16x16xbf16>, vector<256x16xf32> -> vector<256x16xf32>
    %66 = arith.addf %61, %65 : vector<256x16xf32>
    %c48 = arith.constant 48 : index
    %c0_43 = arith.constant 0 : index
    %67 = vector.load %arg8[%c48, %c0_43] : memref<320x16xbf16, #tpu.memory_space<vmem>>, vector<256x16xbf16>
    %c7 = arith.constant 7 : index
    %c0_44 = arith.constant 0 : index
    %c0_45 = arith.constant 0 : index
    %68 = vector.load %arg4[%c7, %c0_44, %c0_45] : memref<9x16x16xbf16, #tpu.memory_space<vmem>>, vector<1x16x16xbf16>
    %69 = vector.shape_cast %68 : vector<1x16x16xbf16> to vector<16x16xbf16>
    %cst_46 = arith.constant dense<0.000000e+00> : vector<256x16xf32>
    %70 = tpu.matmul %67, %69, %cst_46 {dimension_numbers = #tpu.dot_dimension_numbers<[1], [0], [0], [1], [0, 0, 1, 1], [], []>} : vector<256x16xbf16>, vector<16x16xbf16>, vector<256x16xf32> -> vector<256x16xf32>
    %71 = arith.addf %66, %70 : vector<256x16xf32>
    %c0_47 = arith.constant 0 : index
    %c0_48 = arith.constant 0 : index
    %72 = vector.load %arg9[%c0_47, %c0_48] : memref<256x16xf32, #tpu.memory_space<vmem>>, vector<256x16xf32>
    %73 = arith.addf %72, %71 : vector<256x16xf32>
    %c0_49 = arith.constant 0 : index
    %c0_50 = arith.constant 0 : index
    %74 = vector.load %arg9[%c0_49, %c0_50] : memref<256x16xf32, #tpu.memory_space<vmem>>, vector<256x16xf32>
    tpu.vector_store %arg9[%c0_49, %c0_50], %73 {strides = array<i32>} : memref<256x16xf32, #tpu.memory_space<vmem>>, vector<256x16xf32>,
    %c17 = arith.constant 17 : index
    %c0_51 = arith.constant 0 : index
    %75 = vector.load %arg8[%c17, %c0_51] : memref<320x16xbf16, #tpu.memory_space<vmem>>, vector<256x16xbf16>
    %c2 = arith.constant 2 : index
    %c0_52 = arith.constant 0 : index
    %c0_53 = arith.constant 0 : index
    %76 = vector.load %arg4[%c2, %c0_52, %c0_53] : memref<9x16x16xbf16, #tpu.memory_space<vmem>>, vector<1x16x16xbf16>
    %77 = vector.shape_cast %76 : vector<1x16x16xbf16> to vector<16x16xbf16>
    %cst_54 = arith.constant dense<0.000000e+00> : vector<256x16xf32>
    %78 = tpu.matmul %75, %77, %cst_54 {dimension_numbers = #tpu.dot_dimension_numbers<[1], [0], [0], [1], [0, 0, 1, 1], [], []>} : vector<256x16xbf16>, vector<16x16xbf16>, vector<256x16xf32> -> vector<256x16xf32>
    %c33 = arith.constant 33 : index
    %c0_55 = arith.constant 0 : index
    %79 = vector.load %arg8[%c33, %c0_55] : memref<320x16xbf16, #tpu.memory_space<vmem>>, vector<256x16xbf16>
    %c5 = arith.constant 5 : index
    %c0_56 = arith.constant 0 : index
    %c0_57 = arith.constant 0 : index
    %80 = vector.load %arg4[%c5, %c0_56, %c0_57] : memref<9x16x16xbf16, #tpu.memory_space<vmem>>, vector<1x16x16xbf16>
    %81 = vector.shape_cast %80 : vector<1x16x16xbf16> to vector<16x16xbf16>
    %cst_58 = arith.constant dense<0.000000e+00> : vector<256x16xf32>
    %82 = tpu.matmul %79, %81, %cst_58 {dimension_numbers = #tpu.dot_dimension_numbers<[1], [0], [0], [1], [0, 0, 1, 1], [], []>} : vector<256x16xbf16>, vector<16x16xbf16>, vector<256x16xf32> -> vector<256x16xf32>
    %83 = arith.addf %78, %82 : vector<256x16xf32>
    %c49 = arith.constant 49 : index
    %c0_59 = arith.constant 0 : index
    %84 = vector.load %arg8[%c49, %c0_59] : memref<320x16xbf16, #tpu.memory_space<vmem>>, vector<256x16xbf16>
    %c8 = arith.constant 8 : index
    %c0_60 = arith.constant 0 : index
    %c0_61 = arith.constant 0 : index
    %85 = vector.load %arg4[%c8, %c0_60, %c0_61] : memref<9x16x16xbf16, #tpu.memory_space<vmem>>, vector<1x16x16xbf16>
    %86 = vector.shape_cast %85 : vector<1x16x16xbf16> to vector<16x16xbf16>
    %cst_62 = arith.constant dense<0.000000e+00> : vector<256x16xf32>
    %87 = tpu.matmul %84, %86, %cst_62 {dimension_numbers = #tpu.dot_dimension_numbers<[1], [0], [0], [1], [0, 0, 1, 1], [], []>} : vector<256x16xbf16>, vector<16x16xbf16>, vector<256x16xf32> -> vector<256x16xf32>
    %88 = arith.addf %83, %87 : vector<256x16xf32>
    %c0_63 = arith.constant 0 : index
    %c0_64 = arith.constant 0 : index
    %89 = vector.load %arg9[%c0_63, %c0_64] : memref<256x16xf32, #tpu.memory_space<vmem>>, vector<256x16xf32>
    %cst_65 = arith.constant 0.000000e+00 : f32
    %90 = vector.shape_cast %22 : vector<256x1xi1> to vector<256x1xi1>
    %91 = vector.broadcast %90 : vector<256x1xi1> to vector<256x16xi1>
    %92 = vector.broadcast %cst_65 : f32 to vector<256x16xf32>
    %93 = arith.select %91, %88, %92 : vector<256x16xi1>, vector<256x16xf32>
    %94 = arith.addf %89, %93 : vector<256x16xf32>
    %c0_66 = arith.constant 0 : index
    %c0_67 = arith.constant 0 : index
    %95 = vector.load %arg9[%c0_66, %c0_67] : memref<256x16xf32, #tpu.memory_space<vmem>>, vector<256x16xf32>
    tpu.vector_store %arg9[%c0_66, %c0_67], %94 {strides = array<i32>} : memref<256x16xf32, #tpu.memory_space<vmem>>, vector<256x16xf32>,
    %c0_68 = arith.constant 0 : index
    %c0_69 = arith.constant 0 : index
    %96 = vector.load %arg9[%c0_68, %c0_69] : memref<256x16xf32, #tpu.memory_space<vmem>>, vector<256x16xf32>
    %cst_70 = arith.constant dense<0.000000e+00> : vector<16xf32>
    %97 = vector.multi_reduction <add>, %96, %cst_70 [0] : vector<256x16xf32> to vector<16xf32>
    %98 = vector.shape_cast %97 : vector<16xf32> to vector<1x16xf32>
    %99 = arith.addf %27, %98 : vector<1x16xf32>
    %100 = arith.mulf %96, %96 : vector<256x16xf32>
    %cst_71 = arith.constant dense<0.000000e+00> : vector<16xf32>
    %101 = vector.multi_reduction <add>, %100, %cst_71 [0] : vector<256x16xf32> to vector<16xf32>
    %102 = vector.shape_cast %101 : vector<16xf32> to vector<1x16xf32>
    %103 = arith.addf %28, %102 : vector<1x16xf32>
    %104 = arith.truncf %96 : vector<256x16xf32> to vector<256x16xbf16>
    %c0_72 = arith.constant 0 : index
    %c0_73 = arith.constant 0 : index
    %c0_74 = arith.constant 0 : index
    %105 = vector.load %arg5[%c0_72, %c0_73, %c0_74] : memref<1x256x16xbf16, #tpu.memory_space<vmem>>, vector<1x256x16xbf16>
    %106 = vector.shape_cast %105 : vector<1x256x16xbf16> to vector<256x16xbf16>
    %107 = vector.shape_cast %104 : vector<256x16xbf16> to vector<1x256x16xbf16>
    tpu.vector_store %arg5[%c0_72, %c0_73, %c0_74], %107 {strides = array<i32>} : memref<1x256x16xbf16, #tpu.memory_space<vmem>>, vector<1x256x16xbf16>,
    %c0_75 = arith.constant 0 : index
    %c0_76 = arith.constant 0 : index
    %c0_77 = arith.constant 0 : index
    %108 = vector.load %arg6[%c0_75, %c0_76, %c0_77] : memref<1x1x16xf32, #tpu.memory_space<vmem>>, vector<1x1x16xf32>
    %109 = vector.shape_cast %108 : vector<1x1x16xf32> to vector<1x16xf32>
    %110 = vector.shape_cast %99 : vector<1x16xf32> to vector<1x1x16xf32>
    tpu.vector_store %arg6[%c0_75, %c0_76, %c0_77], %110 {strides = array<i32>} : memref<1x1x16xf32, #tpu.memory_space<vmem>>, vector<1x1x16xf32>,
    %c0_78 = arith.constant 0 : index
    %c0_79 = arith.constant 0 : index
    %c0_80 = arith.constant 0 : index
    %111 = vector.load %arg7[%c0_78, %c0_79, %c0_80] : memref<1x1x16xf32, #tpu.memory_space<vmem>>, vector<1x1x16xf32>
    %112 = vector.shape_cast %111 : vector<1x1x16xf32> to vector<1x16xf32>
    %113 = vector.shape_cast %103 : vector<1x16xf32> to vector<1x1x16xf32>
    tpu.vector_store %arg7[%c0_78, %c0_79, %c0_80], %113 {strides = array<i32>} : memref<1x1x16xf32, #tpu.memory_space<vmem>>, vector<1x1x16xf32>,
    return
  }
  func.func @transform_0(%arg0: i32) -> (i32, i32) {
    %c0_i32 = arith.constant 0 : i32
    %c0_i32_0 = arith.constant 0 : i32
    %c0_i32_1 = arith.constant 0 : i32
    return %c0_i32, %c0_i32_0 : i32, i32
  }
  func.func @transform_1(%arg0: i32) -> (i32, i32) {
    %c0_i32 = arith.constant 0 : i32
    %c0_i32_0 = arith.constant 0 : i32
    %c0_i32_1 = arith.constant 0 : i32
    return %c0_i32, %c0_i32_0 : i32, i32
  }
  func.func @transform_2(%arg0: i32) -> (i32, i32, i32) {
    %c0_i32 = arith.constant 0 : i32
    %c0_i32_0 = arith.constant 0 : i32
    %c0_i32_1 = arith.constant 0 : i32
    return %arg0, %c0_i32, %c0_i32_0 : i32, i32, i32
  }
  func.func @transform_3(%arg0: i32) -> (i32, i32, i32) {
    %c0_i32 = arith.constant 0 : i32
    %c0_i32_0 = arith.constant 0 : i32
    %c0_i32_1 = arith.constant 0 : i32
    %c0_i32_2 = arith.constant 0 : i32
    return %c0_i32, %c0_i32_0, %c0_i32_1 : i32, i32, i32
  }
  func.func @transform_4(%arg0: i32) -> (i32, i32, i32) {
    %c0_i32 = arith.constant 0 : i32
    %c0_i32_0 = arith.constant 0 : i32
    %c0_i32_1 = arith.constant 0 : i32
    return %arg0, %c0_i32, %c0_i32_0 : i32, i32, i32
  }
  func.func @transform_5(%arg0: i32) -> (i32, i32, i32) {
    %c0_i32 = arith.constant 0 : i32
    %c0_i32_0 = arith.constant 0 : i32
    %c0_i32_1 = arith.constant 0 : i32
    return %arg0, %c0_i32, %c0_i32_0 : i32, i32, i32
  }
  func.func @transform_6(%arg0: i32) -> (i32, i32, i32) {
    %c0_i32 = arith.constant 0 : i32
    %c0_i32_0 = arith.constant 0 : i32
    %c0_i32_1 = arith.constant 0 : i32
    return %arg0, %c0_i32, %c0_i32_0 : i32, i32, i32
  }
}

</mosaic_0001>

<bundles_post_ra>
// kernel: tpu_custom_call.1
= control target key start
LH: loop header
LB: loop body
LE: loop exit
PB: predicated region body
PF: predicated region fallthrough
CT: control target
= control target key end

     0   :  { %7 = vsyncpa [#allocation4], 0  ;;  %s653_s0 = inlined_call_operand.hbm [shape: f32[1,8,128], index: 0, kind: input, shape index: {}]   ;;  %s654_s1 = inlined_call_operand.hbm [shape: f32[2,8,128], index: 1, kind: input, shape index: {}]   ;;  %s655_s2 = inlined_call_operand.hbm [shape: f32[2,8,128], index: 2, kind: output, shape index: {}]  }
   0x1   :  { %8 = vsyncpa [#allocation7], 0 }
   0x2   :  { %10 = vsyncpa [#allocation7 + $0x1], 0 }
   0x3   :  { %11 = vsyncpa [#allocation5], 0 }
   0x4   :  { %13 = vsyncpa [#allocation5 + $0x1], 0  ;;  %s487_s9 = smov 0   ;;  %s489_s10 = smov 0  }
   0x5   :  { %s491_s11 = smov 0   ;;  %s493_s12 = smov 0  }
   0x6 LB: > { %s508_s13 = sadd.s32 4294967295, %s467_s12   ;;  %s274_s14 = sadd.s32 4294967294, %s467_s12   ;;  %s467_s12 = sphi %s493_s12, %s678_s12   ;;  %s463_s11 = sphi %s491_s11, %s677_s11   ;;  %s459_s10 = sphi %s489_s10, %s676_s10   ;;  %s455_s9 = sphi %s487_s9, %s675_s9  }
   0x7   : > { %p60_p0 = scmp.ne.s32.totalorder %s459_s10, %s455_s9  ;;  %p656_p1 = scmp.eq.s32.totalorder %s508_s13, 0 }
   0x8   : > { %p90_p3 = scmp.eq.s32.totalorder %s274_s14, 1  ;;  %p275_p5 = scmp.ge.s32.totalorder %s467_s12, 1 }
   0x9   : > { %p517_p4 = por %p656_p1, %p60_p0  ;;  %p97_p7 = scmp.lt.s32.totalorder %s467_s12, 3 }
   0xa   : > { %p522_p6 = por %p90_p3, %p60_p0  ;;  %s469_s18 = smov [#allocation3]  }
   0xb   : > { %s660_s15 = scalar_select %p517_p4, 1, 0 }
   0xc   : > { %s661_s16 = scalar_select %p522_p6, 1, 0 }
   0xd   : > { %p527_p8 = pnand %p275_p5, %p97_p7  ;;  %s110_s19 = sshll.u32 %s469_s18, 4  ;;  %s111_s19 = int_to_ptr.vmem [resolvable:$true] %s110_s19 }
   0xe   : > { %s535_s20 = sadd.s32 1, %s467_s12   ;;  %s47_s24 = sadd.s32 1, %s463_s11 }
   0xf   : > { %s662_s17 = scalar_select %p527_p8, 1, 0 }
  0x10   : > { %p296_p10 = pneg %p527_p8  ;;  %s44_s22 = ssub.s32 %s467_s12, %s535_s20 }
  0x11   : > { %p545_p12 = scmp.eq.s32.totalorder %s44_s22, 0  ;;  %p54_p13 = scmp.ne.s32.totalorder %s463_s11, %s459_s10 }
  0x12   : > { %p539_p11 = pnand %p296_p10, %p656_p1  ;;  %s356_s25 = scalar_lea.vmem %s111_s19, 128 }
  0x13   : > { %p357_p3 = scmp.ne.s32.totalorder %s111_s19, %s356_s25  ;;  %p364_p9 = scmp.lt.s32.totalorder %s111_s19, %s111_s19 }
  0x14   : > { %p347_p0 = pneg %p539_p11  ;;  %p365_p2 = scmp.lt.s32.totalorder %s356_s25, %s356_s25 }
  0x16   : > { %p359_p5 = pnand %p357_p3, %p347_p0  ;;  %p366_p10 = por %p365_p2, %p364_p9 }
  0x18   : > { %p360_p7 = pneg %p359_p5 }
  0x1a   : > { %p367_p1 = pnand %p366_p10, %p360_p7 }
  0x1c   : > { %370 = shalt.err (!%p367_p1)
}
  0x1d   : > { %299 = dma.hbm_to_vmem [thread:$0]  (!%p539_p11), %s653_s0, 128, %s111_s19, [#allocation4]  }
  0x1e   : > { %s562_s28 = scalar_select %p545_p12, %s463_s11, %s47_s24  }
  0x1f   : > { %p55_p1 = scmp.eq.s32.totalorder %s467_s12, 0  ;;  %p665_p2 = scmp.eq.s32.totalorder %s508_s13, 1 }
  0x20   : > { %p309_p0 = scmp.lt.s32.totalorder %s467_s12, 2  ;;  %s121_s30 = sand.u32 1, %s463_s11  }
  0x21   : > { %p570_p9 = por %p665_p2, %p54_p13  ;;  %p56_p3 = por %p55_p1, %p54_p13 }
  0x22   : > { %s278_s3 = sshll.u32 %s121_s30, 3  ;;  %s279_s4 = sshll.u32 %s467_s12, 7 }
  0x23   : > { %s666_s29 = scalar_select %p570_p9, 1, 0 }
  0x24   : > { %s583_s7 = scalar_lea.hbm %s654_s1, %s279_s4  ;;  %s125_s8 = scalar_lea.vmem [#allocation6], %s278_s3 }
  0x25   : > { %s132_s14 = sshll.u32 %s125_s8, 4  ;;  %p585_p11 = pnand %p309_p0, %p56_p3  ;;  %s133_s14 = int_to_ptr.vmem [resolvable:$true] %s132_s14 }
  0x26   : > { %s122_s19 = scalar_lea.sflag [#allocation7], %s121_s30  ;;  %s371_s21 = scalar_lea.hbm %s583_s7, 128 }
  0x27   : > { %p372_p12 = scmp.ne.s32.totalorder %s583_s7, %s371_s21  ;;  %p373_p13 = pneg %p585_p11 }
  0x28   : > { %s376_s24 = scalar_lea.hbm %s654_s1, 256  ;;  %p377_p10 = scmp.lt.s32.totalorder %s583_s7, %s654_s1 }
  0x29   : > { %p374_p5 = pnand %p373_p13, %p372_p12  ;;  %p378_p1 = scmp.lt.s32.totalorder %s376_s24, %s371_s21 }
  0x2b   : > { %p375_p7 = pneg %p374_p5  ;;  %p379_p2 = por %p378_p1, %p377_p10 }
  0x2d   : > { %p380_p0 = pnand %p379_p2, %p375_p7 }
  0x2f   : > { %383 = shalt.err (!%p380_p0)
}
  0x30   : > { %s384_s27 = scalar_lea.vmem %s133_s14, 128  ;;  %s470_s30 = smov [#allocation6]  }
  0x31   : > { %p385_p3 = scmp.ne.s32.totalorder %s133_s14, %s384_s27  ;;  %s389_s3 = sshll.u32 %s470_s30, 4  ;;  %s390_s3 = int_to_ptr.vmem [resolvable:$false] %s389_s3 }
  0x32   : > { %s391_s4 = scalar_lea.vmem %s390_s3, 256  ;;  %p392_p12 = scmp.lt.s32.totalorder %s133_s14, %s390_s3 }
  0x33   : > { %p387_p6 = pnand %p385_p3, %p373_p13  ;;  %p393_p5 = scmp.lt.s32.totalorder %s391_s4, %s384_s27 }
  0x35   : > { %p388_p9 = pneg %p387_p6  ;;  %p394_p4 = por %p393_p5, %p392_p12 }
  0x37   : > { %p395_p8 = pnand %p394_p4, %p388_p9 }
  0x39   : > { %398 = shalt.err (!%p395_p8)
}
  0x3a   : > { %303 = dma.hbm_to_vmem [thread:$0]  (!%p585_p11), %s583_s7, 128, %s133_s14, %s122_s19  }
  0x3b   : > { %p668_p7 = scmp.ne.s32.totalorder %s662_s17, 0 }
  0x3c   : > { %p669_p10 = scmp.eq.s32.totalorder (!%p668_p7), %s508_s13, 0 }
  0x3d   : > { %141 = sbr.rel (%p668_p7) target bundleno = 96 (0x60), region = 28 }
  0x42   : > { %442 = dma.done.wait (%p669_p10), [#allocation4], 128   ;;  %p670_p6 = pmov %p669_p10 }
  0x43   : > { %s610_s5 = sand.u32 1, %s459_s10   ;;  %p671_p4 = scmp.ne.s32.totalorder %s660_s15, 0 }
  0x44   : > { %444 = vsyncadd (%p670_p6), [#allocation4], 4294967168  ;;  %s282_s6 = sshll.u32 %s610_s5, 3  ;;  %s148_s8 = scalar_lea.sflag [#allocation7], %s610_s5 }
  0x45   : > { %s151_s18 = scalar_lea.vmem [#allocation6], %s282_s6 }
  0x46   : > { %446 = dma.done.wait (%p671_p4), %s148_s8, 128  }
  0x47   : > { %448 = vsyncadd (%p671_p4), %s148_s8, 4294967168  ;;  %s171_s17 = scalar_lea.vmem [#allocation8], %s282_s6  ;;  %s285_s14 = sshll.u32 %s508_s13, 7  ;;  %v172_v0 = vld [vmem:[%s151_s18] sm:$0xff]  ;;  %v173_v1 = vld [vmem:[#allocation3] sm:$0xff] }
  0x48   : > { %s192_s7 = sshll.u32 %s171_s17, 4  ;;  %v174_v2 = vadd.f32 %v173_v1, %v172_v0  ;;  %s190_s22 = scalar_lea.hbm %s655_s2, %s285_s14  ;;  %s193_s7 = int_to_ptr.vmem [resolvable:$true] %s192_s7 }
  0x49   : > { %s179_s23 = scalar_lea.sflag [#allocation5], %s610_s5  ;;  %s399_s24 = scalar_lea.vmem %s193_s7, 128 }
  0x4a   : > { %177 = vst [vmem:[%s171_s17] sm:$0xff] %v174_v2  ;;  %p400_p8 = scmp.ne.s32.totalorder %s193_s7, %s399_s24  ;;  %p672_p9 = scmp.ne.s32.totalorder %s666_s29, 0 }
  0x4b   : > { %s471_s15 = smov [#allocation8]  }
  0x4c   : > { %p401_p11 = pnand %p400_p8, %p672_p9  ;;  %s403_s25 = sshll.u32 %s471_s15, 4  ;;  %s404_s25 = int_to_ptr.vmem [resolvable:$false] %s403_s25 }
  0x4d   : > { %s405_s26 = scalar_lea.vmem %s404_s25, 256  ;;  %p406_p1 = scmp.lt.s32.totalorder %s193_s7, %s404_s25 }
  0x4e   : > { %p402_p13 = pneg %p401_p11  ;;  %p407_p2 = scmp.lt.s32.totalorder %s405_s26, %s399_s24 }
  0x50   : > { %p408_p0 = por %p407_p2, %p406_p1 }
  0x52   : > { %p409_p3 = pnand %p408_p0, %p402_p13 }
  0x54   : > { %412 = shalt.err (!%p409_p3)
}
  0x55   : > { %s413_s13 = scalar_lea.hbm %s190_s22, 128  ;;  %s417_s3 = scalar_lea.hbm %s655_s2, 256 }
  0x56   : > { %p414_p12 = scmp.ne.s32.totalorder %s190_s22, %s413_s13  ;;  %p418_p10 = scmp.lt.s32.totalorder %s190_s22, %s655_s2 }
  0x57   : > { %p419_p6 = scmp.lt.s32.totalorder %s417_s3, %s413_s13 }
  0x58   : > { %p415_p5 = pnand %p414_p12, %p672_p9 }
  0x59   : > { %p420_p4 = por %p419_p6, %p418_p10 }
  0x5a   : > { %p416_p7 = pneg %p415_p5 }
  0x5c   : > { %p421_p8 = pnand %p420_p4, %p416_p7 }
  0x5e   : > { %424 = shalt.err (!%p421_p8)
}
  0x5f   : > { %294 = dma.vmem_to_hbm [thread:$0]  (%p672_p9), %s193_s7, 128, %s190_s22, %s179_s23  }
  0x60 PF: > { %s204_s6 = sand.u32 1, %s455_s9   ;;  %p673_p11 = scmp.ne.s32.totalorder %s661_s16, 0 }
  0x61   : > { %p674_p13 = scmp.ge.s32.totalorder %s467_s12, 2  ;;  %s205_s8 = scalar_lea.sflag [#allocation5], %s204_s6 }
  0x63   : > { %p305_p1 = pnand %p674_p13, %p673_p11 }
  0x65   : > { %p306_p2 = pneg %p305_p1 }
  0x67   : > { %450 = dma.done.wait (%p306_p2), %s205_s8, 128  }
  0x68   : > { %452 = vsyncadd (%p306_p2), %s205_s8, 4294967168  ;;  %p16_p0 = scmp.ge.s32.totalorder %s535_s20, 4   ;;  %s675_s9 = smov %s459_s10 }
  0x69   : > { %s676_s10 = smov %s463_s11  ;;  %s677_s11 = smov %s562_s28 }
  0x6a   : > { %s678_s12 = smov %s535_s20  ;;  %18 = sbr.rel (!%p16_p0) target bundleno = 6 (0x6), region = 78 }
  0x6f   :  { %210 = vsyncpa [#allocation4], 1 }
  0x70   :  { %212 = vsyncpa [#allocation4 + $0x1], 1 }
  0x71   :  { %213 = vsyncpa [#allocation7], 1 }
  0x72   :  { %215 = vsyncpa [#allocation7 + $0x1], 1 }
  0x73   :  { %216 = vsyncpa [#allocation5], 1 }
  0x74   :  { %218 = vsyncpa [#allocation5 + $0x1], 1 }

// kernel: _block_forward_jit.3
= control target key start
LH: loop header
LB: loop body
LE: loop exit
PB: predicated region body
PF: predicated region fallthrough
CT: control target
= control target key end

     0   :  { %s470_s9 = smov 0   ;;  %s595_s0 = inlined_call_operand.vmem [shape: f32[2,256,16], index: 0, kind: input, shape index: {}]   ;;  %s596_s1 = inlined_call_operand.vmem [shape: f32[2,1,16], index: 1, kind: output, shape index: {0}]   ;;  %s597_s2 = inlined_call_operand.vmem [shape: f32[2,1,16], index: 2, kind: output, shape index: {1}]  }
   0x1 LB: > { %s429_s10 = sadd.s32 4294967295, %s453_s9   ;;  %p433_p0 = scmp.ge.s32.totalorder %s453_s9, 1  ;;  %s453_s9 = sphi %s470_s9, %s13_s9  }
   0x2   : > { %p115_p1 = scmp.lt.s32.totalorder %s453_s9, 3 }
   0x4   : > { %p116_p2 = pnand %p433_p0, %p115_p1 }
   0x5   : > { %p138_p3 = scmp.lt.s32.totalorder (!%p116_p2), %s429_s10, 1 }
   0x6   : > { %119 = sbr.rel (%p116_p2) target bundleno = 96 (0x60), region = 24 }
   0xb   : > { %s599_s10 = smov (!%p138_p3, %s429_s10), 1  ;;  %vm181_vm0 = vcmask 130048   ;;  %vm354_vm1 = vcmask 122880  }
   0xc   : > { %s438_s11 = sshll.u32 %s599_s10, 8  ;;  %s145_s17 = scalar_lea.vmem %s596_s1, %s599_s10 }
   0xd   : > { %s484_s14 = scalar_lea.vmem %s595_s0, %s438_s11  ;;  %s148_s20 = scalar_lea.vmem %s597_s2, %s599_s10 }
   0xe   : > { %v149_v0 = vld [vmem:[%s484_s14] sm:$0xff]  ;;  %v150_v1 = vld [vmem:[%s484_s14 + $0x8] sm:$0xff]  ;;  %v151_v2 = vld [vmem:[%s484_s14 + $0x10] sm:$0xff] }
   0xf   : > { %v182_v3 = vsel %vm181_vm0, %v149_v0, 0.0  ;;  %v183_v4 = vsel %vm181_vm0, %v150_v1, 0.0  ;;  %v185_v5 = vsel %vm181_vm0, %v151_v2, 0.0  ;;  %v152_v6 = vld [vmem:[%s484_s14 + $0x18] sm:$0xff]  ;;  %v153_v9 = vld [vmem:[%s484_s14 + $0x20] sm:$0xff]  ;;  %v154_v12 = vld [vmem:[%s484_s14 + $0x28] sm:$0xff]  ;;  %v252_v27 = vmul.f32 %v149_v0, %v149_v0 }
  0x10   : > { %v184_v7 = vadd.f32 %v183_v4, %v182_v3  ;;  %v187_v8 = vsel %vm181_vm0, %v152_v6, 0.0  ;;  %v189_v11 = vsel %vm181_vm0, %v153_v9, 0.0  ;;  %v191_v14 = vsel %vm181_vm0, %v154_v12, 0.0  ;;  %v155_v15 = vld [vmem:[%s484_s14 + $0x30] sm:$0xff]  ;;  %v156_v18 = vld [vmem:[%s484_s14 + $0x38] sm:$0xff]  ;;  %v157_v21 = vld [vmem:[%s484_s14 + $0x40] sm:$0xff] }
  0x11   : > { %v193_v17 = vsel %vm181_vm0, %v155_v15, 0.0  ;;  %v195_v20 = vsel %vm181_vm0, %v156_v18, 0.0  ;;  %v197_v23 = vsel %vm181_vm0, %v157_v21, 0.0  ;;  %v158_v24 = vld [vmem:[%s484_s14 + $0x48] sm:$0xff]  ;;  %v253_v28 = vmul.f32 %v150_v1, %v150_v1  ;;  %v159_v30 = vld [vmem:[%s484_s14 + $0x50] sm:$0xff]  ;;  %v160_v32 = vld [vmem:[%s484_s14 + $0x58] sm:$0xff] }
  0x12   : > { %v186_v10 = vadd.f32 %v185_v5, %v184_v7  ;;  %v199_v26 = vsel %vm181_vm0, %v158_v24, 0.0  ;;  %v254_v29 = vmul.f32 %v151_v2, %v151_v2  ;;  %v201_v33 = vsel %vm181_vm0, %v159_v30, 0.0  ;;  %v161_v41 = vld [vmem:[%s484_s14 + $0x60] sm:$0xff]  ;;  %v162_v47 = vld [vmem:[%s484_s14 + $0x68] sm:$0xff]  ;;  %v163_v53 = vld [vmem:[%s484_s14 + $0x70] sm:$0xff] }
  0x13   : > { %v255_v34 = vmul.f32 %v152_v6, %v152_v6  ;;  %v203_v36 = vsel %vm181_vm0, %v160_v32, 0.0  ;;  %v256_v37 = vmul.f32 %v153_v9, %v153_v9  ;;  %v284_v38 = vsel %vm181_vm0, %v252_v27, 0.0  ;;  %v164_v59 = vld [vmem:[%s484_s14 + $0x78] sm:$0xff]  ;;  %v165_v1 = vld [vmem:[%s484_s14 + $0x80] sm:$0xff]  ;;  %v166_v7 = vld [vmem:[%s484_s14 + $0x88] sm:$0xff] }
  0x14   : > { %v188_v13 = vadd.f32 %v187_v8, %v186_v10  ;;  %v285_v39 = vsel %vm181_vm0, %v253_v28, 0.0  ;;  %v287_v40 = vsel %vm181_vm0, %v254_v29, 0.0  ;;  %v205_v44 = vsel %vm181_vm0, %v161_v41, 0.0 }
  0x15   : > { %v286_v43 = vadd.f32 %v285_v39, %v284_v38  ;;  %v257_v45 = vmul.f32 %v154_v12, %v154_v12  ;;  %v289_v46 = vsel %vm181_vm0, %v255_v34, 0.0  ;;  %v207_v50 = vsel %vm181_vm0, %v162_v47, 0.0 }
  0x16   : > { %v190_v16 = vadd.f32 %v189_v11, %v188_v13  ;;  %v258_v51 = vmul.f32 %v155_v15, %v155_v15  ;;  %v291_v52 = vsel %vm181_vm0, %v256_v37, 0.0  ;;  %v209_v56 = vsel %vm181_vm0, %v163_v53, 0.0  ;;  %v167_v13 = vld [vmem:[%s484_s14 + $0x90] sm:$0xff] }
  0x17   : > { %v288_v49 = vadd.f32 %v287_v40, %v286_v43  ;;  %v259_v57 = vmul.f32 %v156_v18, %v156_v18  ;;  %v293_v58 = vsel %vm181_vm0, %v257_v45, 0.0  ;;  %v211_v62 = vsel %vm181_vm0, %v164_v59, 0.0  ;;  %v171_v37 = vld [vmem:[%s484_s14 + $0xb0] sm:$0xff]  ;;  %v172_v43 = vld [vmem:[%s484_s14 + $0xb8] sm:$0xff] }
  0x18   : > { %v192_v19 = vadd.f32 %v191_v14, %v190_v16  ;;  %v260_v63 = vmul.f32 %v157_v21, %v157_v21  ;;  %v295_v0 = vsel %vm181_vm0, %v258_v51, 0.0  ;;  %v213_v4 = vsel %vm181_vm0, %v165_v1, 0.0 }
  0x19   : > { %v290_v55 = vadd.f32 %v289_v46, %v288_v49  ;;  %v261_v5 = vmul.f32 %v158_v24, %v158_v24  ;;  %v297_v6 = vsel %vm181_vm0, %v259_v57, 0.0  ;;  %v215_v10 = vsel %vm181_vm0, %v166_v7, 0.0  ;;  %v173_v49 = vld [vmem:[%s484_s14 + $0xc0] sm:$0xff] }
  0x1a   : > { %v194_v22 = vadd.f32 %v193_v17, %v192_v19  ;;  %v262_v11 = vmul.f32 %v159_v30, %v159_v30  ;;  %v299_v12 = vsel %vm181_vm0, %v260_v63, 0.0  ;;  %v217_v16 = vsel %vm181_vm0, %v167_v13, 0.0  ;;  %v168_v19 = vld [vmem:[%s484_s14 + $0x98] sm:$0xff] }
  0x1b   : > { %v292_v61 = vadd.f32 %v291_v52, %v290_v55  ;;  %v263_v17 = vmul.f32 %v160_v32, %v160_v32  ;;  %v301_v18 = vsel %vm181_vm0, %v261_v5, 0.0  ;;  %v265_v29 = vmul.f32 %v162_v47, %v162_v47  ;;  %v174_v55 = vld [vmem:[%s484_s14 + $0xc8] sm:$0xff] }
  0x1c   : > { %v196_v25 = vadd.f32 %v195_v20, %v194_v22  ;;  %v219_v22 = vsel %vm181_vm0, %v168_v19, 0.0  ;;  %v303_v24 = vsel %vm181_vm0, %v262_v11, 0.0  ;;  %v225_v40 = vsel %vm181_vm0, %v171_v37, 0.0 }
  0x1d   : > { %v294_v3 = vadd.f32 %v293_v58, %v292_v61  ;;  %v305_v30 = vsel %vm181_vm0, %v263_v17, 0.0  ;;  %v227_v46 = vsel %vm181_vm0, %v172_v43, 0.0  ;;  %v268_v47 = vmul.f32 %v165_v1, %v165_v1  ;;  %v175_v61 = vld [vmem:[%s484_s14 + $0xd0] sm:$0xff] }
  0x1e   : > { %v198_v31 = vadd.f32 %v197_v23, %v196_v25  ;;  %v264_v23 = vmul.f32 %v161_v41, %v161_v41  ;;  %v169_v25 = vld [vmem:[%s484_s14 + $0xa0] sm:$0xff]  ;;  %v267_v41 = vmul.f32 %v164_v59, %v164_v59  ;;  %v229_v52 = vsel %vm181_vm0, %v173_v49, 0.0 }
  0x1f   : > { %v296_v9 = vadd.f32 %v295_v0, %v294_v3  ;;  %v221_v28 = vsel %vm181_vm0, %v169_v25, 0.0  ;;  %v231_v58 = vsel %vm181_vm0, %v174_v55, 0.0  ;;  %v270_v59 = vmul.f32 %v167_v13, %v167_v13  ;;  %v176_v3 = vld [vmem:[%s484_s14 + $0xd8] sm:$0xff] }
  0x20   : > { %v200_v35 = vadd.f32 %v199_v26, %v198_v31  ;;  %v170_v31 = vld [vmem:[%s484_s14 + $0xa8] sm:$0xff]  ;;  %v233_v0 = vsel %vm181_vm0, %v175_v61, 0.0  ;;  %v271_v1 = vmul.f32 %v168_v19, %v168_v19  ;;  %v274_v19 = vmul.f32 %v171_v37, %v171_v37 }
  0x21   : > { %v298_v15 = vadd.f32 %v297_v6, %v296_v9  ;;  %v223_v34 = vsel %vm181_vm0, %v170_v31, 0.0  ;;  %v235_v6 = vsel %vm181_vm0, %v176_v3, 0.0  ;;  %v177_v9 = vld [vmem:[%s484_s14 + $0xe0] sm:$0xff]  ;;  %v273_v13 = vmul.f32 %v170_v31, %v170_v31 }
  0x22   : > { %v202_v42 = vadd.f32 %v201_v33, %v200_v35  ;;  %v266_v35 = vmul.f32 %v163_v53, %v163_v53  ;;  %v269_v53 = vmul.f32 %v166_v7, %v166_v7  ;;  %v272_v7 = vmul.f32 %v169_v25, %v169_v25 }
  0x23   : > { %v300_v21 = vadd.f32 %v299_v12, %v298_v15  ;;  %v237_v12 = vsel %vm181_vm0, %v177_v9, 0.0  ;;  %v178_v15 = vld [vmem:[%s484_s14 + $0xe8] sm:$0xff]  ;;  %v275_v25 = vmul.f32 %v172_v43, %v172_v43  ;;  %v276_v31 = vmul.f32 %v173_v49, %v173_v49 }
  0x24   : > { %v204_v48 = vadd.f32 %v203_v36, %v202_v42  ;;  %v307_v36 = vsel %vm181_vm0, %v264_v23, 0.0  ;;  %v309_v42 = vsel %vm181_vm0, %v265_v29, 0.0  ;;  %v279_v43 = vmul.f32 %v176_v3, %v176_v3 }
  0x25   : > { %v302_v27 = vadd.f32 %v301_v18, %v300_v21  ;;  %v239_v18 = vsel %vm181_vm0, %v178_v15, 0.0  ;;  %v179_v21 = vld [vmem:[%s484_s14 + $0xf0] sm:$0xff] }
  0x26   : > { %v206_v54 = vadd.f32 %v205_v44, %v204_v48  ;;  %v311_v48 = vsel %vm181_vm0, %v266_v35, 0.0  ;;  %v277_v35 = vmul.f32 %v174_v55, %v174_v55  ;;  %v282_v55 = vmul.f32 %v179_v21, %v179_v21 }
  0x27   : > { %v304_v33 = vadd.f32 %v303_v24, %v302_v27  ;;  %v241_v24 = vsel %vm181_vm0, %v179_v21, 0.0  ;;  %v180_v27 = vld [vmem:[%s484_s14 + $0xf8] sm:$0xff] }
  0x28   : > { %v208_v60 = vadd.f32 %v207_v50, %v206_v54  ;;  %v313_v54 = vsel %vm181_vm0, %v267_v41, 0.0 }
  0x29   : > { %v306_v39 = vadd.f32 %v305_v30, %v304_v33  ;;  %v243_v30 = vsel %vm181_vm0, %v180_v27, 0.0 }
  0x2a   : > { %v210_v2 = vadd.f32 %v209_v56, %v208_v60  ;;  %v315_v60 = vsel %vm181_vm0, %v268_v47, 0.0  ;;  %v280_v47 = vmul.f32 %v177_v9, %v177_v9 }
  0x2b   : > { %v308_v45 = vadd.f32 %v307_v36, %v306_v39  ;;  %v329_v36 = vsel %vm181_vm0, %v275_v25, 0.0  ;;  %v278_v39 = vmul.f32 %v175_v61, %v175_v61 }
  0x2c   : > { %v212_v8 = vadd.f32 %v211_v62, %v210_v2  ;;  %v317_v2 = vsel %vm181_vm0, %v269_v53, 0.0 }
  0x2d   : > { %v310_v51 = vadd.f32 %v309_v42, %v308_v45 }
  0x2e   : > { %v214_v14 = vadd.f32 %v213_v4, %v212_v8  ;;  %v319_v8 = vsel %vm181_vm0, %v270_v59, 0.0  ;;  %v283_v59 = vmul.f32 %v180_v27, %v180_v27 }
  0x2f   : > { %v312_v57 = vadd.f32 %v311_v48, %v310_v51  ;;  %v335_v48 = vsel %vm181_vm0, %v278_v39, 0.0  ;;  %v281_v51 = vmul.f32 %v178_v15, %v178_v15 }
  0x30   : > { %v216_v20 = vadd.f32 %v215_v10, %v214_v14  ;;  %v321_v14 = vsel %vm181_vm0, %v271_v1, 0.0  ;;  %v345_v1 = vsel %vm181_vm0, %v283_v59, 0.0 }
  0x31   : > { %v314_v63 = vadd.f32 %v313_v54, %v312_v57 }
  0x32   : > { %v218_v26 = vadd.f32 %v217_v16, %v216_v20  ;;  %v323_v20 = vsel %vm181_vm0, %v272_v7, 0.0 }
  0x33   : > { %v316_v5 = vadd.f32 %v315_v60, %v314_v63  ;;  %v341_v60 = vsel %vm181_vm0, %v281_v51, 0.0  ;;  %v343_v63 = vsel %vm181_vm0, %v282_v55, 0.0 }
  0x34   : > { %v220_v32 = vadd.f32 %v219_v22, %v218_v26  ;;  %v325_v26 = vsel %vm181_vm0, %v273_v13, 0.0 }
  0x35   : > { %v318_v11 = vadd.f32 %v317_v2, %v316_v5 }
  0x36   : > { %v222_v38 = vadd.f32 %v221_v28, %v220_v32  ;;  %v327_v32 = vsel %vm181_vm0, %v274_v19, 0.0 }
  0x37   : > { %v320_v17 = vadd.f32 %v319_v8, %v318_v11 }
  0x38   : > { %v224_v44 = vadd.f32 %v223_v34, %v222_v38 }
  0x39   : > { %v322_v23 = vadd.f32 %v321_v14, %v320_v17 }
  0x3a   : > { %v226_v50 = vadd.f32 %v225_v40, %v224_v44  ;;  %v331_v40 = vsel %vm181_vm0, %v276_v31, 0.0  ;;  %v333_v44 = vsel %vm181_vm0, %v277_v35, 0.0 }
  0x3b   : > { %v324_v29 = vadd.f32 %v323_v20, %v322_v23 }
  0x3c   : > { %v228_v56 = vadd.f32 %v227_v46, %v226_v50 }
  0x3d   : > { %v326_v34 = vadd.f32 %v325_v26, %v324_v29 }
  0x3e   : > { %v230_v62 = vadd.f32 %v229_v52, %v228_v56  ;;  %v337_v52 = vsel %vm181_vm0, %v279_v43, 0.0  ;;  %v339_v56 = vsel %vm181_vm0, %v280_v47, 0.0 }
  0x3f   : > { %v328_v38 = vadd.f32 %v327_v32, %v326_v34 }
  0x40   : > { %v232_v4 = vadd.f32 %v231_v58, %v230_v62 }
  0x41   : > { %v330_v42 = vadd.f32 %v329_v36, %v328_v38 }
  0x42   : > { %v234_v10 = vadd.f32 %v233_v0, %v232_v4 }
  0x43   : > { %v332_v46 = vadd.f32 %v331_v40, %v330_v42 }
  0x44   : > { %v236_v16 = vadd.f32 %v235_v6, %v234_v10 }
  0x45   : > { %v334_v50 = vadd.f32 %v333_v44, %v332_v46 }
  0x46   : > { %v238_v22 = vadd.f32 %v237_v12, %v236_v16 }
  0x47   : > { %v336_v54 = vadd.f32 %v335_v48, %v334_v50 }
  0x48   : > { %v240_v28 = vadd.f32 %v239_v18, %v238_v22 }
  0x49   : > { %v338_v58 = vadd.f32 %v337_v52, %v336_v54 }
  0x4a   : > { %v242_v33 = vadd.f32 %v241_v24, %v240_v28 }
  0x4b   : > { %v340_v62 = vadd.f32 %v339_v56, %v338_v58 }
  0x4c   : > { %v244_v37 = vadd.f32 %v243_v30, %v242_v33 }
  0x4d   : > { %v342_v0 = vadd.f32 %v341_v60, %v340_v62 }
  0x4e   : > { %v245_v41 = vrot.slane %v244_v37, 4 }
  0x4f   : > { %v344_v2 = vadd.f32 %v343_v63, %v342_v0 }
  0x50   : > { %v246_v45 = vadd.f32 %v245_v41, %v244_v37 }
  0x51   : > { %v346_v3 = vadd.f32 %v345_v1, %v344_v2 }
  0x52   : > { %v247_v49 = vrot.slane %v246_v45, 2 }
  0x53   : > { %v347_v4 = vrot.slane %v346_v3, 4 }
  0x54   : > { %v248_v53 = vadd.f32 %v247_v49, %v246_v45 }
  0x55   : > { %v348_v5 = vadd.f32 %v347_v4, %v346_v3 }
  0x56   : > { %v249_v57 = vrot.slane %v248_v53, 1 }
  0x57   : > { %v349_v6 = vrot.slane %v348_v5, 2 }
  0x58   : > { %v250_v61 = vadd.f32 %v249_v57, %v248_v53 }
  0x59   : > { %v350_v7 = vadd.f32 %v349_v6, %v348_v5 }
  0x5a   : > { %355 = vst.msk [vmem:[%s145_s17] sm:$0x1] %vm354_vm1, %v250_v61 }
  0x5b   : > { %v351_v8 = vrot.slane %v350_v7, 1 }
  0x5d   : > { %v352_v9 = vadd.f32 %v351_v8, %v350_v7 }
  0x5f   : > { %356 = vst.msk [vmem:[%s148_s20] sm:$0x1] %vm354_vm1, %v352_v9 }
  0x60 PF: > { %s13_s9 = sadd.s32 1, %s453_s9  }
  0x61   : > { %p10_p4 = scmp.ge.s32.totalorder %s13_s9, 4  }
  0x63   :  { %12 = sbr.rel (!%p10_p4) target bundleno = 1 (0x1), region = 66 }

// kernel: _block_forward_jit.5
= control target key start
LH: loop header
LB: loop body
LE: loop exit
PB: predicated region body
PF: predicated region fallthrough
CT: control target
= control target key end

     0   :  { %s6000_s18 = smov 0   ;;  %s7432_s0 = inlined_call_operand.vmem [shape: f32[1,16], index: 0, kind: input, shape index: {}]   ;;  %s7433_s1 = inlined_call_operand.vmem [shape: f32[1,16], index: 1, kind: input, shape index: {}]   ;;  %s7434_s2 = inlined_call_operand.vmem [shape: bf16[2,256,16], index: 2, kind: input, shape index: {}]   ;;  %s7435_s3 = inlined_call_operand.vmem [shape: bf16[9,16,16], index: 3, kind: input, shape index: {}]   ;;  %s7436_s4 = inlined_call_operand.vmem [shape: f32[2,256,16], index: 4, kind: input, shape index: {}]   ;;  %s7437_s5 = inlined_call_operand.vmem [shape: f32[2,256,16], index: 5, kind: output, shape index: {}]  }
   0x1 LB: > { %s4941_s19 = sadd.s32 4294967295, %s5967_s18   ;;  %p4945_p0 = scmp.ge.s32.totalorder %s5967_s18, 1  ;;  %s5967_s18 = sphi %s6000_s18, %s15_s18  }
   0x2   : > { %p197_p1 = scmp.lt.s32.totalorder %s5967_s18, 3 }
   0x4   : > { %p198_p2 = pnand %p4945_p0, %p197_p1 }
   0x6   : > { %201 = sbr.rel (%p198_p2) target bundleno = 569 (0x239), region = 40 }
   0xb   : > { %v5847_v0 = vld [vmem:[%s7435_s3 + $0x18] sm:$0xff]   ;;  %p230_p3 = scmp.lt.s32.totalorder %s4941_s19, 1  ;;  %vm729_vm0 = vcmask 125952   ;;  %v5969_v1 = vmov 0   ;;  %v6022_v2 = vld [vmem:[%s7435_s3] sm:$0xff]   ;;  %v6033_v4 = vld [vmem:[%s7435_s3 + $0x30] sm:$0xff]  }
   0xc   : > { %5836 = vmatprep.subr.bf16.mxu1 %v5847_v0  ;;  %5530 = vmatprep.subr.bf16.mxu0 %v5847_v0  ;;  %733 = vst.msk [vmem:[#allocation2 + $0xc] sm:$0xf] %vm729_vm0, %v5969_v1  ;;  %731 = vst.msk [vmem:[#allocation2 + $0x4] sm:$0xf] %vm729_vm0, %v5969_v1  ;;  %v6028_v3 = vld [vmem:[%s7432_s0] ss:$0 sm:$0xff] }
   0xd   : > { %s7562_s19 = smov (!%p230_p3, %s4941_s19), 1  ;;  %732 = vst.msk [vmem:[#allocation2 + $0x8] sm:$0xf] %vm729_vm0, %v5969_v1  ;;  %734 = vst.msk [vmem:[#allocation2 + $0x90] sm:$0xf] %vm729_vm0, %v5969_v1  ;;  %5837 = vmatpush3.bf16.msra.mxu1 %v5847_v0  ;;  %5531 = vmatpush3.bf16.msra.mxu0 %v5847_v0  ;;  %vm1353_vm2 = vcmask 130048  }
   0xe   : > { %735 = vst.msk [vmem:[#allocation2 + $0x94] sm:$0xf] %vm729_vm0, %v5969_v1  ;;  %736 = vst.msk [vmem:[#allocation2 + $0x98] sm:$0xf] %vm729_vm0, %v5969_v1  ;;  %s5263_s24 = sshll.u32 %s7562_s19, 7  ;;  %5564 = vmatprep.subr.bf16.mxu1 %v6022_v2  ;;  %5598 = vmatprep.subr.bf16.mxu0 %v6033_v4  ;;  %s5264_s23 = sshll.u32 %s7562_s19, 8 }
   0xf   : > { %s6038_s6 = scalar_lea.vmem %s7434_s2, %s5263_s24  ;;  %v6052_v14 = vld [vmem:[%s7433_s1] ss:$0 sm:$0xff]  ;;  %vm1194_vm1 = vsmask.f32 4352  ;;  %vm3514_vm3 = vsmask.f32 7424  ;;  %s7165_s26 = scalar_lea.vmem %s7436_s4, %s5264_s23 }
  0x10   : > { %v5299_v5 = vld [vmem:[%s6038_s6] sm:$0xff]   ;;  %v5362_v6 = vld [vmem:[%s6038_s6 + $0x8] sm:$0xff]   ;;  %v6044_v7 = vld [vmem:[%s6038_s6 + $0x38] sm:$0xff]   ;;  %s7182_s29 = scalar_lea.vmem %s7437_s5, %s5264_s23 }
  0x11   : > { %v5300_v8 = vunpack.c.l.bf16 %v5299_v5  ;;  %v5301_v9 = vunpack.c.h.bf16 %v5299_v5  ;;  %v5304_v10 = vunpack.c.l.bf16 %v5362_v6  ;;  %v5305_v11 = vunpack.c.h.bf16 %v5362_v6  ;;  %v5369_v12 = vld [vmem:[%s6038_s6 + $0x40] sm:$0xff]   ;;  %v5370_v13 = vld [vmem:[%s6038_s6 + $0x48] sm:$0xff]   ;;  %v5363_v23 = vld [vmem:[%s6038_s6 + $0x10] sm:$0xff]  }
  0x12   : > { %v5328_v15 = vunpack.c.l.bf16 %v6044_v7  ;;  %v5329_v16 = vunpack.c.h.bf16 %v6044_v7  ;;  %v5332_v17 = vunpack.c.l.bf16 %v5369_v12  ;;  %v5333_v18 = vunpack.c.h.bf16 %v5369_v12  ;;  %v5371_v44 = vld [vmem:[%s6038_s6 + $0x50] sm:$0xff]   ;;  %v6074_v49 = vld [vmem:[%s6038_s6 + $0x18] sm:$0xff]  }
  0x13   : > { %v808_v19 = vsub.f32 %v5300_v8, %v6028_v3  ;;  %v809_v20 = vsub.f32 %v5301_v9, %v6028_v3  ;;  %v810_v21 = vsub.f32 %v5304_v10, %v6028_v3  ;;  %v5336_v22 = vunpack.c.l.bf16 %v5370_v13  ;;  %v6077_v50 = vld [vmem:[%s6038_s6 + $0x58] sm:$0xff]   ;;  %v1072_v6 = vld [vmem:[#allocation2 + $0xc] sm:$0xf] }
  0x14   : > { %v5337_v24 = vunpack.c.h.bf16 %v5370_v13  ;;  %v823_v25 = vsub.f32 %v5329_v16, %v6028_v3  ;;  %v824_v26 = vsub.f32 %v5332_v17, %v6028_v3  ;;  %v825_v27 = vsub.f32 %v5333_v18, %v6028_v3  ;;  %v1105_v8 = vld [vmem:[#allocation2 + $0xc] sm:$0x8]  ;;  %v6098_v13 = vld [vmem:[%s6038_s6 + $0x20] sm:$0xff]  }
  0x15   : > { %v846_v28 = vmul.f32 %v6052_v14, %v808_v19  ;;  %v847_v29 = vmul.f32 %v6052_v14, %v809_v20  ;;  %v848_v30 = vmul.f32 %v6052_v14, %v810_v21  ;;  %v826_v31 = vsub.f32 %v5336_v22, %v6028_v3  ;;  %v6103_v20 = vld [vmem:[%s6038_s6 + $0x60] sm:$0xff]  }
  0x16   : > { %v861_v32 = vmul.f32 %v6052_v14, %v823_v25  ;;  %v862_v33 = vmul.f32 %v6052_v14, %v824_v26  ;;  %v863_v34 = vmul.f32 %v6052_v14, %v825_v27  ;;  %v5308_v35 = vunpack.c.l.bf16 %v5363_v23 }
  0x17   : > { %v878_v36 = vmax.f32 %v846_v28, 0.0  ;;  %v879_v37 = vmax.f32 %v847_v29, 0.0  ;;  %v880_v38 = vmax.f32 %v848_v30, 0.0  ;;  %v864_v39 = vmul.f32 %v6052_v14, %v826_v31 }
  0x18   : > { %v893_v40 = vmax.f32 %v861_v32, 0.0  ;;  %v894_v41 = vmax.f32 %v862_v33, 0.0  ;;  %v895_v42 = vmax.f32 %v863_v34, 0.0  ;;  %v811_v43 = vsub.f32 %v5305_v11, %v6028_v3 }
  0x19   : > { %v5266_v45 = vpack.c.bf16 %v878_v36, %v878_v36  ;;  %v5267_v46 = vpack.c.bf16 %v879_v37, %v879_v37  ;;  %v5268_v47 = vpack.c.bf16 %v880_v38, %v880_v38  ;;  %v896_v48 = vmax.f32 %v864_v39, 0.0 }
  0x1a   : > { %v5281_v51 = vpack.c.bf16 %v893_v40, %v893_v40  ;;  %v5282_v52 = vpack.c.bf16 %v894_v41, %v894_v41  ;;  %v5283_v53 = vpack.c.bf16 %v895_v42, %v895_v42  ;;  %v812_v54 = vsub.f32 %v5308_v35, %v6028_v3 }
  0x1b   : > { %1038 = vst.msk [vmem:[#allocation2 + $0x10] sm:$0xf] %vm729_vm0, %v5266_v45  ;;  %1039 = vst.msk [vmem:[#allocation2 + $0x14] sm:$0xf] %vm729_vm0, %v5267_v46  ;;  %v5284_v55 = vpack.c.bf16 %v896_v48, %v896_v48  ;;  %v849_v56 = vmul.f32 %v6052_v14, %v811_v43  ;;  %v5340_v57 = vunpack.c.l.bf16 %v5371_v44  ;;  %v827_v58 = vsub.f32 %v5337_v24, %v6028_v3 }
  0x1c   : > { %1040 = vst.msk [vmem:[#allocation2 + $0x18] sm:$0xf] %vm729_vm0, %v5268_v47  ;;  %1053 = vst.msk [vmem:[#allocation2 + $0x4c] sm:$0xf] %vm729_vm0, %v5281_v51  ;;  %v850_v59 = vmul.f32 %v6052_v14, %v812_v54  ;;  %v5309_v60 = vunpack.c.h.bf16 %v5363_v23  ;;  %v5312_v61 = vunpack.c.l.bf16 %v6074_v49  ;;  %v5341_v62 = vunpack.c.h.bf16 %v5371_v44 }
  0x1d   : > { %1054 = vst.msk [vmem:[#allocation2 + $0x50] sm:$0xf] %vm729_vm0, %v5282_v52  ;;  %1055 = vst.msk [vmem:[#allocation2 + $0x54] sm:$0xf] %vm729_vm0, %v5283_v53  ;;  %v881_v63 = vmax.f32 %v849_v56, 0.0  ;;  %v828_v0 = vsub.f32 %v5340_v57, %v6028_v3  ;;  %v865_v1 = vmul.f32 %v6052_v14, %v827_v58  ;;  %v5344_v5 = vunpack.c.l.bf16 %v6077_v50 }
  0x1e   : > { %1056 = vst.msk [vmem:[#allocation2 + $0x58] sm:$0xf] %vm729_vm0, %v5284_v55  ;;  %v882_v9 = vmax.f32 %v850_v59, 0.0  ;;  %v813_v10 = vsub.f32 %v5309_v60, %v6028_v3  ;;  %v814_v11 = vsub.f32 %v5312_v61, %v6028_v3  ;;  %v829_v12 = vsub.f32 %v5341_v62, %v6028_v3 }
  0x1f   : > { %v5269_v16 = vpack.c.bf16 %v881_v63, %v881_v63  ;;  %v866_v17 = vmul.f32 %v6052_v14, %v828_v0  ;;  %v897_v18 = vmax.f32 %v865_v1, 0.0  ;;  %v830_v19 = vsub.f32 %v5344_v5, %v6028_v3 }
  0x20   : > { %v5270_v21 = vpack.c.bf16 %v882_v9, %v882_v9  ;;  %v851_v22 = vmul.f32 %v6052_v14, %v813_v10  ;;  %v852_v23 = vmul.f32 %v6052_v14, %v814_v11  ;;  %v867_v24 = vmul.f32 %v6052_v14, %v829_v12 }
  0x21   : > { %1041 = vst.msk [vmem:[#allocation2 + $0x1c] sm:$0xf] %vm729_vm0, %v5269_v16  ;;  %v898_v25 = vmax.f32 %v866_v17, 0.0  ;;  %v5285_v26 = vpack.c.bf16 %v897_v18, %v897_v18  ;;  %v868_v27 = vmul.f32 %v6052_v14, %v830_v19  ;;  %v5313_v28 = vunpack.c.h.bf16 %v6074_v49  ;;  %v6133_v17 = vld [vmem:[%s6038_s6 + $0x28] sm:$0xff]  }
  0x22   : > { %v1073_v29 = vld [vmem:[#allocation2 + $0x10] sm:$0xf]  ;;  %1042 = vst.msk [vmem:[#allocation2 + $0x20] sm:$0xf] %vm729_vm0, %v5270_v21  ;;  %v5316_v30 = vunpack.c.l.bf16 %v6098_v13  ;;  %v5345_v31 = vunpack.c.h.bf16 %v6077_v50  ;;  %v5348_v32 = vunpack.c.l.bf16 %v6103_v20  ;;  %v5317_v33 = vunpack.c.h.bf16 %v6098_v13 }
  0x23   : > { %v4988_v34 = vcombine.low %v1105_v8, %v1073_v29  ;;  %v5849_v35 = vld [vmem:[#allocation2 + $0x14] sm:$0xff]   ;;  %v6116_v36 = vcombine.low %v1072_v6, %v1073_v29  ;;  %v5286_v37 = vpack.c.bf16 %v898_v25, %v898_v25  ;;  %1057 = vst.msk [vmem:[#allocation2 + $0x5c] sm:$0xf] %vm729_vm0, %v5285_v26  ;;  %v883_v38 = vmax.f32 %v851_v22, 0.0 }
  0x24   : > { %v5851_v39 = vld [vmem:[#allocation2 + $0x4c] sm:$0xff]   ;;  %v884_v40 = vmax.f32 %v852_v23, 0.0  ;;  %v815_v41 = vsub.f32 %v5313_v28, %v6028_v3  ;;  %v816_v42 = vsub.f32 %v5316_v30, %v6028_v3  ;;  %v831_v43 = vsub.f32 %v5345_v31, %v6028_v3 }
  0x25   : > { %v1196_v44 = vshrl.u32 %v4988_v34, 16  ;;  %v1199_v45 = vshll.u32 %v4988_v34, 16  ;;  %v1204_v46 = vshrl.u32 %v5849_v35, 16  ;;  %v1207_v47 = vshll.u32 %v5849_v35, 16  ;;  %v5852_v48 = vld [vmem:[#allocation2 + $0x54] sm:$0xff]   ;;  %v6148_v34 = vld [vmem:[%s7435_s3 + $0x8] sm:$0xff]  }
  0x26   : > { %1058 = vst.msk [vmem:[#allocation2 + $0x60] sm:$0xf] %vm729_vm0, %v5286_v37  ;;  %v1267_v49 = vshrl.u32 %v5851_v39, 16  ;;  %v1270_v50 = vshll.u32 %v5851_v39, 16  ;;  %v5271_v51 = vpack.c.bf16 %v883_v38, %v883_v38  ;;  %v5272_v52 = vpack.c.bf16 %v884_v40, %v884_v40 }
  0x27   : > { %v1198_v53 = vrot.slane %v1196_v44, 3  ;;  %v1201_v54 = vrot.slane %v1199_v45, 4  ;;  %v1206_v55 = vrot.slane %v1204_v46, 3  ;;  %v1209_v56 = vrot.slane %v1207_v47, 4 }
  0x28   : > { %v1269_v57 = vrot.slane %v1267_v49, 3  ;;  %v1272_v58 = vrot.slane %v1270_v50, 4  ;;  %v1276_v59 = vshrl.u32 %v5852_v48, 16  ;;  %v1279_v60 = vshll.u32 %v5852_v48, 16  ;;  %1043 = vst.msk [vmem:[#allocation2 + $0x24] sm:$0xf] %vm729_vm0, %v5271_v51 }
  0x29   : > { %1044 = vst.msk [vmem:[#allocation2 + $0x28] sm:$0xf] %vm729_vm0, %v5272_v52  ;;  %v1202_v61 = vor.u32 %v1201_v54, %v1198_v53  ;;  %v6125_v62 = vor.u32 %v1209_v56, %v1206_v55  ;;  %v5854_v63 = vld [vmem:[#allocation2 + $0x1c] sm:$0xff]   ;;  %v899_v0 = vmax.f32 %v867_v24, 0.0  ;;  %v900_v1 = vmax.f32 %v868_v27, 0.0  ;;  %v5374_v48 = vld [vmem:[%s6038_s6 + $0x68] sm:$0xff]  }
  0x2a   : > { %v6127_v5 = vor.u32 %v1272_v58, %v1269_v57  ;;  %v1278_v6 = vrot.slane %v1276_v59, 3  ;;  %v1281_v8 = vrot.slane %v1279_v60, 4  ;;  %v853_v9 = vmul.f32 %v6052_v14, %v815_v41  ;;  %v6168_v53 = vld [vmem:[%s6038_s6 + $0x30] sm:$0xff]   ;;  %v6175_v58 = vld [vmem:[%s7435_s3 + $0x20] sm:$0xff]  }
  0x2b   : > { %v1211_v10 = vsel %vm1194_vm1, %v1202_v61, %v6125_v62  ;;  %v1213_v11 = vshrl.u32 %v5854_v63, 16  ;;  %v1216_v12 = vshll.u32 %v5854_v63, 16  ;;  %v5287_v16 = vpack.c.bf16 %v899_v0, %v899_v0 }
  0x2c   : > { %5532 = vmatprep.mubr.msk.bf16.mxu0 %vm1353_vm2, %v1211_v10  ;;  %v1282_v18 = vor.u32 %v1281_v8, %v1278_v6  ;;  %v5288_v21 = vpack.c.bf16 %v900_v1, %v900_v1  ;;  %v854_v22 = vmul.f32 %v6052_v14, %v816_v42  ;;  %v885_v23 = vmax.f32 %v853_v9, 0.0 }
  0x2d   : > { %v5855_v19 = vld [vmem:[#allocation2 + $0x5c] sm:$0xff]   ;;  %v1215_v24 = vrot.slane %v1213_v11, 3  ;;  %v1218_v25 = vrot.slane %v1216_v12, 4  ;;  %1059 = vst.msk [vmem:[#allocation2 + $0x64] sm:$0xf] %vm729_vm0, %v5287_v16  ;;  %v832_v26 = vsub.f32 %v5348_v32, %v6028_v3  ;;  %v869_v27 = vmul.f32 %v6052_v14, %v831_v43 }
  0x2e   : > { %v6142_v28 = vsel %vm1194_vm1, %v6127_v5, %v1282_v18  ;;  %v1285_v29 = vshrl.u32 %v5855_v19, 16  ;;  %v1288_v30 = vshll.u32 %v5855_v19, 16  ;;  %1060 = vst.msk [vmem:[#allocation2 + $0x68] sm:$0xf] %vm729_vm0, %v5288_v21  ;;  %v886_v31 = vmax.f32 %v854_v22, 0.0 }
  0x2f   : > { %5548 = vmatprep.mubr.msk.bf16.mxu1 %vm1353_vm2, %v6142_v28  ;;  %v1219_v32 = vor.u32 %v1218_v25, %v1215_v24  ;;  %v5273_v37 = vpack.c.bf16 %v885_v23, %v885_v23  ;;  %v870_v38 = vmul.f32 %v6052_v14, %v832_v26  ;;  %v901_v39 = vmax.f32 %v869_v27, 0.0 }
  0x30   : > { %v5857_v35 = vld [vmem:[#allocation2 + $0x24] sm:$0xff]   ;;  %v1287_v40 = vrot.slane %v1285_v29, 3  ;;  %v1290_v41 = vrot.slane %v1288_v30, 4  ;;  %v5274_v42 = vpack.c.bf16 %v886_v31, %v886_v31  ;;  %v5320_v43 = vunpack.c.l.bf16 %v6133_v17 }
  0x31   : > { %v6156_v44 = vsel %vm1194_vm1, %v6125_v62, %v1219_v32  ;;  %v1222_v45 = vshrl.u32 %v5857_v35, 16  ;;  %v1225_v46 = vshll.u32 %v5857_v35, 16  ;;  %1045 = vst.msk [vmem:[#allocation2 + $0x2c] sm:$0xf] %vm729_vm0, %v5273_v37  ;;  %v902_v47 = vmax.f32 %v870_v38, 0.0 }
  0x32   : > { %5533 = vmatmul.mubr.msk.bf16.vlgmr.msra.gmra.mxu0 %vm1353_vm2, %v6156_v44  ;;  %v1291_v49 = vor.u32 %v1290_v41, %v1287_v40  ;;  %1046 = vst.msk [vmem:[#allocation2 + $0x30] sm:$0xf] %vm729_vm0, %v5274_v42  ;;  %v5289_v50 = vpack.c.bf16 %v901_v39, %v901_v39  ;;  %v817_v51 = vsub.f32 %v5317_v33, %v6028_v3  ;;  %v5349_v57 = vunpack.c.h.bf16 %v6103_v20 }
  0x33   : > { %v818_v52 = vsub.f32 %v5320_v43, %v6028_v3  ;;  %5599 = vmatpush3.bf16.msra.mxu0 %v6033_v4  ;;  %v1224_v54 = vrot.slane %v1222_v45, 3  ;;  %v1227_v55 = vrot.slane %v1225_v46, 4  ;;  %v5290_v56 = vpack.c.bf16 %v902_v47, %v902_v47 }
  0x34   : > { %v6178_v59 = vsel %vm1194_vm1, %v1282_v18, %v1291_v49  ;;  %1061 = vst.msk [vmem:[#allocation2 + $0x6c] sm:$0xf] %vm729_vm0, %v5289_v50  ;;  %v855_v13 = vmul.f32 %v6052_v14, %v817_v51  ;;  %v5352_v4 = vunpack.c.l.bf16 %v5374_v48  ;;  %5666 = vmatprep.subr.bf16.mxu0 %v6148_v34  ;;  %v833_v61 = vsub.f32 %v5349_v57, %v6028_v3  ;;  %v6200_v18 = vld [vmem:[%s6038_s6 + $0x70] sm:$0xff]  }
  0x35   : > { %v856_v33 = vmul.f32 %v6052_v14, %v818_v52  ;;  %5549 = vmatmul.mubr.msk.bf16.vlgmr.msra.gmra.mxu1 %vm1353_vm2, %v6178_v59  ;;  %v6186_v20 = vor.u32 %v1227_v55, %v1224_v54  ;;  %v5858_v60 = vld [vmem:[#allocation2 + $0x64] sm:$0xff]   ;;  %1062 = vst.msk [vmem:[#allocation2 + $0x70] sm:$0xf] %vm729_vm0, %v5290_v56  ;;  %v5321_v63 = vunpack.c.h.bf16 %v6133_v17  ;;  %v5324_v0 = vunpack.c.l.bf16 %v6168_v53 }
  0x36   : > { %5565 = vmatpush3.bf16.msra.mxu1 %v6022_v2  ;;  %v887_v1 = vmax.f32 %v855_v13, 0.0  ;;  %v834_v8 = vsub.f32 %v5352_v4, %v6028_v3  ;;  %v5353_v9 = vunpack.c.h.bf16 %v5374_v48  ;;  %v1294_v11 = vshrl.u32 %v5858_v60, 16  ;;  %v5376_v13 = vld [vmem:[%s6038_s6 + $0x78] sm:$0xff]  }
  0x37   : > { %v888_v6 = vmax.f32 %v856_v33, 0.0  ;;  %v6196_v10 = vsel %vm1194_vm1, %v1219_v32, %v6186_v20  ;;  %v1297_v12 = vshll.u32 %v5858_v60, 16  ;;  %v871_v16 = vmul.f32 %v6052_v14, %v833_v61  ;;  %5632 = vmatprep.subr.bf16.mxu1 %v6175_v58 }
  0x38   : > { %5536 = vmatprep.mubr.msk.bf16.mxu0 %vm1353_vm2, %v6196_v10  ;;  %v5275_v2 = vpack.c.bf16 %v887_v1, %v887_v1  ;;  %v872_v19 = vmul.f32 %v6052_v14, %v834_v8  ;;  %v819_v21 = vsub.f32 %v5321_v63, %v6028_v3  ;;  %v1296_v22 = vrot.slane %v1294_v11, 3  ;;  %v5868_v11 = vld [vmem:[#allocation2 + $0x4] sm:$0xf8]  }
  0x39   : > { %v5276_v17 = vpack.c.bf16 %v888_v6, %v888_v6  ;;  %v1299_v23 = vrot.slane %v1297_v12, 4  ;;  %v5859_v24 = vld [vmem:[#allocation2 + $0x2c] sm:$0xff]   ;;  %v903_v25 = vmax.f32 %v871_v16, 0.0  ;;  %v820_v26 = vsub.f32 %v5324_v0, %v6028_v3 }
  0x3a   : > { %1047 = vst.msk [vmem:[#allocation2 + $0x34] sm:$0xf] %vm729_vm0, %v5275_v2  ;;  %v904_v27 = vmax.f32 %v872_v19, 0.0  ;;  %v857_v29 = vmul.f32 %v6052_v14, %v819_v21  ;;  %v5356_v30 = vunpack.c.l.bf16 %v6200_v18  ;;  %v835_v31 = vsub.f32 %v5353_v9, %v6028_v3 }
  0x3b   : > { %1048 = vst.msk [vmem:[#allocation2 + $0x38] sm:$0xf] %vm729_vm0, %v5276_v17  ;;  %v1300_v32 = vor.u32 %v1299_v23, %v1296_v22  ;;  %v1231_v35 = vshrl.u32 %v5859_v24, 16  ;;  %v1234_v37 = vshll.u32 %v5859_v24, 16  ;;  %v5291_v38 = vpack.c.bf16 %v903_v25, %v903_v25 }
  0x3c   : > { %v5860_v39 = vld [vmem:[#allocation2 + $0x6c] sm:$0xff]   ;;  %v5292_v40 = vpack.c.bf16 %v904_v27, %v904_v27  ;;  %v858_v41 = vmul.f32 %v6052_v14, %v820_v26  ;;  %v889_v42 = vmax.f32 %v857_v29, 0.0  ;;  %v836_v43 = vsub.f32 %v5356_v30, %v6028_v3 }
  0x3d   : > { %v6216_v45 = vsel %vm1194_vm1, %v1291_v49, %v1300_v32  ;;  %v1233_v46 = vrot.slane %v1231_v35, 3  ;;  %v1236_v47 = vrot.slane %v1234_v37, 4  ;;  %1063 = vst.msk [vmem:[#allocation2 + $0x74] sm:$0xf] %vm729_vm0, %v5291_v38  ;;  %v873_v48 = vmul.f32 %v6052_v14, %v835_v31 }
  0x3e   : > { %5552 = vmatprep.mubr.msk.bf16.mxu1 %vm1353_vm2, %v6216_v45  ;;  %v1303_v50 = vshrl.u32 %v5860_v39, 16  ;;  %v1306_v51 = vshll.u32 %v5860_v39, 16  ;;  %1064 = vst.msk [vmem:[#allocation2 + $0x78] sm:$0xf] %vm729_vm0, %v5292_v40  ;;  %v890_v52 = vmax.f32 %v858_v41, 0.0  ;;  %v5277_v54 = vpack.c.bf16 %v889_v42, %v889_v42 }
  0x3f   : > { %v1237_v55 = vor.u32 %v1236_v47, %v1233_v46  ;;  %v874_v56 = vmul.f32 %v6052_v14, %v836_v43  ;;  %v905_v49 = vmax.f32 %v873_v48, 0.0  ;;  %v5325_v57 = vunpack.c.h.bf16 %v6168_v53 }
  0x40   : > { %v1305_v33 = vrot.slane %v1303_v50, 3  ;;  %v1308_v4 = vrot.slane %v1306_v51, 4  ;;  %v5278_v60 = vpack.c.bf16 %v890_v52, %v890_v52  ;;  %1049 = vst.msk [vmem:[#allocation2 + $0x3c] sm:$0xf] %vm729_vm0, %v5277_v54  ;;  %v822_v61 = vsub.f32 %v5328_v15, %v6028_v3  ;;  %v5869_v50 = vld [vmem:[#allocation2 + $0x14] sm:$0xf8]  }
  0x41   : > { %v6232_v63 = vsel %vm1194_vm1, %v6186_v20, %v1237_v55  ;;  %v906_v1 = vmax.f32 %v874_v56, 0.0  ;;  %v5293_v6 = vpack.c.bf16 %v905_v49, %v905_v49  ;;  %v821_v8 = vsub.f32 %v5325_v57, %v6028_v3 }
  0x42   : > { %v5861_v0 = vld [vmem:[#allocation2 + $0x34] sm:$0xff]   ;;  %5537 = vmatmul.mubr.msk.bf16.gmra.mxu0 %vm1353_vm2, %v6232_v63  ;;  %v1309_v53 = vor.u32 %v1308_v4, %v1305_v33  ;;  %1050 = vst.msk [vmem:[#allocation2 + $0x40] sm:$0xf] %vm729_vm0, %v5278_v60  ;;  %v860_v9 = vmul.f32 %v6052_v14, %v822_v61  ;;  %v5357_v7 = vunpack.c.h.bf16 %v6200_v18  ;;  %v5360_v15 = vunpack.c.l.bf16 %v5376_v13 }
  0x43   : > { %v1240_v12 = vshrl.u32 %v5861_v0, 16  ;;  %v1243_v20 = vshll.u32 %v5861_v0, 16  ;;  %v5294_v16 = vpack.c.bf16 %v906_v1, %v906_v1  ;;  %1065 = vst.msk [vmem:[#allocation2 + $0x7c] sm:$0xf] %vm729_vm0, %v5293_v6  ;;  %v859_v2 = vmul.f32 %v6052_v14, %v821_v8 }
  0x44   : > { %v6243_v17 = vsel %vm1194_vm1, %v1300_v32, %v1309_v53  ;;  %v892_v19 = vmax.f32 %v860_v9, 0.0  ;;  %v837_v21 = vsub.f32 %v5357_v7, %v6028_v3  ;;  %v838_v22 = vsub.f32 %v5360_v15, %v6028_v3 }
  0x45   : > { %5553 = vmatmul.mubr.msk.bf16.gmra.mxu1 %vm1353_vm2, %v6243_v17  ;;  %v1242_v18 = vrot.slane %v1240_v12, 3  ;;  %v1245_v23 = vrot.slane %v1243_v20, 4  ;;  %v5862_v24 = vld [vmem:[#allocation2 + $0x74] sm:$0xff]   ;;  %1066 = vst.msk [vmem:[#allocation2 + $0x80] sm:$0xf] %vm729_vm0, %v5294_v16  ;;  %v891_v25 = vmax.f32 %v859_v2, 0.0  ;;  %v5361_v26 = vunpack.c.h.bf16 %v5376_v13 }
  0x46   : > { %v5280_v27 = vpack.c.bf16 %v892_v19, %v892_v19  ;;  %v875_v29 = vmul.f32 %v6052_v14, %v837_v21  ;;  %v876_v30 = vmul.f32 %v6052_v14, %v838_v22  ;;  %v1573_v31 = vshrl.u32 %v5868_v11, 16  ;;  %v5870_v13 = vld [vmem:[#allocation2 + $0x1c] sm:$0xff]   ;;  %v5872_v2 = vld [vmem:[#allocation2 + $0x24] sm:$0xff]  }
  0x47   : > { %v1246_v32 = vor.u32 %v1245_v23, %v1242_v18  ;;  %v1312_v35 = vshrl.u32 %v5862_v24, 16  ;;  %v1315_v37 = vshll.u32 %v5862_v24, 16  ;;  %v5279_v38 = vpack.c.bf16 %v891_v25, %v891_v25  ;;  %v5874_v25 = vld [vmem:[#allocation2 + $0x2c] sm:$0xff]  }
  0x48   : > { %1052 = vst.msk [vmem:[#allocation2 + $0x48] sm:$0xf] %vm729_vm0, %v5280_v27  ;;  %v907_v39 = vmax.f32 %v875_v29, 0.0  ;;  %v908_v40 = vmax.f32 %v876_v30, 0.0  ;;  %v839_v41 = vsub.f32 %v5361_v26, %v6028_v3  ;;  %v1576_v48 = vshll.u32 %v5868_v11, 16 }
  0x49   : > { %v6255_v42 = vsel %vm1194_vm1, %v1237_v55, %v1246_v32  ;;  %v1314_v43 = vrot.slane %v1312_v35, 3  ;;  %v1317_v46 = vrot.slane %v1315_v37, 4  ;;  %v5863_v47 = vld [vmem:[#allocation2 + $0x3c] sm:$0xff]   ;;  %1051 = vst.msk [vmem:[#allocation2 + $0x44] sm:$0xf] %vm729_vm0, %v5279_v38  ;;  %v1581_v56 = vshrl.u32 %v6116_v36, 16 }
  0x4a   : > { %5540 = vmatprep.mubr.msk.bf16.mxu0 %vm1353_vm2, %v6255_v42  ;;  %v5295_v51 = vpack.c.bf16 %v907_v39, %v907_v39  ;;  %v5296_v52 = vpack.c.bf16 %v908_v40, %v908_v40  ;;  %v877_v54 = vmul.f32 %v6052_v14, %v839_v41  ;;  %v1249_v49 = vshrl.u32 %v5863_v47, 16 }
  0x4b   : > { %v1318_v3 = vor.u32 %v1317_v46, %v1314_v43  ;;  %v1252_v55 = vshll.u32 %v5863_v47, 16  ;;  %v6262_v57 = vrot.slane %v1573_v31, 3  ;;  %v6266_v60 = vrot.slane %v1576_v48, 4 }
  0x4c   : > { %v5864_v33 = vld [vmem:[#allocation2 + $0x7c] sm:$0xff]   ;;  %1067 = vst.msk [vmem:[#allocation2 + $0x84] sm:$0xf] %vm729_vm0, %v5295_v51  ;;  %1068 = vst.msk [vmem:[#allocation2 + $0x88] sm:$0xf] %vm729_vm0, %v5296_v52  ;;  %v909_v4 = vmax.f32 %v877_v54, 0.0 }
  0x4d   : > { %v1584_v61 = vshll.u32 %v6116_v36, 16  ;;  %v6270_v14 = vsel %vm1194_vm1, %v1309_v53, %v1318_v3  ;;  %v1251_v0 = vrot.slane %v1249_v49, 3  ;;  %v1254_v1 = vrot.slane %v1252_v55, 4 }
  0x4e   : > { %v1583_v6 = vrot.slane %v1581_v56, 3  ;;  %5556 = vmatprep.mubr.msk.bf16.mxu1 %vm1353_vm2, %v6270_v14  ;;  %v1321_v8 = vshrl.u32 %v5864_v33, 16  ;;  %v1324_v9 = vshll.u32 %v5864_v33, 16  ;;  %v5297_v7 = vpack.c.bf16 %v909_v4, %v909_v4  ;;  %v5875_v56 = vld [vmem:[#allocation2 + $0x34] sm:$0xff]  }
  0x4f   : > { %v1586_v15 = vrot.slane %v1584_v61, 4  ;;  %v1255_v11 = vor.u32 %v1254_v1, %v1251_v0  ;;  %v1895_v12 = vshrl.u32 %v5869_v50, 16  ;;  %v1898_v20 = vshll.u32 %v5869_v50, 16  ;;  %v5876_v1 = vld [vmem:[#allocation2 + $0x3c] sm:$0xff]  }
  0x50   : > { %v1903_v16 = vshrl.u32 %v5870_v13, 16  ;;  %v1323_v19 = vrot.slane %v1321_v8, 3  ;;  %v1326_v36 = vrot.slane %v1324_v9, 4  ;;  %v5865_v21 = vld [vmem:[#allocation2 + $0x44] sm:$0xff]   ;;  %1069 = vst.msk [vmem:[#allocation2 + $0x8c] sm:$0xf] %vm729_vm0, %v5297_v7  ;;  %v1579_v7 = vor.u32 %v6266_v60, %v6262_v57 }
  0x51   : > { %v1906_v53 = vshll.u32 %v5870_v13, 16  ;;  %v6276_v22 = vsel %vm1194_vm1, %v1246_v32, %v1255_v11  ;;  %v1897_v18 = vrot.slane %v1895_v12, 3  ;;  %v1900_v23 = vrot.slane %v1898_v20, 4 }
  0x52   : > { %v1905_v24 = vrot.slane %v1903_v16, 3  ;;  %5541 = vmatmul.mubr.msk.bf16.gmra.mxu0 %vm1353_vm2, %v6276_v22  ;;  %v6280_v26 = vor.u32 %v1326_v36, %v1323_v19  ;;  %v1258_v27 = vshrl.u32 %v5865_v21, 16  ;;  %v1261_v29 = vshll.u32 %v5865_v21, 16 }
  0x53   : > { %v6282_v30 = vld [vmem:[#allocation2 + $0x84] sm:$0xf]  ;;  %v1106_v31 = vld [vmem:[#allocation2 + $0x88] sm:$0xf]  ;;  %v1901_v35 = vor.u32 %v1900_v23, %v1897_v18  ;;  %v1908_v37 = vrot.slane %v1906_v53, 4  ;;  %v1912_v38 = vshrl.u32 %v5872_v2, 16 }
  0x54   : > { %v6286_v32 = vsel %vm1194_vm1, %v1318_v3, %v6280_v26  ;;  %v1260_v39 = vrot.slane %v1258_v27, 3  ;;  %v1263_v40 = vrot.slane %v1261_v29, 4  ;;  %v5003_v41 = vcombine.low %v6282_v30, %v1106_v31  ;;  %v5877_v27 = vld [vmem:[#allocation2 + $0x44] sm:$0xff]  }
  0x55   : > { %5557 = vmatmul.mubr.msk.bf16.gmra.mxu1 %vm1353_vm2, %v6286_v32  ;;  %v1909_v43 = vor.u32 %v1908_v37, %v1905_v24  ;;  %v1914_v46 = vrot.slane %v1912_v38, 3  ;;  %v1915_v47 = vshll.u32 %v5872_v2, 16  ;;  %v1921_v48 = vshrl.u32 %v5874_v25, 16  ;;  %v5878_v37 = vld [vmem:[#allocation2 + $0x4c] sm:$0xff]  }
  0x56   : > { %v1264_v50 = vor.u32 %v1263_v40, %v1260_v39  ;;  %v1330_v51 = vshrl.u32 %v5003_v41, 16  ;;  %v1333_v52 = vshll.u32 %v5003_v41, 16  ;;  %v1924_v54 = vshll.u32 %v5874_v25, 16  ;;  %v6317_v38 = vld [vmem:[%s7435_s3 + $0x28] sm:$0xff]  }
  0x57   : > { %v5867_v49 = vld [vmem:[#allocation2 + $0x8c] ss:$0 sps:$4 sm:$0xff]   ;;  %v1910_v3 = vsel %vm1194_vm1, %v1901_v35, %v1909_v43  ;;  %v1917_v55 = vrot.slane %v1915_v47, 4  ;;  %v1923_v13 = vrot.slane %v1921_v48, 3  ;;  %v1930_v16 = vshrl.u32 %v5875_v56, 16 }
  0x58   : > { %v6293_v33 = vsel %vm1194_vm1, %v1255_v11, %v1264_v50  ;;  %v1332_v4 = vrot.slane %v1330_v51, 3  ;;  %v1335_v61 = vrot.slane %v1333_v52, 4  ;;  %v6297_v0 = vsel %vm1194_vm1, %v1264_v50, %v6127_v5  ;;  %v5879_v50 = vld [vmem:[#allocation2 + $0x54] sm:$0xff]  }
  0x59   : > { %5544 = vmatprep.mubr.msk.bf16.mxu0 %vm1353_vm2, %v6293_v33  ;;  %v1339_v8 = vshrl.u32 %v5867_v49, 16  ;;  %v1342_v9 = vshll.u32 %v5867_v49, 16  ;;  %v1926_v12 = vrot.slane %v1924_v54, 4  ;;  %v1587_v11 = vor.u32 %v1586_v15, %v1583_v6  ;;  %v6329_v51 = vld [vmem:[%s7435_s3 + $0x38] sm:$0xff]  }
  0x5a   : > { %v1336_v20 = vor.u32 %v1335_v61, %v1332_v4  ;;  %5545 = vmatmul.mubr.msk.bf16.gmra.mxu0 %vm1353_vm2, %v6297_v0  ;;  %v1933_v2 = vshll.u32 %v5875_v56, 16  ;;  %v1918_v36 = vor.u32 %v1917_v55, %v1914_v46  ;;  %v1939_v18 = vshrl.u32 %v5876_v1, 16 }
  0x5b   : > { %v1341_v19 = vrot.slane %v1339_v8, 3  ;;  %v1344_v5 = vrot.slane %v1342_v9, 4  ;;  %5600 = vmatprep.mubr.msk.bf16.mxu0 %vm1353_vm2, %v1910_v3  ;;  %v1927_v53 = vor.u32 %v1926_v12, %v1923_v13  ;;  %v1942_v60 = vshll.u32 %v5876_v1, 16 }
  0x5c   : > { %v1337_v21 = vsel %vm1194_vm1, %v6280_v26, %v1336_v20  ;;  %v1588_v23 = vsel %vm1194_vm1, %v1579_v7, %v1587_v11  ;;  %v1919_v15 = vsel %vm1194_vm1, %v1909_v43, %v1918_v36  ;;  %v1932_v24 = vrot.slane %v1930_v16, 3  ;;  %v5882_v16 = vld [vmem:[#allocation2 + $0x6c] sm:$0xff]  }
  0x5d   : > { %5560 = vmatprep.mubr.msk.bf16.mxu1 %vm1353_vm2, %v1337_v21  ;;  %v1345_v57 = vor.u32 %v1344_v5, %v1341_v19  ;;  %v1935_v25 = vrot.slane %v1933_v2, 4  ;;  %v1928_v29 = vsel %vm1194_vm1, %v1918_v36, %v1927_v53  ;;  %v1941_v31 = vrot.slane %v1939_v18, 3 }
  0x5e   : > { %v1944_v35 = vrot.slane %v1942_v60, 4  ;;  %v1948_v40 = vshrl.u32 %v5877_v27, 16  ;;  %v1951_v41 = vshll.u32 %v5877_v27, 16  ;;  %v1957_v46 = vshrl.u32 %v5878_v37, 16 }
  0x5f   : > { %v1346_v6 = vsel %vm1194_vm1, %v1336_v20, %v1345_v57  ;;  %v1936_v39 = vor.u32 %v1935_v25, %v1932_v24  ;;  %v1960_v47 = vshll.u32 %v5878_v37, 16  ;;  %v1589_v48 = vsel %vm1194_vm1, %v1587_v11, %v6125_v62  ;;  %v5880_v62 = vld [vmem:[#allocation2 + $0x5c] sm:$0xff]   ;;  %v5881_v20 = vld [vmem:[#allocation2 + $0x64] sm:$0xff]  }
  0x60   : > { %5561 = vmatmul.mubr.msk.bf16.gmra.mxu1 %vm1353_vm2, %v1346_v6  ;;  %v1945_v43 = vor.u32 %v1944_v35, %v1941_v31  ;;  %v1950_v52 = vrot.slane %v1948_v40, 3  ;;  %v1953_v54 = vrot.slane %v1951_v41, 4  ;;  %v5024_v56 = vcombine.low %v6282_v30, %v6282_v30  ;;  %v5884_v24 = vld [vmem:[#allocation2 + $0x7c] sm:$0xff]  }
  0x61   : > { %5566 = vmatprep.mubr.msk.bf16.mxu1 %vm1353_vm2, %v1588_v23  ;;  %v1959_v3 = vrot.slane %v1957_v46, 3  ;;  %v1962_v55 = vrot.slane %v1960_v47, 4  ;;  %v1966_v30 = vshrl.u32 %v5879_v50, 16  ;;  %v1969_v4 = vshll.u32 %v5879_v50, 16  ;;  %v5885_v46 = vld [vmem:[#allocation2 + $0x84] sm:$0xff]  }
  0x62   : > { %5601 = vmatmul.mubr.msk.bf16.vlgmr.msra.gmra.mxu0 %vm1353_vm2, %v1919_v15  ;;  %v1946_v49 = vsel %vm1194_vm1, %v1936_v39, %v1945_v43  ;;  %v1954_v13 = vor.u32 %v1953_v54, %v1950_v52  ;;  %v1591_v61 = vshrl.u32 %v5024_v56, 16  ;;  %v1975_v8 = vshrl.u32 %v5880_v62, 16  ;;  %v5883_v15 = vld [vmem:[#allocation2 + $0x74] sm:$0xff]   ;;  %v5886_v52 = vld [vmem:[#allocation2 + $0x8c] sm:$0xff]  }
  0x63   : > { %5667 = vmatpush3.bf16.msra.mxu0 %v6148_v34  ;;  %5604 = vmatprep.mubr.msk.bf16.mxu0 %vm1353_vm2, %v1928_v29  ;;  %v1937_v34 = vsel %vm1194_vm1, %v1927_v53, %v1936_v39  ;;  %v1963_v1 = vor.u32 %v1962_v55, %v1959_v3  ;;  %v1978_v9 = vshll.u32 %v5880_v62, 16  ;;  %v1594_v12 = vshll.u32 %v5024_v56, 16 }
  0x64   : > { %5734 = vmatprep.subr.bf16.mxu0 %v6317_v38  ;;  %v1593_v7 = vrot.slane %v1591_v61, 3  ;;  %v1968_v11 = vrot.slane %v1966_v30, 3  ;;  %v1977_v5 = vrot.slane %v1975_v8, 3  ;;  %v1984_v18 = vshrl.u32 %v5881_v20, 16 }
  0x65   : > { %v1596_v2 = vrot.slane %v1594_v12, 4  ;;  %v1964_v19 = vsel %vm1194_vm1, %v1954_v13, %v1963_v1  ;;  %v1980_v36 = vrot.slane %v1978_v9, 4  ;;  %v1987_v57 = vshll.u32 %v5881_v20, 16 }
  0x66   : > { %v1993_v23 = vshrl.u32 %v5882_v16, 16  ;;  %v1996_v6 = vshll.u32 %v5882_v16, 16  ;;  %v2002_v37 = vshrl.u32 %v5883_v15, 16  ;;  %v2005_v39 = vshll.u32 %v5883_v15, 16  ;;  %v5889_v16 = vld [vmem:[#allocation2 + $0x8] sm:$0xff]  }
  0x67   : > { %v1597_v21 = vor.u32 %v1596_v2, %v1593_v7  ;;  %v1989_v27 = vrot.slane %v1987_v57, 4  ;;  %v2011_v41 = vshrl.u32 %v5884_v24, 16  ;;  %v2020_v54 = vshrl.u32 %v5885_v46, 16  ;;  %v5891_v2 = vld [vmem:[#allocation2 + $0x18] sm:$0xff]   ;;  %v5908_v57 = vld [vmem:[#allocation2 + $0x10] sm:$0xff]  }
  0x68   : > { %5567 = vmatmul.mubr.msk.bf16.vlgmr.msra.gmra.mxu1 %vm1353_vm2, %v1589_v48  ;;  %v1995_v31 = vrot.slane %v1993_v23, 3  ;;  %v1998_v35 = vrot.slane %v1996_v6, 4  ;;  %v2004_v47 = vrot.slane %v2002_v37, 3  ;;  %v2007_v48 = vrot.slane %v2005_v39, 4  ;;  %v5903_v6 = vld [vmem:[#allocation2 + $0x70] sm:$0xff]  }
  0x69   : > { %5633 = vmatpush3.bf16.msra.mxu1 %v6175_v58  ;;  %5570 = vmatprep.mubr.msk.bf16.mxu1 %vm1353_vm2, %v6156_v44  ;;  %v1955_v58 = vsel %vm1194_vm1, %v1945_v43, %v1954_v13  ;;  %v1971_v44 = vrot.slane %v1969_v4, 4  ;;  %v6352_v60 = vsel %vm1194_vm1, %v6280_v26, %v1597_v21  ;;  %v2014_v43 = vshll.u32 %v5884_v24, 16  ;;  %v5887_v13 = vld [vmem:[#allocation2 + $0x94] ss:$0 sps:$4 sm:$0xff]  }
  0x6a   : > { %5605 = vmatmul.mubr.msk.bf16.gmra.mxu0 %vm1353_vm2, %v1937_v34  ;;  %5700 = vmatprep.subr.bf16.mxu1 %v6329_v51  ;;  %v1999_v40 = vor.u32 %v1998_v35, %v1995_v31  ;;  %v2013_v50 = vrot.slane %v2011_v41, 3  ;;  %v2023_v56 = vshll.u32 %v5885_v46, 16  ;;  %v2029_v55 = vshrl.u32 %v5886_v52, 16  ;;  %v5899_v21 = vld [vmem:[#allocation2 + $0x50] sm:$0xff]   ;;  %v5915_v35 = vld [vmem:[#allocation2 + $0x28] sm:$0xff]  }
  0x6b   : > { %5608 = vmatprep.mubr.msk.bf16.mxu0 %vm1353_vm2, %v1946_v49  ;;  %v1972_v53 = vor.u32 %v1971_v44, %v1968_v11  ;;  %v2016_v34 = vrot.slane %v2014_v43, 4  ;;  %v2008_v49 = vor.u32 %v2007_v48, %v2004_v47  ;;  %v2032_v62 = vshll.u32 %v5886_v52, 16  ;;  %v5906_v48 = vld [vmem:[#allocation2 + $0x88] sm:$0xff]   ;;  %v5907_v52 = vld [vmem:[#allocation2 + $0x18] sm:$0xff]  }
  0x6c   : > { %v2025_v30 = vrot.slane %v2023_v56, 4  ;;  %v2031_v61 = vrot.slane %v2029_v55, 3  ;;  %v2038_v8 = vshrl.u32 %v5887_v13, 16  ;;  %v2041_v9 = vshll.u32 %v5887_v13, 16 }
  0x6d   : > { %v1973_v25 = vsel %vm1194_vm1, %v1963_v1, %v1972_v53  ;;  %v2017_v3 = vor.u32 %v2016_v34, %v2013_v50  ;;  %v2009_v4 = vsel %vm1194_vm1, %v1999_v40, %v2008_v49  ;;  %v2034_v1 = vrot.slane %v2032_v62, 4  ;;  %v5919_v34 = vld [vmem:[#allocation2 + $0x38] sm:$0xff]  }
  0x6e   : > { %v2040_v20 = vrot.slane %v2038_v8, 3  ;;  %v3518_v23 = vshll.u32 %v5908_v57, 16  ;;  %v3516_v15 = vshrl.u32 %v5908_v57, 16  ;;  %v3539_v43 = vshll.u32 %v5915_v35, 16  ;;  %v5914_v8 = vld [vmem:[#allocation2 + $0x28] sm:$0xff]  }
  0x6f   : > { %v2035_v12 = vor.u32 %v2034_v1, %v2031_v61  ;;  %v3555_v62 = vshll.u32 %v5919_v34, 16  ;;  %v5923_v1 = vld [vmem:[#allocation2 + $0x48] sm:$0xff]  }
  0x70   : > { %5571 = vmatmul.mubr.msk.bf16.gmra.mxu1 %vm1353_vm2, %v6196_v10  ;;  %v1981_v10 = vor.u32 %v1980_v36, %v1977_v5  ;;  %v5896_v5 = vld [vmem:[#allocation2 + $0x38] sm:$0xff]   ;;  %v5898_v36 = vld [vmem:[#allocation2 + $0x48] sm:$0xff]   ;;  %v6433_v24 = vrot.slane %v3518_v23, 1  ;;  %v3541_v50 = vrot.slane %v3539_v43, 1 }
  0x71   : > { %5574 = vmatprep.mubr.msk.bf16.mxu1 %vm1353_vm2, %v6232_v63  ;;  %v1986_v63 = vrot.slane %v1984_v18, 3  ;;  %v5901_v18 = vld [vmem:[#allocation2 + $0x60] sm:$0xff]   ;;  %v3557_v61 = vrot.slane %v3555_v62, 1 }
  0x72   : > { %5609 = vmatmul.mubr.msk.bf16.gmra.mxu0 %vm1353_vm2, %v1955_v58  ;;  %v1982_v29 = vsel %vm1194_vm1, %v1972_v53, %v1981_v10  ;;  %v2043_v58 = vrot.slane %v2041_v9, 4  ;;  %v5900_v53 = vld [vmem:[#allocation2 + $0x58] sm:$0xff]  }
  0x73   : > { %5612 = vmatprep.mubr.msk.bf16.mxu0 %vm1353_vm2, %v1964_v19  ;;  %v1990_v26 = vor.u32 %v1989_v27, %v1986_v63  ;;  %v5894_v19 = vld [vmem:[#allocation2 + $0x28] sm:$0xff]   ;;  %v5904_v63 = vld [vmem:[#allocation2 + $0x78] sm:$0xff]   ;;  %v5912_v27 = vld [vmem:[#allocation2 + $0x20] sm:$0xff]  }
  0x74   : > { %v3531_v37 = vshll.u32 %v5912_v27, 16  ;;  %v3535_v41 = vshrl.u32 %v5912_v27, 16 }
  0x76   : > { %v3533_v46 = vrot.slane %v3531_v37, 1 }
  0x78   : > { %5575 = vmatmul.mubr.msk.bf16.gmra.mxu1 %vm1353_vm2, %v6255_v42  ;;  %v1991_v42 = vsel %vm1194_vm1, %v1981_v10, %v1990_v26  ;;  %v5909_v10 = vld [vmem:[#allocation2 + $0x18] sm:$0xff]  }
  0x79   : > { %5578 = vmatprep.mubr.msk.bf16.mxu1 %vm1353_vm2, %v6276_v22  ;;  %v2000_v22 = vsel %vm1194_vm1, %v1990_v26, %v1999_v40  ;;  %v5905_v26 = vld [vmem:[#allocation2 + $0x80] sm:$0xff]   ;;  %v3527_v39 = vshrl.u32 %v5909_v10, 16 }
  0x7a   : > { %5613 = vmatmul.mubr.msk.bf16.gmra.mxu0 %vm1353_vm2, %v1973_v25  ;;  %v3523_v25 = vshll.u32 %v5909_v10, 16 }
  0x7b   : > { %5616 = vmatprep.mubr.msk.bf16.mxu0 %vm1353_vm2, %v1982_v29  ;;  %v3521_v29 = vor.u32 %v6433_v24, %v3516_v15  ;;  %v5922_v15 = vld [vmem:[#allocation2 + $0x48] sm:$0xff]  }
  0x7c   : > { %v3525_v31 = vrot.slane %v3523_v25, 1 }
  0x7e   : > { %v6441_v40 = vsel %vm3514_vm3, %v3521_v29, %v3525_v31  ;;  %v3529_v47 = vor.u32 %v3527_v39, %v3525_v31 }
  0x80   : > { %5579 = vmatmul.mubr.msk.bf16.gmra.mxu1 %vm1353_vm2, %v6293_v33  ;;  %v2022_v33 = vrot.slane %v2020_v54, 3  ;;  %v6448_v56 = vsel %vm3514_vm3, %v3529_v47, %v3533_v46  ;;  %v5924_v47 = vld [vmem:[#allocation2 + $0x50] sm:$0xff]  }
  0x81   : > { %5582 = vmatprep.mubr.msk.bf16.mxu1 %vm1353_vm2, %v6297_v0  ;;  %v2018_v0 = vsel %vm1194_vm1, %v2008_v49, %v2017_v3  ;;  %v3543_v49 = vshrl.u32 %v5915_v35, 16 }
  0x82   : > { %5617 = vmatmul.mubr.msk.bf16.gmra.mxu0 %vm1353_vm2, %v1991_v42  ;;  %v2026_v7 = vor.u32 %v2025_v30, %v2022_v33  ;;  %v5917_v42 = vld [vmem:[#allocation2 + $0x30] sm:$0xff]   ;;  %v5921_v33 = vld [vmem:[#allocation2 + $0x40] sm:$0xff]  }
  0x83   : > { %5620 = vmatprep.mubr.msk.bf16.mxu0 %vm1353_vm2, %v2000_v22  ;;  %v3537_v22 = vor.u32 %v3535_v41, %v3533_v46  ;;  %v3547_v54 = vshll.u32 %v5917_v42, 16  ;;  %v3551_v55 = vshrl.u32 %v5917_v42, 16  ;;  %v3545_v30 = vor.u32 %v3543_v49, %v3541_v50  ;;  %v5933_v46 = vld [vmem:[#allocation2 + $0x70] sm:$0xff]  }
  0x84   : > { %v2027_v11 = vsel %vm1194_vm1, %v2017_v3, %v2026_v7  ;;  %v3563_v9 = vshll.u32 %v5921_v33, 16  ;;  %v3611_v49 = vshll.u32 %v5933_v46, 16 }
  0x85   : > { %v6452_v3 = vsel %vm3514_vm3, %v3537_v22, %v3541_v50  ;;  %v3549_v13 = vrot.slane %v3547_v54, 1  ;;  %v5935_v50 = vld [vmem:[#allocation2 + $0x78] sm:$0xff]  }
  0x88   : > { %5583 = vmatmul.mubr.msk.bf16.gmra.mxu1 %vm1353_vm2, %v6142_v28  ;;  %v2036_v28 = vsel %vm1194_vm1, %v2026_v7, %v2035_v12  ;;  %v6461_v7 = vsel %vm3514_vm3, %v3545_v30, %v3549_v13  ;;  %v3619_v30 = vshll.u32 %v5935_v50, 16 }
  0x89   : > { %5586 = vmatprep.mubr.msk.bf16.mxu1 %vm1353_vm2, %v6178_v59  ;;  %v2044_v59 = vor.u32 %v2043_v58, %v2040_v20  ;;  %v3567_v58 = vshrl.u32 %v5921_v33, 16  ;;  %v3615_v33 = vshrl.u32 %v5933_v46, 16 }
  0x8a   : > { %5621 = vmatmul.mubr.msk.bf16.gmra.mxu0 %vm1353_vm2, %v2009_v4  ;;  %v5911_v4 = vld [vmem:[#allocation2 + $0x20] sm:$0xff]  }
  0x8b   : > { %5624 = vmatprep.mubr.msk.bf16.mxu0 %vm1353_vm2, %v2018_v0  ;;  %v2045_v44 = vsel %vm1194_vm1, %v2035_v12, %v2044_v59  ;;  %v3553_v0 = vor.u32 %v3551_v55, %v3549_v13  ;;  %v3559_v12 = vshrl.u32 %v5919_v34, 16  ;;  %v5925_v59 = vld [vmem:[#allocation2 + $0x50] sm:$0xff]   ;;  %v5926_v34 = vld [vmem:[#allocation2 + $0x58] sm:$0xff]  }
  0x8d   : > { %v6465_v20 = vsel %vm3514_vm3, %v3553_v0, %v3557_v61 }
  0x90   : > { %5587 = vmatmul.mubr.msk.bf16.gmra.mxu1 %vm1353_vm2, %v6216_v45  ;;  %v5888_v45 = vld [vmem:[#allocation2 + $0x10] sm:$0xff]  }
  0x91   : > { %5590 = vmatprep.mubr.msk.bf16.mxu1 %vm1353_vm2, %v6243_v17  ;;  %v6398_v17 = vld [vmem:[%s7435_s3 + $0x40] sm:$0xff]  }
  0x92   : > { %5625 = vmatmul.mubr.msk.bf16.gmra.mxu0 %vm1353_vm2, %v2027_v11  ;;  %v3571_v11 = vshll.u32 %v5923_v1, 16 }
  0x93   : > { %5628 = vmatprep.mubr.msk.bf16.mxu0 %vm1353_vm2, %v2036_v28  ;;  %v3565_v28 = vrot.slane %v3563_v9, 1  ;;  %v5928_v9 = vld [vmem:[#allocation2 + $0x60] sm:$0xff]  }
  0x98   : > { %5591 = vmatmul.mubr.msk.bf16.gmra.mxu1 %vm1353_vm2, %v6270_v14  ;;  %v5893_v14 = vld [vmem:[#allocation2 + $0x20] sm:$0xff]  }
  0x99   : > { %5594 = vmatprep.mubr.msk.bf16.mxu1 %vm1353_vm2, %v6286_v32  ;;  %v6408_v32 = vld [vmem:[%s7435_s3 + $0x10] sm:$0xff]  }
  0x9a   : > { %5629 = vmatmul.mubr.msk.bf16.gmra.mxu0 %vm1353_vm2, %v2045_v44  ;;  %v3561_v44 = vor.u32 %v3559_v12, %v3557_v61  ;;  %v3613_v61 = vrot.slane %v3611_v49, 1 }
  0x9b   : > { %5668 = vmatprep.mubr.msk.bf16.mxu0 %vm1353_vm2, %v5889_v16  ;;  %v5916_v16 = vld [vmem:[#allocation2 + $0x30] sm:$0xff]  }
  0x9c   : > { %v3617_v12 = vor.u32 %v3615_v33, %v3613_v61  ;;  %v5945_v33 = vld [vmem:[#allocation2 + $0x28] sm:$0xff]  }
  0xa0   : > { %5595 = vmatmul.mubr.msk.bf16.gmra.mxu1 %vm1353_vm2, %v6352_v60  ;;  %v5902_v60 = vld [vmem:[#allocation2 + $0x68] sm:$0xff]  }
  0xa1   : > { %5634 = vmatprep.mubr.msk.bf16.mxu1 %vm1353_vm2, %v5888_v45 }
  0xa2   : > { %5669 = vmatmul.mubr.msk.bf16.vlgmr.msra.gmra.mxu0 %vm1353_vm2, %v5888_v45  ;;  %v3569_v45 = vor.u32 %v3567_v58, %v3565_v28  ;;  %v3621_v58 = vrot.slane %v3619_v30, 1 }
  0xa3   : > { %5735 = vmatpush3.bf16.msra.mxu0 %v6317_v38  ;;  %5672 = vmatprep.mubr.msk.bf16.mxu0 %vm1353_vm2, %v5891_v2  ;;  %v5895_v38 = vld [vmem:[#allocation2 + $0x30] sm:$0xff]  }
  0xa4   : > { %5802 = vmatprep.subr.bf16.mxu0 %v6398_v17 }
  0xa8   : > { %5635 = vmatmul.mubr.msk.bf16.vlgmr.msra.gmra.mxu1 %vm1353_vm2, %v5891_v2  ;;  %v5927_v2 = vld [vmem:[#allocation2 + $0x58] sm:$0xff]  }
  0xa9   : > { %5701 = vmatpush3.bf16.msra.mxu1 %v6329_v51  ;;  %5638 = vmatprep.mubr.msk.bf16.mxu1 %vm1353_vm2, %v5893_v14  ;;  %v5897_v51 = vld [vmem:[#allocation2 + $0x40] sm:$0xff]   ;;  %v3591_v31 = vshrl.u32 %v5927_v2, 16 }
  0xaa   : > { %5673 = vmatmul.mubr.msk.bf16.gmra.mxu0 %vm1353_vm2, %v5893_v14  ;;  %5768 = vmatprep.subr.bf16.mxu1 %v6408_v32  ;;  %v5918_v14 = vld [vmem:[#allocation2 + $0x38] sm:$0xff]  }
  0xab   : > { %5676 = vmatprep.mubr.msk.bf16.mxu0 %vm1353_vm2, %v5894_v19 }
  0xb0   : > { %5639 = vmatmul.mubr.msk.bf16.gmra.mxu1 %vm1353_vm2, %v5894_v19  ;;  %v3579_v19 = vshll.u32 %v5925_v59, 16 }
  0xb1   : > { %5642 = vmatprep.mubr.msk.bf16.mxu1 %vm1353_vm2, %v5895_v38 }
  0xb2   : > { %5677 = vmatmul.mubr.msk.bf16.gmra.mxu0 %vm1353_vm2, %v5895_v38  ;;  %v6474_v38 = vsel %vm3514_vm3, %v3561_v44, %v3565_v28  ;;  %v5930_v28 = vld [vmem:[#allocation2 + $0x68] sm:$0xff]  }
  0xb3   : > { %5680 = vmatprep.mubr.msk.bf16.mxu0 %vm1353_vm2, %v5896_v5 }
  0xb8   : > { %5643 = vmatmul.mubr.msk.bf16.gmra.mxu1 %vm1353_vm2, %v5896_v5 }
  0xb9   : > { %5646 = vmatprep.mubr.msk.bf16.mxu1 %vm1353_vm2, %v5897_v51 }
  0xba   : > { %5681 = vmatmul.mubr.msk.bf16.gmra.mxu0 %vm1353_vm2, %v5897_v51  ;;  %v3583_v51 = vshrl.u32 %v5925_v59, 16 }
  0xbb   : > { %5684 = vmatprep.mubr.msk.bf16.mxu0 %vm1353_vm2, %v5898_v36 }
  0xc0   : > { %5647 = vmatmul.mubr.msk.bf16.gmra.mxu1 %vm1353_vm2, %v5898_v36  ;;  %v3587_v36 = vshll.u32 %v5927_v2, 16  ;;  %v6536_v2 = vsel %vm3514_vm3, %v3617_v12, %v3621_v58 }
  0xc1   : > { %5650 = vmatprep.mubr.msk.bf16.mxu1 %vm1353_vm2, %v5899_v21  ;;  %7443 = vst [vmem:[#allocation4_spill] sm:$0xff] %v6536_v2 }
  0xc2   : > { %5685 = vmatmul.mubr.msk.bf16.gmra.mxu0 %vm1353_vm2, %v5899_v21  ;;  %v3581_v21 = vrot.slane %v3579_v19, 1  ;;  %v3589_v23 = vrot.slane %v3587_v36, 1 }
  0xc3   : > { %5688 = vmatprep.mubr.msk.bf16.mxu0 %vm1353_vm2, %v5900_v53 }
  0xc4   : > { %v3585_v10 = vor.u32 %v3583_v51, %v3581_v21  ;;  %v3593_v42 = vor.u32 %v3591_v31, %v3589_v23  ;;  %v5934_v31 = vld [vmem:[#allocation2 + $0x78] sm:$0xff]  }
  0xc6   : > { %v6496_v35 = vsel %vm3514_vm3, %v3585_v10, %v3589_v23 }
  0xc8   : > { %5651 = vmatmul.mubr.msk.bf16.gmra.mxu1 %vm1353_vm2, %v5900_v53 }
  0xc9   : > { %5654 = vmatprep.mubr.msk.bf16.mxu1 %vm1353_vm2, %v5901_v18 }
  0xca   : > { %5689 = vmatmul.mubr.msk.bf16.gmra.mxu0 %vm1353_vm2, %v5901_v18  ;;  %v5929_v18 = vld [vmem:[#allocation2 + $0x60] sm:$0xff]  }
  0xcb   : > { %5692 = vmatprep.mubr.msk.bf16.mxu0 %vm1353_vm2, %v5902_v60 }
  0xd0   : > { %5655 = vmatmul.mubr.msk.bf16.gmra.mxu1 %vm1353_vm2, %v5902_v60  ;;  %v5920_v60 = vld [vmem:[#allocation2 + $0x40] sm:$0xff]  }
  0xd1   : > { %5658 = vmatprep.mubr.msk.bf16.mxu1 %vm1353_vm2, %v5903_v6 }
  0xd2   : > { %5693 = vmatmul.mubr.msk.bf16.gmra.mxu0 %vm1353_vm2, %v5903_v6  ;;  %v5931_v6 = vld [vmem:[#allocation2 + $0x68] sm:$0xff]  }
  0xd3   : > { %5696 = vmatprep.mubr.msk.bf16.mxu0 %vm1353_vm2, %v5904_v63  ;;  %v3603_v37 = vshll.u32 %v5931_v6, 16  ;;  %v3607_v62 = vshrl.u32 %v5931_v6, 16  ;;  %v5944_v6 = vld [vmem:[#allocation2 + $0x20] sm:$0xff]  }
  0xd5   : > { %v3605_v22 = vrot.slane %v3603_v37, 1  ;;  %v5942_v37 = vld [vmem:[#allocation2 + $0x8] sm:$0xff]  }
  0xd8   : > { %5659 = vmatmul.mubr.msk.bf16.gmra.mxu1 %vm1353_vm2, %v5904_v63  ;;  %v3595_v63 = vshll.u32 %v5929_v18, 16 }
  0xd9   : > { %5662 = vmatprep.mubr.msk.bf16.mxu1 %vm1353_vm2, %v5905_v26 }
  0xda   : > { %5697 = vmatmul.mubr.msk.bf16.gmra.mxu0 %vm1353_vm2, %v5905_v26  ;;  %v3599_v26 = vshrl.u32 %v5929_v18, 16  ;;  %v3597_v41 = vrot.slane %v3595_v63, 1 }
  0xdb   : > { %5736 = vmatprep.mubr.msk.bf16.mxu0 %vm1353_vm2, %v6441_v40 }
  0xdc   : > { %v6512_v55 = vsel %vm3514_vm3, %v3593_v42, %v3597_v41 }
  0xe0   : > { %5663 = vmatmul.mubr.msk.bf16.gmra.mxu1 %vm1353_vm2, %v5906_v48  ;;  %v3601_v48 = vor.u32 %v3599_v26, %v3597_v41 }
  0xe1   : > { %5702 = vmatprep.mubr.msk.bf16.mxu1 %vm1353_vm2, %v5907_v52 }
  0xe2   : > { %5737 = vmatmul.mubr.msk.bf16.vlgmr.msra.gmra.mxu0 %vm1353_vm2, %v6448_v56  ;;  %v6516_v13 = vsel %vm3514_vm3, %v3601_v48, %v3605_v22 }
  0xe3   : > { %5803 = vmatpush3.bf16.msra.mxu0 %v6398_v17  ;;  %5740 = vmatprep.mubr.msk.bf16.mxu0 %vm1353_vm2, %v6452_v3  ;;  %v3573_v17 = vrot.slane %v3571_v11, 1  ;;  %v5939_v11 = vld [vmem:[#allocation2 + $0x88] sm:$0xff]  }
  0xe4   : > { %v3635_v19 = vshll.u32 %v5939_v11, 16  ;;  %v3639_v46 = vshrl.u32 %v5939_v11, 16 }
  0xe5   : > { %v6478_v5 = vsel %vm3514_vm3, %v3569_v45, %v3573_v17 }
  0xe6   : > { %v3637_v23 = vrot.slane %v3635_v19, 1  ;;  %v4191_v19 = vshll.u32 %v5945_v33, 16 }
  0xe8   : > { %5703 = vmatmul.mubr.msk.bf16.vlgmr.msra.gmra.mxu1 %vm1353_vm2, %v5911_v4  ;;  %v3641_v30 = vor.u32 %v3639_v46, %v3637_v23 }
  0xe9   : > { %5769 = vmatpush3.bf16.msra.mxu1 %v6408_v32  ;;  %5706 = vmatprep.mubr.msk.bf16.mxu1 %vm1353_vm2, %v5914_v8  ;;  %v3575_v32 = vshrl.u32 %v5923_v1, 16  ;;  %v5937_v1 = vld [vmem:[#allocation2 + $0x80] sm:$0xff]   ;;  %v3609_v8 = vor.u32 %v3607_v62, %v3605_v22  ;;  %v3873_v62 = vshll.u32 %v5942_v37, 16 }
  0xea   : > { %5741 = vmatmul.mubr.msk.bf16.gmra.mxu0 %vm1353_vm2, %v6461_v7 }
  0xeb   : > { %5744 = vmatprep.mubr.msk.bf16.mxu0 %vm1353_vm2, %v6465_v20  ;;  %v3577_v57 = vor.u32 %v3575_v32, %v3573_v17  ;;  %v6532_v45 = vsel %vm3514_vm3, %v3609_v8, %v3613_v61  ;;  %v3623_v17 = vshrl.u32 %v5935_v50, 16  ;;  %v5943_v32 = vld [vmem:[#allocation2 + $0x18] sm:$0xff]   ;;  %v4183_v50 = vshll.u32 %v5944_v6, 16 }
  0xec   : > { %v4176_v48 = vshrl.u32 %v5943_v32, 16 }
  0xed   : > { %v6492_v29 = vsel %vm3514_vm3, %v3577_v57, %v3581_v21  ;;  %v3625_v18 = vor.u32 %v3623_v17, %v3621_v58  ;;  %v5941_v57 = vld [vmem:[#allocation2 + $0x90] ss:$0 sps:$4 sm:$0x11]   ;;  %v4185_v12 = vrot.slane %v4183_v50, 1  ;;  %v3871_v17 = vshrl.u32 %v5942_v37, 16 }
  0xee   : > { %v3643_v42 = vshll.u32 %v5941_v57, 16  ;;  %v5946_v58 = vld [vmem:[#allocation2 + $0x30] sm:$0xff]  }
  0xef   : > { %v5940_v50 = vld [vmem:[#allocation2 + $0x90] sm:$0xff]  }
  0xf0   : > { %5707 = vmatmul.mubr.msk.bf16.gmra.mxu1 %vm1353_vm2, %v5916_v16  ;;  %v3627_v16 = vshll.u32 %v5937_v1, 16  ;;  %v3645_v61 = vrot.slane %v3643_v42, 1  ;;  %v248_v42 = vlaneseq }
  0xf1   : > { %5710 = vmatprep.mubr.msk.bf16.mxu1 %vm1353_vm2, %v5918_v14  ;;  %v3631_v14 = vshrl.u32 %v5937_v1, 16  ;;  %v5936_v1 = vld [vmem:[#allocation2 + $0x80] sm:$0xff]  }
  0xf2   : > { %5745 = vmatmul.mubr.msk.bf16.gmra.mxu0 %vm1353_vm2, %v6474_v38  ;;  %v6483_v53 = vpop.f32.mrf.mxu0  ;;  %v3629_v21 = vrot.slane %v3627_v16, 1 }
  0xf3   : > { %5748 = vmatprep.mubr.msk.bf16.mxu0 %vm1353_vm2, %v6478_v5 }
  0xf4   : > { %v6489_v27 = vpop.f32.mrf.mxu0  ;;  %v6547_v10 = vor.u32 %v3631_v14, %v3629_v21  ;;  %v6554_v41 = vsel %vm3514_vm3, %v3625_v18, %v3629_v21  ;;  %v3875_v14 = vrot.slane %v3873_v62, 1  ;;  %v3646_v21 = vsel %vm3514_vm3, %v3641_v30, %v3645_v61  ;;  %v5948_v61 = vld [vmem:[#allocation2 + $0x40] sm:$0xff]  }
  0xf5   : > { %v6487_v25 = vpop.f32.mrf.mxu1  ;;  %7445 = vst [vmem:[#allocation6_spill] sm:$0xff] %v6554_v41  ;;  %v4187_v18 = vshrl.u32 %v5944_v6, 16  ;;  %v5947_v6 = vld [vmem:[#allocation2 + $0x38] sm:$0xff]  }
  0xf6   : > { %v6503_v43 = vpop.f32.mrf.mxu0  ;;  %7444 = vst [vmem:[#allocation5_spill] sm:$0xff] %v6547_v10  ;;  %v3876_v46 = vor.u32 %v3875_v14, %v3871_v17  ;;  %v4207_v17 = vshll.u32 %v5947_v6, 16  ;;  %v4203_v14 = vshrl.u32 %v5946_v58, 16 }
  0xf7   : > { %v6499_v39 = vpop.f32.mrf.mxu1 }
  0xf8   : > { %5711 = vmatmul.mubr.msk.bf16.gmra.mxu1 %vm1353_vm2, %v5920_v60  ;;  %v6509_v54 = vpop.f32.mrf.mxu0  ;;  %v5932_v60 = vld [vmem:[#allocation2 + $0x70] sm:$0xff]  }
  0xf9   : > { %5714 = vmatprep.mubr.msk.bf16.mxu1 %vm1353_vm2, %v5922_v15  ;;  %v6507_v52 = vpop.f32.mrf.mxu1  ;;  %v4178_v15 = vshll.u32 %v5943_v32, 16 }
  0xfa   : > { %5749 = vmatmul.mubr.msk.bf16.gmra.mxu0 %vm1353_vm2, %v6492_v29 }
  0xfb   : > { %5752 = vmatprep.mubr.msk.bf16.mxu0 %vm1353_vm2, %v6496_v35  ;;  %v6519_v4 = vpop.f32.mrf.mxu1  ;;  %v4180_v22 = vrot.slane %v4178_v15, 1  ;;  %v4199_v15 = vshll.u32 %v5946_v58, 16  ;;  %v4209_v58 = vrot.slane %v4207_v17, 1 }
  0xfd   : > { %v4201_v30 = vrot.slane %v4199_v15, 1 }
 0x100   : > { %5715 = vmatmul.mubr.msk.bf16.gmra.mxu1 %vm1353_vm2, %v5924_v47  ;;  %v3638_v47 = vsel %vm3514_vm3, %v6547_v10, %v3637_v23  ;;  %v4195_v23 = vshrl.u32 %v5945_v33, 16  ;;  %v4219_v10 = vshrl.u32 %v5948_v61, 16 }
 0x101   : > { %5718 = vmatprep.mubr.msk.bf16.mxu1 %vm1353_vm2, %v5926_v34 }
 0x102   : > { %5753 = vmatmul.mubr.msk.bf16.gmra.mxu0 %vm1353_vm2, %v6512_v55  ;;  %v6523_v0 = vpop.f32.mrf.mxu0 }
 0x103   : > { %5756 = vmatprep.mubr.msk.bf16.mxu0 %vm1353_vm2, %v6516_v13 }
 0x104   : > { %v6529_v44 = vpop.f32.mrf.mxu0 }
 0x105   : > { %v6527_v59 = vpop.f32.mrf.mxu1 }
 0x106   : > { %v6543_v36 = vpop.f32.mrf.mxu0 }
 0x107   : > { %v6539_v51 = vpop.f32.mrf.mxu1 }
 0x108   : > { %5719 = vmatmul.mubr.msk.bf16.gmra.mxu1 %vm1353_vm2, %v5928_v9  ;;  %v6551_v26 = vpop.f32.mrf.mxu0  ;;  %v4181_v9 = vor.u32 %v4180_v22, %v4176_v48  ;;  %v4189_v48 = vor.u32 %v4187_v18, %v4185_v12 }
 0x109   : > { %5722 = vmatprep.mubr.msk.bf16.mxu1 %vm1353_vm2, %v5930_v28  ;;  %v6549_v63 = vpop.f32.mrf.mxu1  ;;  %v5938_v28 = vld [vmem:[#allocation2 + $0x88] sm:$0xff]  }
 0x10a   : > { %5757 = vmatmul.mubr.msk.bf16.gmra.mxu0 %vm1353_vm2, %v6532_v45 }
 0x10b   : > { %5760 = vmatprep.mubr.msk.bf16.mxu0 %vm1353_vm2, %v6536_v2  ;;  %v6559_v34 = vpop.f32.mrf.mxu1  ;;  %v6638_v2 = vld [vmem:[#allocation2 + $0x60] sm:$0xff]  }
 0x110   : > { %5723 = vmatmul.mubr.msk.bf16.gmra.mxu1 %vm1353_vm2, %v5932_v60  ;;  %v4186_v60 = vsel %vm3514_vm3, %v4181_v9, %v4185_v12  ;;  %v3877_v9 = vsel %vm3514_vm3, %v3876_v46, %v6433_v24 }
 0x111   : > { %5726 = vmatprep.mubr.msk.bf16.mxu1 %vm1353_vm2, %v5934_v31 }
 0x112   : > { %v6562_v49 = vpop.f32.mrf.mxu0  ;;  %5761 = vmatmul.mubr.msk.bf16.gmra.mxu0 %vm1353_vm2, %v6554_v41 }
 0x113   : > { %5764 = vmatprep.mubr.msk.bf16.mxu0 %vm1353_vm2, %v3638_v47  ;;  %v4193_v47 = vrot.slane %v4191_v19, 1 }
 0x114   : > { %v6567_v8 = vpop.f32.mrf.mxu0 }
 0x115   : > { %v6569_v11 = vpop.f32.mrf.mxu1  ;;  %v4197_v33 = vor.u32 %v4195_v23, %v4193_v47  ;;  %v4194_v12 = vsel %vm3514_vm3, %v4189_v48, %v4193_v47  ;;  %v4215_v23 = vshll.u32 %v5948_v61, 16  ;;  %v4205_v47 = vor.u32 %v4203_v14, %v4201_v30 }
 0x116   : > { %7446 = vst [vmem:[#allocation7_spill] sm:$0xff] %v6569_v11  ;;  %v6571_v16 = vpop.f32.mrf.mxu0 }
 0x117   : > { %v6573_v32 = vpop.f32.mrf.mxu1  ;;  %v4202_v18 = vsel %vm3514_vm3, %v4197_v33, %v4201_v30 }
 0x118   : > { %7447 = vst [vmem:[#allocation8_spill] sm:$0xff] %v6573_v32  ;;  %5727 = vmatmul.mubr.msk.bf16.gmra.mxu1 %vm1353_vm2, %v5936_v1  ;;  %v6577_v57 = vpop.f32.mrf.mxu0 }
 0x119   : > { %v6580_v31 = vpop.f32.mrf.mxu1  ;;  %5730 = vmatprep.mubr.msk.bf16.mxu1 %vm1353_vm2, %v5938_v28  ;;  %v6595_v28 = vshrl.u32 %v248_v42, 7  ;;  %v5949_v42 = vld [vmem:[#allocation2 + $0x48] sm:$0xff]  }
 0x11a   : > { %7448 = vst [vmem:[#allocation9_spill] sm:$0xff] %v6580_v31  ;;  %v6583_v37 = vpop.f32.mrf.mxu0  ;;  %5765 = vmatmul.mubr.msk.bf16.gmra.mxu0 %vm1353_vm2, %v3646_v21  ;;  %v4223_v31 = vshll.u32 %v5949_v42, 16 }
 0x11b   : > { %5804 = vmatprep.mubr.msk.bf16.mxu0 %vm1353_vm2, %v4186_v60  ;;  %v6587_v22 = vpop.f32.mrf.mxu1  ;;  %7450 = vst [vmem:[#allocation11_spill] sm:$0xff] %v6595_v28  ;;  %v4211_v60 = vshrl.u32 %v5947_v6, 16  ;;  %v251_v24 = vadd.s32 16, %v6595_v28  ;;  %v4217_v6 = vrot.slane %v4215_v23, 1  ;;  %v285_v30 = vand.u32 15, %v6595_v28 }
 0x11c   : > { %7449 = vst [vmem:[#allocation10_spill] sm:$0xff] %v6587_v22  ;;  %v6589_v62 = vpop.f32.mrf.mxu0 }
 0x11d   : > { %v4213_v33 = vor.u32 %v4211_v60, %v4209_v58  ;;  %v4227_v60 = vshrl.u32 %v5949_v42, 16  ;;  %v5951_v42 = vld [vmem:[#allocation2 + $0x58] sm:$0xff]   ;;  %vm6633_vm5 = vcmp.ne.s32.totalorder %v285_v30, 0 }
 0x11e   : > { %v6591_v1 = vpop.f32.mrf.mxu0  ;;  %v4239_v30 = vshll.u32 %v5951_v42, 16 }
 0x120   : > { %v6598_v19 = vpop.f32.mrf.mxu1  ;;  %5731 = vmatmul.mubr.msk.bf16.gmra.mxu1 %vm1353_vm2, %v5940_v50  ;;  %v6601_v21 = vpop.f32.mrf.mxu0 }
 0x121   : > { %7451 = vst [vmem:[#allocation12_spill] sm:$0xff] %v6598_v19  ;;  %5770 = vmatprep.mubr.msk.bf16.mxu1 %vm1353_vm2, %v3877_v9  ;;  %v6612_v19 = vld [vmem:[#allocation2 + $0x50] sm:$0xff]  }
 0x122   : > { %v6605_v15 = vpop.f32.mrf.mxu1  ;;  %v5602_v46 = vpop.f32.mrf.mxu0  ;;  %5805 = vmatmul.mubr.msk.bf16.vlgmr.msra.gmra.mxu0 %vm1353_vm2, %v4194_v12  ;;  %v4210_v12 = vsel %vm3514_vm3, %v4205_v47, %v4209_v58  ;;  %v4231_v23 = vshll.u32 %v6612_v19, 16  ;;  %v4221_v47 = vor.u32 %v4219_v10, %v4217_v6  ;;  %v4235_v61 = vshrl.u32 %v6612_v19, 16 }
 0x123   : > { %7452 = vst [vmem:[#allocation13_spill] sm:$0xff] %v6605_v15  ;;  %5808 = vmatprep.mubr.msk.bf16.mxu0 %vm1353_vm2, %v4202_v18  ;;  %v299_v15 = vand.u32 15, %v251_v24  ;;  %v4218_v18 = vsel %vm3514_vm3, %v4213_v33, %v4217_v6  ;;  %v4225_v33 = vrot.slane %v4223_v31, 1 }
 0x124   : > { %v6610_v48 = vpop.f32.mrf.mxu1  ;;  %v2134_v50 = vpop.f32.mrf.mxu0  ;;  %v4233_v11 = vrot.slane %v4231_v23, 1 }
 0x125   : > { %7453 = vst [vmem:[#allocation14_spill] sm:$0xff] %v6610_v48  ;;  %vm6625_vm4 = vcmp.ne.s32.totalorder %v299_v15, 0  ;;  %v253_v15 = vadd.s32 32, %v6595_v28  ;;  %v4229_v41 = vor.u32 %v4227_v60, %v4225_v33 }
 0x126   : > { %v6614_v9 = vpop.f32.mrf.mxu1  ;;  %v5603_v22 = vpop.f32.mrf.mxu0 }
 0x127   : > { %7454 = vst [vmem:[#allocation15_spill] sm:$0xff] %v6614_v9 }
 0x128   : > { %v5568_v17 = vpop.f32.mrf.mxu1  ;;  %5771 = vmatmul.mubr.msk.bf16.vlgmr.msra.gmra.mxu1 %vm1353_vm2, %v6441_v40  ;;  %v2137_v14 = vpop.f32.mrf.mxu0  ;;  %v255_v40 = vadd.s32 48, %v6595_v28 }
 0x129   : > { %v1657_v9 = vadd.f32 %v5568_v17, %v6483_v53  ;;  %5774 = vmatprep.mubr.msk.bf16.mxu1 %vm1353_vm2, %v6448_v56  ;;  %v4237_v56 = vor.u32 %v4235_v61, %v4233_v11 }
 0x12a   : > { %v1648_v24 = vpop.f32.mrf.mxu1  ;;  %v5606_v58 = vpop.f32.mrf.mxu0  ;;  %5809 = vmatmul.mubr.msk.bf16.gmra.mxu0 %vm1353_vm2, %v4210_v12  ;;  %v327_v6 = vand.u32 15, %v255_v40  ;;  %v4226_v12 = vsel %vm3514_vm3, %v4221_v47, %v4225_v33  ;;  %v4247_v40 = vshll.u32 %v6638_v2, 16  ;;  %v259_v47 = vadd.s32 80, %v6595_v28 }
 0x12b   : > { %v2263_v48 = vadd.f32 %v5602_v46, %v1657_v9  ;;  %v1649_v32 = vadd.f32 %v1648_v24, %v6489_v27  ;;  %5812 = vmatprep.mubr.msk.bf16.mxu0 %vm1353_vm2, %v4218_v18  ;;  %v4243_v24 = vshrl.u32 %v5951_v42, 16  ;;  %v5953_v42 = vld [vmem:[#allocation2 + $0x68] sm:$0xff]  }
 0x12c   : > { %v5569_v53 = vpop.f32.mrf.mxu1  ;;  %v2150_v17 = vpop.f32.mrf.mxu0  ;;  %vm6658_vm6 = vcmp.ne.s32.totalorder %v327_v6, 0 }
 0x12d   : > { %v2359_v10 = vsel %vm6625_vm4, %v2263_v48, 0.0  ;;  %v2261_v31 = vadd.f32 %v2134_v50, %v1649_v32  ;;  %v1660_v27 = vadd.f32 %v5569_v53, %v6503_v43  ;;  %v313_v43 = vand.u32 15, %v253_v15 }
 0x12e   : > { %2391 = vst.msk [vmem:[#allocation3 + $0x10] sm:$0xff] %vm1353_vm2, %v2359_v10  ;;  %v1651_v46 = vpop.f32.mrf.mxu1  ;;  %v5607_v9 = vpop.f32.mrf.mxu0  ;;  %v4234_v50 = vsel %vm3514_vm3, %v4229_v41, %v4233_v11  ;;  %v4241_v41 = vrot.slane %v4239_v30, 1  ;;  %v257_v15 = vadd.s32 64, %v6595_v28 }
 0x12f   : > { %v2357_v18 = vsel %vm6633_vm5, %v2261_v31, 0.0  ;;  %v2264_v60 = vadd.f32 %v5603_v22, %v1660_v27  ;;  %v1652_v23 = vadd.f32 %v1651_v46, %v6509_v54  ;;  %vm6667_vm7 = vcmp.ne.s32.totalorder %v313_v43, 0  ;;  %v6672_v46 = vld [vmem:[#allocation2 + $0x70] sm:$0xff]  }
 0x130   : > { %2389 = vst.msk [vmem:[#allocation3] sm:$0xff] %vm1353_vm2, %v2357_v18  ;;  %v5572_v32 = vpop.f32.mrf.mxu1  ;;  %5775 = vmatmul.mubr.msk.bf16.gmra.mxu1 %vm1353_vm2, %v6452_v3  ;;  %v2153_v48 = vpop.f32.mrf.mxu0  ;;  %v4245_v31 = vor.u32 %v4243_v24, %v4241_v41  ;;  %v4249_v27 = vrot.slane %v4247_v40, 1  ;;  %v4251_v18 = vshrl.u32 %v6638_v2, 16  ;;  %v4242_v43 = vsel %vm3514_vm3, %v4237_v56, %v4241_v41  ;;  %v5955_v41 = vld [vmem:[#allocation2 + $0x78] sm:$0xff]  }
 0x131   : > { %2392 = vst.msk [vmem:[#allocation3 + $0x18] sm:$0xff] %vm1353_vm2, %v2264_v60  ;;  %v2262_v22 = vadd.f32 %v2137_v14, %v1652_v23  ;;  %v1673_v54 = vadd.f32 %v5572_v32, %v6523_v0  ;;  %5778 = vmatprep.mubr.msk.bf16.mxu1 %vm1353_vm2, %v6461_v7  ;;  %v4255_v60 = vshll.u32 %v5953_v42, 16  ;;  %v4259_v2 = vshrl.u32 %v5953_v42, 16 }
 0x132   : > { %v1664_v3 = vpop.f32.mrf.mxu1  ;;  %v5610_v33 = vpop.f32.mrf.mxu0  ;;  %5813 = vmatmul.mubr.msk.bf16.gmra.mxu0 %vm1353_vm2, %v4226_v12  ;;  %v355_v12 = vand.u32 15, %v259_v47  ;;  %v4250_v24 = vsel %vm3514_vm3, %v4245_v31, %v4249_v27  ;;  %v4263_v40 = vshll.u32 %v6672_v46, 16 }
 0x133   : > { %2390 = vst.msk [vmem:[#allocation3 + $0x8] sm:$0xff] %vm1353_vm2, %v2262_v22  ;;  %v2267_v14 = vadd.f32 %v5606_v58, %v1673_v54  ;;  %v1665_v0 = vadd.f32 %v1664_v3, %v6529_v44  ;;  %5816 = vmatprep.mubr.msk.bf16.mxu0 %vm1353_vm2, %v4234_v50  ;;  %v263_v54 = vadd.s32 112, %v6595_v28  ;;  %v4253_v3 = vor.u32 %v4251_v18, %v4249_v27 }
 0x134   : > { %v5573_v53 = vpop.f32.mrf.mxu1  ;;  %v2166_v10 = vpop.f32.mrf.mxu0  ;;  %vm6692_vm8 = vcmp.ne.s32.totalorder %v355_v12, 0  ;;  %v4257_v47 = vrot.slane %v4255_v60, 1  ;;  %v4265_v7 = vrot.slane %v4263_v40, 1  ;;  %v4267_v60 = vshrl.u32 %v6672_v46, 16 }
 0x135   : > { %v2363_v58 = vsel %vm6658_vm6, %v2267_v14, 0.0  ;;  %v2265_v6 = vadd.f32 %v2150_v17, %v1665_v0  ;;  %v1676_v44 = vadd.f32 %v5573_v53, %v6543_v36  ;;  %v341_v36 = vand.u32 15, %v257_v15  ;;  %v6706_v53 = vld [vmem:[#allocation2 + $0x80] sm:$0xff]  }
 0x136   : > { %2395 = vst.msk [vmem:[#allocation3 + $0x30] sm:$0xff] %vm1353_vm2, %v2363_v58  ;;  %v1667_v11 = vpop.f32.mrf.mxu1  ;;  %v5611_v30 = vpop.f32.mrf.mxu0  ;;  %v261_v14 = vadd.s32 96, %v6595_v28  ;;  %v4261_v56 = vor.u32 %v4259_v2, %v4257_v47  ;;  %v383_v27 = vand.u32 15, %v263_v54  ;;  %v5957_v2 = vld [vmem:[#allocation2 + $0x88] sm:$0xff]   ;;  %v4269_v40 = vor.u32 %v4267_v60, %v4265_v7 }
 0x137   : > { %v2361_v23 = vsel %vm6667_vm7, %v2265_v6, 0.0  ;;  %v2268_v61 = vadd.f32 %v5607_v9, %v1676_v44  ;;  %v1668_v32 = vadd.f32 %v1667_v11, %v6551_v26  ;;  %vm6701_vm9 = vcmp.ne.s32.totalorder %v341_v36, 0 }
 0x138   : > { %2393 = vst.msk [vmem:[#allocation3 + $0x20] sm:$0xff] %vm1353_vm2, %v2361_v23  ;;  %v5576_v17 = vpop.f32.mrf.mxu1  ;;  %5779 = vmatmul.mubr.msk.bf16.gmra.mxu1 %vm1353_vm2, %v6465_v20  ;;  %v2169_v50 = vpop.f32.mrf.mxu0  ;;  %v4258_v6 = vsel %vm3514_vm3, %v4253_v3, %v4257_v47  ;;  %v4271_v44 = vshll.u32 %v5955_v41, 16  ;;  %vm6726_vm10 = vcmp.ne.s32.totalorder %v383_v27, 0  ;;  %v6740_v3 = vld [vmem:[#allocation2 + $0x90] sm:$0xff]  }
 0x139   : > { %2396 = vst.msk [vmem:[#allocation3 + $0x38] sm:$0xff] %vm1353_vm2, %v2268_v61  ;;  %v2266_v9 = vadd.f32 %v2153_v48, %v1668_v32  ;;  %v1689_v26 = vadd.f32 %v5576_v17, %v6562_v49  ;;  %5782 = vmatprep.mubr.msk.bf16.mxu1 %vm1353_vm2, %v6474_v38  ;;  %v4266_v61 = vsel %vm3514_vm3, %v4261_v56, %v4265_v7  ;;  %v4275_v32 = vshrl.u32 %v5955_v41, 16 }
 0x13a   : > { %v1680_v20 = vpop.f32.mrf.mxu1  ;;  %v5614_v19 = vpop.f32.mrf.mxu0  ;;  %5817 = vmatmul.mubr.msk.bf16.gmra.mxu0 %vm1353_vm2, %v4242_v43  ;;  %v4279_v43 = vshll.u32 %v6706_v53, 16  ;;  %v267_v17 = vadd.s32 144, %v6595_v28  ;;  %v4283_v38 = vshrl.u32 %v6706_v53, 16  ;;  %v4291_v53 = vshrl.u32 %v5957_v2, 16 }
 0x13b   : > { %2394 = vst.msk [vmem:[#allocation3 + $0x28] sm:$0xff] %vm1353_vm2, %v2266_v9  ;;  %v2271_v48 = vadd.f32 %v5610_v33, %v1689_v26  ;;  %v1681_v49 = vadd.f32 %v1680_v20, %v6567_v8  ;;  %5820 = vmatprep.mubr.msk.bf16.mxu0 %vm1353_vm2, %v4250_v24  ;;  %v4273_v24 = vrot.slane %v4271_v44, 1  ;;  %v265_v26 = vadd.s32 128, %v6595_v28 }
 0x13c   : > { %v5577_v42 = vpop.f32.mrf.mxu1  ;;  %v2182_v0 = vpop.f32.mrf.mxu0  ;;  %v4281_v54 = vrot.slane %v4279_v43, 1 }
 0x13d   : > { %v2367_v15 = vsel %vm6692_vm8, %v2271_v48, 0.0  ;;  %v2269_v33 = vadd.f32 %v2166_v10, %v1681_v49  ;;  %v1692_v8 = vadd.f32 %v5577_v42, %v6571_v16  ;;  %v369_v16 = vand.u32 15, %v261_v14 }
 0x13e   : > { %2399 = vst.msk [vmem:[#allocation3 + $0x50] sm:$0xff] %vm1353_vm2, %v2367_v15  ;;  %v1683_v31 = vpop.f32.mrf.mxu1  ;;  %v5615_v58 = vpop.f32.mrf.mxu0  ;;  %v4277_v20 = vor.u32 %v4275_v32, %v4273_v24  ;;  %v411_v48 = vand.u32 15, %v267_v17  ;;  %v4287_v42 = vshll.u32 %v5957_v2, 16  ;;  %v4274_v15 = vsel %vm3514_vm3, %v4269_v40, %v4273_v24 }
 0x13f   : > { %v2365_v11 = vsel %vm6701_vm9, %v2269_v33, 0.0  ;;  %v2272_v12 = vadd.f32 %v5611_v30, %v1692_v8  ;;  %v1684_v18 = vadd.f32 %v1683_v31, %v6577_v57  ;;  %vm6735_vm11 = vcmp.ne.s32.totalorder %v369_v16, 0 }
 0x140   : > { %2397 = vst.msk [vmem:[#allocation3 + $0x40] sm:$0xff] %vm1353_vm2, %v2365_v11  ;;  %v5580_v10 = vpop.f32.mrf.mxu1  ;;  %5783 = vmatmul.mubr.msk.bf16.gmra.mxu1 %vm1353_vm2, %v6478_v5  ;;  %v2185_v23 = vpop.f32.mrf.mxu0  ;;  %v4282_v8 = vsel %vm3514_vm3, %v4277_v20, %v4281_v54  ;;  %v4295_v31 = vshll.u32 %v6740_v3, 16  ;;  %vm6760_vm12 = vcmp.ne.s32.totalorder %v411_v48, 0  ;;  %v4285_v11 = vor.u32 %v4283_v38, %v4281_v54 }
 0x141   : > { %2400 = vst.msk [vmem:[#allocation3 + $0x58] sm:$0xff] %vm1353_vm2, %v2272_v12  ;;  %v2270_v30 = vadd.f32 %v2169_v50, %v1684_v18  ;;  %v1705_v57 = vadd.f32 %v5580_v10, %v6583_v37  ;;  %5786 = vmatprep.mubr.msk.bf16.mxu1 %vm1353_vm2, %v6492_v29  ;;  %v4289_v12 = vrot.slane %v4287_v42, 1  ;;  %v269_v16 = vadd.s32 160, %v6595_v28 }
 0x142   : > { %v1696_v5 = vpop.f32.mrf.mxu1  ;;  %v5618_v36 = vpop.f32.mrf.mxu0  ;;  %5821 = vmatmul.mubr.msk.bf16.gmra.mxu0 %vm1353_vm2, %v4258_v6  ;;  %v271_v6 = vadd.s32 176, %v6595_v28  ;;  %v4297_v32 = vrot.slane %v4295_v31, 1  ;;  %v273_v48 = vadd.s32 192, %v6595_v28  ;;  %v7479_v31 = vld [vmem:[#allocation4_spill] sm:$0xff] }
 0x143   : > { %2398 = vst.msk [vmem:[#allocation3 + $0x48] sm:$0xff] %vm1353_vm2, %v2270_v30  ;;  %v2275_v50 = vadd.f32 %v5614_v19, %v1705_v57  ;;  %v1697_v37 = vadd.f32 %v1696_v5, %v6589_v62  ;;  %5824 = vmatprep.mubr.msk.bf16.mxu0 %vm1353_vm2, %v4266_v61  ;;  %v4293_v61 = vor.u32 %v4291_v53, %v4289_v12 }
 0x144   : > { %v5581_v9 = vpop.f32.mrf.mxu1  ;;  %v2198_v22 = vpop.f32.mrf.mxu0  ;;  %v439_v46 = vand.u32 15, %v271_v6  ;;  %v4290_v17 = vsel %vm3514_vm3, %v4285_v11, %v4289_v12  ;;  %v7481_v6 = vld [vmem:[#allocation6_spill] sm:$0xff]  ;;  %v279_v12 = vadd.s32 240, %v6595_v28 }
 0x145   : > { %v2371_v19 = vsel %vm6726_vm10, %v2275_v50, 0.0  ;;  %v2273_v47 = vadd.f32 %v2182_v0, %v1697_v37  ;;  %v1708_v62 = vadd.f32 %v5581_v9, %v6591_v1  ;;  %v397_v1 = vand.u32 15, %v265_v26 }
 0x146   : > { %2403 = vst.msk [vmem:[#allocation3 + $0x70] sm:$0xff] %vm1353_vm2, %v2371_v19  ;;  %v1699_v41 = vpop.f32.mrf.mxu1  ;;  %v5619_v49 = vpop.f32.mrf.mxu0  ;;  %v4298_v9 = vsel %vm3514_vm3, %v4293_v61, %v4297_v32  ;;  %vm6791_vm14 = vcmp.ne.s32.totalorder %v439_v46, 0 }
 0x147   : > { %v2369_v14 = vsel %vm6735_vm11, %v2273_v47, 0.0  ;;  %v2276_v56 = vadd.f32 %v5615_v58, %v1708_v62  ;;  %v1700_v7 = vadd.f32 %v1699_v41, %v6601_v21  ;;  %vm6769_vm13 = vcmp.ne.s32.totalorder %v397_v1, 0  ;;  %v7480_v58 = vld [vmem:[#allocation7_spill] sm:$0xff]  ;;  %v7492_v62 = vld [vmem:[#allocation14_spill] sm:$0xff] }
 0x148   : > { %2401 = vst.msk [vmem:[#allocation3 + $0x60] sm:$0xff] %vm1353_vm2, %v2369_v14  ;;  %v5584_v0 = vpop.f32.mrf.mxu1  ;;  %5787 = vmatmul.mubr.msk.bf16.gmra.mxu1 %vm1353_vm2, %v6496_v35  ;;  %v2201_v33 = vpop.f32.mrf.mxu0 }
 0x149   : > { %2404 = vst.msk [vmem:[#allocation3 + $0x78] sm:$0xff] %vm1353_vm2, %v2276_v56  ;;  %v2274_v27 = vadd.f32 %v2185_v23, %v1700_v7  ;;  %v1721_v21 = vadd.f32 %v5584_v0, %v6487_v25  ;;  %5790 = vmatprep.mubr.msk.bf16.mxu1 %vm1353_vm2, %v6512_v55  ;;  %v5960_v55 = vld [vmem:[#allocation2 + $0x98] ss:$0 sps:$4 sm:$0x11]  }
 0x14a   : > { %v1712_v35 = vpop.f32.mrf.mxu1  ;;  %v5622_v44 = vpop.f32.mrf.mxu0  ;;  %5825 = vmatmul.mubr.msk.bf16.gmra.mxu0 %vm1353_vm2, %v4274_v15  ;;  %v4303_v37 = vshll.u32 %v5960_v55, 16  ;;  %v7484_v55 = vld [vmem:[#allocation8_spill] sm:$0xff] }
 0x14b   : > { %2402 = vst.msk [vmem:[#allocation3 + $0x68] sm:$0xff] %vm1353_vm2, %v2274_v27  ;;  %v2279_v18 = vadd.f32 %v5618_v36, %v1721_v21  ;;  %v1713_v25 = vadd.f32 %v1712_v35, %v6499_v39  ;;  %5828 = vmatprep.mubr.msk.bf16.mxu0 %vm1353_vm2, %v4282_v8  ;;  %v4299_v36 = vshrl.u32 %v6740_v3, 16 }
 0x14c   : > { %v5585_v10 = vpop.f32.mrf.mxu1  ;;  %v2214_v23 = vpop.f32.mrf.mxu0 }
 0x14d   : > { %v2375_v43 = vsel %vm6760_vm12, %v2279_v18, 0.0  ;;  %v2277_v30 = vadd.f32 %v2198_v22, %v1713_v25  ;;  %v1724_v57 = vadd.f32 %v5585_v10, %v6507_v52  ;;  %v425_v52 = vand.u32 15, %v269_v16 }
 0x14e   : > { %2407 = vst.msk [vmem:[#allocation3 + $0x90] sm:$0xff] %vm1353_vm2, %v2375_v43  ;;  %v1715_v39 = vpop.f32.mrf.mxu1  ;;  %v5623_v5 = vpop.f32.mrf.mxu0 }
 0x14f   : > { %v2373_v24 = vsel %vm6769_vm13, %v2277_v30, 0.0  ;;  %v2280_v2 = vadd.f32 %v5619_v49, %v1724_v57  ;;  %v1716_v50 = vadd.f32 %v1715_v39, %v6519_v4  ;;  %v5959_v4 = vld [vmem:[#allocation2 + $0x88] ss:$0 sps:$4 sm:$0x11]   ;;  %vm6800_vm15 = vcmp.ne.s32.totalorder %v425_v52, 0 }
 0x150   : > { %2405 = vst.msk [vmem:[#allocation3 + $0x80] sm:$0xff] %vm1353_vm2, %v2373_v24  ;;  %v5588_v40 = vpop.f32.mrf.mxu1  ;;  %5791 = vmatmul.mubr.msk.bf16.gmra.mxu1 %vm1353_vm2, %v6516_v13  ;;  %v2217_v29 = vpop.f32.mrf.mxu0  ;;  %v275_v13 = vadd.s32 208, %v6595_v28  ;;  %v3879_v56 = vshll.u32 %v5959_v4, 16  ;;  %v7487_v30 = vld [vmem:[#allocation9_spill] sm:$0xff] }
 0x151   : > { %2408 = vst.msk [vmem:[#allocation3 + $0x98] sm:$0xff] %vm1353_vm2, %v2280_v2  ;;  %v2278_v26 = vadd.f32 %v2201_v33, %v1716_v50  ;;  %v1737_v22 = vadd.f32 %v5588_v40, %v6527_v59  ;;  %5794 = vmatprep.mubr.msk.bf16.mxu1 %vm1353_vm2, %v6532_v45  ;;  %v4301_v59 = vor.u32 %v4299_v36, %v4297_v32  ;;  %v4305_v45 = vrot.slane %v4303_v37, 1  ;;  %v7488_v39 = vld [vmem:[#allocation5_spill] sm:$0xff]  ;;  %v7489_v50 = vld [vmem:[#allocation10_spill] sm:$0xff] }
 0x152   : > { %v1728_v54 = vpop.f32.mrf.mxu1  ;;  %v5626_v3 = vpop.f32.mrf.mxu0  ;;  %5829 = vmatmul.mubr.msk.bf16.gmra.mxu0 %vm1353_vm2, %v4290_v17  ;;  %v467_v7 = vand.u32 15, %v275_v13  ;;  %v495_v17 = vand.u32 15, %v279_v12  ;;  %v7491_v13 = vld [vmem:[#allocation13_spill] sm:$0xff] }
 0x153   : > { %2406 = vst.msk [vmem:[#allocation3 + $0x88] sm:$0xff] %vm1353_vm2, %v2278_v26  ;;  %v2283_v19 = vadd.f32 %v5622_v44, %v1737_v22  ;;  %v1729_v47 = vadd.f32 %v1728_v54, %v6539_v51  ;;  %5832 = vmatprep.mubr.msk.bf16.mxu0 %vm1353_vm2, %v4298_v9  ;;  %v4306_v8 = vsel %vm3514_vm3, %v4301_v59, %v4305_v45  ;;  %v3881_v44 = vrot.slane %v3879_v56, 1  ;;  %v7490_v26 = vld [vmem:[#allocation12_spill] sm:$0xff] }
 0x154   : > { %v5589_v41 = vpop.f32.mrf.mxu1  ;;  %v2230_v49 = vpop.f32.mrf.mxu0  ;;  %vm6820_vm0 = vcmp.ne.s32.totalorder %v467_v7, 0 }
 0x155   : > { %v2379_v38 = vsel %vm6791_vm14, %v2283_v19, 0.0  ;;  %v2281_v42 = vadd.f32 %v2214_v23, %v1729_v47  ;;  %v1740_v14 = vadd.f32 %v5589_v41, %v6549_v63  ;;  %v453_v63 = vand.u32 15, %v273_v48 }
 0x156   : > { %2411 = vst.msk [vmem:[#allocation3 + $0xb0] sm:$0xff] %vm1353_vm2, %v2379_v38  ;;  %v1731_v51 = vpop.f32.mrf.mxu1  ;;  %v5627_v15 = vpop.f32.mrf.mxu0  ;;  %v277_v23 = vadd.s32 224, %v6595_v28  ;;  %v3882_v46 = vsel %vm3514_vm3, %v7488_v39, %v3881_v44  ;;  %vm695_vm3 = vcmp.ne.s32.totalorder %v495_v17, 0 }
 0x157   : > { %v2377_v0 = vsel %vm6800_vm15, %v2281_v42, 0.0  ;;  %v2284_v1 = vadd.f32 %v5623_v5, %v1740_v14  ;;  %v1732_v33 = vadd.f32 %v1731_v51, %v6559_v34  ;;  %vm6828_vm1 = vcmp.ne.s32.totalorder %v453_v63, 0  ;;  %v7493_v14 = vld [vmem:[#allocation15_spill] sm:$0xff] }
 0x158   : > { %2409 = vst.msk [vmem:[#allocation3 + $0xa0] sm:$0xff] %vm1353_vm2, %v2377_v0  ;;  %v5592_v53 = vpop.f32.mrf.mxu1  ;;  %5795 = vmatmul.mubr.msk.bf16.gmra.mxu1 %vm1353_vm2, %v7479_v31  ;;  %v2233_v27 = vpop.f32.mrf.mxu0  ;;  %v481_v52 = vand.u32 15, %v277_v23 }
 0x159   : > { %2412 = vst.msk [vmem:[#allocation3 + $0xb8] sm:$0xff] %vm1353_vm2, %v2284_v1  ;;  %v2282_v21 = vadd.f32 %v2217_v29, %v1732_v33  ;;  %v1753_v35 = vadd.f32 %v5592_v53, %v7480_v58  ;;  %5798 = vmatprep.mubr.msk.bf16.mxu1 %vm1353_vm2, %v7481_v6 }
 0x15a   : > { %v1744_v11 = vpop.f32.mrf.mxu1  ;;  %v5630_v18 = vpop.f32.mrf.mxu0  ;;  %5833 = vmatmul.mubr.msk.bf16.gmra.mxu0 %vm1353_vm2, %v4306_v8  ;;  %vm693_vm4 = vcmp.ne.s32.totalorder %v481_v52, 0 }
 0x15b   : > { %2410 = vst.msk [vmem:[#allocation3 + $0xa8] sm:$0xff] %vm1353_vm2, %v2282_v21  ;;  %v2287_v25 = vadd.f32 %v5626_v3, %v1753_v35  ;;  %v1745_v60 = vadd.f32 %v1744_v11, %v7484_v55 }
 0x15c   : > { %v5593_v16 = vpop.f32.mrf.mxu1  ;;  %v2246_v61 = vpop.f32.mrf.mxu0 }
 0x15d   : > { %v2383_v32 = vsel %vm6820_vm0, %v2287_v25, 0.0  ;;  %v2285_v43 = vadd.f32 %v2230_v49, %v1745_v60  ;;  %v1756_v57 = vadd.f32 %v5593_v16, %v7487_v30 }
 0x15e   : > { %2415 = vst.msk [vmem:[#allocation3 + $0xd0] sm:$0xff] %vm1353_vm2, %v2383_v32  ;;  %v1747_v5 = vpop.f32.mrf.mxu1  ;;  %v5631_v36 = vpop.f32.mrf.mxu0 }
 0x15f   : > { %v2381_v24 = vsel %vm6828_vm1, %v2285_v43, 0.0  ;;  %v2288_v2 = vadd.f32 %v5627_v15, %v1756_v57  ;;  %v1748_v37 = vadd.f32 %v1747_v5, %v7489_v50 }
 0x160   : > { %2413 = vst.msk [vmem:[#allocation3 + $0xc0] sm:$0xff] %vm1353_vm2, %v2381_v24  ;;  %v5596_v40 = vpop.f32.mrf.mxu1  ;;  %5799 = vmatmul.mubr.msk.bf16.gmra.mxu1 %vm1353_vm2, %v3882_v46  ;;  %v2249_v29 = vpop.f32.mrf.mxu0 }
 0x161   : > { %2416 = vst.msk [vmem:[#allocation3 + $0xd8] sm:$0xff] %vm1353_vm2, %v2288_v2  ;;  %v2286_v9 = vadd.f32 %v2233_v27, %v1748_v37  ;;  %v1769_v22 = vadd.f32 %v5596_v40, %v7490_v26 }
 0x162   : > { %v1760_v4 = vpop.f32.mrf.mxu1  ;;  %v6846_v20 = vpop.f32.mrf.mxu0 }
 0x163   : > { %2414 = vst.msk [vmem:[#allocation3 + $0xc8] sm:$0xff] %vm1353_vm2, %v2286_v9  ;;  %v2291_v54 = vadd.f32 %v5630_v18, %v1769_v22  ;;  %v1761_v3 = vadd.f32 %v1760_v4, %v7491_v13 }
 0x164   : > { %v5597_v19 = vpop.f32.mrf.mxu1  ;;  %v6850_v47 = vpop.f32.mrf.mxu0 }
 0x165   : > { %v2387_v59 = vsel %vm695_vm3, %v2291_v54, 0.0  ;;  %v2289_v45 = vadd.f32 %v2246_v61, %v1761_v3  ;;  %v1772_v41 = vadd.f32 %v5597_v19, %v7492_v62 }
 0x166   : > { %2419 = vst.msk [vmem:[#allocation3 + $0xf0] sm:$0xff] %vm1353_vm2, %v2387_v59  ;;  %v1763_v48 = vpop.f32.mrf.mxu1  ;;  %v6854_v49 = vpop.f32.mrf.mxu0 }
 0x167   : > { %v2385_v38 = vsel %vm693_vm4, %v2289_v45, 0.0  ;;  %v2292_v42 = vadd.f32 %v5631_v36, %v1772_v41  ;;  %v1764_v56 = vadd.f32 %v1763_v48, %v7493_v14 }
 0x168   : > { %2417 = vst.msk [vmem:[#allocation3 + $0xe0] sm:$0xff] %vm1353_vm2, %v2385_v38  ;;  %v6858_v51 = vpop.f32.mrf.mxu1  ;;  %v6860_v7 = vpop.f32.mrf.mxu0 }
 0x169   : > { %2420 = vst.msk [vmem:[#allocation3 + $0xf8] sm:$0xff] %vm1353_vm2, %v2292_v42  ;;  %v2290_v15 = vadd.f32 %v2249_v29, %v1764_v56 }
 0x16a   : > { %v6863_v0 = vpop.f32.mrf.mxu1  ;;  %v6865_v1 = vpop.f32.mrf.mxu0 }
 0x16b   : > { %2418 = vst.msk [vmem:[#allocation3 + $0xe8] sm:$0xff] %vm1353_vm2, %v2290_v15 }
 0x16c   : > { %v6868_v33 = vpop.f32.mrf.mxu1  ;;  %v6870_v8 = vpop.f32.mrf.mxu0 }
 0x16e   : > { %v6872_v53 = vpop.f32.mrf.mxu1  ;;  %v6874_v31 = vpop.f32.mrf.mxu0 }
 0x170   : > { %v6876_v63 = vpop.f32.mrf.mxu1  ;;  %v6878_v27 = vpop.f32.mrf.mxu0 }
 0x172   : > { %v6880_v21 = vpop.f32.mrf.mxu1  ;;  %v6882_v58 = vpop.f32.mrf.mxu0 }
 0x174   : > { %v6884_v35 = vpop.f32.mrf.mxu1  ;;  %v6886_v6 = vpop.f32.mrf.mxu0 }
 0x176   : > { %v6888_v44 = vpop.f32.mrf.mxu1  ;;  %v6890_v34 = vpop.f32.mrf.mxu0 }
 0x178   : > { %v6892_v11 = vpop.f32.mrf.mxu1  ;;  %v6894_v12 = vpop.f32.mrf.mxu0 }
 0x17a   : > { %v6896_v18 = vpop.f32.mrf.mxu1  ;;  %v6898_v25 = vpop.f32.mrf.mxu0 }
 0x17c   : > { %v6900_v55 = vpop.f32.mrf.mxu1  ;;  %v6902_v60 = vpop.f32.mrf.mxu0 }
 0x17e   : > { %v6904_v10 = vpop.f32.mrf.mxu1  ;;  %v6906_v16 = vpop.f32.mrf.mxu0 }
 0x180   : > { %v6908_v23 = vpop.f32.mrf.mxu1  ;;  %v6910_v61 = vpop.f32.mrf.mxu0 }
 0x182   : > { %v6912_v32 = vpop.f32.mrf.mxu1  ;;  %v6914_v43 = vpop.f32.mrf.mxu0 }
 0x184   : > { %v6916_v30 = vpop.f32.mrf.mxu1  ;;  %v6918_v57 = vpop.f32.mrf.mxu0 }
 0x186   : > { %v6920_v39 = vpop.f32.mrf.mxu1  ;;  %v6922_v46 = vpop.f32.mrf.mxu0 }
 0x188   : > { %v6924_v5 = vpop.f32.mrf.mxu1  ;;  %v6926_v17 = vpop.f32.mrf.mxu0 }
 0x18a   : > { %v6928_v36 = vpop.f32.mrf.mxu1  ;;  %v6930_v24 = vpop.f32.mrf.mxu0 }
 0x18c   : > { %v6932_v2 = vpop.f32.mrf.mxu1  ;;  %v6934_v50 = vpop.f32.mrf.mxu0 }
 0x18e   : > { %v6936_v37 = vpop.f32.mrf.mxu1  ;;  %v6938_v40 = vpop.f32.mrf.mxu0 }
 0x190   : > { %v6940_v52 = vpop.f32.mrf.mxu1  ;;  %v6942_v29 = vpop.f32.mrf.mxu0 }
 0x192   : > { %v6944_v9 = vpop.f32.mrf.mxu1  ;;  %v6946_v26 = vpop.f32.mrf.mxu0 }
 0x194   : > { %v6948_v22 = vpop.f32.mrf.mxu1  ;;  %v6950_v4 = vpop.f32.mrf.mxu0 }
 0x195   : > { %7494 = vst [vmem:[#allocation4_spill] sm:$0xff] %v6950_v4 }
 0x196   : > { %v6952_v54 = vpop.f32.mrf.mxu1  ;;  %v6954_v13 = vpop.f32.mrf.mxu0 }
 0x197   : > { %7495 = vst [vmem:[#allocation7_spill] sm:$0xff] %v6954_v13 }
 0x198   : > { %v6956_v3 = vpop.f32.mrf.mxu1  ;;  %v6958_v19 = vpop.f32.mrf.mxu0 }
 0x199   : > { %7496 = vst [vmem:[#allocation6_spill] sm:$0xff] %v6958_v19 }
 0x19a   : > { %v6960_v59 = vpop.f32.mrf.mxu1  ;;  %v6962_v45 = vpop.f32.mrf.mxu0 }
 0x19b   : > { %7497 = vst [vmem:[#allocation8_spill] sm:$0xff] %v6960_v59  ;;  %7498 = vst [vmem:[#allocation9_spill] sm:$0xff] %v6962_v45 }
 0x19c   : > { %v6964_v62 = vpop.f32.mrf.mxu1  ;;  %v6966_v41 = vpop.f32.mrf.mxu0 }
 0x19d   : > { %7499 = vst [vmem:[#allocation5_spill] sm:$0xff] %v6964_v62  ;;  %7500 = vst [vmem:[#allocation10_spill] sm:$0xff] %v6966_v41  ;;  %v2813_v41 = vadd.f32 %v6846_v20, %v6858_v51  ;;  %v2808_v20 = vadd.f32 %v6860_v7, %v6872_v53  ;;  %v2821_v7 = vadd.f32 %v6870_v8, %v6880_v21 }
 0x19e   : > { %v6968_v48 = vpop.f32.mrf.mxu1  ;;  %v6970_v38 = vpop.f32.mrf.mxu0  ;;  %v2824_v8 = vadd.f32 %v6878_v27, %v6888_v44  ;;  %v2837_v27 = vadd.f32 %v6886_v6, %v6896_v18  ;;  %v2840_v6 = vadd.f32 %v6894_v12, %v6904_v10  ;;  %v2853_v12 = vadd.f32 %v6902_v60, %v6912_v32 }
 0x19f   : > { %7501 = vst [vmem:[#allocation12_spill] sm:$0xff] %v6968_v48  ;;  %7502 = vst [vmem:[#allocation13_spill] sm:$0xff] %v6970_v38  ;;  %v2856_v60 = vadd.f32 %v6910_v61, %v6920_v39  ;;  %v2869_v61 = vadd.f32 %v6918_v57, %v6928_v36  ;;  %v2872_v57 = vadd.f32 %v6926_v17, %v6936_v37 }
 0x1a0   : > { %v6972_v42 = vpop.f32.mrf.mxu1  ;;  %v6974_v14 = vpop.f32.mrf.mxu0  ;;  %v2885_v17 = vadd.f32 %v6934_v50, %v6944_v9  ;;  %v2888_v50 = vadd.f32 %v6942_v29, %v6952_v54  ;;  %v7512_v54 = vld [vmem:[#allocation4_spill] sm:$0xff] }
 0x1a1   : > { %7503 = vst [vmem:[#allocation14_spill] sm:$0xff] %v6972_v42  ;;  %7504 = vst [vmem:[#allocation15_spill] sm:$0xff] %v6974_v14  ;;  %v2805_v14 = vadd.f32 %v6850_v47, %v6863_v0  ;;  %v3295_v42 = vld [vmem:[#allocation3 + $0x10] sm:$0xff]  ;;  %v3296_v0 = vld [vmem:[#allocation3 + $0x18] sm:$0xff] }
 0x1a2   : > { %v6976_v56 = vpop.f32.mrf.mxu1  ;;  %v6978_v15 = vpop.f32.mrf.mxu0  ;;  %v7511_v29 = vld [vmem:[#allocation8_spill] sm:$0xff] }
 0x1a3   : > { %7505 = vst [vmem:[#allocation16_spill] sm:$0xff] %v6976_v56  ;;  %7506 = vst [vmem:[#allocation17_spill] sm:$0xff] %v6978_v15 }
 0x1a4   : > { %v6980_v28 = vpop.f32.mrf.mxu1  ;;  %v6982_v19 = vpop.f32.mrf.mxu0 }
 0x1a5   : > { %7507 = vst [vmem:[#allocation18_spill] sm:$0xff] %v6980_v28  ;;  %7508 = vst [vmem:[#allocation19_spill] sm:$0xff] %v6982_v19  ;;  %v2816_v19 = vadd.f32 %v6854_v49, %v6868_v33  ;;  %v2829_v49 = vadd.f32 %v6865_v1, %v6876_v63  ;;  %v2832_v1 = vadd.f32 %v6874_v31, %v6884_v35 }
 0x1a6   : > { %v6984_v45 = vpop.f32.mrf.mxu1  ;;  %v6986_v13 = vpop.f32.mrf.mxu0  ;;  %v2845_v31 = vadd.f32 %v6882_v58, %v6892_v11  ;;  %v2848_v58 = vadd.f32 %v6890_v34, %v6900_v55  ;;  %v2861_v34 = vadd.f32 %v6898_v25, %v6908_v23  ;;  %v2864_v25 = vadd.f32 %v6906_v16, %v6916_v30 }
 0x1a7   : > { %7509 = vst [vmem:[#allocation20_spill] sm:$0xff] %v6984_v45  ;;  %7510 = vst [vmem:[#allocation21_spill] sm:$0xff] %v6986_v13  ;;  %v3293_v13 = vld [vmem:[#allocation3] sm:$0xff]  ;;  %v2877_v16 = vadd.f32 %v6914_v43, %v6924_v5  ;;  %v2880_v43 = vadd.f32 %v6922_v46, %v6932_v2  ;;  %v2893_v46 = vadd.f32 %v6930_v24, %v6940_v52 }
 0x1a8   : > { %v5704_v38 = vpop.f32.mrf.mxu1  ;;  %v6990_v48 = vpop.f32.mrf.mxu0  ;;  %v2896_v24 = vadd.f32 %v6938_v40, %v6948_v22  ;;  %v2909_v40 = vadd.f32 %v6946_v26, %v6956_v3  ;;  %v7513_v26 = vld [vmem:[#allocation5_spill] sm:$0xff]  ;;  %v7514_v3 = vld [vmem:[#allocation7_spill] sm:$0xff] }
 0x1a9   : > { %v3263_v56 = vadd.f32 %v5704_v38, %v2813_v41 }
 0x1aa   : > { %v3134_v15 = vpop.f32.mrf.mxu1  ;;  %v6994_v62 = vpop.f32.mrf.mxu0 }
 0x1ab   : > { %v3327_v45 = vadd.f32 %v3295_v42, %v3263_v56  ;;  %v3261_v28 = vadd.f32 %v3134_v15, %v2805_v14  ;;  %v3294_v14 = vld [vmem:[#allocation3 + $0x8] sm:$0xff] }
 0x1ac   : > { %v5705_v4 = vpop.f32.mrf.mxu1  ;;  %v6998_v59 = vpop.f32.mrf.mxu0 }
 0x1ad   : > { %3359 = vst.msk [vmem:[#allocation3 + $0x10] sm:$0xff] %vm1353_vm2, %v3327_v45  ;;  %v3325_v47 = vadd.f32 %v3293_v13, %v3261_v28  ;;  %v3264_v51 = vadd.f32 %v5705_v4, %v2816_v19  ;;  %v3299_v4 = vld [vmem:[#allocation3 + $0x30] sm:$0xff] }
 0x1ae   : > { %v3137_v41 = vpop.f32.mrf.mxu1  ;;  %v7003_v38 = vpop.f32.mrf.mxu0 }
 0x1af   : > { %3357 = vst.msk [vmem:[#allocation3] sm:$0xff] %vm1353_vm2, %v3325_v47  ;;  %v3328_v33 = vadd.f32 %v3296_v0, %v3264_v51  ;;  %v3262_v42 = vadd.f32 %v3137_v41, %v2808_v20  ;;  %v3297_v20 = vld [vmem:[#allocation3 + $0x20] sm:$0xff]  ;;  %v3300_v41 = vld [vmem:[#allocation3 + $0x38] sm:$0xff] }
 0x1b0   : > { %v5708_v56 = vpop.f32.mrf.mxu1  ;;  %v7008_v15 = vpop.f32.mrf.mxu0 }
 0x1b1   : > { %3360 = vst.msk [vmem:[#allocation3 + $0x18] sm:$0xff] %vm1353_vm2, %v3328_v33  ;;  %v3326_v28 = vadd.f32 %v3294_v14, %v3262_v42  ;;  %v3267_v53 = vadd.f32 %v5708_v56, %v2829_v49  ;;  %v3298_v14 = vld [vmem:[#allocation3 + $0x28] sm:$0xff] }
 0x1b2   : > { %v3150_v13 = vpop.f32.mrf.mxu1  ;;  %v7013_v19 = vpop.f32.mrf.mxu0 }
 0x1b3   : > { %3358 = vst.msk [vmem:[#allocation3 + $0x8] sm:$0xff] %vm1353_vm2, %v3326_v28  ;;  %v3331_v63 = vadd.f32 %v3299_v4, %v3267_v53  ;;  %v3265_v45 = vadd.f32 %v3150_v13, %v2821_v7  ;;  %v3303_v53 = vld [vmem:[#allocation3 + $0x50] sm:$0xff] }
 0x1b4   : > { %v5709_v47 = vpop.f32.mrf.mxu1  ;;  %v7018_v51 = vpop.f32.mrf.mxu0 }
 0x1b5   : > { %3363 = vst.msk [vmem:[#allocation3 + $0x30] sm:$0xff] %vm1353_vm2, %v3331_v63  ;;  %v3329_v21 = vadd.f32 %v3297_v20, %v3265_v45  ;;  %v3268_v0 = vadd.f32 %v5709_v47, %v2832_v1  ;;  %v3301_v63 = vld [vmem:[#allocation3 + $0x40] sm:$0xff] }
 0x1b6   : > { %v3153_v49 = vpop.f32.mrf.mxu1  ;;  %v7023_v33 = vpop.f32.mrf.mxu0 }
 0x1b7   : > { %3361 = vst.msk [vmem:[#allocation3 + $0x20] sm:$0xff] %vm1353_vm2, %v3329_v21  ;;  %v3332_v35 = vadd.f32 %v3300_v41, %v3268_v0  ;;  %v3266_v42 = vadd.f32 %v3153_v49, %v2824_v8  ;;  %v3304_v8 = vld [vmem:[#allocation3 + $0x58] sm:$0xff]  ;;  %v3302_v49 = vld [vmem:[#allocation3 + $0x48] sm:$0xff] }
 0x1b8   : > { %v5712_v56 = vpop.f32.mrf.mxu1  ;;  %v7028_v7 = vpop.f32.mrf.mxu0 }
 0x1b9   : > { %3364 = vst.msk [vmem:[#allocation3 + $0x38] sm:$0xff] %vm1353_vm2, %v3332_v35  ;;  %v3330_v44 = vadd.f32 %v3298_v14, %v3266_v42  ;;  %v3271_v28 = vadd.f32 %v5712_v56, %v2845_v31  ;;  %v3307_v14 = vld [vmem:[#allocation3 + $0x70] sm:$0xff] }
 0x1ba   : > { %v3166_v4 = vpop.f32.mrf.mxu1  ;;  %v7033_v13 = vpop.f32.mrf.mxu0 }
 0x1bb   : > { %3362 = vst.msk [vmem:[#allocation3 + $0x28] sm:$0xff] %vm1353_vm2, %v3330_v44  ;;  %v3335_v11 = vadd.f32 %v3303_v53, %v3271_v28  ;;  %v3269_v1 = vadd.f32 %v3166_v4, %v2837_v27  ;;  %v3305_v28 = vld [vmem:[#allocation3 + $0x60] sm:$0xff] }
 0x1bc   : > { %v5713_v45 = vpop.f32.mrf.mxu1  ;;  %v7038_v20 = vpop.f32.mrf.mxu0 }
 0x1bd   : > { %3367 = vst.msk [vmem:[#allocation3 + $0x50] sm:$0xff] %vm1353_vm2, %v3335_v11  ;;  %v3333_v18 = vadd.f32 %v3301_v63, %v3269_v1  ;;  %v3272_v47 = vadd.f32 %v5713_v45, %v2848_v58  ;;  %v3308_v11 = vld [vmem:[#allocation3 + $0x78] sm:$0xff] }
 0x1be   : > { %v3169_v21 = vpop.f32.mrf.mxu1  ;;  %v7043_v0 = vpop.f32.mrf.mxu0 }
 0x1bf   : > { %3365 = vst.msk [vmem:[#allocation3 + $0x40] sm:$0xff] %vm1353_vm2, %v3333_v18  ;;  %v3336_v55 = vadd.f32 %v3304_v8, %v3272_v47  ;;  %v3270_v41 = vadd.f32 %v3169_v21, %v2840_v6  ;;  %v3306_v6 = vld [vmem:[#allocation3 + $0x68] sm:$0xff]  ;;  %v3311_v21 = vld [vmem:[#allocation3 + $0x90] sm:$0xff] }
 0x1c0   : > { %v5716_v31 = vpop.f32.mrf.mxu1  ;;  %v7048_v35 = vpop.f32.mrf.mxu0 }
 0x1c1   : > { %3368 = vst.msk [vmem:[#allocation3 + $0x58] sm:$0xff] %vm1353_vm2, %v3336_v55  ;;  %v3334_v10 = vadd.f32 %v3302_v49, %v3270_v41  ;;  %v3275_v42 = vadd.f32 %v5716_v31, %v2861_v34  ;;  %v3309_v49 = vld [vmem:[#allocation3 + $0x80] sm:$0xff] }
 0x1c2   : > { %v3182_v56 = vpop.f32.mrf.mxu1  ;;  %v7053_v27 = vpop.f32.mrf.mxu0 }
 0x1c3   : > { %3366 = vst.msk [vmem:[#allocation3 + $0x48] sm:$0xff] %vm1353_vm2, %v3334_v10  ;;  %v3339_v23 = vadd.f32 %v3307_v14, %v3275_v42  ;;  %v3273_v44 = vadd.f32 %v3182_v56, %v2853_v12  ;;  %v3312_v42 = vld [vmem:[#allocation3 + $0x98] sm:$0xff] }
 0x1c4   : > { %v5717_v53 = vpop.f32.mrf.mxu1  ;;  %v7058_v4 = vpop.f32.mrf.mxu0 }
 0x1c5   : > { %3371 = vst.msk [vmem:[#allocation3 + $0x70] sm:$0xff] %vm1353_vm2, %v3339_v23  ;;  %v3337_v32 = vadd.f32 %v3305_v28, %v3273_v44  ;;  %v3276_v58 = vadd.f32 %v5717_v53, %v2864_v25  ;;  %v3310_v23 = vld [vmem:[#allocation3 + $0x88] sm:$0xff] }
 0x1c6   : > { %v3185_v1 = vpop.f32.mrf.mxu1  ;;  %v7063_v63 = vpop.f32.mrf.mxu0 }
 0x1c7   : > { %3369 = vst.msk [vmem:[#allocation3 + $0x60] sm:$0xff] %vm1353_vm2, %v3337_v32  ;;  %v3340_v30 = vadd.f32 %v3308_v11, %v3276_v58  ;;  %v3274_v45 = vadd.f32 %v3185_v1, %v2856_v60  ;;  %v3315_v60 = vld [vmem:[#allocation3 + $0xb0] sm:$0xff]  ;;  %v3313_v1 = vld [vmem:[#allocation3 + $0xa0] sm:$0xff] }
 0x1c8   : > { %v5720_v18 = vpop.f32.mrf.mxu1  ;;  %v7068_v47 = vpop.f32.mrf.mxu0 }
 0x1c9   : > { %3372 = vst.msk [vmem:[#allocation3 + $0x78] sm:$0xff] %vm1353_vm2, %v3340_v30  ;;  %v3338_v39 = vadd.f32 %v3306_v6, %v3274_v45  ;;  %v3279_v8 = vadd.f32 %v5720_v18, %v2877_v16  ;;  %v3316_v6 = vld [vmem:[#allocation3 + $0xb8] sm:$0xff] }
 0x1ca   : > { %v3198_v34 = vpop.f32.mrf.mxu1  ;;  %v7073_v55 = vpop.f32.mrf.mxu0 }
 0x1cb   : > { %3370 = vst.msk [vmem:[#allocation3 + $0x68] sm:$0xff] %vm1353_vm2, %v3338_v39  ;;  %v3343_v5 = vadd.f32 %v3311_v21, %v3279_v8  ;;  %v3277_v41 = vadd.f32 %v3198_v34, %v2869_v61  ;;  %v3314_v8 = vld [vmem:[#allocation3 + $0xa8] sm:$0xff] }
 0x1cc   : > { %v5721_v31 = vpop.f32.mrf.mxu1  ;;  %v7078_v12 = vpop.f32.mrf.mxu0 }
 0x1cd   : > { %3375 = vst.msk [vmem:[#allocation3 + $0x90] sm:$0xff] %vm1353_vm2, %v3343_v5  ;;  %v3341_v36 = vadd.f32 %v3309_v49, %v3277_v41  ;;  %v3280_v10 = vadd.f32 %v5721_v31, %v2880_v43  ;;  %v2901_v43 = vadd.f32 %v7512_v54, %v7511_v29  ;;  %v3319_v49 = vld [vmem:[#allocation3 + $0xd0] sm:$0xff] }
 0x1ce   : > { %v3201_v14 = vpop.f32.mrf.mxu1  ;;  %v7083_v56 = vpop.f32.mrf.mxu0  ;;  %v7521_v54 = vld [vmem:[#allocation18_spill] sm:$0xff] }
 0x1cf   : > { %3373 = vst.msk [vmem:[#allocation3 + $0x80] sm:$0xff] %vm1353_vm2, %v3341_v36  ;;  %v3344_v2 = vadd.f32 %v3312_v42, %v3280_v10  ;;  %v3278_v25 = vadd.f32 %v3201_v14, %v2872_v57  ;;  %v2912_v36 = vadd.f32 %v7514_v3, %v7513_v26  ;;  %v3317_v14 = vld [vmem:[#allocation3 + $0xc0] sm:$0xff] }
 0x1d0   : > { %v5724_v44 = vpop.f32.mrf.mxu1  ;;  %v7088_v28 = vpop.f32.mrf.mxu0 }
 0x1d1   : > { %3376 = vst.msk [vmem:[#allocation3 + $0x98] sm:$0xff] %vm1353_vm2, %v3344_v2  ;;  %v3342_v37 = vadd.f32 %v3310_v23, %v3278_v25  ;;  %v3283_v53 = vadd.f32 %v5724_v44, %v2893_v46  ;;  %v7515_v25 = vld [vmem:[#allocation12_spill] sm:$0xff]  ;;  %v7516_v23 = vld [vmem:[#allocation6_spill] sm:$0xff] }
 0x1d2   : > { %v3214_v32 = vpop.f32.mrf.mxu1  ;;  %v7093_v58 = vpop.f32.mrf.mxu0  ;;  %v2904_v44 = vadd.f32 %v7516_v23, %v7515_v25  ;;  %v3324_v25 = vld [vmem:[#allocation3 + $0xf8] sm:$0xff] }
 0x1d3   : > { %3374 = vst.msk [vmem:[#allocation3 + $0x88] sm:$0xff] %vm1353_vm2, %v3342_v37  ;;  %v3347_v52 = vadd.f32 %v3315_v60, %v3283_v53  ;;  %v3281_v11 = vadd.f32 %v3214_v32, %v2885_v17  ;;  %v3320_v53 = vld [vmem:[#allocation3 + $0xd8] sm:$0xff] }
 0x1d4   : > { %v5725_v16 = vpop.f32.mrf.mxu1  ;;  %v7098_v30 = vpop.f32.mrf.mxu0 }
 0x1d5   : > { %3379 = vst.msk [vmem:[#allocation3 + $0xb0] sm:$0xff] %vm1353_vm2, %v3347_v52  ;;  %v3345_v9 = vadd.f32 %v3313_v1, %v3281_v11  ;;  %v3284_v45 = vadd.f32 %v5725_v16, %v2896_v24  ;;  %v7517_v24 = vld [vmem:[#allocation14_spill] sm:$0xff]  ;;  %v7518_v52 = vld [vmem:[#allocation9_spill] sm:$0xff] }
 0x1d6   : > { %v3217_v18 = vpop.f32.mrf.mxu1  ;;  %v7103_v61 = vpop.f32.mrf.mxu0  ;;  %v2925_v11 = vadd.f32 %v7518_v52, %v7517_v24  ;;  %v3322_v24 = vld [vmem:[#allocation3 + $0xe8] sm:$0xff] }
 0x1d7   : > { %3377 = vst.msk [vmem:[#allocation3 + $0xa0] sm:$0xff] %vm1353_vm2, %v3345_v9  ;;  %v3348_v22 = vadd.f32 %v3316_v6, %v3284_v45  ;;  %v3282_v39 = vadd.f32 %v3217_v18, %v2888_v50  ;;  %v3318_v50 = vld [vmem:[#allocation3 + $0xc8] sm:$0xff]  ;;  %v7519_v6 = vld [vmem:[#allocation16_spill] sm:$0xff]  ;;  %v7520_v18 = vld [vmem:[#allocation10_spill] sm:$0xff] }
 0x1d8   : > { %v5728_v21 = vpop.f32.mrf.mxu1  ;;  %v7108_v34 = vpop.f32.mrf.mxu0 }
 0x1d9   : > { %3380 = vst.msk [vmem:[#allocation3 + $0xb8] sm:$0xff] %vm1353_vm2, %v3348_v22  ;;  %v3346_v5 = vadd.f32 %v3314_v8, %v3282_v39  ;;  %v3287_v41 = vadd.f32 %v5728_v21, %v2909_v40  ;;  %v2917_v40 = vadd.f32 %v7520_v18, %v7519_v6  ;;  %v3323_v8 = vld [vmem:[#allocation3 + $0xf0] sm:$0xff] }
 0x1da   : > { %v3230_v31 = vpop.f32.mrf.mxu1  ;;  %v7113_v57 = vpop.f32.mrf.mxu0 }
 0x1db   : > { %3378 = vst.msk [vmem:[#allocation3 + $0xa8] sm:$0xff] %vm1353_vm2, %v3346_v5  ;;  %v3351_v10 = vadd.f32 %v3319_v49, %v3287_v41  ;;  %v3285_v42 = vadd.f32 %v3230_v31, %v2901_v43  ;;  %v7522_v43 = vld [vmem:[#allocation13_spill] sm:$0xff]  ;;  %v3321_v31 = vld [vmem:[#allocation3 + $0xe0] sm:$0xff] }
 0x1dc   : > { %v5729_v46 = vpop.f32.mrf.mxu1  ;;  %v7118_v2 = vpop.f32.mrf.mxu0  ;;  %v2928_v5 = vadd.f32 %v7522_v43, %v7521_v54 }
 0x1dd   : > { %3383 = vst.msk [vmem:[#allocation3 + $0xd0] sm:$0xff] %vm1353_vm2, %v3351_v10  ;;  %v3349_v17 = vadd.f32 %v3317_v14, %v3285_v42  ;;  %v3288_v37 = vadd.f32 %v5729_v46, %v2912_v36  ;;  %v7523_v36 = vld [vmem:[#allocation20_spill] sm:$0xff]  ;;  %v7524_v10 = vld [vmem:[#allocation15_spill] sm:$0xff] }
 0x1de   : > { %v3233_v60 = vpop.f32.mrf.mxu1  ;;  %v7123_v32 = vpop.f32.mrf.mxu0  ;;  %v2920_v42 = vadd.f32 %v7524_v10, %v7523_v36  ;;  %v4554_v36 = vld [vmem:[#allocation3] sm:$0xff] }
 0x1df   : > { %3381 = vst.msk [vmem:[#allocation3 + $0xc0] sm:$0xff] %vm1353_vm2, %v3349_v17  ;;  %v3352_v1 = vadd.f32 %v3320_v53, %v3288_v37  ;;  %v3286_v16 = vadd.f32 %v3233_v60, %v2904_v44  ;;  %v7525_v44 = vld [vmem:[#allocation11_spill] sm:$0xff] }
 0x1e0   : > { %v5732_v9 = vpop.f32.mrf.mxu1  ;;  %v7128_v45 = vpop.f32.mrf.mxu0  ;;  %v252_v17 = vadd.s32 24, %v7525_v44 }
 0x1e1   : > { %3384 = vst.msk [vmem:[#allocation3 + $0xd8] sm:$0xff] %vm1353_vm2, %v3352_v1  ;;  %v3350_v22 = vadd.f32 %v3318_v50, %v3286_v16  ;;  %v3291_v39 = vadd.f32 %v5732_v9, %v2925_v11  ;;  %v250_v11 = vadd.s32 8, %v7525_v44  ;;  %v7526_v50 = vld [vmem:[#allocation17_spill] sm:$0xff] }
 0x1e2   : > { %v3246_v21 = vpop.f32.mrf.mxu1  ;;  %v5806_v29 = vpop.f32.mrf.mxu0  ;;  %v306_v18 = vand.u32 15, %v252_v17 }
 0x1e3   : > { %3382 = vst.msk [vmem:[#allocation3 + $0xc8] sm:$0xff] %vm1353_vm2, %v3350_v22  ;;  %v3355_v41 = vadd.f32 %v3323_v8, %v3291_v39  ;;  %v3289_v49 = vadd.f32 %v3246_v21, %v2917_v40  ;;  %v7527_v39 = vld [vmem:[#allocation19_spill] sm:$0xff]  ;;  %v4556_v21 = vld [vmem:[#allocation3 + $0x10] sm:$0xff]  ;;  %v292_v43 = vand.u32 15, %v250_v11 }
 0x1e4   : > { %v5733_v26 = vpop.f32.mrf.mxu1  ;;  %v4395_v3 = vpop.f32.mrf.mxu0  ;;  %vm7148_vm5 = vcmp.ne.s32.totalorder %v306_v18, 15 }
 0x1e5   : > { %3387 = vst.msk [vmem:[#allocation3 + $0xf0] sm:$0xff] %vm1353_vm2, %v3355_v41  ;;  %v3353_v14 = vadd.f32 %v3321_v31, %v3289_v49  ;;  %v3292_v46 = vadd.f32 %v5733_v26, %v2928_v5  ;;  %v7528_v31 = vld [vmem:[#allocation21_spill] sm:$0xff]  ;;  %vm7155_vm6 = vcmp.ne.s32.totalorder %v292_v43, 15 }
 0x1e6   : > { %v3249_v23 = vpop.f32.mrf.mxu1  ;;  %v5807_v37 = vpop.f32.mrf.mxu0 }
 0x1e7   : > { %3385 = vst.msk [vmem:[#allocation3 + $0xe0] sm:$0xff] %vm1353_vm2, %v3353_v14  ;;  %v3356_v53 = vadd.f32 %v3324_v25, %v3292_v46  ;;  %v3290_v60 = vadd.f32 %v3249_v23, %v2920_v42 }
 0x1e8   : > { %v5772_v52 = vpop.f32.mrf.mxu1  ;;  %v4398_v1 = vpop.f32.mrf.mxu0 }
 0x1e9   : > { %3388 = vst.msk [vmem:[#allocation3 + $0xf8] sm:$0xff] %vm1353_vm2, %v3356_v53  ;;  %v3354_v16 = vadd.f32 %v3322_v24, %v3290_v60  ;;  %v3938_v9 = vadd.f32 %v5772_v52, %v7526_v50  ;;  %v254_v53 = vadd.s32 40, %v7525_v44 }
 0x1ea   : > { %v3929_v6 = vpop.f32.mrf.mxu1  ;;  %v5810_v40 = vpop.f32.mrf.mxu0 }
 0x1eb   : > { %3386 = vst.msk [vmem:[#allocation3 + $0xe8] sm:$0xff] %vm1353_vm2, %v3354_v16  ;;  %v4524_v22 = vadd.f32 %v5806_v29, %v3938_v9  ;;  %v3930_v8 = vadd.f32 %v3929_v6, %v7527_v39  ;;  %v256_v29 = vadd.s32 56, %v7525_v44  ;;  %v4555_v6 = vld [vmem:[#allocation3 + $0x8] sm:$0xff] }
 0x1ec   : > { %v5773_v54 = vpop.f32.mrf.mxu1  ;;  %v4411_v5 = vpop.f32.mrf.mxu0 }
 0x1ed   : > { %v4684_v41 = vadd.f32 %v4556_v21, %v4524_v22  ;;  %v4522_v49 = vadd.f32 %v4395_v3, %v3930_v8  ;;  %v3941_v26 = vadd.f32 %v5773_v54, %v7528_v31  ;;  %v334_v50 = vand.u32 15, %v256_v29  ;;  %v4780_v8 = vld [vmem:[%s7165_s26 + $0x10] sm:$0xff] }
 0x1ee   : > { %v3932_v42 = vpop.f32.mrf.mxu1  ;;  %v5811_v14 = vpop.f32.mrf.mxu0 }
 0x1ef   : > { %4716 = vst.msk [vmem:[#allocation3 + $0x10] sm:$0xff] %vm1353_vm2, %v4684_v41  ;;  %v4682_v46 = vadd.f32 %v4554_v36, %v4522_v49  ;;  %v4525_v25 = vadd.f32 %v5807_v37, %v3941_v26  ;;  %v3933_v23 = vadd.f32 %v3932_v42, %v6990_v48  ;;  %v4557_v37 = vld [vmem:[#allocation3 + $0x18] sm:$0xff]  ;;  %v4558_v26 = vld [vmem:[#allocation3 + $0x20] sm:$0xff]  ;;  %vm7186_vm7 = vcmp.ne.s32.totalorder %v334_v50, 15 }
 0x1f0   : > { %v5776_v17 = vpop.f32.mrf.mxu1  ;;  %v4414_v60 = vpop.f32.mrf.mxu0 }
 0x1f1   : > { %4714 = vst.msk [vmem:[#allocation3] sm:$0xff] %vm1353_vm2, %v4682_v46  ;;  %v4653_v48 = vsel %vm7148_vm5, %v4525_v25, 0.0  ;;  %v4523_v24 = vadd.f32 %v4398_v1, %v3933_v23  ;;  %v3954_v52 = vadd.f32 %v5776_v17, %v6994_v62  ;;  %v4560_v1 = vld [vmem:[#allocation3 + $0x30] sm:$0xff]  ;;  %v320_v62 = vand.u32 15, %v254_v53 }
 0x1f2   : > { %v4685_v11 = vadd.f32 %v4653_v48, %v4557_v37  ;;  %v3945_v16 = vpop.f32.mrf.mxu1  ;;  %v5814_v9 = vpop.f32.mrf.mxu0  ;;  %v258_v53 = vadd.s32 72, %v7525_v44 }
 0x1f3   : > { %v4651_v18 = vsel %vm7155_vm6, %v4523_v24, 0.0  ;;  %v4528_v22 = vadd.f32 %v5810_v40, %v3954_v52  ;;  %v3946_v39 = vadd.f32 %v3945_v16, %v6998_v59  ;;  %v4778_v59 = vld [vmem:[%s7165_s26] sm:$0xff]  ;;  %vm7193_vm8 = vcmp.ne.s32.totalorder %v320_v62, 15  ;;  %v4781_v24 = vld [vmem:[%s7165_s26 + $0x18] sm:$0xff]  ;;  %v4784_v62 = vld [vmem:[%s7165_s26 + $0x30] sm:$0xff] }
 0x1f4   : > { %4717 = vst.msk [vmem:[#allocation3 + $0x18] sm:$0xff] %vm1353_vm2, %v4685_v11  ;;  %v4683_v21 = vadd.f32 %v4651_v18, %v4555_v6  ;;  %v5777_v54 = vpop.f32.mrf.mxu1  ;;  %v4427_v43 = vpop.f32.mrf.mxu0 }
 0x1f5   : > { %v4688_v41 = vadd.f32 %v4560_v1, %v4528_v22  ;;  %v4526_v49 = vadd.f32 %v4411_v5, %v3946_v39  ;;  %v3957_v31 = vadd.f32 %v5777_v54, %v7003_v38  ;;  %v260_v38 = vadd.s32 88, %v7525_v44  ;;  %v4779_v39 = vld [vmem:[%s7165_s26 + $0x8] sm:$0xff] }
 0x1f6   : > { %v4748_v40 = vld [vmem:[#allocation3 + $0x10] sm:$0xff]  ;;  %4715 = vst.msk [vmem:[#allocation3 + $0x8] sm:$0xff] %vm1353_vm2, %v4683_v21  ;;  %v3948_v5 = vpop.f32.mrf.mxu1  ;;  %v5815_v10 = vpop.f32.mrf.mxu0 }
 0x1f7   : > { %v4812_v42 = vadd.f32 %v4780_v8, %v4748_v40  ;;  %4720 = vst.msk [vmem:[#allocation3 + $0x30] sm:$0xff] %vm1353_vm2, %v4688_v41  ;;  %v4686_v29 = vadd.f32 %v4558_v26, %v4526_v49  ;;  %v4529_v46 = vadd.f32 %v5811_v14, %v3957_v31  ;;  %v3949_v25 = vadd.f32 %v3948_v5, %v7008_v15  ;;  %v4561_v14 = vld [vmem:[#allocation3 + $0x38] sm:$0xff]  ;;  %v4559_v8 = vld [vmem:[#allocation3 + $0x28] sm:$0xff]  ;;  %v4564_v41 = vld [vmem:[#allocation3 + $0x50] sm:$0xff] }
 0x1f8   : > { %v4746_v23 = vld [vmem:[#allocation3] sm:$0xff]  ;;  %v5780_v17 = vpop.f32.mrf.mxu1  ;;  %v4430_v37 = vpop.f32.mrf.mxu0  ;;  %v362_v6 = vand.u32 15, %v260_v38  ;;  %v348_v31 = vand.u32 15, %v258_v53 }
 0x1f9   : > { %4844 = vst.msk [vmem:[%s7182_s29 + $0x10] sm:$0xff] %vm1353_vm2, %v4812_v42  ;;  %v4810_v48 = vadd.f32 %v4778_v59, %v4746_v23  ;;  %4718 = vst.msk [vmem:[#allocation3 + $0x20] sm:$0xff] %vm1353_vm2, %v4686_v29  ;;  %v4657_v15 = vsel %vm7186_vm7, %v4529_v46, 0.0  ;;  %v4527_v52 = vadd.f32 %v4414_v60, %v3949_v25  ;;  %v3970_v11 = vadd.f32 %v5780_v17, %v7013_v19  ;;  %v4782_v38 = vld [vmem:[%s7165_s26 + $0x20] sm:$0xff] }
 0x1fa   : > { %v4689_v16 = vadd.f32 %v4657_v15, %v4561_v14  ;;  %v3961_v50 = vpop.f32.mrf.mxu1  ;;  %v5818_v18 = vpop.f32.mrf.mxu0  ;;  %v4562_v42 = vld [vmem:[#allocation3 + $0x40] sm:$0xff]  ;;  %vm7218_vm9 = vcmp.ne.s32.totalorder %v362_v6, 15  ;;  %vm7227_vm10 = vcmp.ne.s32.totalorder %v348_v31, 15  ;;  %v262_v14 = vadd.s32 104, %v7525_v44 }
 0x1fb   : > { %4842 = vst.msk [vmem:[%s7182_s29] sm:$0xff] %vm1353_vm2, %v4810_v48  ;;  %v4749_v22 = vld [vmem:[#allocation3 + $0x18] sm:$0xff]  ;;  %v4655_v21 = vsel %vm7193_vm8, %v4527_v52, 0.0  ;;  %v4532_v1 = vadd.f32 %v5814_v9, %v3970_v11  ;;  %v3962_v54 = vadd.f32 %v3961_v50, %v7018_v51 }
 0x1fc   : > { %v4813_v60 = vadd.f32 %v4781_v24, %v4749_v22  ;;  %4721 = vst.msk [vmem:[#allocation3 + $0x38] sm:$0xff] %vm1353_vm2, %v4689_v16  ;;  %v4687_v19 = vadd.f32 %v4655_v21, %v4559_v8  ;;  %v5781_v49 = vpop.f32.mrf.mxu1  ;;  %v4443_v40 = vpop.f32.mrf.mxu0  ;;  %v4785_v11 = vld [vmem:[%s7165_s26 + $0x38] sm:$0xff] }
 0x1fd   : > { %v4747_v59 = vld [vmem:[#allocation3 + $0x8] sm:$0xff]  ;;  %v4692_v26 = vadd.f32 %v4564_v41, %v4532_v1  ;;  %v4530_v36 = vadd.f32 %v4427_v43, %v3962_v54  ;;  %v3973_v5 = vadd.f32 %v5781_v49, %v7023_v33  ;;  %v264_v43 = vadd.s32 120, %v7525_v44  ;;  %v4788_v41 = vld [vmem:[%s7165_s26 + $0x50] sm:$0xff] }
 0x1fe   : > { %4845 = vst.msk [vmem:[%s7182_s29 + $0x18] sm:$0xff] %vm1353_vm2, %v4813_v60  ;;  %v4811_v9 = vadd.f32 %v4779_v39, %v4747_v59  ;;  %v4752_v51 = vld [vmem:[#allocation3 + $0x30] sm:$0xff]  ;;  %4719 = vst.msk [vmem:[#allocation3 + $0x28] sm:$0xff] %vm1353_vm2, %v4687_v19  ;;  %v3964_v46 = vpop.f32.mrf.mxu1  ;;  %v5819_v25 = vpop.f32.mrf.mxu0  ;;  %v4783_v1 = vld [vmem:[%s7165_s26 + $0x28] sm:$0xff]  ;;  %v376_v59 = vand.u32 15, %v262_v14 }
 0x1ff   : > { %v4816_v33 = vadd.f32 %v4784_v62, %v4752_v51  ;;  %4724 = vst.msk [vmem:[#allocation3 + $0x50] sm:$0xff] %vm1353_vm2, %v4692_v26  ;;  %v4690_v23 = vadd.f32 %v4562_v42, %v4530_v36  ;;  %v4533_v3 = vadd.f32 %v5815_v10, %v3973_v5  ;;  %v3965_v17 = vadd.f32 %v3964_v46, %v7028_v7  ;;  %v4565_v7 = vld [vmem:[#allocation3 + $0x58] sm:$0xff]  ;;  %v4563_v54 = vld [vmem:[#allocation3 + $0x48] sm:$0xff]  ;;  %v4568_v49 = vld [vmem:[#allocation3 + $0x70] sm:$0xff] }
 0x200   : > { %4843 = vst.msk [vmem:[%s7182_s29 + $0x8] sm:$0xff] %vm1353_vm2, %v4811_v9  ;;  %v4750_v53 = vld [vmem:[#allocation3 + $0x20] sm:$0xff]  ;;  %v5784_v24 = vpop.f32.mrf.mxu1  ;;  %v4446_v15 = vpop.f32.mrf.mxu0  ;;  %v390_v39 = vand.u32 15, %v264_v43  ;;  %vm7261_vm12 = vcmp.ne.s32.totalorder %v376_v59, 15 }
 0x201   : > { %4848 = vst.msk [vmem:[%s7182_s29 + $0x30] sm:$0xff] %vm1353_vm2, %v4816_v33  ;;  %v4814_v52 = vadd.f32 %v4782_v38, %v4750_v53  ;;  %4722 = vst.msk [vmem:[#allocation3 + $0x40] sm:$0xff] %vm1353_vm2, %v4690_v23  ;;  %v4661_v10 = vsel %vm7218_vm9, %v4533_v3, 0.0  ;;  %v4531_v16 = vadd.f32 %v4430_v37, %v3965_v17  ;;  %v3986_v50 = vadd.f32 %v5784_v24, %v7033_v13  ;;  %v4786_v38 = vld [vmem:[%s7165_s26 + $0x40] sm:$0xff]  ;;  %v4793_v53 = vld [vmem:[%s7165_s26 + $0x78] sm:$0xff] }
 0x202   : > { %v4693_v6 = vadd.f32 %v4661_v10, %v4565_v7  ;;  %v3977_v22 = vpop.f32.mrf.mxu1  ;;  %v5822_v8 = vpop.f32.mrf.mxu0  ;;  %v4566_v42 = vld [vmem:[#allocation3 + $0x60] sm:$0xff]  ;;  %vm7252_vm11 = vcmp.ne.s32.totalorder %v390_v39, 15  ;;  %v266_v24 = vadd.s32 136, %v7525_v44 }
 0x203   : > { %4846 = vst.msk [vmem:[%s7182_s29 + $0x20] sm:$0xff] %vm1353_vm2, %v4814_v52  ;;  %v4753_v21 = vld [vmem:[#allocation3 + $0x38] sm:$0xff]  ;;  %v4659_v60 = vsel %vm7227_vm10, %v4531_v16, 0.0  ;;  %v4536_v62 = vadd.f32 %v5818_v18, %v3986_v50  ;;  %v3978_v19 = vadd.f32 %v3977_v22, %v7038_v20 }
 0x204   : > { %v4817_v37 = vadd.f32 %v4785_v11, %v4753_v21  ;;  %4725 = vst.msk [vmem:[#allocation3 + $0x58] sm:$0xff] %vm1353_vm2, %v4693_v6  ;;  %v4691_v13 = vadd.f32 %v4659_v60, %v4563_v54  ;;  %v5785_v31 = vpop.f32.mrf.mxu1  ;;  %v4459_v26 = vpop.f32.mrf.mxu0  ;;  %v4789_v11 = vld [vmem:[%s7165_s26 + $0x58] sm:$0xff]  ;;  %v4787_v21 = vld [vmem:[%s7165_s26 + $0x48] sm:$0xff] }
 0x205   : > { %v4751_v36 = vld [vmem:[#allocation3 + $0x28] sm:$0xff]  ;;  %v4696_v5 = vadd.f32 %v4568_v49, %v4536_v62  ;;  %v4534_v9 = vadd.f32 %v4443_v40, %v3978_v19  ;;  %v3989_v51 = vadd.f32 %v5785_v31, %v7043_v0  ;;  %v268_v40 = vadd.s32 152, %v7525_v44  ;;  %v4792_v19 = vld [vmem:[%s7165_s26 + $0x70] sm:$0xff] }
 0x206   : > { %4849 = vst.msk [vmem:[%s7182_s29 + $0x38] sm:$0xff] %vm1353_vm2, %v4817_v37  ;;  %v4815_v18 = vadd.f32 %v4783_v1, %v4751_v36  ;;  %v4756_v20 = vld [vmem:[#allocation3 + $0x50] sm:$0xff]  ;;  %4723 = vst.msk [vmem:[#allocation3 + $0x48] sm:$0xff] %vm1353_vm2, %v4691_v13  ;;  %v3980_v46 = vpop.f32.mrf.mxu1  ;;  %v5823_v43 = vpop.f32.mrf.mxu0  ;;  %v4567_v1 = vld [vmem:[#allocation3 + $0x68] sm:$0xff]  ;;  %v404_v13 = vand.u32 15, %v266_v24 }
 0x207   : > { %v4820_v0 = vadd.f32 %v4788_v41, %v4756_v20  ;;  %4728 = vst.msk [vmem:[#allocation3 + $0x70] sm:$0xff] %vm1353_vm2, %v4696_v5  ;;  %v4694_v33 = vadd.f32 %v4566_v42, %v4534_v9  ;;  %v4537_v23 = vadd.f32 %v5819_v25, %v3989_v51  ;;  %v3981_v3 = vadd.f32 %v3980_v46, %v7048_v35  ;;  %v4569_v35 = vld [vmem:[#allocation3 + $0x78] sm:$0xff]  ;;  %v4572_v37 = vld [vmem:[#allocation3 + $0x90] sm:$0xff]  ;;  %v4790_v9 = vld [vmem:[%s7165_s26 + $0x60] sm:$0xff] }
 0x208   : > { %4847 = vst.msk [vmem:[%s7182_s29 + $0x28] sm:$0xff] %vm1353_vm2, %v4815_v18  ;;  %v4754_v17 = vld [vmem:[#allocation3 + $0x40] sm:$0xff]  ;;  %v5788_v48 = vpop.f32.mrf.mxu1  ;;  %v4462_v14 = vpop.f32.mrf.mxu0  ;;  %v418_v6 = vand.u32 15, %v268_v40  ;;  %vm7295_vm14 = vcmp.ne.s32.totalorder %v404_v13, 15 }
 0x209   : > { %4852 = vst.msk [vmem:[%s7182_s29 + $0x50] sm:$0xff] %vm1353_vm2, %v4820_v0  ;;  %v4818_v52 = vadd.f32 %v4786_v38, %v4754_v17  ;;  %4726 = vst.msk [vmem:[#allocation3 + $0x60] sm:$0xff] %vm1353_vm2, %v4694_v33  ;;  %v4665_v25 = vsel %vm7252_vm11, %v4537_v23, 0.0  ;;  %v4535_v7 = vadd.f32 %v4446_v15, %v3981_v3  ;;  %v4002_v10 = vadd.f32 %v5788_v48, %v7053_v27  ;;  %v4570_v51 = vld [vmem:[#allocation3 + $0x80] sm:$0xff] }
 0x20a   : > { %v4697_v16 = vadd.f32 %v4665_v25, %v4569_v35  ;;  %v3993_v50 = vpop.f32.mrf.mxu1  ;;  %v5826_v22 = vpop.f32.mrf.mxu0  ;;  %vm7286_vm13 = vcmp.ne.s32.totalorder %v418_v6, 15  ;;  %v270_v23 = vadd.s32 168, %v7525_v44  ;;  %v4574_v13 = vld [vmem:[#allocation3 + $0xa0] sm:$0xff] }
 0x20b   : > { %4850 = vst.msk [vmem:[%s7182_s29 + $0x40] sm:$0xff] %vm1353_vm2, %v4818_v52  ;;  %v4757_v39 = vld [vmem:[#allocation3 + $0x58] sm:$0xff]  ;;  %v4663_v54 = vsel %vm7261_vm12, %v4535_v7, 0.0  ;;  %v4540_v60 = vadd.f32 %v5822_v8, %v4002_v10  ;;  %v3994_v62 = vadd.f32 %v3993_v50, %v7058_v4  ;;  %v4791_v10 = vld [vmem:[%s7165_s26 + $0x68] sm:$0xff] }
 0x20c   : > { %v4821_v15 = vadd.f32 %v4789_v11, %v4757_v39  ;;  %4729 = vst.msk [vmem:[#allocation3 + $0x78] sm:$0xff] %vm1353_vm2, %v4697_v16  ;;  %v4695_v27 = vadd.f32 %v4663_v54, %v4567_v1  ;;  %v5789_v41 = vpop.f32.mrf.mxu1  ;;  %v4475_v49 = vpop.f32.mrf.mxu0  ;;  %v4571_v16 = vld [vmem:[#allocation3 + $0x88] sm:$0xff]  ;;  %v4576_v1 = vld [vmem:[#allocation3 + $0xb0] sm:$0xff] }
 0x20d   : > { %v4755_v31 = vld [vmem:[#allocation3 + $0x48] sm:$0xff]  ;;  %v4700_v59 = vadd.f32 %v4572_v37, %v4540_v60  ;;  %v4538_v36 = vadd.f32 %v4459_v26, %v3994_v62  ;;  %v4005_v5 = vadd.f32 %v5789_v41, %v7063_v63  ;;  %v272_v26 = vadd.s32 184, %v7525_v44  ;;  %v4794_v41 = vld [vmem:[%s7165_s26 + $0x80] sm:$0xff] }
 0x20e   : > { %4853 = vst.msk [vmem:[%s7182_s29 + $0x58] sm:$0xff] %vm1353_vm2, %v4821_v15  ;;  %v4819_v8 = vadd.f32 %v4787_v21, %v4755_v31  ;;  %v4760_v4 = vld [vmem:[#allocation3 + $0x70] sm:$0xff]  ;;  %4727 = vst.msk [vmem:[#allocation3 + $0x68] sm:$0xff] %vm1353_vm2, %v4695_v27  ;;  %v3996_v20 = vpop.f32.mrf.mxu1  ;;  %v5827_v38 = vpop.f32.mrf.mxu0  ;;  %v432_v60 = vand.u32 15, %v270_v23 }
 0x20f   : > { %v4824_v63 = vadd.f32 %v4792_v19, %v4760_v4  ;;  %4732 = vst.msk [vmem:[#allocation3 + $0x90] sm:$0xff] %vm1353_vm2, %v4700_v59  ;;  %v4698_v42 = vadd.f32 %v4570_v51, %v4538_v36  ;;  %v4541_v29 = vadd.f32 %v5823_v43, %v4005_v5  ;;  %v3997_v46 = vadd.f32 %v3996_v20, %v7068_v47  ;;  %v4573_v47 = vld [vmem:[#allocation3 + $0x98] sm:$0xff]  ;;  %v4796_v21 = vld [vmem:[%s7165_s26 + $0x90] sm:$0xff] }
 0x210   : > { %4851 = vst.msk [vmem:[%s7182_s29 + $0x48] sm:$0xff] %vm1353_vm2, %v4819_v8  ;;  %v4758_v40 = vld [vmem:[#allocation3 + $0x60] sm:$0xff]  ;;  %v5792_v33 = vpop.f32.mrf.mxu1  ;;  %v4478_v3 = vpop.f32.mrf.mxu0  ;;  %v446_v35 = vand.u32 15, %v272_v26  ;;  %vm7329_vm0 = vcmp.ne.s32.totalorder %v432_v60, 15  ;;  %v274_v20 = vadd.s32 200, %v7525_v44 }
 0x211   : > { %4856 = vst.msk [vmem:[%s7182_s29 + $0x70] sm:$0xff] %vm1353_vm2, %v4824_v63  ;;  %v4822_v17 = vadd.f32 %v4790_v9, %v4758_v40  ;;  %4730 = vst.msk [vmem:[#allocation3 + $0x80] sm:$0xff] %vm1353_vm2, %v4698_v42  ;;  %v4669_v43 = vsel %vm7286_vm13, %v4541_v29, 0.0  ;;  %v4539_v48 = vadd.f32 %v4462_v14, %v3997_v46  ;;  %v4018_v24 = vadd.f32 %v5792_v33, %v7073_v55  ;;  %v4797_v42 = vld [vmem:[%s7165_s26 + $0x98] sm:$0xff] }
 0x212   : > { %v4701_v52 = vadd.f32 %v4669_v43, %v4573_v47  ;;  %v4009_v11 = vpop.f32.mrf.mxu1  ;;  %v5830_v25 = vpop.f32.mrf.mxu0  ;;  %vm7320_vm15 = vcmp.ne.s32.totalorder %v446_v35, 15  ;;  %v4575_v47 = vld [vmem:[#allocation3 + $0xa8] sm:$0xff] }
 0x213   : > { %4854 = vst.msk [vmem:[%s7182_s29 + $0x60] sm:$0xff] %vm1353_vm2, %v4822_v17  ;;  %v4761_v7 = vld [vmem:[#allocation3 + $0x78] sm:$0xff]  ;;  %v4667_v50 = vsel %vm7295_vm14, %v4539_v48, 0.0  ;;  %v4544_v6 = vadd.f32 %v5826_v22, %v4018_v24  ;;  %v4010_v39 = vadd.f32 %v4009_v11, %v7078_v12  ;;  %v4580_v11 = vld [vmem:[#allocation3 + $0xd0] sm:$0xff] }
 0x214   : > { %v4825_v14 = vadd.f32 %v4793_v53, %v4761_v7  ;;  %4733 = vst.msk [vmem:[#allocation3 + $0x98] sm:$0xff] %vm1353_vm2, %v4701_v52  ;;  %v4699_v55 = vadd.f32 %v4667_v50, %v4571_v16  ;;  %v5793_v54 = vpop.f32.mrf.mxu1  ;;  %v4491_v62 = vpop.f32.mrf.mxu0  ;;  %v4795_v53 = vld [vmem:[%s7165_s26 + $0x88] sm:$0xff]  ;;  %v4800_v52 = vld [vmem:[%s7165_s26 + $0xb0] sm:$0xff]  ;;  %v460_v7 = vand.u32 15, %v274_v20 }
 0x215   : > { %v4759_v15 = vld [vmem:[#allocation3 + $0x68] sm:$0xff]  ;;  %v4704_v19 = vadd.f32 %v4576_v1, %v4544_v6  ;;  %v4542_v27 = vadd.f32 %v4475_v49, %v4010_v39  ;;  %v4021_v37 = vadd.f32 %v5793_v54, %v7083_v56  ;;  %v276_v49 = vadd.s32 216, %v7525_v44 }
 0x216   : > { %4857 = vst.msk [vmem:[%s7182_s29 + $0x78] sm:$0xff] %vm1353_vm2, %v4825_v14  ;;  %v4823_v22 = vadd.f32 %v4791_v10, %v4759_v15  ;;  %v4764_v12 = vld [vmem:[#allocation3 + $0x90] sm:$0xff]  ;;  %4731 = vst.msk [vmem:[#allocation3 + $0x88] sm:$0xff] %vm1353_vm2, %v4699_v55  ;;  %v4012_v59 = vpop.f32.mrf.mxu1  ;;  %v5831_v36 = vpop.f32.mrf.mxu0  ;;  %v4798_v14 = vld [vmem:[%s7165_s26 + $0xa0] sm:$0xff]  ;;  %v280_v54 = vadd.s32 248, %v7525_v44  ;;  %vm7363_vm3 = vcmp.ne.s32.totalorder %v460_v7, 15 }
 0x217   : > { %v4828_v56 = vadd.f32 %v4796_v21, %v4764_v12  ;;  %4736 = vst.msk [vmem:[#allocation3 + $0xb0] sm:$0xff] %vm1353_vm2, %v4704_v19  ;;  %v4702_v5 = vadd.f32 %v4574_v13, %v4542_v27  ;;  %v4545_v8 = vadd.f32 %v5827_v38, %v4021_v37  ;;  %v4013_v4 = vadd.f32 %v4012_v59, %v7088_v28  ;;  %v4577_v28 = vld [vmem:[#allocation3 + $0xb8] sm:$0xff]  ;;  %v4807_v27 = vld [vmem:[%s7165_s26 + $0xe8] sm:$0xff] }
 0x218   : > { %4855 = vst.msk [vmem:[%s7182_s29 + $0x68] sm:$0xff] %vm1353_vm2, %v4823_v22  ;;  %v4762_v9 = vld [vmem:[#allocation3 + $0x80] sm:$0xff]  ;;  %v5796_v18 = vpop.f32.mrf.mxu1  ;;  %v4494_v26 = vpop.f32.mrf.mxu0  ;;  %v474_v33 = vand.u32 15, %v276_v49  ;;  %v278_v22 = vadd.s32 232, %v7525_v44  ;;  %v4581_v13 = vld [vmem:[#allocation3 + $0xd8] sm:$0xff] }
 0x219   : > { %4860 = vst.msk [vmem:[%s7182_s29 + $0x90] sm:$0xff] %vm1353_vm2, %v4828_v56  ;;  %v4826_v63 = vadd.f32 %v4794_v41, %v4762_v9  ;;  %4734 = vst.msk [vmem:[#allocation3 + $0xa0] sm:$0xff] %vm1353_vm2, %v4702_v5  ;;  %v4673_v38 = vsel %vm7320_vm15, %v4545_v8, 0.0  ;;  %v4543_v29 = vadd.f32 %v4478_v3, %v4013_v4  ;;  %v4034_v46 = vadd.f32 %v5796_v18, %v7093_v58  ;;  %v4801_v41 = vld [vmem:[%s7165_s26 + $0xb8] sm:$0xff]  ;;  %v4799_v8 = vld [vmem:[%s7165_s26 + $0xa8] sm:$0xff] }
 0x21a   : > { %v4705_v40 = vadd.f32 %v4673_v38, %v4577_v28  ;;  %v4025_v0 = vpop.f32.mrf.mxu1  ;;  %v5834_v23 = vpop.f32.mrf.mxu0  ;;  %vm7354_vm1 = vcmp.ne.s32.totalorder %v474_v33, 15  ;;  %v502_v56 = vand.u32 15, %v280_v54  ;;  %v4579_v4 = vld [vmem:[#allocation3 + $0xc8] sm:$0xff]  ;;  %v488_v28 = vand.u32 15, %v278_v22  ;;  %v4806_v54 = vld [vmem:[%s7165_s26 + $0xe0] sm:$0xff] }
 0x21b   : > { %4858 = vst.msk [vmem:[%s7182_s29 + $0x80] sm:$0xff] %vm1353_vm2, %v4826_v63  ;;  %v4765_v17 = vld [vmem:[#allocation3 + $0x98] sm:$0xff]  ;;  %v4671_v43 = vsel %vm7329_vm0, %v4543_v29, 0.0  ;;  %v4548_v48 = vadd.f32 %v5830_v25, %v4034_v46  ;;  %v4026_v24 = vadd.f32 %v4025_v0, %v7098_v30  ;;  %v4578_v30 = vld [vmem:[#allocation3 + $0xc0] sm:$0xff]  ;;  %v4584_v63 = vld [vmem:[#allocation3 + $0xf0] sm:$0xff] }
 0x21c   : > { %v4829_v3 = vadd.f32 %v4797_v42, %v4765_v17  ;;  %4737 = vst.msk [vmem:[#allocation3 + $0xb8] sm:$0xff] %vm1353_vm2, %v4705_v40  ;;  %v4703_v58 = vadd.f32 %v4671_v43, %v4575_v47  ;;  %v5797_v35 = vpop.f32.mrf.mxu1  ;;  %v4507_v1 = vpop.f32.mrf.mxu0  ;;  %vm7388_vm4 = vcmp.ne.s32.totalorder %v502_v56, 15  ;;  %vm7396_vm5 = vcmp.ne.s32.totalorder %v488_v28, 15 }
 0x21d   : > { %v4763_v10 = vld [vmem:[#allocation3 + $0x88] sm:$0xff]  ;;  %v4708_v16 = vadd.f32 %v4580_v11, %v4548_v48  ;;  %v4546_v50 = vadd.f32 %v4491_v62, %v4026_v24  ;;  %v4037_v6 = vadd.f32 %v5797_v35, %v7103_v61  ;;  %v4805_v11 = vld [vmem:[%s7165_s26 + $0xd8] sm:$0xff] }
 0x21e   : > { %4861 = vst.msk [vmem:[%s7182_s29 + $0x98] sm:$0xff] %vm1353_vm2, %v4829_v3  ;;  %v4827_v25 = vadd.f32 %v4795_v53, %v4763_v10  ;;  %v4768_v39 = vld [vmem:[#allocation3 + $0xb0] sm:$0xff]  ;;  %4735 = vst.msk [vmem:[#allocation3 + $0xa8] sm:$0xff] %vm1353_vm2, %v4703_v58  ;;  %v4028_v55 = vpop.f32.mrf.mxu1  ;;  %v5835_v5 = vpop.f32.mrf.mxu0  ;;  %v4585_v35 = vld [vmem:[#allocation3 + $0xf8] sm:$0xff] }
 0x21f   : > { %v4832_v61 = vadd.f32 %v4800_v52, %v4768_v39  ;;  %4740 = vst.msk [vmem:[#allocation3 + $0xd0] sm:$0xff] %vm1353_vm2, %v4708_v16  ;;  %v4706_v60 = vadd.f32 %v4578_v30, %v4546_v50  ;;  %v4549_v62 = vadd.f32 %v5831_v36, %v4037_v6  ;;  %v4029_v15 = vadd.f32 %v4028_v55, %v7108_v34  ;;  %v4803_v50 = vld [vmem:[%s7165_s26 + $0xc8] sm:$0xff] }
 0x220   : > { %4859 = vst.msk [vmem:[%s7182_s29 + $0x88] sm:$0xff] %vm1353_vm2, %v4827_v25  ;;  %v4766_v19 = vld [vmem:[#allocation3 + $0xa0] sm:$0xff]  ;;  %v5800_v37 = vpop.f32.mrf.mxu1  ;;  %v4510_v47 = vpop.f32.mrf.mxu0  ;;  %v4583_v6 = vld [vmem:[#allocation3 + $0xe8] sm:$0xff] }
 0x221   : > { %4864 = vst.msk [vmem:[%s7182_s29 + $0xb0] sm:$0xff] %vm1353_vm2, %v4832_v61  ;;  %v4830_v12 = vadd.f32 %v4798_v14, %v4766_v19  ;;  %4738 = vst.msk [vmem:[#allocation3 + $0xc0] sm:$0xff] %vm1353_vm2, %v4706_v60  ;;  %v4677_v34 = vsel %vm7354_vm1, %v4549_v62, 0.0  ;;  %v4547_v31 = vadd.f32 %v4494_v26, %v4029_v15  ;;  %v4050_v59 = vadd.f32 %v5800_v37, %v7113_v57  ;;  %v4804_v26 = vld [vmem:[%s7165_s26 + $0xd0] sm:$0xff]  ;;  %v4809_v15 = vld [vmem:[%s7165_s26 + $0xf8] sm:$0xff] }
 0x222   : > { %v4709_v49 = vadd.f32 %v4677_v34, %v4581_v13  ;;  %v4041_v36 = vpop.f32.mrf.mxu1  ;;  %v4808_v14 = vld [vmem:[%s7165_s26 + $0xf0] sm:$0xff] }
 0x223   : > { %4862 = vst.msk [vmem:[%s7182_s29 + $0xa0] sm:$0xff] %vm1353_vm2, %v4830_v12  ;;  %v4769_v44 = vld [vmem:[#allocation3 + $0xb8] sm:$0xff]  ;;  %v4675_v9 = vsel %vm7363_vm3, %v4547_v31, 0.0  ;;  %v4552_v51 = vadd.f32 %v5834_v23, %v4050_v59  ;;  %v4042_v18 = vadd.f32 %v4041_v36, %v7118_v2  ;;  %v4802_v2 = vld [vmem:[%s7165_s26 + $0xc0] sm:$0xff] }
 0x224   : > { %v4833_v20 = vadd.f32 %v4801_v41, %v4769_v44  ;;  %4741 = vst.msk [vmem:[#allocation3 + $0xd8] sm:$0xff] %vm1353_vm2, %v4709_v49  ;;  %v4707_v57 = vadd.f32 %v4675_v9, %v4579_v4  ;;  %v5801_v42 = vpop.f32.mrf.mxu1  ;;  %v4582_v23 = vld [vmem:[#allocation3 + $0xe0] sm:$0xff] }
 0x225   : > { %v4767_v38 = vld [vmem:[#allocation3 + $0xa8] sm:$0xff]  ;;  %v4712_v29 = vadd.f32 %v4584_v63, %v4552_v51  ;;  %v4550_v46 = vadd.f32 %v4507_v1, %v4042_v18  ;;  %v4053_v40 = vadd.f32 %v5801_v42, %v7123_v32 }
 0x226   : > { %4865 = vst.msk [vmem:[%s7182_s29 + $0xb8] sm:$0xff] %vm1353_vm2, %v4833_v20  ;;  %v4831_v0 = vadd.f32 %v4799_v8, %v4767_v38  ;;  %v4772_v33 = vld [vmem:[#allocation3 + $0xd0] sm:$0xff]  ;;  %4739 = vst.msk [vmem:[#allocation3 + $0xc8] sm:$0xff] %vm1353_vm2, %v4707_v57  ;;  %v4044_v53 = vpop.f32.mrf.mxu1 }
 0x227   : > { %v4836_v43 = vadd.f32 %v4804_v26, %v4772_v33  ;;  %4744 = vst.msk [vmem:[#allocation3 + $0xf0] sm:$0xff] %vm1353_vm2, %v4712_v29  ;;  %v4710_v32 = vadd.f32 %v4582_v23, %v4550_v46  ;;  %v4553_v48 = vadd.f32 %v5835_v5, %v4053_v40  ;;  %v4045_v24 = vadd.f32 %v4044_v53, %v7128_v45 }
 0x228   : > { %4863 = vst.msk [vmem:[%s7182_s29 + $0xa8] sm:$0xff] %vm1353_vm2, %v4831_v0  ;;  %v4770_v3 = vld [vmem:[#allocation3 + $0xc0] sm:$0xff] }
 0x229   : > { %4868 = vst.msk [vmem:[%s7182_s29 + $0xd0] sm:$0xff] %vm1353_vm2, %v4836_v43  ;;  %v4834_v58 = vadd.f32 %v4802_v2, %v4770_v3  ;;  %4742 = vst.msk [vmem:[#allocation3 + $0xe0] sm:$0xff] %vm1353_vm2, %v4710_v32  ;;  %v4681_v7 = vsel %vm7388_vm4, %v4553_v48, 0.0  ;;  %v4551_v45 = vadd.f32 %v4510_v47, %v4045_v24 }
 0x22a   : > { %v4713_v10 = vadd.f32 %v4681_v7, %v4585_v35 }
 0x22b   : > { %4866 = vst.msk [vmem:[%s7182_s29 + $0xc0] sm:$0xff] %vm1353_vm2, %v4834_v58  ;;  %v4773_v16 = vld [vmem:[#allocation3 + $0xd8] sm:$0xff]  ;;  %v4679_v25 = vsel %vm7396_vm5, %v4551_v45, 0.0 }
 0x22c   : > { %v4837_v39 = vadd.f32 %v4805_v11, %v4773_v16  ;;  %4745 = vst.msk [vmem:[#allocation3 + $0xf8] sm:$0xff] %vm1353_vm2, %v4713_v10  ;;  %v4711_v30 = vadd.f32 %v4679_v25, %v4583_v6 }
 0x22d   : > { %v4771_v21 = vld [vmem:[#allocation3 + $0xc8] sm:$0xff] }
 0x22e   : > { %4869 = vst.msk [vmem:[%s7182_s29 + $0xd8] sm:$0xff] %vm1353_vm2, %v4837_v39  ;;  %v4835_v55 = vadd.f32 %v4803_v50, %v4771_v21  ;;  %v4776_v1 = vld [vmem:[#allocation3 + $0xf0] sm:$0xff]  ;;  %4743 = vst.msk [vmem:[#allocation3 + $0xe8] sm:$0xff] %vm1353_vm2, %v4711_v30 }
 0x22f   : > { %v4840_v61 = vadd.f32 %v4808_v14, %v4776_v1 }
 0x230   : > { %4867 = vst.msk [vmem:[%s7182_s29 + $0xc8] sm:$0xff] %vm1353_vm2, %v4835_v55  ;;  %v4774_v60 = vld [vmem:[#allocation3 + $0xe0] sm:$0xff] }
 0x231   : > { %4872 = vst.msk [vmem:[%s7182_s29 + $0xf0] sm:$0xff] %vm1353_vm2, %v4840_v61  ;;  %v4838_v62 = vadd.f32 %v4806_v54, %v4774_v60 }
 0x233   : > { %4870 = vst.msk [vmem:[%s7182_s29 + $0xe0] sm:$0xff] %vm1353_vm2, %v4838_v62  ;;  %v4777_v19 = vld [vmem:[#allocation3 + $0xf8] sm:$0xff] }
 0x234   : > { %v4841_v37 = vadd.f32 %v4809_v15, %v4777_v19 }
 0x235   : > { %v4775_v22 = vld [vmem:[#allocation3 + $0xe8] sm:$0xff] }
 0x236   : > { %4873 = vst.msk [vmem:[%s7182_s29 + $0xf8] sm:$0xff] %vm1353_vm2, %v4841_v37  ;;  %v4839_v12 = vadd.f32 %v4807_v27, %v4775_v22 }
 0x238   : > { %4871 = vst.msk [vmem:[%s7182_s29 + $0xe8] sm:$0xff] %vm1353_vm2, %v4839_v12 }
 0x239 PF: > { %s15_s18 = sadd.s32 1, %s5967_s18  }
 0x23a   : > { %p12_p4 = scmp.ge.s32.totalorder %s15_s18, 4  }
 0x23c   :  { %14 = sbr.rel (!%p12_p4) target bundleno = 1 (0x1), region = 81 }

// kernel: _block_forward_jit.4
= control target key start
LH: loop header
LB: loop body
LE: loop exit
PB: predicated region body
PF: predicated region fallthrough
CT: control target
= control target key end

     0   :  { %s6256_s21 = smov 0   ;;  %s7816_s0 = inlined_call_operand.vmem [shape: f32[1,16], index: 0, kind: input, shape index: {}]   ;;  %s7817_s1 = inlined_call_operand.vmem [shape: f32[1,16], index: 1, kind: input, shape index: {}]   ;;  %s7818_s2 = inlined_call_operand.vmem [shape: f32[2,256,16], index: 2, kind: input, shape index: {}]   ;;  %s7819_s3 = inlined_call_operand.vmem [shape: bf16[9,16,16], index: 3, kind: input, shape index: {}]   ;;  %s7820_s4 = inlined_call_operand.vmem [shape: bf16[2,256,16], index: 4, kind: output, shape index: {0}]   ;;  %s7821_s5 = inlined_call_operand.vmem [shape: f32[2,1,16], index: 5, kind: output, shape index: {1}]   ;;  %s7822_s6 = inlined_call_operand.vmem [shape: f32[2,1,16], index: 6, kind: output, shape index: {2}]  }
   0x1 LB: > { %s5210_s22 = sadd.s32 4294967295, %s6218_s21   ;;  %p5214_p0 = scmp.ge.s32.totalorder %s6218_s21, 1  ;;  %s6218_s21 = sphi %s6256_s21, %s17_s21  }
   0x2   : > { %p217_p1 = scmp.lt.s32.totalorder %s6218_s21, 3 }
   0x4   : > { %p218_p2 = pnand %p5214_p0, %p217_p1 }
   0x6   : > { %221 = sbr.rel (%p218_p2) target bundleno = 593 (0x251), region = 36 }
   0xb   : > { %v6098_v0 = vld [vmem:[%s7819_s3 + $0x18] sm:$0xff]   ;;  %p253_p3 = scmp.lt.s32.totalorder %s5210_s22, 1  ;;  %vm753_vm0 = vcmask 125952   ;;  %v6272_v1 = vld [vmem:[%s7816_s0] ss:$0 sm:$0xff]  ;;  %v6220_v2 = vmov 0  }
   0xc   : > { %6087 = vmatprep.subr.bf16.mxu1 %v6098_v0  ;;  %5781 = vmatprep.subr.bf16.mxu0 %v6098_v0  ;;  %757 = vst.msk [vmem:[#allocation2 + $0xc] sm:$0xf] %vm753_vm0, %v6220_v2  ;;  %755 = vst.msk [vmem:[#allocation2 + $0x4] sm:$0xf] %vm753_vm0, %v6220_v2  ;;  %v6283_v3 = vld [vmem:[%s7819_s3] sm:$0xff]   ;;  %v6289_v4 = vld [vmem:[%s7819_s3 + $0x30] sm:$0xff]  }
   0xd   : > { %s7949_s22 = smov (!%p253_p3, %s5210_s22), 1  ;;  %756 = vst.msk [vmem:[#allocation2 + $0x8] sm:$0xf] %vm753_vm0, %v6220_v2  ;;  %758 = vst.msk [vmem:[#allocation2 + $0x90] sm:$0xf] %vm753_vm0, %v6220_v2  ;;  %6088 = vmatpush3.bf16.msra.mxu1 %v6098_v0  ;;  %5782 = vmatpush3.bf16.msra.mxu0 %v6098_v0  ;;  %vm1345_vm2 = vcmask 130048  }
   0xe   : > { %759 = vst.msk [vmem:[#allocation2 + $0x94] sm:$0xf] %vm753_vm0, %v6220_v2  ;;  %760 = vst.msk [vmem:[#allocation2 + $0x98] sm:$0xf] %vm753_vm0, %v6220_v2  ;;  %s5562_s29 = sshll.u32 %s7949_s22, 8  ;;  %5815 = vmatprep.subr.bf16.mxu1 %v6283_v3  ;;  %5849 = vmatprep.subr.bf16.mxu0 %v6289_v4  ;;  %s5563_s27 = sshll.u32 %s7949_s22, 7 }
   0xf   : > { %s6294_s10 = scalar_lea.vmem %s7818_s2, %s5562_s29  ;;  %v6299_v5 = vld [vmem:[%s7817_s1] ss:$0 sm:$0xff]  ;;  %vm1186_vm1 = vsmask.f32 4352  ;;  %vm3506_vm3 = vsmask.f32 7424  ;;  %s7453_s30 = scalar_lea.vmem %s7820_s4, %s5563_s27 }
  0x10   : > { %v762_v6 = vld [vmem:[%s6294_s10] sm:$0xff]  ;;  %v763_v7 = vld [vmem:[%s6294_s10 + $0x8] sm:$0xff]  ;;  %v764_v8 = vld [vmem:[%s6294_s10 + $0x10] sm:$0xff]  ;;  %s265_s9 = scalar_lea.vmem %s7821_s5, %s7949_s22  ;;  %s268_s12 = scalar_lea.vmem %s7822_s6, %s7949_s22 }
  0x11   : > { %v800_v9 = vsub.f32 %v762_v6, %v6272_v1  ;;  %v801_v10 = vsub.f32 %v763_v7, %v6272_v1  ;;  %v802_v11 = vsub.f32 %v764_v8, %v6272_v1  ;;  %v777_v12 = vld [vmem:[%s6294_s10 + $0x78] sm:$0xff]  ;;  %v778_v13 = vld [vmem:[%s6294_s10 + $0x80] sm:$0xff]  ;;  %v779_v14 = vld [vmem:[%s6294_s10 + $0x88] sm:$0xff] }
  0x12   : > { %v780_v15 = vld [vmem:[%s6294_s10 + $0x90] sm:$0xff]  ;;  %v815_v16 = vsub.f32 %v777_v12, %v6272_v1  ;;  %v816_v17 = vsub.f32 %v778_v13, %v6272_v1  ;;  %v817_v18 = vsub.f32 %v779_v14, %v6272_v1  ;;  %v765_v19 = vld [vmem:[%s6294_s10 + $0x18] sm:$0xff]  ;;  %v766_v24 = vld [vmem:[%s6294_s10 + $0x20] sm:$0xff] }
  0x13   : > { %v838_v20 = vmul.f32 %v6299_v5, %v800_v9  ;;  %v839_v21 = vmul.f32 %v6299_v5, %v801_v10  ;;  %v840_v22 = vmul.f32 %v6299_v5, %v802_v11  ;;  %v818_v23 = vsub.f32 %v780_v15, %v6272_v1  ;;  %v781_v37 = vld [vmem:[%s6294_s10 + $0x98] sm:$0xff]  ;;  %v782_v38 = vld [vmem:[%s6294_s10 + $0xa0] sm:$0xff]  ;;  %v767_v43 = vld [vmem:[%s6294_s10 + $0x28] sm:$0xff] }
  0x14   : > { %v853_v25 = vmul.f32 %v6299_v5, %v815_v16  ;;  %v854_v26 = vmul.f32 %v6299_v5, %v816_v17  ;;  %v855_v27 = vmul.f32 %v6299_v5, %v817_v18  ;;  %v803_v28 = vsub.f32 %v765_v19, %v6272_v1  ;;  %v768_v44 = vld [vmem:[%s6294_s10 + $0x30] sm:$0xff]  ;;  %v783_v45 = vld [vmem:[%s6294_s10 + $0xa8] sm:$0xff]  ;;  %v769_v63 = vld [vmem:[%s6294_s10 + $0x38] sm:$0xff] }
  0x15   : > { %v870_v29 = vmax.f32 %v838_v20, 0.0  ;;  %v871_v30 = vmax.f32 %v839_v21, 0.0  ;;  %v872_v31 = vmax.f32 %v840_v22, 0.0  ;;  %v856_v32 = vmul.f32 %v6299_v5, %v818_v23  ;;  %v784_v50 = vld [vmem:[%s6294_s10 + $0xb0] sm:$0xff]  ;;  %v1097_v0 = vld [vmem:[#allocation2 + $0xc] sm:$0x8] }
  0x16   : > { %v885_v33 = vmax.f32 %v853_v25, 0.0  ;;  %v886_v34 = vmax.f32 %v854_v26, 0.0  ;;  %v887_v35 = vmax.f32 %v855_v27, 0.0  ;;  %v804_v36 = vsub.f32 %v766_v24, %v6272_v1  ;;  %v770_v9 = vld [vmem:[%s6294_s10 + $0x40] sm:$0xff]  ;;  %v785_v18 = vld [vmem:[%s6294_s10 + $0xb8] sm:$0xff]  ;;  %v771_v24 = vld [vmem:[%s6294_s10 + $0x48] sm:$0xff] }
  0x17   : > { %v5564_v39 = vpack.c.bf16 %v870_v29, %v870_v29  ;;  %v5565_v40 = vpack.c.bf16 %v871_v30, %v871_v30  ;;  %v5566_v41 = vpack.c.bf16 %v872_v31, %v872_v31  ;;  %v888_v42 = vmax.f32 %v856_v32, 0.0  ;;  %v786_v19 = vld [vmem:[%s6294_s10 + $0xc0] sm:$0xff] }
  0x18   : > { %v5579_v46 = vpack.c.bf16 %v885_v33, %v885_v33  ;;  %v5580_v47 = vpack.c.bf16 %v886_v34, %v886_v34  ;;  %v5581_v48 = vpack.c.bf16 %v887_v35, %v887_v35  ;;  %v841_v49 = vmul.f32 %v6299_v5, %v803_v28 }
  0x19   : > { %1030 = vst.msk [vmem:[#allocation2 + $0x10] sm:$0xf] %vm753_vm0, %v5564_v39  ;;  %1031 = vst.msk [vmem:[#allocation2 + $0x14] sm:$0xf] %vm753_vm0, %v5565_v40  ;;  %v5582_v51 = vpack.c.bf16 %v888_v42, %v888_v42  ;;  %v842_v52 = vmul.f32 %v6299_v5, %v804_v36  ;;  %v819_v53 = vsub.f32 %v781_v37, %v6272_v1 }
  0x1a   : > { %1032 = vst.msk [vmem:[#allocation2 + $0x18] sm:$0xf] %vm753_vm0, %v5566_v41  ;;  %v820_v54 = vsub.f32 %v782_v38, %v6272_v1  ;;  %1045 = vst.msk [vmem:[#allocation2 + $0x4c] sm:$0xf] %vm753_vm0, %v5579_v46  ;;  %v873_v55 = vmax.f32 %v841_v49, 0.0  ;;  %v805_v56 = vsub.f32 %v767_v43, %v6272_v1  ;;  %v806_v57 = vsub.f32 %v768_v44, %v6272_v1 }
  0x1b   : > { %1046 = vst.msk [vmem:[#allocation2 + $0x50] sm:$0xf] %vm753_vm0, %v5580_v47  ;;  %1047 = vst.msk [vmem:[#allocation2 + $0x54] sm:$0xf] %vm753_vm0, %v5581_v48  ;;  %v821_v58 = vsub.f32 %v783_v45, %v6272_v1  ;;  %v874_v59 = vmax.f32 %v842_v52, 0.0  ;;  %v857_v60 = vmul.f32 %v6299_v5, %v819_v53  ;;  %v822_v62 = vsub.f32 %v784_v50, %v6272_v1  ;;  %v6379_v48 = vld [vmem:[%s6294_s10 + $0x50] sm:$0xff] }
  0x1c   : > { %1048 = vst.msk [vmem:[#allocation2 + $0x58] sm:$0xf] %vm753_vm0, %v5582_v51  ;;  %v858_v61 = vmul.f32 %v6299_v5, %v820_v54  ;;  %v5567_v2 = vpack.c.bf16 %v873_v55, %v873_v55  ;;  %v843_v6 = vmul.f32 %v6299_v5, %v805_v56  ;;  %v844_v7 = vmul.f32 %v6299_v5, %v806_v57  ;;  %v6382_v53 = vld [vmem:[%s6294_s10 + $0xc8] sm:$0xff]  ;;  %v6385_v54 = vld [vmem:[%s6294_s10 + $0xd0] sm:$0xff] }
  0x1d   : > { %v859_v8 = vmul.f32 %v6299_v5, %v821_v58  ;;  %v5568_v10 = vpack.c.bf16 %v874_v59, %v874_v59  ;;  %v889_v11 = vmax.f32 %v857_v60, 0.0  ;;  %v860_v13 = vmul.f32 %v6299_v5, %v822_v62 }
  0x1e   : > { %v890_v12 = vmax.f32 %v858_v61, 0.0  ;;  %1033 = vst.msk [vmem:[#allocation2 + $0x1c] sm:$0xf] %vm753_vm0, %v5567_v2  ;;  %v875_v14 = vmax.f32 %v843_v6, 0.0  ;;  %v876_v15 = vmax.f32 %v844_v7, 0.0  ;;  %v807_v17 = vsub.f32 %v769_v63, %v6272_v1 }
  0x1f   : > { %v891_v16 = vmax.f32 %v859_v8, 0.0  ;;  %1034 = vst.msk [vmem:[#allocation2 + $0x20] sm:$0xf] %vm753_vm0, %v5568_v10  ;;  %v5583_v20 = vpack.c.bf16 %v889_v11, %v889_v11  ;;  %v892_v22 = vmax.f32 %v860_v13, 0.0  ;;  %v808_v23 = vsub.f32 %v770_v9, %v6272_v1 }
  0x20   : > { %v5584_v21 = vpack.c.bf16 %v890_v12, %v890_v12  ;;  %v6364_v25 = vld [vmem:[#allocation2 + $0x10] sm:$0xf]  ;;  %v5569_v26 = vpack.c.bf16 %v875_v14, %v875_v14  ;;  %v5570_v27 = vpack.c.bf16 %v876_v15, %v876_v15  ;;  %v845_v29 = vmul.f32 %v6299_v5, %v807_v17 }
  0x21   : > { %v5585_v28 = vpack.c.bf16 %v891_v16, %v891_v16  ;;  %v5255_v30 = vcombine.low %v1097_v0, %v6364_v25  ;;  %v6100_v31 = vld [vmem:[#allocation2 + $0x14] sm:$0xff]   ;;  %1049 = vst.msk [vmem:[#allocation2 + $0x5c] sm:$0xf] %vm753_vm0, %v5583_v20  ;;  %v5586_v32 = vpack.c.bf16 %v892_v22, %v892_v22  ;;  %v846_v33 = vmul.f32 %v6299_v5, %v808_v23 }
  0x22   : > { %1050 = vst.msk [vmem:[#allocation2 + $0x60] sm:$0xf] %vm753_vm0, %v5584_v21  ;;  %v6102_v34 = vld [vmem:[#allocation2 + $0x4c] sm:$0xff]   ;;  %1035 = vst.msk [vmem:[#allocation2 + $0x24] sm:$0xf] %vm753_vm0, %v5569_v26  ;;  %v877_v35 = vmax.f32 %v845_v29, 0.0  ;;  %v823_v36 = vsub.f32 %v785_v18, %v6272_v1  ;;  %v824_v37 = vsub.f32 %v786_v19, %v6272_v1  ;;  %v809_v38 = vsub.f32 %v771_v24, %v6272_v1 }
  0x23   : > { %1036 = vst.msk [vmem:[#allocation2 + $0x28] sm:$0xf] %vm753_vm0, %v5570_v27  ;;  %1051 = vst.msk [vmem:[#allocation2 + $0x64] sm:$0xf] %vm753_vm0, %v5585_v28  ;;  %v1188_v39 = vshrl.u32 %v5255_v30, 16  ;;  %v1191_v40 = vshll.u32 %v5255_v30, 16  ;;  %v810_v13 = vsub.f32 %v6379_v48, %v6272_v1  ;;  %v825_v16 = vsub.f32 %v6382_v53, %v6272_v1 }
  0x24   : > { %v1196_v41 = vshrl.u32 %v6100_v31, 16  ;;  %v1199_v42 = vshll.u32 %v6100_v31, 16  ;;  %v6103_v43 = vld [vmem:[#allocation2 + $0x54] sm:$0xff]   ;;  %1052 = vst.msk [vmem:[#allocation2 + $0x68] sm:$0xf] %vm753_vm0, %v5586_v32  ;;  %v1259_v44 = vshrl.u32 %v6102_v34, 16  ;;  %v5571_v47 = vpack.c.bf16 %v877_v35, %v877_v35 }
  0x25   : > { %v1262_v45 = vshll.u32 %v6102_v34, 16  ;;  %v878_v46 = vmax.f32 %v846_v33, 0.0  ;;  %v1190_v49 = vrot.slane %v1188_v39, 3  ;;  %v1193_v50 = vrot.slane %v1191_v40, 4  ;;  %v774_v48 = vld [vmem:[%s6294_s10 + $0x60] sm:$0xff]  ;;  %v789_v53 = vld [vmem:[%s6294_s10 + $0xd8] sm:$0xff] }
  0x26   : > { %v1198_v51 = vrot.slane %v1196_v41, 3  ;;  %v1201_v52 = vrot.slane %v1199_v42, 4  ;;  %v1261_v55 = vrot.slane %v1259_v44, 3  ;;  %v1268_v57 = vshrl.u32 %v6103_v43, 16  ;;  %1037 = vst.msk [vmem:[#allocation2 + $0x2c] sm:$0xf] %vm753_vm0, %v5571_v47 }
  0x27   : > { %v1264_v56 = vrot.slane %v1262_v45, 4  ;;  %v1271_v58 = vshll.u32 %v6103_v43, 16  ;;  %v1194_v59 = vor.u32 %v1193_v50, %v1190_v49  ;;  %v6105_v61 = vld [vmem:[#allocation2 + $0x1c] sm:$0xff]   ;;  %v5572_v62 = vpack.c.bf16 %v878_v46, %v878_v46 }
  0x28   : > { %v6388_v60 = vor.u32 %v1201_v52, %v1198_v51  ;;  %v861_v63 = vmul.f32 %v6299_v5, %v823_v36  ;;  %v1270_v2 = vrot.slane %v1268_v57, 3  ;;  %v862_v7 = vmul.f32 %v6299_v5, %v824_v37  ;;  %v6414_v36 = vld [vmem:[%s7819_s3 + $0x20] sm:$0xff]   ;;  %v6419_v37 = vld [vmem:[%s7819_s3 + $0x8] sm:$0xff]   ;;  %v773_v42 = vld [vmem:[%s6294_s10 + $0x58] sm:$0xff] }
  0x29   : > { %v6391_v0 = vor.u32 %v1264_v56, %v1261_v55  ;;  %v1273_v6 = vrot.slane %v1271_v58, 4  ;;  %v1205_v9 = vshrl.u32 %v6105_v61, 16  ;;  %v1208_v10 = vshll.u32 %v6105_v61, 16  ;;  %v6106_v11 = vld [vmem:[#allocation2 + $0x5c] sm:$0xff]   ;;  %1038 = vst.msk [vmem:[#allocation2 + $0x30] sm:$0xf] %vm753_vm0, %v5572_v62 }
  0x2a   : > { %v1203_v8 = vsel %vm1186_vm1, %v1194_v59, %v6388_v60  ;;  %v6108_v12 = vld [vmem:[#allocation2 + $0x24] sm:$0xff]   ;;  %v847_v15 = vmul.f32 %v6299_v5, %v809_v38  ;;  %v826_v17 = vsub.f32 %v6385_v54, %v6272_v1  ;;  %v1277_v20 = vshrl.u32 %v6106_v11, 16  ;;  %v776_v59 = vld [vmem:[%s6294_s10 + $0x70] sm:$0xff] }
  0x2b   : > { %5783 = vmatprep.mubr.msk.bf16.mxu0 %vm1345_vm2, %v1203_v8  ;;  %v1274_v14 = vor.u32 %v1273_v6, %v1270_v2  ;;  %v1207_v18 = vrot.slane %v1205_v9, 3  ;;  %v1210_v19 = vrot.slane %v1208_v10, 4  ;;  %v1280_v21 = vshll.u32 %v6106_v11, 16  ;;  %v6109_v22 = vld [vmem:[#allocation2 + $0x64] sm:$0xff]   ;;  %v792_v11 = vld [vmem:[%s6294_s10 + $0xf0] sm:$0xff] }
  0x2c   : > { %v1214_v24 = vshrl.u32 %v6108_v12, 16  ;;  %v1217_v26 = vshll.u32 %v6108_v12, 16  ;;  %v893_v27 = vmax.f32 %v861_v63, 0.0  ;;  %v1279_v29 = vrot.slane %v1277_v20, 3  ;;  %v790_v54 = vld [vmem:[%s6294_s10 + $0xe0] sm:$0xff]  ;;  %v775_v58 = vld [vmem:[%s6294_s10 + $0x68] sm:$0xff] }
  0x2d   : > { %v6407_v23 = vsel %vm1186_vm1, %v6391_v0, %v1274_v14  ;;  %v1211_v28 = vor.u32 %v1210_v19, %v1207_v18  ;;  %v1282_v30 = vrot.slane %v1280_v21, 4  ;;  %v1286_v31 = vshrl.u32 %v6109_v22, 16  ;;  %v791_v6 = vld [vmem:[%s6294_s10 + $0xe8] sm:$0xff] }
  0x2e   : > { %5799 = vmatprep.mubr.msk.bf16.mxu1 %vm1345_vm2, %v6407_v23  ;;  %v1216_v32 = vrot.slane %v1214_v24, 3  ;;  %v1219_v33 = vrot.slane %v1217_v26, 4  ;;  %v1289_v34 = vshll.u32 %v6109_v22, 16  ;;  %v894_v35 = vmax.f32 %v862_v7, 0.0 }
  0x2f   : > { %v6423_v38 = vsel %vm1186_vm1, %v6388_v60, %v1211_v28  ;;  %v1283_v39 = vor.u32 %v1282_v30, %v1279_v29  ;;  %v1288_v40 = vrot.slane %v1286_v31, 3  ;;  %v5587_v41 = vpack.c.bf16 %v893_v27, %v893_v27 }
  0x30   : > { %5784 = vmatmul.mubr.msk.bf16.vlgmr.msra.gmra.mxu0 %vm1345_vm2, %v6423_v38  ;;  %v1220_v43 = vor.u32 %v1219_v33, %v1216_v32  ;;  %v1291_v44 = vrot.slane %v1289_v34, 4  ;;  %v6110_v45 = vld [vmem:[#allocation2 + $0x2c] sm:$0xff]   ;;  %v5588_v46 = vpack.c.bf16 %v894_v35, %v894_v35  ;;  %v848_v47 = vmul.f32 %v6299_v5, %v810_v13 }
  0x31   : > { %v6431_v49 = vsel %vm1186_vm1, %v1274_v14, %v1283_v39  ;;  %5850 = vmatpush3.bf16.msra.mxu0 %v6289_v4  ;;  %1053 = vst.msk [vmem:[#allocation2 + $0x6c] sm:$0xf] %vm753_vm0, %v5587_v41  ;;  %v879_v50 = vmax.f32 %v847_v15, 0.0  ;;  %v863_v51 = vmul.f32 %v6299_v5, %v825_v16  ;;  %v864_v52 = vmul.f32 %v6299_v5, %v826_v17  ;;  %v1064_v34 = vld [vmem:[#allocation2 + $0xc] sm:$0xf] }
  0x32   : > { %5800 = vmatmul.mubr.msk.bf16.vlgmr.msra.gmra.mxu1 %vm1345_vm2, %v6431_v49  ;;  %v6442_v55 = vsel %vm1186_vm1, %v1211_v28, %v1220_v43  ;;  %v6444_v56 = vor.u32 %v1291_v44, %v1288_v40  ;;  %v1223_v57 = vshrl.u32 %v6110_v45, 16  ;;  %v1226_v4 = vshll.u32 %v6110_v45, 16  ;;  %1054 = vst.msk [vmem:[#allocation2 + $0x70] sm:$0xf] %vm753_vm0, %v5588_v46  ;;  %5917 = vmatprep.subr.bf16.mxu0 %v6419_v37 }
  0x33   : > { %5816 = vmatpush3.bf16.msra.mxu1 %v6283_v3  ;;  %5787 = vmatprep.mubr.msk.bf16.mxu0 %vm1345_vm2, %v6442_v55  ;;  %v880_v61 = vmax.f32 %v848_v47, 0.0  ;;  %v5573_v62 = vpack.c.bf16 %v879_v50, %v879_v50  ;;  %v895_v63 = vmax.f32 %v863_v51, 0.0  ;;  %v896_v2 = vmax.f32 %v864_v52, 0.0  ;;  %v793_v47 = vld [vmem:[%s6294_s10 + $0xf8] sm:$0xff] }
  0x34   : > { %v6456_v7 = vsel %vm1186_vm1, %v1283_v39, %v6444_v56  ;;  %v1225_v8 = vrot.slane %v1223_v57, 3  ;;  %v1228_v9 = vrot.slane %v1226_v4, 4  ;;  %v811_v10 = vsub.f32 %v773_v42, %v6272_v1  ;;  %5883 = vmatprep.subr.bf16.mxu1 %v6414_v36  ;;  %v6119_v42 = vld [vmem:[#allocation2 + $0x4] sm:$0xf8]  }
  0x35   : > { %5803 = vmatprep.mubr.msk.bf16.mxu1 %vm1345_vm2, %v6456_v7  ;;  %v5574_v3 = vpack.c.bf16 %v880_v61, %v880_v61  ;;  %1039 = vst.msk [vmem:[#allocation2 + $0x34] sm:$0xf] %vm753_vm0, %v5573_v62  ;;  %v5589_v12 = vpack.c.bf16 %v895_v63, %v895_v63  ;;  %v5590_v13 = vpack.c.bf16 %v896_v2, %v896_v2 }
  0x36   : > { %v812_v14 = vsub.f32 %v774_v48, %v6272_v1  ;;  %v6465_v15 = vor.u32 %v1228_v9, %v1225_v8  ;;  %v849_v16 = vmul.f32 %v6299_v5, %v811_v10  ;;  %v827_v17 = vsub.f32 %v789_v53, %v6272_v1 }
  0x37   : > { %v828_v18 = vsub.f32 %v790_v54, %v6272_v1  ;;  %1040 = vst.msk [vmem:[#allocation2 + $0x38] sm:$0xf] %vm753_vm0, %v5574_v3  ;;  %1055 = vst.msk [vmem:[#allocation2 + $0x74] sm:$0xf] %vm753_vm0, %v5589_v12  ;;  %v813_v20 = vsub.f32 %v775_v58, %v6272_v1  ;;  %v814_v21 = vsub.f32 %v776_v59, %v6272_v1  ;;  %v1565_v9 = vshrl.u32 %v6119_v42, 16 }
  0x38   : > { %1056 = vst.msk [vmem:[#allocation2 + $0x78] sm:$0xf] %vm753_vm0, %v5590_v13  ;;  %v850_v19 = vmul.f32 %v6299_v5, %v812_v14  ;;  %v829_v22 = vsub.f32 %v791_v6, %v6272_v1  ;;  %v6479_v24 = vsel %vm1186_vm1, %v1220_v43, %v6465_v15  ;;  %v881_v26 = vmax.f32 %v849_v16, 0.0  ;;  %v6120_v13 = vld [vmem:[#allocation2 + $0x14] sm:$0xf8]  }
  0x39   : > { %v865_v27 = vmul.f32 %v6299_v5, %v827_v17  ;;  %v866_v28 = vmul.f32 %v6299_v5, %v828_v18  ;;  %5788 = vmatmul.mubr.msk.bf16.gmra.mxu0 %vm1345_vm2, %v6479_v24  ;;  %v6111_v29 = vld [vmem:[#allocation2 + $0x6c] sm:$0xff]   ;;  %v851_v31 = vmul.f32 %v6299_v5, %v813_v20  ;;  %v852_v32 = vmul.f32 %v6299_v5, %v814_v21 }
  0x3a   : > { %v882_v30 = vmax.f32 %v850_v19, 0.0  ;;  %v830_v33 = vsub.f32 %v792_v11, %v6272_v1  ;;  %v5575_v35 = vpack.c.bf16 %v881_v26, %v881_v26  ;;  %v867_v41 = vmul.f32 %v6299_v5, %v829_v22 }
  0x3b   : > { %v897_v39 = vmax.f32 %v865_v27, 0.0  ;;  %v898_v40 = vmax.f32 %v866_v28, 0.0  ;;  %v1295_v43 = vshrl.u32 %v6111_v29, 16  ;;  %v1298_v44 = vshll.u32 %v6111_v29, 16 }
  0x3c   : > { %v5576_v45 = vpack.c.bf16 %v882_v30, %v882_v30  ;;  %v883_v46 = vmax.f32 %v851_v31, 0.0  ;;  %1041 = vst.msk [vmem:[#allocation2 + $0x3c] sm:$0xf] %vm753_vm0, %v5575_v35  ;;  %v884_v51 = vmax.f32 %v852_v32, 0.0  ;;  %v868_v52 = vmul.f32 %v6299_v5, %v830_v33  ;;  %v6121_v35 = vld [vmem:[#allocation2 + $0x1c] sm:$0xff]  }
  0x3d   : > { %v5591_v48 = vpack.c.bf16 %v897_v39, %v897_v39  ;;  %v5592_v50 = vpack.c.bf16 %v898_v40, %v898_v40  ;;  %v1297_v53 = vrot.slane %v1295_v43, 3  ;;  %v1300_v54 = vrot.slane %v1298_v44, 4 }
  0x3e   : > { %1042 = vst.msk [vmem:[#allocation2 + $0x40] sm:$0xf] %vm753_vm0, %v5576_v45  ;;  %v5577_v57 = vpack.c.bf16 %v883_v46, %v883_v46  ;;  %v899_v4 = vmax.f32 %v867_v41, 0.0  ;;  %v6112_v58 = vld [vmem:[#allocation2 + $0x34] sm:$0xff]   ;;  %v5578_v59 = vpack.c.bf16 %v884_v51, %v884_v51  ;;  %v900_v61 = vmax.f32 %v868_v52, 0.0 }
  0x3f   : > { %1057 = vst.msk [vmem:[#allocation2 + $0x7c] sm:$0xf] %vm753_vm0, %v5591_v48  ;;  %1058 = vst.msk [vmem:[#allocation2 + $0x80] sm:$0xf] %vm753_vm0, %v5592_v50  ;;  %v831_v62 = vsub.f32 %v793_v47, %v6272_v1  ;;  %v5290_v63 = vcombine.low %v1064_v34, %v6364_v25  ;;  %v1301_v2 = vor.u32 %v1300_v54, %v1297_v53  ;;  %v6113_v6 = vld [vmem:[#allocation2 + $0x74] sm:$0xff]   ;;  %v1232_v10 = vshrl.u32 %v6112_v58, 16 }
  0x40   : > { %1043 = vst.msk [vmem:[#allocation2 + $0x44] sm:$0xf] %vm753_vm0, %v5577_v57  ;;  %v5593_v8 = vpack.c.bf16 %v899_v4, %v899_v4  ;;  %v1235_v11 = vshll.u32 %v6112_v58, 16  ;;  %1044 = vst.msk [vmem:[#allocation2 + $0x48] sm:$0xf] %vm753_vm0, %v5578_v59  ;;  %v5594_v3 = vpack.c.bf16 %v900_v61, %v900_v61  ;;  %v1304_v1 = vshrl.u32 %v6113_v6, 16 }
  0x41   : > { %v869_v12 = vmul.f32 %v6299_v5, %v831_v62  ;;  %v6502_v14 = vsel %vm1186_vm1, %v6444_v56, %v1301_v2  ;;  %v1307_v25 = vshll.u32 %v6113_v6, 16  ;;  %v1568_v16 = vshll.u32 %v6119_v42, 16  ;;  %v6123_v50 = vld [vmem:[#allocation2 + $0x24] sm:$0xff]  }
  0x42   : > { %1059 = vst.msk [vmem:[#allocation2 + $0x84] sm:$0xf] %vm753_vm0, %v5593_v8  ;;  %5804 = vmatmul.mubr.msk.bf16.gmra.mxu1 %vm1345_vm2, %v6502_v14  ;;  %v1234_v17 = vrot.slane %v1232_v10, 3  ;;  %v1237_v18 = vrot.slane %v1235_v11, 4  ;;  %1060 = vst.msk [vmem:[#allocation2 + $0x88] sm:$0xf] %vm753_vm0, %v5594_v3 }
  0x43   : > { %v901_v19 = vmax.f32 %v869_v12, 0.0  ;;  %v1306_v20 = vrot.slane %v1304_v1, 3  ;;  %v1309_v5 = vrot.slane %v1307_v25, 4  ;;  %v6508_v21 = vrot.slane %v1565_v9, 3 }
  0x44   : > { %v1573_v22 = vshrl.u32 %v5290_v63, 16  ;;  %v1238_v56 = vor.u32 %v1237_v18, %v1234_v17  ;;  %v1576_v28 = vshll.u32 %v5290_v63, 16  ;;  %v6510_v31 = vrot.slane %v1568_v16, 4  ;;  %v6125_v16 = vld [vmem:[#allocation2 + $0x2c] sm:$0xff]  }
  0x45   : > { %v6114_v26 = vld [vmem:[#allocation2 + $0x3c] sm:$0xff]   ;;  %v5595_v27 = vpack.c.bf16 %v901_v19, %v901_v19  ;;  %v1310_v29 = vor.u32 %v1309_v5, %v1306_v20  ;;  %v1887_v39 = vshrl.u32 %v6120_v13, 16  ;;  %v1890_v48 = vshll.u32 %v6120_v13, 16 }
  0x46   : > { %v6115_v30 = vld [vmem:[#allocation2 + $0x7c] sm:$0xff]   ;;  %v6514_v32 = vsel %vm1186_vm1, %v6465_v15, %v1238_v56  ;;  %v1241_v33 = vshrl.u32 %v6114_v26, 16  ;;  %v1244_v34 = vshll.u32 %v6114_v26, 16  ;;  %v1575_v44 = vrot.slane %v1573_v22, 3 }
  0x47   : > { %1061 = vst.msk [vmem:[#allocation2 + $0x8c] sm:$0xf] %vm753_vm0, %v5595_v27  ;;  %5791 = vmatprep.mubr.msk.bf16.mxu0 %vm1345_vm2, %v6514_v32  ;;  %v6520_v40 = vsel %vm1186_vm1, %v1301_v2, %v1310_v29  ;;  %v1313_v41 = vshrl.u32 %v6115_v30, 16  ;;  %v1316_v42 = vshll.u32 %v6115_v30, 16  ;;  %v6116_v43 = vld [vmem:[#allocation2 + $0x44] sm:$0xff]   ;;  %v1578_v47 = vrot.slane %v1576_v28, 4 }
  0x48   : > { %5807 = vmatprep.mubr.msk.bf16.mxu1 %vm1345_vm2, %v6520_v40  ;;  %v1243_v15 = vrot.slane %v1241_v33, 3  ;;  %v1246_v45 = vrot.slane %v1244_v34, 4  ;;  %v1250_v53 = vshrl.u32 %v6116_v43, 16  ;;  %v1253_v54 = vshll.u32 %v6116_v43, 16  ;;  %v6126_v30 = vld [vmem:[#allocation2 + $0x34] sm:$0xff]  }
  0x49   : > { %v6524_v46 = vld [vmem:[#allocation2 + $0x84] sm:$0xf]  ;;  %v1315_v51 = vrot.slane %v1313_v41, 3  ;;  %v1318_v52 = vrot.slane %v1316_v42, 4  ;;  %v1098_v57 = vld [vmem:[#allocation2 + $0x88] sm:$0xf]  ;;  %v1571_v11 = vor.u32 %v6510_v31, %v6508_v21  ;;  %v1579_v1 = vor.u32 %v1578_v47, %v1575_v44 }
  0x4a   : > { %v1247_v4 = vor.u32 %v1246_v45, %v1243_v15  ;;  %v5270_v58 = vcombine.low %v6524_v46, %v1098_v57  ;;  %v1889_v59 = vrot.slane %v1887_v39, 3  ;;  %v1892_v61 = vrot.slane %v1890_v48, 4  ;;  %v6127_v15 = vld [vmem:[#allocation2 + $0x3c] sm:$0xff]  }
  0x4b   : > { %v6527_v62 = vor.u32 %v1318_v52, %v1315_v51  ;;  %v1252_v63 = vrot.slane %v1250_v53, 3  ;;  %v1255_v2 = vrot.slane %v1253_v54, 4  ;;  %v1895_v6 = vshrl.u32 %v6121_v35, 16 }
  0x4c   : > { %v6530_v8 = vsel %vm1186_vm1, %v1238_v56, %v1247_v4  ;;  %v1322_v9 = vshrl.u32 %v5270_v58, 16  ;;  %v1325_v10 = vshll.u32 %v5270_v58, 16  ;;  %v1898_v25 = vshll.u32 %v6121_v35, 16 }
  0x4d   : > { %5792 = vmatmul.mubr.msk.bf16.gmra.mxu0 %vm1345_vm2, %v6530_v8  ;;  %v6538_v3 = vsel %vm1186_vm1, %v1310_v29, %v6527_v62  ;;  %v1256_v12 = vor.u32 %v1255_v2, %v1252_v63  ;;  %v1897_v19 = vrot.slane %v1895_v6, 3  ;;  %v1904_v20 = vshrl.u32 %v6123_v50, 16  ;;  %v6128_v63 = vld [vmem:[#allocation2 + $0x44] sm:$0xff]  }
  0x4e   : > { %v6118_v13 = vld [vmem:[#allocation2 + $0x8c] ss:$0 sps:$4 sm:$0xff]   ;;  %5808 = vmatmul.mubr.msk.bf16.gmra.mxu1 %vm1345_vm2, %v6538_v3  ;;  %v1324_v17 = vrot.slane %v1322_v9, 3  ;;  %v1327_v18 = vrot.slane %v1325_v10, 4  ;;  %v1893_v56 = vor.u32 %v1892_v61, %v1889_v59  ;;  %v1900_v28 = vrot.slane %v1898_v25, 4 }
  0x4f   : > { %v6543_v5 = vsel %vm1186_vm1, %v1247_v4, %v1256_v12  ;;  %v1331_v21 = vshrl.u32 %v6118_v13, 16  ;;  %v1334_v22 = vshll.u32 %v6118_v13, 16  ;;  %v6549_v27 = vsel %vm1186_vm1, %v1256_v12, %v6391_v0  ;;  %v6129_v10 = vld [vmem:[#allocation2 + $0x4c] sm:$0xff]  }
  0x50   : > { %5795 = vmatprep.mubr.msk.bf16.mxu0 %vm1345_vm2, %v6543_v5  ;;  %v1328_v26 = vor.u32 %v1327_v18, %v1324_v17  ;;  %v1907_v29 = vshll.u32 %v6123_v50, 16  ;;  %v1913_v34 = vshrl.u32 %v6125_v16, 16  ;;  %v1916_v35 = vshll.u32 %v6125_v16, 16  ;;  %v6575_v13 = vld [vmem:[%s7819_s3 + $0x28] sm:$0xff]  }
  0x51   : > { %v1333_v31 = vrot.slane %v1331_v21, 3  ;;  %v1336_v33 = vrot.slane %v1334_v22, 4  ;;  %v1901_v41 = vor.u32 %v1900_v28, %v1897_v19  ;;  %v1906_v42 = vrot.slane %v1904_v20, 3  ;;  %v6130_v19 = vld [vmem:[#allocation2 + $0x54] sm:$0xff]  }
  0x52   : > { %v1329_v39 = vsel %vm1186_vm1, %v6527_v62, %v1328_v26  ;;  %v1909_v43 = vrot.slane %v1907_v29, 4  ;;  %v1580_v0 = vsel %vm1186_vm1, %v1571_v11, %v1579_v1  ;;  %v1915_v48 = vrot.slane %v1913_v34, 3  ;;  %v6568_v11 = vld [vmem:[%s7819_s3 + $0x38] sm:$0xff]  }
  0x53   : > { %5811 = vmatprep.mubr.msk.bf16.mxu1 %vm1345_vm2, %v1329_v39  ;;  %v1337_v44 = vor.u32 %v1336_v33, %v1333_v31  ;;  %v1902_v45 = vsel %vm1186_vm1, %v1893_v56, %v1901_v41  ;;  %v1918_v50 = vrot.slane %v1916_v35, 4  ;;  %v1922_v52 = vshrl.u32 %v6126_v30, 16 }
  0x54   : > { %v1910_v51 = vor.u32 %v1909_v43, %v1906_v42  ;;  %v1925_v53 = vshll.u32 %v6126_v30, 16  ;;  %v1931_v54 = vshrl.u32 %v6127_v15, 16  ;;  %v1934_v57 = vshll.u32 %v6127_v15, 16  ;;  %v6132_v42 = vld [vmem:[#allocation2 + $0x64] sm:$0xff]   ;;  %v6133_v43 = vld [vmem:[#allocation2 + $0x6c] sm:$0xff]  }
  0x55   : > { %5796 = vmatmul.mubr.msk.bf16.gmra.mxu0 %vm1345_vm2, %v6549_v27  ;;  %v1338_v47 = vsel %vm1186_vm1, %v1328_v26, %v1337_v44  ;;  %v1919_v4 = vor.u32 %v1918_v50, %v1915_v48  ;;  %v1924_v59 = vrot.slane %v1922_v52, 3  ;;  %v1581_v2 = vsel %vm1186_vm1, %v1579_v1, %v6388_v60  ;;  %v6131_v26 = vld [vmem:[#allocation2 + $0x5c] sm:$0xff]  }
  0x56   : > { %5812 = vmatmul.mubr.msk.bf16.gmra.mxu1 %vm1345_vm2, %v1338_v47  ;;  %5851 = vmatprep.mubr.msk.bf16.mxu0 %vm1345_vm2, %v1902_v45  ;;  %v1911_v58 = vsel %vm1186_vm1, %v1901_v41, %v1910_v51  ;;  %v1927_v61 = vrot.slane %v1925_v53, 4  ;;  %v1933_v6 = vrot.slane %v1931_v54, 3  ;;  %v1936_v9 = vrot.slane %v1934_v57, 4 }
  0x57   : > { %5817 = vmatprep.mubr.msk.bf16.mxu1 %vm1345_vm2, %v1580_v0  ;;  %v1920_v12 = vsel %vm1186_vm1, %v1910_v51, %v1919_v4  ;;  %v1940_v1 = vshrl.u32 %v6128_v63, 16  ;;  %v1943_v25 = vshll.u32 %v6128_v63, 16  ;;  %v1949_v17 = vshrl.u32 %v6129_v10, 16 }
  0x58   : > { %v1928_v60 = vor.u32 %v1927_v61, %v1924_v59  ;;  %v1937_v16 = vor.u32 %v1936_v9, %v1933_v6  ;;  %v1952_v18 = vshll.u32 %v6129_v10, 16  ;;  %v1958_v28 = vshrl.u32 %v6130_v19, 16  ;;  %v6134_v59 = vld [vmem:[#allocation2 + $0x74] sm:$0xff]   ;;  %v6135_v61 = vld [vmem:[#allocation2 + $0x7c] sm:$0xff]  }
  0x59   : > { %v1942_v20 = vrot.slane %v1940_v1, 3  ;;  %v1945_v21 = vrot.slane %v1943_v25, 4  ;;  %v1961_v30 = vshll.u32 %v6130_v19, 16  ;;  %v1967_v35 = vshrl.u32 %v6131_v26, 16  ;;  %v6136_v1 = vld [vmem:[#allocation2 + $0x84] sm:$0xff]   ;;  %v6137_v25 = vld [vmem:[#allocation2 + $0x8c] sm:$0xff]  }
  0x5a   : > { %v1938_v22 = vsel %vm1186_vm1, %v1928_v60, %v1937_v16  ;;  %v1954_v56 = vrot.slane %v1952_v18, 4  ;;  %v1970_v39 = vshll.u32 %v6131_v26, 16  ;;  %v1960_v15 = vrot.slane %v1958_v28, 3 }
  0x5b   : > { %v1946_v29 = vor.u32 %v1945_v21, %v1942_v20  ;;  %v1969_v47 = vrot.slane %v1967_v35, 3  ;;  %v1976_v51 = vshrl.u32 %v6132_v42, 16  ;;  %v1979_v52 = vshll.u32 %v6132_v42, 16 }
  0x5c   : > { %v1972_v48 = vrot.slane %v1970_v39, 4  ;;  %v1985_v54 = vshrl.u32 %v6133_v43, 16  ;;  %v1988_v57 = vshll.u32 %v6133_v43, 16  ;;  %v1994_v6 = vshrl.u32 %v6134_v59, 16  ;;  %v6140_v43 = vld [vmem:[#allocation2 + $0x8] sm:$0xff]  }
  0x5d   : > { %5852 = vmatmul.mubr.msk.bf16.vlgmr.msra.gmra.mxu0 %vm1345_vm2, %v1911_v58  ;;  %v1947_v44 = vsel %vm1186_vm1, %v1937_v16, %v1946_v29  ;;  %v1981_v58 = vrot.slane %v1979_v52, 4  ;;  %v1997_v9 = vshll.u32 %v6134_v59, 16  ;;  %v2012_v20 = vshrl.u32 %v6136_v1, 16  ;;  %v6154_v52 = vld [vmem:[#allocation2 + $0x70] sm:$0xff]  }
  0x5e   : > { %5818 = vmatmul.mubr.msk.bf16.vlgmr.msra.gmra.mxu1 %vm1345_vm2, %v1581_v2  ;;  %5918 = vmatpush3.bf16.msra.mxu0 %v6419_v37  ;;  %v1929_v37 = vsel %vm1186_vm1, %v1919_v4, %v1928_v60  ;;  %v1973_v53 = vor.u32 %v1972_v48, %v1969_v47  ;;  %v1990_v2 = vrot.slane %v1988_v57, 4  ;;  %v2006_v60 = vshll.u32 %v6135_v61, 16  ;;  %v6149_v47 = vld [vmem:[#allocation2 + $0x48] sm:$0xff]   ;;  %v6150_v48 = vld [vmem:[#allocation2 + $0x50] sm:$0xff]  }
  0x5f   : > { %5884 = vmatpush3.bf16.msra.mxu1 %v6414_v36  ;;  %5821 = vmatprep.mubr.msk.bf16.mxu1 %vm1345_vm2, %v6423_v38  ;;  %v1951_v36 = vrot.slane %v1949_v17, 3  ;;  %v5291_v38 = vcombine.low %v6524_v46, %v6524_v46  ;;  %v1996_v17 = vrot.slane %v1994_v6, 3  ;;  %v1999_v18 = vrot.slane %v1997_v9, 4  ;;  %v6157_v6 = vld [vmem:[#allocation2 + $0x88] sm:$0xff]  }
  0x60   : > { %5855 = vmatprep.mubr.msk.bf16.mxu0 %vm1345_vm2, %v1920_v12  ;;  %5951 = vmatprep.subr.bf16.mxu1 %v6568_v11  ;;  %v2003_v12 = vshrl.u32 %v6135_v61, 16  ;;  %v2015_v21 = vshll.u32 %v6136_v1, 16  ;;  %v2014_v26 = vrot.slane %v2012_v20, 3 }
  0x61   : > { %5985 = vmatprep.subr.bf16.mxu0 %v6575_v13  ;;  %v1583_v31 = vshrl.u32 %v5291_v38, 16  ;;  %v1586_v33 = vshll.u32 %v5291_v38, 16  ;;  %v1955_v34 = vor.u32 %v1954_v56, %v1951_v36  ;;  %v2024_v36 = vshll.u32 %v6137_v25, 16  ;;  %v6138_v38 = vld [vmem:[#allocation2 + $0x94] ss:$0 sps:$4 sm:$0xff]  }
  0x63   : > { %v1585_v41 = vrot.slane %v1583_v31, 3  ;;  %v1588_v46 = vrot.slane %v1586_v33, 4  ;;  %v1956_v45 = vsel %vm1186_vm1, %v1946_v29, %v1955_v34  ;;  %v2017_v29 = vrot.slane %v2015_v21, 4  ;;  %v6162_v21 = vld [vmem:[#allocation2 + $0x20] sm:$0xff]  }
  0x64   : > { %v2026_v31 = vrot.slane %v2024_v36, 4  ;;  %v6165_v36 = vld [vmem:[#allocation2 + $0x28] sm:$0xff]  }
  0x65   : > { %5856 = vmatmul.mubr.msk.bf16.gmra.mxu0 %vm1345_vm2, %v1929_v37  ;;  %v1589_v0 = vor.u32 %v1588_v46, %v1585_v41  ;;  %v2008_v37 = vrot.slane %v2006_v60, 4 }
  0x66   : > { %5822 = vmatmul.mubr.msk.bf16.gmra.mxu1 %vm1345_vm2, %v6442_v55  ;;  %5859 = vmatprep.mubr.msk.bf16.mxu0 %vm1345_vm2, %v1938_v22  ;;  %v1963_v55 = vrot.slane %v1961_v30, 4  ;;  %v2021_v22 = vshrl.u32 %v6137_v25, 16 }
  0x67   : > { %5825 = vmatprep.mubr.msk.bf16.mxu1 %vm1345_vm2, %v6479_v24  ;;  %v6599_v50 = vsel %vm1186_vm1, %v6527_v62, %v1589_v0  ;;  %v1978_v62 = vrot.slane %v1976_v51, 3  ;;  %v6145_v0 = vld [vmem:[#allocation2 + $0x28] sm:$0xff]  }
  0x68   : > { %v1964_v24 = vor.u32 %v1963_v55, %v1960_v15  ;;  %v2023_v30 = vrot.slane %v2021_v22, 3  ;;  %v6144_v15 = vld [vmem:[#allocation2 + $0x20] sm:$0xff]   ;;  %v6648_v55 = vld [vmem:[%s7819_s3 + $0x10] sm:$0xff]   ;;  %v6153_v51 = vld [vmem:[#allocation2 + $0x68] sm:$0xff]  }
  0x6a   : > { %v1965_v4 = vsel %vm1186_vm1, %v1955_v34, %v1964_v24  ;;  %v1974_v63 = vsel %vm1186_vm1, %v1964_v24, %v1973_v53  ;;  %v2030_v34 = vshrl.u32 %v6138_v38, 16  ;;  %v2027_v35 = vor.u32 %v2026_v31, %v2023_v30  ;;  %v6152_v24 = vld [vmem:[#allocation2 + $0x60] sm:$0xff]  }
  0x6c   : > { %v2032_v41 = vrot.slane %v2030_v34, 3 }
  0x6d   : > { %5860 = vmatmul.mubr.msk.bf16.gmra.mxu0 %vm1345_vm2, %v1947_v44  ;;  %v6139_v44 = vld [vmem:[#allocation2 + $0x10] sm:$0xff]  }
  0x6e   : > { %5826 = vmatmul.mubr.msk.bf16.gmra.mxu1 %vm1345_vm2, %v6514_v32  ;;  %5863 = vmatprep.mubr.msk.bf16.mxu0 %vm1345_vm2, %v1956_v45  ;;  %v1987_v32 = vrot.slane %v1985_v54, 3  ;;  %v6146_v45 = vld [vmem:[#allocation2 + $0x30] sm:$0xff]   ;;  %v6160_v54 = vld [vmem:[#allocation2 + $0x18] sm:$0xff]  }
  0x6f   : > { %5829 = vmatprep.mubr.msk.bf16.mxu1 %vm1345_vm2, %v6530_v8  ;;  %v1982_v8 = vor.u32 %v1981_v58, %v1978_v62  ;;  %v6156_v62 = vld [vmem:[#allocation2 + $0x80] sm:$0xff]   ;;  %v3515_v61 = vshll.u32 %v6160_v54, 16  ;;  %v3519_v9 = vshrl.u32 %v6160_v54, 16 }
  0x70   : > { %v1991_v10 = vor.u32 %v1990_v2, %v1987_v32 }
  0x71   : > { %v1983_v16 = vsel %vm1186_vm1, %v1973_v53, %v1982_v8  ;;  %v6159_v53 = vld [vmem:[#allocation2 + $0x10] sm:$0xff]   ;;  %v3517_v2 = vrot.slane %v3515_v61, 1 }
  0x72   : > { %v1992_v19 = vsel %vm1186_vm1, %v1982_v8, %v1991_v10  ;;  %v3510_v57 = vshll.u32 %v6159_v53, 16  ;;  %v3508_v58 = vshrl.u32 %v6159_v53, 16  ;;  %v6166_v8 = vld [vmem:[#allocation2 + $0x28] sm:$0xff]  }
  0x73   : > { %v3531_v25 = vshll.u32 %v6166_v8, 16  ;;  %v3535_v22 = vshrl.u32 %v6166_v8, 16  ;;  %v6177_v8 = vld [vmem:[#allocation2 + $0x58] sm:$0xff]  }
  0x74   : > { %v6683_v59 = vrot.slane %v3510_v57, 1  ;;  %v6182_v57 = vld [vmem:[#allocation2 + $0x68] sm:$0xff]  }
  0x75   : > { %5864 = vmatmul.mubr.msk.bf16.gmra.mxu0 %vm1345_vm2, %v1965_v4  ;;  %v6155_v4 = vld [vmem:[#allocation2 + $0x78] sm:$0xff]  }
  0x76   : > { %5830 = vmatmul.mubr.msk.bf16.gmra.mxu1 %vm1345_vm2, %v6543_v5  ;;  %5867 = vmatprep.mubr.msk.bf16.mxu0 %vm1345_vm2, %v1974_v63  ;;  %v2005_v5 = vrot.slane %v2003_v12, 3  ;;  %v6163_v63 = vld [vmem:[#allocation2 + $0x20] sm:$0xff]   ;;  %v3513_v32 = vor.u32 %v6683_v59, %v3508_v58  ;;  %v6158_v12 = vld [vmem:[#allocation2 + $0x18] sm:$0xff]   ;;  %v6175_v58 = vld [vmem:[#allocation2 + $0x50] sm:$0xff]  }
  0x77   : > { %5833 = vmatprep.mubr.msk.bf16.mxu1 %vm1345_vm2, %v6549_v27  ;;  %v2000_v27 = vor.u32 %v1999_v18, %v1996_v17  ;;  %v3527_v1 = vshrl.u32 %v6163_v63, 16  ;;  %v3521_v17 = vor.u32 %v3519_v9, %v3517_v2 }
  0x78   : > { %v2009_v56 = vor.u32 %v2008_v37, %v2005_v5  ;;  %v6691_v60 = vsel %vm3506_vm3, %v3513_v32, %v3517_v2  ;;  %v3533_v37 = vrot.slane %v3531_v25, 1  ;;  %v6184_v25 = vld [vmem:[#allocation2 + $0x70] sm:$0xff]  }
  0x79   : > { %v2001_v28 = vsel %vm1186_vm1, %v1991_v10, %v2000_v27  ;;  %v3523_v10 = vshll.u32 %v6163_v63, 16 }
  0x7a   : > { %v2010_v33 = vsel %vm1186_vm1, %v2000_v27, %v2009_v56  ;;  %v3537_v30 = vor.u32 %v3535_v22, %v3533_v37 }
  0x7b   : > { %v3525_v18 = vrot.slane %v3523_v10, 1  ;;  %v3595_v10 = vshll.u32 %v6182_v57, 16 }
  0x7d   : > { %5868 = vmatmul.mubr.msk.bf16.gmra.mxu0 %vm1345_vm2, %v1983_v16  ;;  %v6168_v16 = vld [vmem:[#allocation2 + $0x30] sm:$0xff]   ;;  %v3529_v5 = vor.u32 %v3527_v1, %v3525_v18  ;;  %v6699_v27 = vsel %vm3506_vm3, %v3521_v17, %v3525_v18 }
  0x7e   : > { %5834 = vmatmul.mubr.msk.bf16.gmra.mxu1 %vm1345_vm2, %v6407_v23  ;;  %5871 = vmatprep.mubr.msk.bf16.mxu0 %vm1345_vm2, %v1992_v19  ;;  %v2018_v23 = vor.u32 %v2017_v29, %v2014_v26  ;;  %v6170_v19 = vld [vmem:[#allocation2 + $0x38] sm:$0xff]   ;;  %v3539_v20 = vshll.u32 %v6168_v16, 16  ;;  %v6172_v29 = vld [vmem:[#allocation2 + $0x40] sm:$0xff]  }
  0x7f   : > { %5837 = vmatprep.mubr.msk.bf16.mxu1 %vm1345_vm2, %v6431_v49  ;;  %v2033_v49 = vshll.u32 %v6138_v38, 16  ;;  %v3547_v26 = vshll.u32 %v6170_v19, 16  ;;  %v6704_v38 = vsel %vm3506_vm3, %v3529_v5, %v3533_v37  ;;  %v3555_v34 = vshll.u32 %v6172_v29, 16  ;;  %v6186_v5 = vld [vmem:[#allocation2 + $0x78] sm:$0xff]  }
  0x80   : > { %v2019_v39 = vsel %vm1186_vm1, %v2009_v56, %v2018_v23  ;;  %v2028_v42 = vsel %vm1186_vm1, %v2018_v23, %v2027_v35  ;;  %v3543_v56 = vshrl.u32 %v6168_v16, 16  ;;  %v6174_v23 = vld [vmem:[#allocation2 + $0x48] sm:$0xff]  }
  0x81   : > { %v2035_v46 = vrot.slane %v2033_v49, 4  ;;  %v6167_v49 = vld [vmem:[#allocation2 + $0x30] sm:$0xff]  }
  0x85   : > { %5872 = vmatmul.mubr.msk.bf16.gmra.mxu0 %vm1345_vm2, %v2001_v28  ;;  %v3541_v28 = vrot.slane %v3539_v20, 1  ;;  %v3603_v20 = vshll.u32 %v6184_v25, 16 }
  0x86   : > { %5838 = vmatmul.mubr.msk.bf16.gmra.mxu1 %vm1345_vm2, %v6456_v7  ;;  %5875 = vmatprep.mubr.msk.bf16.mxu0 %vm1345_vm2, %v2010_v33  ;;  %v2036_v7 = vor.u32 %v2035_v46, %v2032_v41  ;;  %v3549_v33 = vrot.slane %v3547_v26, 1  ;;  %v6169_v41 = vld [vmem:[#allocation2 + $0x38] sm:$0xff]   ;;  %v6181_v26 = vld [vmem:[#allocation2 + $0x68] sm:$0xff]  }
  0x87   : > { %5841 = vmatprep.mubr.msk.bf16.mxu1 %vm1345_vm2, %v6502_v14  ;;  %v3545_v31 = vor.u32 %v3543_v56, %v3541_v28  ;;  %v3599_v56 = vshrl.u32 %v6182_v57, 16 }
  0x88   : > { %v2037_v14 = vsel %vm1186_vm1, %v2027_v35, %v2036_v7  ;;  %v6713_v35 = vsel %vm3506_vm3, %v3537_v30, %v3541_v28  ;;  %v3563_v7 = vshll.u32 %v6174_v23, 16  ;;  %v3611_v30 = vshll.u32 %v6186_v5, 16 }
  0x89   : > { %v6716_v46 = vsel %vm3506_vm3, %v3545_v31, %v3549_v33 }
  0x8d   : > { %5876 = vmatmul.mubr.msk.bf16.gmra.mxu0 %vm1345_vm2, %v2019_v39  ;;  %v3551_v39 = vshrl.u32 %v6170_v19, 16  ;;  %v3597_v19 = vrot.slane %v3595_v10, 1 }
  0x8e   : > { %5842 = vmatmul.mubr.msk.bf16.gmra.mxu1 %vm1345_vm2, %v6520_v40  ;;  %5879 = vmatprep.mubr.msk.bf16.mxu0 %vm1345_vm2, %v2028_v42  ;;  %v6142_v40 = vld [vmem:[#allocation2 + $0x18] sm:$0xff]   ;;  %v3559_v42 = vshrl.u32 %v6172_v29, 16  ;;  %v3607_v29 = vshrl.u32 %v6184_v25, 16 }
  0x8f   : > { %5845 = vmatprep.mubr.msk.bf16.mxu1 %vm1345_vm2, %v6538_v3  ;;  %v6654_v3 = vld [vmem:[%s7819_s3 + $0x40] sm:$0xff]  }
  0x95   : > { %5880 = vmatmul.mubr.msk.bf16.gmra.mxu0 %vm1345_vm2, %v2037_v14  ;;  %v3557_v14 = vrot.slane %v3555_v34, 1 }
  0x96   : > { %5846 = vmatmul.mubr.msk.bf16.gmra.mxu1 %vm1345_vm2, %v6599_v50  ;;  %5919 = vmatprep.mubr.msk.bf16.mxu0 %vm1345_vm2, %v6140_v43  ;;  %v6151_v50 = vld [vmem:[#allocation2 + $0x58] sm:$0xff]   ;;  %v6176_v43 = vld [vmem:[#allocation2 + $0x50] sm:$0xff]  }
  0x97   : > { %5885 = vmatprep.mubr.msk.bf16.mxu1 %vm1345_vm2, %v6139_v44 }
  0x9d   : > { %5920 = vmatmul.mubr.msk.bf16.vlgmr.msra.gmra.mxu0 %vm1345_vm2, %v6139_v44  ;;  %v3553_v44 = vor.u32 %v3551_v39, %v3549_v33  ;;  %v3605_v33 = vrot.slane %v3603_v20, 1 }
  0x9e   : > { %5886 = vmatmul.mubr.msk.bf16.vlgmr.msra.gmra.mxu1 %vm1345_vm2, %v6142_v40  ;;  %5986 = vmatpush3.bf16.msra.mxu0 %v6575_v13  ;;  %v6147_v13 = vld [vmem:[#allocation2 + $0x38] sm:$0xff]  }
  0x9f   : > { %5952 = vmatpush3.bf16.msra.mxu1 %v6568_v11  ;;  %5889 = vmatprep.mubr.msk.bf16.mxu1 %vm1345_vm2, %v6144_v15  ;;  %v6148_v11 = vld [vmem:[#allocation2 + $0x40] sm:$0xff]   ;;  %v3609_v39 = vor.u32 %v3607_v29, %v3605_v33 }
  0xa0   : > { %5923 = vmatprep.mubr.msk.bf16.mxu0 %vm1345_vm2, %v6142_v40  ;;  %6019 = vmatprep.subr.bf16.mxu1 %v6648_v55  ;;  %v3561_v40 = vor.u32 %v3559_v42, %v3557_v14  ;;  %v6190_v42 = vld [vmem:[#allocation2 + $0x88] sm:$0xff]  }
  0xa1   : > { %6053 = vmatprep.subr.bf16.mxu0 %v6654_v3 }
  0xa5   : > { %5924 = vmatmul.mubr.msk.bf16.gmra.mxu0 %vm1345_vm2, %v6144_v15  ;;  %v3565_v15 = vrot.slane %v3563_v7, 1 }
  0xa6   : > { %5890 = vmatmul.mubr.msk.bf16.gmra.mxu1 %vm1345_vm2, %v6145_v0  ;;  %5927 = vmatprep.mubr.msk.bf16.mxu0 %vm1345_vm2, %v6145_v0  ;;  %v6171_v0 = vld [vmem:[#allocation2 + $0x40] sm:$0xff]  }
  0xa7   : > { %5893 = vmatprep.mubr.msk.bf16.mxu1 %vm1345_vm2, %v6146_v45 }
  0xad   : > { %5928 = vmatmul.mubr.msk.bf16.gmra.mxu0 %vm1345_vm2, %v6146_v45  ;;  %v6725_v45 = vsel %vm3506_vm3, %v3553_v44, %v3557_v14  ;;  %v6183_v44 = vld [vmem:[#allocation2 + $0x70] sm:$0xff]  }
  0xae   : > { %5894 = vmatmul.mubr.msk.bf16.gmra.mxu1 %vm1345_vm2, %v6147_v13  ;;  %5931 = vmatprep.mubr.msk.bf16.mxu0 %vm1345_vm2, %v6147_v13  ;;  %v3567_v13 = vshrl.u32 %v6174_v23, 16  ;;  %v6188_v23 = vld [vmem:[#allocation2 + $0x80] sm:$0xff]  }
  0xaf   : > { %5897 = vmatprep.mubr.msk.bf16.mxu1 %vm1345_vm2, %v6148_v11  ;;  %v3619_v14 = vshll.u32 %v6188_v23, 16 }
  0xb5   : > { %5932 = vmatmul.mubr.msk.bf16.gmra.mxu0 %vm1345_vm2, %v6148_v11  ;;  %v6173_v11 = vld [vmem:[#allocation2 + $0x48] sm:$0xff]  }
  0xb6   : > { %5898 = vmatmul.mubr.msk.bf16.gmra.mxu1 %vm1345_vm2, %v6149_v47  ;;  %5935 = vmatprep.mubr.msk.bf16.mxu0 %vm1345_vm2, %v6149_v47  ;;  %v6728_v47 = vsel %vm3506_vm3, %v3561_v40, %v3565_v15 }
  0xb7   : > { %5901 = vmatprep.mubr.msk.bf16.mxu1 %vm1345_vm2, %v6150_v48 }
  0xbd   : > { %5936 = vmatmul.mubr.msk.bf16.gmra.mxu0 %vm1345_vm2, %v6150_v48  ;;  %v3575_v48 = vshrl.u32 %v6176_v43, 16 }
  0xbe   : > { %5902 = vmatmul.mubr.msk.bf16.gmra.mxu1 %vm1345_vm2, %v6151_v50  ;;  %5939 = vmatprep.mubr.msk.bf16.mxu0 %vm1345_vm2, %v6151_v50 }
  0xbf   : > { %5905 = vmatprep.mubr.msk.bf16.mxu1 %vm1345_vm2, %v6152_v24 }
  0xc5   : > { %5940 = vmatmul.mubr.msk.bf16.gmra.mxu0 %vm1345_vm2, %v6152_v24 }
  0xc6   : > { %5906 = vmatmul.mubr.msk.bf16.gmra.mxu1 %vm1345_vm2, %v6153_v51  ;;  %5943 = vmatprep.mubr.msk.bf16.mxu0 %vm1345_vm2, %v6153_v51  ;;  %v6180_v51 = vld [vmem:[#allocation2 + $0x60] sm:$0xff]  }
  0xc7   : > { %5909 = vmatprep.mubr.msk.bf16.mxu1 %vm1345_vm2, %v6154_v52  ;;  %v3591_v9 = vshrl.u32 %v6180_v51, 16 }
  0xcd   : > { %5944 = vmatmul.mubr.msk.bf16.gmra.mxu0 %vm1345_vm2, %v6154_v52  ;;  %v3569_v52 = vor.u32 %v3567_v13, %v3565_v15  ;;  %v3615_v15 = vshrl.u32 %v6186_v5, 16  ;;  %v3627_v13 = vshll.u32 %v6190_v42, 16 }
  0xce   : > { %5910 = vmatmul.mubr.msk.bf16.gmra.mxu1 %vm1345_vm2, %v6155_v4  ;;  %5947 = vmatprep.mubr.msk.bf16.mxu0 %vm1345_vm2, %v6155_v4 }
  0xcf   : > { %5913 = vmatprep.mubr.msk.bf16.mxu1 %vm1345_vm2, %v6156_v62 }
  0xd5   : > { %5948 = vmatmul.mubr.msk.bf16.gmra.mxu0 %vm1345_vm2, %v6156_v62  ;;  %v3587_v62 = vshll.u32 %v6180_v51, 16  ;;  %v3621_v51 = vrot.slane %v3619_v14, 1 }
  0xd6   : > { %5914 = vmatmul.mubr.msk.bf16.gmra.mxu1 %vm1345_vm2, %v6157_v6  ;;  %5987 = vmatprep.mubr.msk.bf16.mxu0 %vm1345_vm2, %v6691_v60 }
  0xd7   : > { %5953 = vmatprep.mubr.msk.bf16.mxu1 %vm1345_vm2, %v6158_v12  ;;  %v3589_v12 = vrot.slane %v3587_v62, 1  ;;  %v3629_v62 = vrot.slane %v3627_v13, 1 }
  0xd9   : > { %v3593_v18 = vor.u32 %v3591_v9, %v3589_v12 }
  0xdb   : > { %v6766_v28 = vsel %vm3506_vm3, %v3593_v18, %v3597_v19 }
  0xdd   : > { %5988 = vmatmul.mubr.msk.bf16.vlgmr.msra.gmra.mxu0 %vm1345_vm2, %v6699_v27 }
  0xde   : > { %5954 = vmatmul.mubr.msk.bf16.vlgmr.msra.gmra.mxu1 %vm1345_vm2, %v6162_v21  ;;  %6054 = vmatpush3.bf16.msra.mxu0 %v6654_v3  ;;  %v3571_v3 = vshll.u32 %v6176_v43, 16  ;;  %v6179_v21 = vld [vmem:[#allocation2 + $0x60] sm:$0xff]  }
  0xdf   : > { %6020 = vmatpush3.bf16.msra.mxu1 %v6648_v55  ;;  %5957 = vmatprep.mubr.msk.bf16.mxu1 %vm1345_vm2, %v6165_v36  ;;  %v6178_v55 = vld [vmem:[#allocation2 + $0x58] sm:$0xff]  }
  0xe0   : > { %5991 = vmatprep.mubr.msk.bf16.mxu0 %vm1345_vm2, %v6704_v38  ;;  %v3579_v50 = vshll.u32 %v6178_v55, 16  ;;  %v3573_v24 = vrot.slane %v3571_v3, 1  ;;  %v3583_v32 = vshrl.u32 %v6178_v55, 16  ;;  %v6185_v55 = vld [vmem:[#allocation2 + $0x78] sm:$0xff]  }
  0xe2   : > { %v3577_v53 = vor.u32 %v3575_v48, %v3573_v24  ;;  %v3581_v54 = vrot.slane %v3579_v50, 1  ;;  %v6739_v61 = vsel %vm3506_vm3, %v3569_v52, %v3573_v24  ;;  %v6193_v50 = vld [vmem:[#allocation2 + $0x8] sm:$0xff]  }
  0xe4   : > { %v6746_v6 = vsel %vm3506_vm3, %v3577_v53, %v3581_v54  ;;  %v3585_v16 = vor.u32 %v3583_v32, %v3581_v54  ;;  %v6192_v54 = vld [vmem:[#allocation2 + $0x90] ss:$0 sps:$4 sm:$0x11]  }
  0xe5   : > { %5992 = vmatmul.mubr.msk.bf16.gmra.mxu0 %vm1345_vm2, %v6713_v35  ;;  %v3635_v18 = vshll.u32 %v6192_v54, 16 }
  0xe6   : > { %5958 = vmatmul.mubr.msk.bf16.gmra.mxu1 %vm1345_vm2, %v6167_v49  ;;  %5995 = vmatprep.mubr.msk.bf16.mxu0 %vm1345_vm2, %v6716_v46  ;;  %v6761_v22 = vsel %vm3506_vm3, %v3585_v16, %v3589_v12  ;;  %v3601_v49 = vor.u32 %v3599_v56, %v3597_v19  ;;  %v6187_v12 = vld [vmem:[#allocation2 + $0x80] sm:$0xff]   ;;  %v3631_v16 = vshrl.u32 %v6190_v42, 16  ;;  %v6189_v19 = vld [vmem:[#allocation2 + $0x88] sm:$0xff]  }
  0xe7   : > { %5961 = vmatprep.mubr.msk.bf16.mxu1 %vm1345_vm2, %v6169_v41  ;;  %v3613_v41 = vrot.slane %v3611_v30, 1 }
  0xe8   : > { %v6783_v40 = vsel %vm3506_vm3, %v3601_v49, %v3605_v33  ;;  %v6196_v33 = vld [vmem:[#allocation2 + $0x28] sm:$0xff]   ;;  %v3633_v49 = vor.u32 %v3631_v16, %v3629_v62 }
  0xe9   : > { %v6786_v3 = vsel %vm3506_vm3, %v3609_v39, %v3613_v41  ;;  %v3617_v53 = vor.u32 %v3615_v15, %v3613_v41  ;;  %v3637_v39 = vrot.slane %v3635_v18, 1 }
  0xeb   : > { %v6807_v25 = vsel %vm3506_vm3, %v3617_v53, %v3621_v51  ;;  %v3638_v53 = vsel %vm3506_vm3, %v3633_v49, %v3637_v39 }
  0xec   : > { %7828 = vst [vmem:[#allocation5_spill] sm:$0xff] %v6807_v25 }
  0xed   : > { %5996 = vmatmul.mubr.msk.bf16.gmra.mxu0 %vm1345_vm2, %v6725_v45 }
  0xee   : > { %5962 = vmatmul.mubr.msk.bf16.gmra.mxu1 %vm1345_vm2, %v6171_v0  ;;  %5999 = vmatprep.mubr.msk.bf16.mxu0 %vm1345_vm2, %v6728_v47  ;;  %v3623_v0 = vshrl.u32 %v6188_v23, 16 }
  0xef   : > { %5965 = vmatprep.mubr.msk.bf16.mxu1 %vm1345_vm2, %v6173_v11  ;;  %v6194_v11 = vld [vmem:[#allocation2 + $0x18] sm:$0xff]  }
  0xf0   : > { %v6736_v4 = vpop.f32.mrf.mxu0  ;;  %v6800_v57 = vor.u32 %v3623_v0, %v3621_v51  ;;  %v4170_v32 = vshll.u32 %v6194_v11, 16  ;;  %v4168_v20 = vshrl.u32 %v6194_v11, 16  ;;  %v272_v0 = vlaneseq  ;;  %v6191_v51 = vld [vmem:[#allocation2 + $0x90] sm:$0xff]  }
  0xf1   : > { %v4183_v11 = vshll.u32 %v6196_v33, 16 }
  0xf2   : > { %v6741_v63 = vpop.f32.mrf.mxu1  ;;  %v6743_v2 = vpop.f32.mrf.mxu0  ;;  %7827 = vst [vmem:[#allocation4_spill] sm:$0xff] %v6800_v57  ;;  %v3630_v5 = vsel %vm3506_vm3, %v6800_v57, %v3629_v62 }
  0xf4   : > { %v6750_v1 = vpop.f32.mrf.mxu0  ;;  %v6755_v17 = vpop.f32.mrf.mxu1 }
  0xf5   : > { %6000 = vmatmul.mubr.msk.bf16.gmra.mxu0 %vm1345_vm2, %v6739_v61 }
  0xf6   : > { %5966 = vmatmul.mubr.msk.bf16.gmra.mxu1 %vm1345_vm2, %v6175_v58  ;;  %6003 = vmatprep.mubr.msk.bf16.mxu0 %vm1345_vm2, %v6746_v6  ;;  %v6758_v37 = vpop.f32.mrf.mxu0  ;;  %v6763_v36 = vpop.f32.mrf.mxu1  ;;  %v6195_v58 = vld [vmem:[#allocation2 + $0x20] sm:$0xff]  }
  0xf7   : > { %5969 = vmatprep.mubr.msk.bf16.mxu1 %vm1345_vm2, %v6177_v8  ;;  %v3865_v8 = vshll.u32 %v6193_v50, 16  ;;  %v4175_v56 = vshll.u32 %v6195_v58, 16  ;;  %v4179_v54 = vshrl.u32 %v6195_v58, 16 }
  0xf8   : > { %v6773_v34 = vpop.f32.mrf.mxu1 }
  0xf9   : > { %v6770_v31 = vpop.f32.mrf.mxu0  ;;  %v3867_v29 = vrot.slane %v3865_v8, 1  ;;  %v4177_v14 = vrot.slane %v4175_v56, 1  ;;  %v4187_v8 = vshrl.u32 %v6196_v33, 16 }
  0xfb   : > { %v6778_v7 = vpop.f32.mrf.mxu0  ;;  %v4181_v56 = vor.u32 %v4179_v54, %v4177_v14 }
  0xfd   : > { %6004 = vmatmul.mubr.msk.bf16.gmra.mxu0 %vm1345_vm2, %v6761_v22  ;;  %v6792_v24 = vpop.f32.mrf.mxu0 }
  0xfe   : > { %5970 = vmatmul.mubr.msk.bf16.gmra.mxu1 %vm1345_vm2, %v6179_v21  ;;  %6007 = vmatprep.mubr.msk.bf16.mxu0 %vm1345_vm2, %v6766_v28  ;;  %v4172_v21 = vrot.slane %v4170_v32, 1 }
  0xff   : > { %5973 = vmatprep.mubr.msk.bf16.mxu1 %vm1345_vm2, %v6181_v26  ;;  %v6802_v9 = vpop.f32.mrf.mxu0  ;;  %v3863_v26 = vshrl.u32 %v6193_v50, 16 }
 0x100   : > { %v4173_v42 = vor.u32 %v4172_v21, %v4168_v20  ;;  %v4185_v21 = vrot.slane %v4183_v11, 1 }
 0x102   : > { %v6780_v43 = vpop.f32.mrf.mxu1  ;;  %v4178_v32 = vsel %vm3506_vm3, %v4173_v42, %v4177_v14  ;;  %v4186_v14 = vsel %vm3506_vm3, %v4181_v56, %v4185_v21 }
 0x104   : > { %v6788_v48 = vpop.f32.mrf.mxu1 }
 0x105   : > { %6008 = vmatmul.mubr.msk.bf16.gmra.mxu0 %vm1345_vm2, %v6783_v40 }
 0x106   : > { %5974 = vmatmul.mubr.msk.bf16.gmra.mxu1 %vm1345_vm2, %v6183_v44  ;;  %v6795_v52 = vpop.f32.mrf.mxu1  ;;  %6011 = vmatprep.mubr.msk.bf16.mxu0 %vm1345_vm2, %v6786_v3  ;;  %v6197_v44 = vld [vmem:[#allocation2 + $0x30] sm:$0xff]  }
 0x107   : > { %5977 = vmatprep.mubr.msk.bf16.mxu1 %vm1345_vm2, %v6185_v55  ;;  %v3868_v55 = vor.u32 %v3867_v29, %v3863_v26  ;;  %v6199_v26 = vld [vmem:[#allocation2 + $0x40] sm:$0xff]   ;;  %v4195_v11 = vshrl.u32 %v6197_v44, 16 }
 0x108   : > { %v6804_v10 = vpop.f32.mrf.mxu1 }
 0x109   : > { %v3869_v18 = vsel %vm3506_vm3, %v3868_v55, %v6683_v59  ;;  %v4189_v59 = vor.u32 %v4187_v8, %v4185_v21 }
 0x10d   : > { %v6811_v30 = vpop.f32.mrf.mxu0  ;;  %6012 = vmatmul.mubr.msk.bf16.gmra.mxu0 %vm1345_vm2, %v6807_v25 }
 0x10e   : > { %v6815_v23 = vpop.f32.mrf.mxu1  ;;  %5978 = vmatmul.mubr.msk.bf16.gmra.mxu1 %vm1345_vm2, %v6187_v12  ;;  %6015 = vmatprep.mubr.msk.bf16.mxu0 %vm1345_vm2, %v3630_v5  ;;  %v4191_v12 = vshll.u32 %v6197_v44, 16  ;;  %v6198_v5 = vld [vmem:[#allocation2 + $0x38] sm:$0xff]  }
 0x10f   : > { %7829 = vst [vmem:[#allocation6_spill] sm:$0xff] %v6815_v23  ;;  %v6819_v41 = vpop.f32.mrf.mxu0  ;;  %5981 = vmatprep.mubr.msk.bf16.mxu1 %vm1345_vm2, %v6189_v19  ;;  %v6836_v19 = vshrl.u32 %v272_v0, 7  ;;  %v4199_v42 = vshll.u32 %v6198_v5, 16  ;;  %v6202_v23 = vld [vmem:[#allocation2 + $0x58] sm:$0xff]  }
 0x110   : > { %v6822_v15 = vpop.f32.mrf.mxu1  ;;  %v4193_v33 = vrot.slane %v4191_v12, 1 }
 0x111   : > { %7830 = vst [vmem:[#allocation7_spill] sm:$0xff] %v6822_v15  ;;  %v6824_v13 = vpop.f32.mrf.mxu0  ;;  %7833 = vst [vmem:[#allocation10_spill] sm:$0xff] %v6836_v19  ;;  %v275_v39 = vadd.s32 16, %v6836_v19  ;;  %v309_v44 = vand.u32 15, %v6836_v19 }
 0x112   : > { %v6826_v50 = vpop.f32.mrf.mxu1 }
 0x113   : > { %7831 = vst [vmem:[#allocation8_spill] sm:$0xff] %v6826_v50  ;;  %v6829_v62 = vpop.f32.mrf.mxu0  ;;  %v323_v12 = vand.u32 15, %v275_v39  ;;  %vm6878_vm5 = vcmp.ne.s32.totalorder %v309_v44, 0 }
 0x114   : > { %v6832_v16 = vpop.f32.mrf.mxu1 }
 0x115   : > { %7832 = vst [vmem:[#allocation9_spill] sm:$0xff] %v6832_v16  ;;  %v6838_v20 = vpop.f32.mrf.mxu0  ;;  %6016 = vmatmul.mubr.msk.bf16.gmra.mxu0 %vm1345_vm2, %v3638_v53  ;;  %v4207_v53 = vshll.u32 %v6199_v26, 16  ;;  %vm6871_vm4 = vcmp.ne.s32.totalorder %v323_v12, 0 }
 0x116   : > { %v6841_v58 = vpop.f32.mrf.mxu1  ;;  %5982 = vmatmul.mubr.msk.bf16.gmra.mxu1 %vm1345_vm2, %v6191_v51  ;;  %6055 = vmatprep.mubr.msk.bf16.mxu0 %vm1345_vm2, %v4178_v32  ;;  %v4203_v51 = vshrl.u32 %v6198_v5, 16  ;;  %v4194_v32 = vsel %vm3506_vm3, %v4189_v59, %v4193_v33  ;;  %v4197_v5 = vor.u32 %v4195_v11, %v4193_v33  ;;  %v6866_v59 = vld [vmem:[#allocation2 + $0x50] sm:$0xff]   ;;  %v277_v33 = vadd.s32 32, %v6836_v19 }
 0x117   : > { %7834 = vst [vmem:[#allocation11_spill] sm:$0xff] %v6841_v58  ;;  %v6845_v29 = vpop.f32.mrf.mxu0  ;;  %6021 = vmatprep.mubr.msk.bf16.mxu1 %vm1345_vm2, %v3869_v18  ;;  %v4201_v18 = vrot.slane %v4199_v42, 1  ;;  %v6200_v58 = vld [vmem:[#allocation2 + $0x48] sm:$0xff]   ;;  %v4209_v56 = vrot.slane %v4207_v53, 1  ;;  %v4211_v11 = vshrl.u32 %v6199_v26, 16  ;;  %v4223_v57 = vshll.u32 %v6866_v59, 16 }
 0x118   : > { %v6848_v49 = vpop.f32.mrf.mxu1  ;;  %v337_v15 = vand.u32 15, %v277_v33  ;;  %v289_v33 = vadd.s32 128, %v6836_v19 }
 0x119   : > { %7835 = vst [vmem:[#allocation12_spill] sm:$0xff] %v6848_v49  ;;  %v6851_v55 = vpop.f32.mrf.mxu0  ;;  %v4205_v21 = vor.u32 %v4203_v51, %v4201_v18  ;;  %v4213_v25 = vor.u32 %v4211_v11, %v4209_v56  ;;  %v283_v11 = vadd.s32 80, %v6836_v19 }
 0x11a   : > { %v6853_v0 = vpop.f32.mrf.mxu1  ;;  %vm6910_vm7 = vcmp.ne.s32.totalorder %v337_v15, 0 }
 0x11b   : > { %7836 = vst [vmem:[#allocation13_spill] sm:$0xff] %v6853_v0  ;;  %v6856_v54 = vpop.f32.mrf.mxu0  ;;  %v4215_v0 = vshll.u32 %v6200_v58, 16  ;;  %v4210_v12 = vsel %vm3506_vm3, %v4205_v21, %v4209_v56  ;;  %v4225_v56 = vrot.slane %v4223_v57, 1 }
 0x11c   : > { %v6859_v8 = vpop.f32.mrf.mxu1 }
 0x11d   : > { %7837 = vst [vmem:[#allocation14_spill] sm:$0xff] %v6859_v8  ;;  %v5853_v49 = vpop.f32.mrf.mxu0  ;;  %6056 = vmatmul.mubr.msk.bf16.vlgmr.msra.gmra.mxu0 %vm1345_vm2, %v4186_v14  ;;  %v279_v8 = vadd.s32 48, %v6836_v19 }
 0x11e   : > { %v5819_v16 = vpop.f32.mrf.mxu1  ;;  %6022 = vmatmul.mubr.msk.bf16.vlgmr.msra.gmra.mxu1 %vm1345_vm2, %v6691_v60  ;;  %6059 = vmatprep.mubr.msk.bf16.mxu0 %vm1345_vm2, %v4194_v32 }
 0x11f   : > { %v1649_v39 = vadd.f32 %v5819_v16, %v6736_v4  ;;  %v2126_v42 = vpop.f32.mrf.mxu0  ;;  %6025 = vmatprep.mubr.msk.bf16.mxu1 %vm1345_vm2, %v6699_v27  ;;  %v4202_v16 = vsel %vm3506_vm3, %v4197_v5, %v4201_v18 }
 0x120   : > { %v1640_v60 = vpop.f32.mrf.mxu1 }
 0x121   : > { %v2255_v51 = vadd.f32 %v5853_v49, %v1649_v39  ;;  %v1641_v53 = vadd.f32 %v1640_v60, %v6743_v2  ;;  %v5854_v32 = vpop.f32.mrf.mxu0  ;;  %v4219_v39 = vshrl.u32 %v6200_v58, 16  ;;  %v351_v60 = vand.u32 15, %v279_v8 }
 0x122   : > { %v5820_v27 = vpop.f32.mrf.mxu1 }
 0x123   : > { %v2351_v50 = vsel %vm6871_vm4, %v2255_v51, 0.0  ;;  %v2253_v26 = vadd.f32 %v2126_v42, %v1641_v53  ;;  %v1652_v49 = vadd.f32 %v5820_v27, %v6750_v1  ;;  %v2129_v2 = vpop.f32.mrf.mxu0  ;;  %v4217_v42 = vrot.slane %v4215_v0, 1 }
 0x124   : > { %2383 = vst.msk [vmem:[#allocation3 + $0x10] sm:$0xff] %vm1345_vm2, %v2351_v50  ;;  %v1643_v44 = vpop.f32.mrf.mxu1  ;;  %v6897_v50 = vld [vmem:[#allocation2 + $0x60] sm:$0xff]   ;;  %vm6903_vm6 = vcmp.ne.s32.totalorder %v351_v60, 0  ;;  %v4231_v51 = vshll.u32 %v6202_v23, 16  ;;  %v281_v27 = vadd.s32 64, %v6836_v19 }
 0x125   : > { %v2349_v18 = vsel %vm6878_vm5, %v2253_v26, 0.0  ;;  %v2256_v5 = vadd.f32 %v5854_v32, %v1652_v49  ;;  %v1644_v21 = vadd.f32 %v1643_v44, %v6758_v37  ;;  %v5857_v14 = vpop.f32.mrf.mxu0  ;;  %6060 = vmatmul.mubr.msk.bf16.gmra.mxu0 %vm1345_vm2, %v4202_v16  ;;  %v4221_v0 = vor.u32 %v4219_v39, %v4217_v42 }
 0x126   : > { %2381 = vst.msk [vmem:[#allocation3] sm:$0xff] %vm1345_vm2, %v2349_v18  ;;  %v5823_v1 = vpop.f32.mrf.mxu1  ;;  %6026 = vmatmul.mubr.msk.bf16.gmra.mxu1 %vm1345_vm2, %v6704_v38  ;;  %6063 = vmatprep.mubr.msk.bf16.mxu0 %vm1345_vm2, %v4210_v12  ;;  %v4218_v57 = vsel %vm3506_vm3, %v4213_v25, %v4217_v42  ;;  %v4227_v16 = vshrl.u32 %v6866_v59, 16  ;;  %v4235_v12 = vshrl.u32 %v6202_v23, 16  ;;  %v4239_v26 = vshll.u32 %v6897_v50, 16 }
 0x127   : > { %2384 = vst.msk [vmem:[#allocation3 + $0x18] sm:$0xff] %vm1345_vm2, %v2256_v5  ;;  %v2254_v58 = vadd.f32 %v2129_v2, %v1644_v21  ;;  %v1665_v8 = vadd.f32 %v5823_v1, %v6770_v31  ;;  %v2142_v37 = vpop.f32.mrf.mxu0  ;;  %6029 = vmatprep.mubr.msk.bf16.mxu1 %vm1345_vm2, %v6713_v35  ;;  %v4226_v39 = vsel %vm3506_vm3, %v4221_v0, %v4225_v56  ;;  %v379_v44 = vand.u32 15, %v283_v11  ;;  %v6204_v21 = vld [vmem:[#allocation2 + $0x68] sm:$0xff]  }
 0x128   : > { %v1656_v38 = vpop.f32.mrf.mxu1  ;;  %v4233_v60 = vrot.slane %v4231_v51, 1  ;;  %v4229_v42 = vor.u32 %v4227_v16, %v4225_v56  ;;  %v287_v56 = vadd.s32 112, %v6836_v19  ;;  %v4243_v11 = vshrl.u32 %v6897_v50, 16 }
 0x129   : > { %2382 = vst.msk [vmem:[#allocation3 + $0x8] sm:$0xff] %vm1345_vm2, %v2254_v58  ;;  %v2259_v53 = vadd.f32 %v5857_v14, %v1665_v8  ;;  %v1657_v32 = vadd.f32 %v1656_v38, %v6778_v7  ;;  %v5858_v35 = vpop.f32.mrf.mxu0  ;;  %v365_v14 = vand.u32 15, %v281_v27  ;;  %v4241_v58 = vrot.slane %v4239_v26, 1  ;;  %v6931_v8 = vld [vmem:[#allocation2 + $0x70] sm:$0xff]  }
 0x12a   : > { %v5824_v4 = vpop.f32.mrf.mxu1  ;;  %v4237_v1 = vor.u32 %v4235_v12, %v4233_v60  ;;  %vm6937_vm8 = vcmp.ne.s32.totalorder %v379_v44, 0  ;;  %v285_v38 = vadd.s32 96, %v6836_v19  ;;  %v4251_v12 = vshrl.u32 %v6204_v21, 16 }
 0x12b   : > { %v2355_v49 = vsel %vm6903_vm6, %v2259_v53, 0.0  ;;  %v2257_v2 = vadd.f32 %v2142_v37, %v1657_v32  ;;  %v1668_v7 = vadd.f32 %v5824_v4, %v6792_v24  ;;  %v2145_v15 = vpop.f32.mrf.mxu0  ;;  %v4247_v32 = vshll.u32 %v6204_v21, 16 }
 0x12c   : > { %2387 = vst.msk [vmem:[#allocation3 + $0x30] sm:$0xff] %vm1345_vm2, %v2355_v49  ;;  %v1659_v25 = vpop.f32.mrf.mxu1  ;;  %vm6946_vm9 = vcmp.ne.s32.totalorder %v365_v14, 0  ;;  %v4255_v4 = vshll.u32 %v6931_v8, 16  ;;  %v407_v49 = vand.u32 15, %v287_v56 }
 0x12d   : > { %v2353_v59 = vsel %vm6910_vm7, %v2257_v2, 0.0  ;;  %v2260_v23 = vadd.f32 %v5858_v35, %v1668_v7  ;;  %v1660_v18 = vadd.f32 %v1659_v25, %v6802_v9  ;;  %v5861_v5 = vpop.f32.mrf.mxu0  ;;  %6064 = vmatmul.mubr.msk.bf16.gmra.mxu0 %vm1345_vm2, %v4218_v57  ;;  %v4234_v35 = vsel %vm3506_vm3, %v4229_v42, %v4233_v60 }
 0x12e   : > { %2385 = vst.msk [vmem:[#allocation3 + $0x20] sm:$0xff] %vm1345_vm2, %v2353_v59  ;;  %v5827_v24 = vpop.f32.mrf.mxu1  ;;  %6030 = vmatmul.mubr.msk.bf16.gmra.mxu1 %vm1345_vm2, %v6716_v46  ;;  %6067 = vmatprep.mubr.msk.bf16.mxu0 %vm1345_vm2, %v4226_v39  ;;  %v4242_v57 = vsel %vm3506_vm3, %v4237_v1, %v4241_v58  ;;  %v393_v2 = vand.u32 15, %v285_v38  ;;  %v4245_v7 = vor.u32 %v4243_v11, %v4241_v58  ;;  %v4249_v59 = vrot.slane %v4247_v32, 1 }
 0x12f   : > { %2388 = vst.msk [vmem:[#allocation3 + $0x38] sm:$0xff] %vm1345_vm2, %v2260_v23  ;;  %v2258_v9 = vadd.f32 %v2145_v15, %v1660_v18  ;;  %v1681_v37 = vadd.f32 %v5827_v24, %v6811_v30  ;;  %v2158_v0 = vpop.f32.mrf.mxu0  ;;  %6033 = vmatprep.mubr.msk.bf16.mxu1 %vm1345_vm2, %v6725_v45  ;;  %v6206_v15 = vld [vmem:[#allocation2 + $0x78] sm:$0xff]   ;;  %v6965_v23 = vld [vmem:[#allocation2 + $0x80] sm:$0xff]   ;;  %v4257_v24 = vrot.slane %v4255_v4, 1  ;;  %vm6971_vm10 = vcmp.ne.s32.totalorder %v407_v49, 0 }
 0x130   : > { %v1672_v46 = vpop.f32.mrf.mxu1  ;;  %v4253_v21 = vor.u32 %v4251_v12, %v4249_v59  ;;  %v291_v42 = vadd.s32 144, %v6836_v19  ;;  %v4263_v1 = vshll.u32 %v6206_v15, 16  ;;  %vm6978_vm11 = vcmp.ne.s32.totalorder %v393_v2, 0 }
 0x131   : > { %2386 = vst.msk [vmem:[#allocation3 + $0x28] sm:$0xff] %vm1345_vm2, %v2258_v9  ;;  %v2263_v51 = vadd.f32 %v5861_v5, %v1681_v37  ;;  %v1673_v30 = vadd.f32 %v1672_v46, %v6819_v41  ;;  %v5862_v53 = vpop.f32.mrf.mxu0  ;;  %v4250_v37 = vsel %vm3506_vm3, %v4245_v7, %v4249_v59  ;;  %v4259_v46 = vshrl.u32 %v6931_v8, 16 }
 0x132   : > { %v5828_v31 = vpop.f32.mrf.mxu1  ;;  %v4267_v56 = vshrl.u32 %v6206_v15, 16  ;;  %v4271_v38 = vshll.u32 %v6965_v23, 16  ;;  %v435_v45 = vand.u32 15, %v291_v42  ;;  %v295_v15 = vadd.s32 176, %v6836_v19 }
 0x133   : > { %v2359_v50 = vsel %vm6937_vm8, %v2263_v51, 0.0  ;;  %v2261_v27 = vadd.f32 %v2158_v0, %v1673_v30  ;;  %v1684_v16 = vadd.f32 %v5828_v31, %v6824_v13  ;;  %v2161_v41 = vpop.f32.mrf.mxu0  ;;  %v4265_v31 = vrot.slane %v4263_v1, 1 }
 0x134   : > { %2391 = vst.msk [vmem:[#allocation3 + $0x50] sm:$0xff] %vm1345_vm2, %v2359_v50  ;;  %v1675_v26 = vpop.f32.mrf.mxu1  ;;  %v6208_v50 = vld [vmem:[#allocation2 + $0x88] sm:$0xff]   ;;  %v4273_v12 = vrot.slane %v4271_v38, 1  ;;  %vm7005_vm12 = vcmp.ne.s32.totalorder %v435_v45, 0  ;;  %v463_v42 = vand.u32 15, %v295_v15 }
 0x135   : > { %v2357_v39 = vsel %vm6946_vm9, %v2261_v27, 0.0  ;;  %v2264_v25 = vadd.f32 %v5862_v53, %v1684_v16  ;;  %v1676_v44 = vadd.f32 %v1675_v26, %v6829_v62  ;;  %v5865_v60 = vpop.f32.mrf.mxu0  ;;  %6068 = vmatmul.mubr.msk.bf16.gmra.mxu0 %vm1345_vm2, %v4234_v35  ;;  %v4258_v53 = vsel %vm3506_vm3, %v4253_v21, %v4257_v24  ;;  %v6999_v26 = vld [vmem:[#allocation2 + $0x90] sm:$0xff]  }
 0x136   : > { %2389 = vst.msk [vmem:[#allocation3 + $0x40] sm:$0xff] %vm1345_vm2, %v2357_v39  ;;  %v5831_v13 = vpop.f32.mrf.mxu1  ;;  %6034 = vmatmul.mubr.msk.bf16.gmra.mxu1 %vm1345_vm2, %v6728_v47  ;;  %6071 = vmatprep.mubr.msk.bf16.mxu0 %vm1345_vm2, %v4242_v57  ;;  %v421_v27 = vand.u32 15, %v289_v33  ;;  %v4261_v16 = vor.u32 %v4259_v46, %v4257_v24  ;;  %v293_v39 = vadd.s32 160, %v6836_v19  ;;  %v4279_v59 = vshll.u32 %v6208_v50, 16 }
 0x137   : > { %2392 = vst.msk [vmem:[#allocation3 + $0x58] sm:$0xff] %vm1345_vm2, %v2264_v25  ;;  %v2262_v18 = vadd.f32 %v2161_v41, %v1676_v44  ;;  %v1697_v5 = vadd.f32 %v5831_v13, %v6838_v20  ;;  %v2174_v62 = vpop.f32.mrf.mxu0  ;;  %6037 = vmatprep.mubr.msk.bf16.mxu1 %vm1345_vm2, %v6739_v61  ;;  %v4269_v41 = vor.u32 %v4267_v56, %v4265_v31  ;;  %v4275_v25 = vshrl.u32 %v6965_v23, 16  ;;  %v6210_v33 = vld [vmem:[#allocation2 + $0x88] ss:$0 sps:$4 sm:$0x11]  }
 0x138   : > { %v1688_v47 = vpop.f32.mrf.mxu1  ;;  %vm7014_vm13 = vcmp.ne.s32.totalorder %v421_v27, 0  ;;  %v4283_v14 = vshrl.u32 %v6208_v50, 16  ;;  %v449_v1 = vand.u32 15, %v293_v39  ;;  %v6211_v46 = vld [vmem:[#allocation2 + $0x98] ss:$0 sps:$4 sm:$0x11]  }
 0x139   : > { %2390 = vst.msk [vmem:[#allocation3 + $0x48] sm:$0xff] %vm1345_vm2, %v2262_v18  ;;  %v2267_v58 = vadd.f32 %v5865_v60, %v1697_v5  ;;  %v1689_v9 = vadd.f32 %v1688_v47, %v6845_v29  ;;  %v5866_v61 = vpop.f32.mrf.mxu0  ;;  %v4266_v18 = vsel %vm3506_vm3, %v4261_v16, %v4265_v31  ;;  %v4274_v5 = vsel %vm3506_vm3, %v4269_v41, %v4273_v12 }
 0x13a   : > { %v5832_v0 = vpop.f32.mrf.mxu1  ;;  %vm7037_vm14 = vcmp.ne.s32.totalorder %v463_v42, 0  ;;  %vm7044_vm15 = vcmp.ne.s32.totalorder %v449_v1, 0  ;;  %v7869_v42 = vld [vmem:[#allocation8_spill] sm:$0xff] }
 0x13b   : > { %v2363_v11 = vsel %vm6971_vm10, %v2267_v58, 0.0  ;;  %v2265_v51 = vadd.f32 %v2174_v62, %v1689_v9  ;;  %v1700_v29 = vadd.f32 %v5832_v0, %v6851_v55  ;;  %v2177_v30 = vpop.f32.mrf.mxu0  ;;  %v4287_v62 = vshll.u32 %v6999_v26, 16 }
 0x13c   : > { %2395 = vst.msk [vmem:[#allocation3 + $0x70] sm:$0xff] %vm1345_vm2, %v2363_v11  ;;  %v1691_v32 = vpop.f32.mrf.mxu1  ;;  %v4277_v58 = vor.u32 %v4275_v25, %v4273_v12  ;;  %v4281_v0 = vrot.slane %v4279_v59, 1  ;;  %v7862_v25 = vld [vmem:[#allocation6_spill] sm:$0xff] }
 0x13d   : > { %v2361_v8 = vsel %vm6978_vm11, %v2265_v51, 0.0  ;;  %v2268_v35 = vadd.f32 %v5866_v61, %v1700_v29  ;;  %v1692_v57 = vadd.f32 %v1691_v32, %v6856_v54  ;;  %v5869_v4 = vpop.f32.mrf.mxu0  ;;  %6072 = vmatmul.mubr.msk.bf16.gmra.mxu0 %vm1345_vm2, %v4250_v37  ;;  %v4289_v51 = vrot.slane %v4287_v62, 1 }
 0x13e   : > { %2393 = vst.msk [vmem:[#allocation3 + $0x60] sm:$0xff] %vm1345_vm2, %v2361_v8  ;;  %v5835_v55 = vpop.f32.mrf.mxu1  ;;  %6038 = vmatmul.mubr.msk.bf16.gmra.mxu1 %vm1345_vm2, %v6746_v6  ;;  %6075 = vmatprep.mubr.msk.bf16.mxu0 %vm1345_vm2, %v4258_v53  ;;  %v4285_v11 = vor.u32 %v4283_v14, %v4281_v0  ;;  %v297_v8 = vadd.s32 192, %v6836_v19 }
 0x13f   : > { %2396 = vst.msk [vmem:[#allocation3 + $0x78] sm:$0xff] %vm1345_vm2, %v2268_v35  ;;  %v2266_v54 = vadd.f32 %v2177_v30, %v1692_v57  ;;  %v1713_v49 = vadd.f32 %v5835_v55, %v6741_v63  ;;  %v2190_v2 = vpop.f32.mrf.mxu0  ;;  %6041 = vmatprep.mubr.msk.bf16.mxu1 %vm1345_vm2, %v6761_v22  ;;  %v299_v30 = vadd.s32 208, %v6836_v19  ;;  %v4291_v35 = vshrl.u32 %v6999_v26, 16 }
 0x140   : > { %v1704_v6 = vpop.f32.mrf.mxu1  ;;  %v3871_v57 = vshll.u32 %v6210_v33, 16  ;;  %v4290_v16 = vsel %vm3506_vm3, %v4285_v11, %v4289_v51  ;;  %v303_v22 = vadd.s32 240, %v6836_v19  ;;  %v7871_v33 = vld [vmem:[#allocation9_spill] sm:$0xff] }
 0x141   : > { %2394 = vst.msk [vmem:[#allocation3 + $0x68] sm:$0xff] %vm1345_vm2, %v2266_v54  ;;  %v2271_v44 = vadd.f32 %v5869_v4, %v1713_v49  ;;  %v1705_v63 = vadd.f32 %v1704_v6, %v6755_v17  ;;  %v5870_v60 = vpop.f32.mrf.mxu0  ;;  %v4295_v4 = vshll.u32 %v6211_v46, 16  ;;  %v491_v12 = vand.u32 15, %v299_v30 }
 0x142   : > { %v5836_v13 = vpop.f32.mrf.mxu1  ;;  %v4293_v6 = vor.u32 %v4291_v35, %v4289_v51  ;;  %v7872_v51 = vld [vmem:[#allocation11_spill] sm:$0xff]  ;;  %v7874_v35 = vld [vmem:[#allocation13_spill] sm:$0xff] }
 0x143   : > { %v2367_v23 = vsel %vm7005_vm12, %v2271_v44, 0.0  ;;  %v2269_v21 = vadd.f32 %v2190_v2, %v1705_v63  ;;  %v1716_v24 = vadd.f32 %v5836_v13, %v6763_v36  ;;  %v2193_v17 = vpop.f32.mrf.mxu0  ;;  %v4297_v15 = vrot.slane %v4295_v4, 1  ;;  %v7863_v63 = vld [vmem:[#allocation5_spill] sm:$0xff] }
 0x144   : > { %2399 = vst.msk [vmem:[#allocation3 + $0x90] sm:$0xff] %vm1345_vm2, %v2367_v23  ;;  %v1707_v47 = vpop.f32.mrf.mxu1  ;;  %vm7068_vm1 = vcmp.ne.s32.totalorder %v491_v12, 0 }
 0x145   : > { %v2365_v9 = vsel %vm7014_vm13, %v2269_v21, 0.0  ;;  %v2272_v20 = vadd.f32 %v5870_v60, %v1716_v24  ;;  %v1708_v61 = vadd.f32 %v1707_v47, %v6773_v34  ;;  %v5873_v37 = vpop.f32.mrf.mxu0  ;;  %6076 = vmatmul.mubr.msk.bf16.gmra.mxu0 %vm1345_vm2, %v4266_v18  ;;  %v3873_v60 = vrot.slane %v3871_v57, 1  ;;  %v7866_v18 = vld [vmem:[#allocation7_spill] sm:$0xff] }
 0x146   : > { %2397 = vst.msk [vmem:[#allocation3 + $0x80] sm:$0xff] %vm1345_vm2, %v2365_v9  ;;  %v5839_v36 = vpop.f32.mrf.mxu1  ;;  %6042 = vmatmul.mubr.msk.bf16.gmra.mxu1 %vm1345_vm2, %v6766_v28  ;;  %6079 = vmatprep.mubr.msk.bf16.mxu0 %vm1345_vm2, %v4274_v5  ;;  %v4298_v24 = vsel %vm3506_vm3, %v4293_v6, %v4297_v15  ;;  %v7870_v9 = vld [vmem:[#allocation4_spill] sm:$0xff] }
 0x147   : > { %2400 = vst.msk [vmem:[#allocation3 + $0x98] sm:$0xff] %vm1345_vm2, %v2272_v20  ;;  %v2270_v56 = vadd.f32 %v2193_v17, %v1708_v61  ;;  %v1729_v38 = vadd.f32 %v5839_v36, %v6780_v43  ;;  %v2206_v34 = vpop.f32.mrf.mxu0  ;;  %6045 = vmatprep.mubr.msk.bf16.mxu1 %vm1345_vm2, %v6783_v40  ;;  %v4282_v40 = vsel %vm3506_vm3, %v4277_v58, %v4281_v0  ;;  %v301_v17 = vadd.s32 224, %v6836_v19 }
 0x148   : > { %v1720_v28 = vpop.f32.mrf.mxu1  ;;  %v3874_v20 = vsel %vm3506_vm3, %v7870_v9, %v3873_v60 }
 0x149   : > { %2398 = vst.msk [vmem:[#allocation3 + $0x88] sm:$0xff] %vm1345_vm2, %v2270_v56  ;;  %v2275_v53 = vadd.f32 %v5873_v37, %v1729_v38  ;;  %v1721_v32 = vadd.f32 %v1720_v28, %v6788_v48  ;;  %v5874_v45 = vpop.f32.mrf.mxu0  ;;  %v519_v37 = vand.u32 15, %v303_v22 }
 0x14a   : > { %v5840_v31 = vpop.f32.mrf.mxu1 }
 0x14b   : > { %v2371_v50 = vsel %vm7037_vm14, %v2275_v53, 0.0  ;;  %v2273_v55 = vadd.f32 %v2206_v34, %v1721_v32  ;;  %v1732_v48 = vadd.f32 %v5840_v31, %v6795_v52  ;;  %v2209_v27 = vpop.f32.mrf.mxu0  ;;  %v477_v52 = vand.u32 15, %v297_v8  ;;  %v7873_v32 = vld [vmem:[#allocation12_spill] sm:$0xff] }
 0x14c   : > { %2403 = vst.msk [vmem:[#allocation3 + $0xb0] sm:$0xff] %vm1345_vm2, %v2371_v50  ;;  %v1723_v41 = vpop.f32.mrf.mxu1  ;;  %v505_v34 = vand.u32 15, %v301_v17  ;;  %vm719_vm3 = vcmp.ne.s32.totalorder %v519_v37, 0 }
 0x14d   : > { %v2369_v54 = vsel %vm7044_vm15, %v2273_v55, 0.0  ;;  %v2276_v49 = vadd.f32 %v5874_v45, %v1732_v48  ;;  %v1724_v26 = vadd.f32 %v1723_v41, %v6804_v10  ;;  %v5877_v2 = vpop.f32.mrf.mxu0  ;;  %6080 = vmatmul.mubr.msk.bf16.gmra.mxu0 %vm1345_vm2, %v4282_v40  ;;  %vm7075_vm4 = vcmp.ne.s32.totalorder %v477_v52, 0 }
 0x14e   : > { %2401 = vst.msk [vmem:[#allocation3 + $0xa0] sm:$0xff] %vm1345_vm2, %v2369_v54  ;;  %v5843_v7 = vpop.f32.mrf.mxu1  ;;  %6046 = vmatmul.mubr.msk.bf16.gmra.mxu1 %vm1345_vm2, %v6786_v3  ;;  %6083 = vmatprep.mubr.msk.bf16.mxu0 %vm1345_vm2, %v4290_v16  ;;  %vm717_vm5 = vcmp.ne.s32.totalorder %v505_v34, 0 }
 0x14f   : > { %2404 = vst.msk [vmem:[#allocation3 + $0xb8] sm:$0xff] %vm1345_vm2, %v2276_v49  ;;  %v2274_v39 = vadd.f32 %v2209_v27, %v1724_v26  ;;  %v1745_v44 = vadd.f32 %v5843_v7, %v7862_v25  ;;  %v2222_v10 = vpop.f32.mrf.mxu0  ;;  %6049 = vmatprep.mubr.msk.bf16.mxu1 %vm1345_vm2, %v7863_v63  ;;  %v7875_v27 = vld [vmem:[#allocation14_spill] sm:$0xff] }
 0x150   : > { %v1736_v3 = vpop.f32.mrf.mxu1 }
 0x151   : > { %2402 = vst.msk [vmem:[#allocation3 + $0xa8] sm:$0xff] %vm1345_vm2, %v2274_v39  ;;  %v2279_v13 = vadd.f32 %v5877_v2, %v1745_v44  ;;  %v1737_v5 = vadd.f32 %v1736_v3, %v7866_v18  ;;  %v5878_v62 = vpop.f32.mrf.mxu0 }
 0x152   : > { %v5844_v21 = vpop.f32.mrf.mxu1 }
 0x153   : > { %v2375_v14 = vsel %vm7068_vm1, %v2279_v13, 0.0  ;;  %v2277_v47 = vadd.f32 %v2222_v10, %v1737_v5  ;;  %v1748_v1 = vadd.f32 %v5844_v21, %v7869_v42  ;;  %v2225_v58 = vpop.f32.mrf.mxu0 }
 0x154   : > { %2407 = vst.msk [vmem:[#allocation3 + $0xd0] sm:$0xff] %vm1345_vm2, %v2375_v14  ;;  %v1739_v61 = vpop.f32.mrf.mxu1 }
 0x155   : > { %v2373_v0 = vsel %vm7075_vm4, %v2277_v47, 0.0  ;;  %v2280_v36 = vadd.f32 %v5878_v62, %v1748_v1  ;;  %v1740_v46 = vadd.f32 %v1739_v61, %v7871_v33  ;;  %v5881_v56 = vpop.f32.mrf.mxu0  ;;  %6084 = vmatmul.mubr.msk.bf16.gmra.mxu0 %vm1345_vm2, %v4298_v24 }
 0x156   : > { %2405 = vst.msk [vmem:[#allocation3 + $0xc0] sm:$0xff] %vm1345_vm2, %v2373_v0  ;;  %v5847_v38 = vpop.f32.mrf.mxu1  ;;  %6050 = vmatmul.mubr.msk.bf16.gmra.mxu1 %vm1345_vm2, %v3874_v20 }
 0x157   : > { %2408 = vst.msk [vmem:[#allocation3 + $0xd8] sm:$0xff] %vm1345_vm2, %v2280_v36  ;;  %v2278_v11 = vadd.f32 %v2225_v58, %v1740_v46  ;;  %v1761_v29 = vadd.f32 %v5847_v38, %v7872_v51  ;;  %v2238_v28 = vpop.f32.mrf.mxu0 }
 0x158   : > { %v1752_v30 = vpop.f32.mrf.mxu1 }
 0x159   : > { %2406 = vst.msk [vmem:[#allocation3 + $0xc8] sm:$0xff] %vm1345_vm2, %v2278_v11  ;;  %v2283_v53 = vadd.f32 %v5881_v56, %v1761_v29  ;;  %v1753_v43 = vadd.f32 %v1752_v30, %v7873_v32  ;;  %v5882_v45 = vpop.f32.mrf.mxu0 }
 0x15a   : > { %v5848_v40 = vpop.f32.mrf.mxu1 }
 0x15b   : > { %v2379_v31 = vsel %vm719_vm3, %v2283_v53, 0.0  ;;  %v2281_v8 = vadd.f32 %v2238_v28, %v1753_v43  ;;  %v1764_v57 = vadd.f32 %v5848_v40, %v7874_v35  ;;  %v2241_v4 = vpop.f32.mrf.mxu0 }
 0x15c   : > { %2411 = vst.msk [vmem:[#allocation3 + $0xf0] sm:$0xff] %vm1345_vm2, %v2379_v31  ;;  %v1755_v50 = vpop.f32.mrf.mxu1 }
 0x15d   : > { %v2377_v55 = vsel %vm717_vm5, %v2281_v8, 0.0  ;;  %v2284_v48 = vadd.f32 %v5882_v45, %v1764_v57  ;;  %v1756_v16 = vadd.f32 %v1755_v50, %v7875_v27  ;;  %v7100_v41 = vpop.f32.mrf.mxu0 }
 0x15e   : > { %2409 = vst.msk [vmem:[#allocation3 + $0xe0] sm:$0xff] %vm1345_vm2, %v2377_v55  ;;  %v7103_v12 = vpop.f32.mrf.mxu1 }
 0x15f   : > { %2412 = vst.msk [vmem:[#allocation3 + $0xf8] sm:$0xff] %vm1345_vm2, %v2284_v48  ;;  %v2282_v54 = vadd.f32 %v2241_v4, %v1756_v16  ;;  %v7106_v49 = vpop.f32.mrf.mxu0 }
 0x160   : > { %v7108_v26 = vpop.f32.mrf.mxu1 }
 0x161   : > { %2410 = vst.msk [vmem:[#allocation3 + $0xe8] sm:$0xff] %vm1345_vm2, %v2282_v54  ;;  %v7111_v2 = vpop.f32.mrf.mxu0 }
 0x162   : > { %v7113_v7 = vpop.f32.mrf.mxu1 }
 0x163   : > { %v7115_v52 = vpop.f32.mrf.mxu0 }
 0x164   : > { %v7117_v6 = vpop.f32.mrf.mxu1 }
 0x165   : > { %v7119_v15 = vpop.f32.mrf.mxu0 }
 0x166   : > { %v7121_v39 = vpop.f32.mrf.mxu1 }
 0x167   : > { %v7123_v25 = vpop.f32.mrf.mxu0 }
 0x168   : > { %v7125_v44 = vpop.f32.mrf.mxu1 }
 0x169   : > { %v7127_v10 = vpop.f32.mrf.mxu0 }
 0x16a   : > { %v7129_v63 = vpop.f32.mrf.mxu1 }
 0x16b   : > { %v7131_v60 = vpop.f32.mrf.mxu0 }
 0x16c   : > { %v7133_v59 = vpop.f32.mrf.mxu1 }
 0x16d   : > { %v7135_v3 = vpop.f32.mrf.mxu0 }
 0x16e   : > { %v7137_v22 = vpop.f32.mrf.mxu1 }
 0x16f   : > { %v7139_v13 = vpop.f32.mrf.mxu0 }
 0x170   : > { %v7141_v18 = vpop.f32.mrf.mxu1 }
 0x171   : > { %v7143_v5 = vpop.f32.mrf.mxu0 }
 0x172   : > { %v7145_v62 = vpop.f32.mrf.mxu1 }
 0x173   : > { %v7147_v23 = vpop.f32.mrf.mxu0 }
 0x174   : > { %v7149_v21 = vpop.f32.mrf.mxu1 }
 0x175   : > { %v7151_v24 = vpop.f32.mrf.mxu0 }
 0x176   : > { %v7153_v17 = vpop.f32.mrf.mxu1 }
 0x177   : > { %v7155_v14 = vpop.f32.mrf.mxu0 }
 0x178   : > { %v7157_v47 = vpop.f32.mrf.mxu1 }
 0x179   : > { %v7159_v42 = vpop.f32.mrf.mxu0 }
 0x17a   : > { %v7161_v1 = vpop.f32.mrf.mxu1 }
 0x17b   : > { %v7163_v58 = vpop.f32.mrf.mxu0 }
 0x17c   : > { %v7165_v9 = vpop.f32.mrf.mxu1 }
 0x17d   : > { %v7167_v20 = vpop.f32.mrf.mxu0 }
 0x17e   : > { %v7169_v61 = vpop.f32.mrf.mxu1 }
 0x17f   : > { %v7171_v37 = vpop.f32.mrf.mxu0 }
 0x180   : > { %v7173_v0 = vpop.f32.mrf.mxu1 }
 0x181   : > { %v7175_v36 = vpop.f32.mrf.mxu0 }
 0x182   : > { %v7177_v33 = vpop.f32.mrf.mxu1 }
 0x183   : > { %v7179_v46 = vpop.f32.mrf.mxu0 }
 0x184   : > { %v7181_v56 = vpop.f32.mrf.mxu1 }
 0x185   : > { %v7183_v38 = vpop.f32.mrf.mxu0 }
 0x186   : > { %v7185_v34 = vpop.f32.mrf.mxu1 }
 0x187   : > { %v7187_v11 = vpop.f32.mrf.mxu0 }
 0x188   : > { %v7189_v51 = vpop.f32.mrf.mxu1 }
 0x189   : > { %v7191_v29 = vpop.f32.mrf.mxu0 }
 0x18a   : > { %v7193_v28 = vpop.f32.mrf.mxu1 }
 0x18b   : > { %v7195_v30 = vpop.f32.mrf.mxu0 }
 0x18c   : > { %v7197_v53 = vpop.f32.mrf.mxu1 }
 0x18d   : > { %v7199_v32 = vpop.f32.mrf.mxu0 }
 0x18e   : > { %v7201_v43 = vpop.f32.mrf.mxu1 }
 0x18f   : > { %v7203_v45 = vpop.f32.mrf.mxu0 }
 0x190   : > { %7876 = vst [vmem:[#allocation6_spill] sm:$0xff] %v7203_v45  ;;  %v7205_v40 = vpop.f32.mrf.mxu1  ;;  %v3285_v45 = vld [vmem:[#allocation3] sm:$0xff] }
 0x191   : > { %v7207_v31 = vpop.f32.mrf.mxu0 }
 0x192   : > { %7877 = vst [vmem:[#allocation5_spill] sm:$0xff] %v7207_v31  ;;  %v7209_v8 = vpop.f32.mrf.mxu1 }
 0x193   : > { %7878 = vst [vmem:[#allocation7_spill] sm:$0xff] %v7209_v8  ;;  %v7211_v35 = vpop.f32.mrf.mxu0 }
 0x194   : > { %7879 = vst [vmem:[#allocation8_spill] sm:$0xff] %v7211_v35  ;;  %v7213_v57 = vpop.f32.mrf.mxu1  ;;  %v2805_v35 = vadd.f32 %v7100_v41, %v7103_v12  ;;  %v2800_v12 = vadd.f32 %v7115_v52, %v7117_v6  ;;  %v2813_v52 = vadd.f32 %v7123_v25, %v7125_v44  ;;  %v2816_v25 = vadd.f32 %v7131_v60, %v7133_v59 }
 0x195   : > { %7880 = vst [vmem:[#allocation4_spill] sm:$0xff] %v7213_v57  ;;  %v7215_v4 = vpop.f32.mrf.mxu0  ;;  %v2829_v60 = vadd.f32 %v7139_v13, %v7141_v18  ;;  %v2832_v13 = vadd.f32 %v7147_v23, %v7149_v21  ;;  %v2845_v23 = vadd.f32 %v7155_v14, %v7157_v47  ;;  %v2848_v14 = vadd.f32 %v7163_v58, %v7165_v9 }
 0x196   : > { %7881 = vst [vmem:[#allocation9_spill] sm:$0xff] %v7215_v4  ;;  %v7217_v50 = vpop.f32.mrf.mxu1  ;;  %v2861_v58 = vadd.f32 %v7171_v37, %v7173_v0  ;;  %v2864_v37 = vadd.f32 %v7179_v46, %v7181_v56  ;;  %v2877_v46 = vadd.f32 %v7187_v11, %v7189_v51  ;;  %v2880_v11 = vadd.f32 %v7195_v30, %v7197_v53 }
 0x197   : > { %7882 = vst [vmem:[#allocation11_spill] sm:$0xff] %v7217_v50  ;;  %v7219_v55 = vpop.f32.mrf.mxu0  ;;  %v2797_v50 = vadd.f32 %v7106_v49, %v7108_v26  ;;  %v7890_v30 = vld [vmem:[#allocation6_spill] sm:$0xff] }
 0x198   : > { %7883 = vst [vmem:[#allocation12_spill] sm:$0xff] %v7219_v55  ;;  %v7221_v48 = vpop.f32.mrf.mxu1  ;;  %v2893_v53 = vadd.f32 %v7890_v30, %v7205_v40 }
 0x199   : > { %7884 = vst [vmem:[#allocation13_spill] sm:$0xff] %v7221_v48  ;;  %v7223_v27 = vpop.f32.mrf.mxu0  ;;  %v3287_v48 = vld [vmem:[#allocation3 + $0x10] sm:$0xff] }
 0x19a   : > { %7885 = vst [vmem:[#allocation14_spill] sm:$0xff] %v7223_v27  ;;  %v7225_v16 = vpop.f32.mrf.mxu1 }
 0x19b   : > { %7886 = vst [vmem:[#allocation15_spill] sm:$0xff] %v7225_v16  ;;  %v7227_v54 = vpop.f32.mrf.mxu0  ;;  %v2808_v16 = vadd.f32 %v7111_v2, %v7113_v7  ;;  %v2821_v2 = vadd.f32 %v7119_v15, %v7121_v39  ;;  %v2824_v15 = vadd.f32 %v7127_v10, %v7129_v63  ;;  %v2837_v10 = vadd.f32 %v7135_v3, %v7137_v22 }
 0x19c   : > { %7887 = vst [vmem:[#allocation16_spill] sm:$0xff] %v7227_v54  ;;  %v7229_v19 = vpop.f32.mrf.mxu1  ;;  %v2840_v3 = vadd.f32 %v7143_v5, %v7145_v62  ;;  %v2853_v5 = vadd.f32 %v7151_v24, %v7153_v17  ;;  %v2856_v24 = vadd.f32 %v7159_v42, %v7161_v1  ;;  %v2869_v42 = vadd.f32 %v7167_v20, %v7169_v61  ;;  %v7893_v40 = vld [vmem:[#allocation4_spill] sm:$0xff] }
 0x19d   : > { %7888 = vst [vmem:[#allocation17_spill] sm:$0xff] %v7229_v19  ;;  %v7233_v57 = vpop.f32.mrf.mxu0  ;;  %v2872_v20 = vadd.f32 %v7175_v36, %v7177_v33  ;;  %v2885_v36 = vadd.f32 %v7183_v38, %v7185_v34  ;;  %v2888_v38 = vadd.f32 %v7191_v29, %v7193_v28  ;;  %v2901_v29 = vadd.f32 %v7199_v32, %v7201_v43  ;;  %v7891_v32 = vld [vmem:[#allocation7_spill] sm:$0xff]  ;;  %v7892_v43 = vld [vmem:[#allocation5_spill] sm:$0xff] }
 0x19e   : > { %v5955_v4 = vpop.f32.mrf.mxu1 }
 0x19f   : > { %v3255_v55 = vadd.f32 %v5955_v4, %v2805_v35  ;;  %v7237_v31 = vpop.f32.mrf.mxu0  ;;  %v3288_v4 = vld [vmem:[#allocation3 + $0x18] sm:$0xff] }
 0x1a0   : > { %7889 = vst [vmem:[#allocation18_spill] sm:$0xff] %v7237_v31  ;;  %v3126_v27 = vpop.f32.mrf.mxu1 }
 0x1a1   : > { %v3319_v54 = vadd.f32 %v3287_v48, %v3255_v55  ;;  %v3253_v8 = vadd.f32 %v3126_v27, %v2797_v50  ;;  %v7241_v19 = vpop.f32.mrf.mxu0  ;;  %v3286_v48 = vld [vmem:[#allocation3 + $0x8] sm:$0xff]  ;;  %v7900_v30 = vld [vmem:[#allocation14_spill] sm:$0xff] }
 0x1a2   : > { %v5956_v41 = vpop.f32.mrf.mxu1 }
 0x1a3   : > { %3351 = vst.msk [vmem:[#allocation3 + $0x10] sm:$0xff] %vm1345_vm2, %v3319_v54  ;;  %v3317_v49 = vadd.f32 %v3285_v45, %v3253_v8  ;;  %v3256_v26 = vadd.f32 %v5956_v41, %v2808_v16  ;;  %v7246_v35 = vpop.f32.mrf.mxu0  ;;  %v3291_v16 = vld [vmem:[#allocation3 + $0x30] sm:$0xff] }
 0x1a4   : > { %v3129_v31 = vpop.f32.mrf.mxu1 }
 0x1a5   : > { %3349 = vst.msk [vmem:[#allocation3] sm:$0xff] %vm1345_vm2, %v3317_v49  ;;  %v3320_v7 = vadd.f32 %v3288_v4, %v3256_v26  ;;  %v3254_v50 = vadd.f32 %v3129_v31, %v2800_v12  ;;  %v7251_v55 = vpop.f32.mrf.mxu0  ;;  %v3289_v12 = vld [vmem:[#allocation3 + $0x20] sm:$0xff] }
 0x1a6   : > { %v5959_v27 = vpop.f32.mrf.mxu1 }
 0x1a7   : > { %3352 = vst.msk [vmem:[#allocation3 + $0x18] sm:$0xff] %vm1345_vm2, %v3320_v7  ;;  %v3318_v6 = vadd.f32 %v3286_v48, %v3254_v50  ;;  %v3259_v45 = vadd.f32 %v5959_v27, %v2821_v2  ;;  %v7256_v8 = vpop.f32.mrf.mxu0  ;;  %v3292_v2 = vld [vmem:[#allocation3 + $0x38] sm:$0xff]  ;;  %v3290_v27 = vld [vmem:[#allocation3 + $0x28] sm:$0xff] }
 0x1a8   : > { %v3142_v54 = vpop.f32.mrf.mxu1 }
 0x1a9   : > { %3350 = vst.msk [vmem:[#allocation3 + $0x8] sm:$0xff] %vm1345_vm2, %v3318_v6  ;;  %v3323_v39 = vadd.f32 %v3291_v16, %v3259_v45  ;;  %v3257_v31 = vadd.f32 %v3142_v54, %v2813_v52  ;;  %v7261_v41 = vpop.f32.mrf.mxu0  ;;  %v3295_v16 = vld [vmem:[#allocation3 + $0x50] sm:$0xff] }
 0x1aa   : > { %v5960_v49 = vpop.f32.mrf.mxu1 }
 0x1ab   : > { %3355 = vst.msk [vmem:[#allocation3 + $0x30] sm:$0xff] %vm1345_vm2, %v3323_v39  ;;  %v3321_v44 = vadd.f32 %v3289_v12, %v3257_v31  ;;  %v3260_v26 = vadd.f32 %v5960_v49, %v2824_v15  ;;  %v7266_v4 = vpop.f32.mrf.mxu0  ;;  %v3293_v31 = vld [vmem:[#allocation3 + $0x40] sm:$0xff] }
 0x1ac   : > { %v3145_v7 = vpop.f32.mrf.mxu1 }
 0x1ad   : > { %3353 = vst.msk [vmem:[#allocation3 + $0x20] sm:$0xff] %vm1345_vm2, %v3321_v44  ;;  %v3324_v63 = vadd.f32 %v3292_v2, %v3260_v26  ;;  %v3258_v50 = vadd.f32 %v3145_v7, %v2816_v25  ;;  %v7271_v48 = vpop.f32.mrf.mxu0  ;;  %v3296_v44 = vld [vmem:[#allocation3 + $0x58] sm:$0xff] }
 0x1ae   : > { %v5963_v52 = vpop.f32.mrf.mxu1 }
 0x1af   : > { %3356 = vst.msk [vmem:[#allocation3 + $0x38] sm:$0xff] %vm1345_vm2, %v3324_v63  ;;  %v3322_v59 = vadd.f32 %v3290_v27, %v3258_v50  ;;  %v3263_v6 = vadd.f32 %v5963_v52, %v2837_v10  ;;  %v7276_v45 = vpop.f32.mrf.mxu0  ;;  %v3294_v10 = vld [vmem:[#allocation3 + $0x48] sm:$0xff]  ;;  %v3299_v52 = vld [vmem:[#allocation3 + $0x70] sm:$0xff] }
 0x1b0   : > { %v3158_v54 = vpop.f32.mrf.mxu1 }
 0x1b1   : > { %3354 = vst.msk [vmem:[#allocation3 + $0x28] sm:$0xff] %vm1345_vm2, %v3322_v59  ;;  %v3327_v22 = vadd.f32 %v3295_v16, %v3263_v6  ;;  %v3261_v15 = vadd.f32 %v3158_v54, %v2829_v60  ;;  %v7281_v39 = vpop.f32.mrf.mxu0  ;;  %v3297_v16 = vld [vmem:[#allocation3 + $0x60] sm:$0xff] }
 0x1b2   : > { %v5964_v12 = vpop.f32.mrf.mxu1 }
 0x1b3   : > { %3359 = vst.msk [vmem:[#allocation3 + $0x50] sm:$0xff] %vm1345_vm2, %v3327_v22  ;;  %v3325_v18 = vadd.f32 %v3293_v31, %v3261_v15  ;;  %v3264_v49 = vadd.f32 %v5964_v12, %v2840_v3  ;;  %v7286_v25 = vpop.f32.mrf.mxu0  ;;  %v3300_v15 = vld [vmem:[#allocation3 + $0x78] sm:$0xff] }
 0x1b4   : > { %v3161_v26 = vpop.f32.mrf.mxu1 }
 0x1b5   : > { %3357 = vst.msk [vmem:[#allocation3 + $0x40] sm:$0xff] %vm1345_vm2, %v3325_v18  ;;  %v3328_v62 = vadd.f32 %v3296_v44, %v3264_v49  ;;  %v3262_v2 = vadd.f32 %v3161_v26, %v2832_v13  ;;  %v7291_v7 = vpop.f32.mrf.mxu0  ;;  %v3298_v18 = vld [vmem:[#allocation3 + $0x68] sm:$0xff] }
 0x1b6   : > { %v5967_v63 = vpop.f32.mrf.mxu1 }
 0x1b7   : > { %3360 = vst.msk [vmem:[#allocation3 + $0x58] sm:$0xff] %vm1345_vm2, %v3328_v62  ;;  %v3326_v21 = vadd.f32 %v3294_v10, %v3262_v2  ;;  %v3267_v50 = vadd.f32 %v5967_v63, %v2853_v5  ;;  %v7296_v27 = vpop.f32.mrf.mxu0  ;;  %v3303_v5 = vld [vmem:[#allocation3 + $0x90] sm:$0xff]  ;;  %v3301_v63 = vld [vmem:[#allocation3 + $0x80] sm:$0xff] }
 0x1b8   : > { %v3174_v60 = vpop.f32.mrf.mxu1 }
 0x1b9   : > { %3358 = vst.msk [vmem:[#allocation3 + $0x48] sm:$0xff] %vm1345_vm2, %v3326_v21  ;;  %v3331_v17 = vadd.f32 %v3299_v52, %v3267_v50  ;;  %v3265_v59 = vadd.f32 %v3174_v60, %v2845_v23  ;;  %v7301_v6 = vpop.f32.mrf.mxu0  ;;  %v3304_v52 = vld [vmem:[#allocation3 + $0x98] sm:$0xff] }
 0x1ba   : > { %v5968_v54 = vpop.f32.mrf.mxu1 }
 0x1bb   : > { %3363 = vst.msk [vmem:[#allocation3 + $0x70] sm:$0xff] %vm1345_vm2, %v3331_v17  ;;  %v3329_v47 = vadd.f32 %v3297_v16, %v3265_v59  ;;  %v3268_v3 = vadd.f32 %v5968_v54, %v2856_v24  ;;  %v7306_v22 = vpop.f32.mrf.mxu0  ;;  %v3302_v59 = vld [vmem:[#allocation3 + $0x88] sm:$0xff] }
 0x1bc   : > { %v3177_v31 = vpop.f32.mrf.mxu1 }
 0x1bd   : > { %3361 = vst.msk [vmem:[#allocation3 + $0x60] sm:$0xff] %vm1345_vm2, %v3329_v47  ;;  %v3332_v1 = vadd.f32 %v3300_v15, %v3268_v3  ;;  %v3266_v12 = vadd.f32 %v3177_v31, %v2848_v14  ;;  %v7311_v13 = vpop.f32.mrf.mxu0  ;;  %v3307_v47 = vld [vmem:[#allocation3 + $0xb0] sm:$0xff] }
 0x1be   : > { %v5971_v49 = vpop.f32.mrf.mxu1 }
 0x1bf   : > { %3364 = vst.msk [vmem:[#allocation3 + $0x78] sm:$0xff] %vm1345_vm2, %v3332_v1  ;;  %v3330_v9 = vadd.f32 %v3298_v18, %v3266_v12  ;;  %v3271_v44 = vadd.f32 %v5971_v49, %v2869_v42  ;;  %v7316_v26 = vpop.f32.mrf.mxu0  ;;  %v3305_v42 = vld [vmem:[#allocation3 + $0xa0] sm:$0xff]  ;;  %v3308_v49 = vld [vmem:[#allocation3 + $0xb8] sm:$0xff] }
 0x1c0   : > { %v3190_v62 = vpop.f32.mrf.mxu1 }
 0x1c1   : > { %3362 = vst.msk [vmem:[#allocation3 + $0x68] sm:$0xff] %vm1345_vm2, %v3330_v9  ;;  %v3335_v61 = vadd.f32 %v3303_v5, %v3271_v44  ;;  %v3269_v2 = vadd.f32 %v3190_v62, %v2861_v58  ;;  %v7321_v10 = vpop.f32.mrf.mxu0  ;;  %v3306_v5 = vld [vmem:[#allocation3 + $0xa8] sm:$0xff] }
 0x1c2   : > { %v5972_v23 = vpop.f32.mrf.mxu1 }
 0x1c3   : > { %3367 = vst.msk [vmem:[#allocation3 + $0x90] sm:$0xff] %vm1345_vm2, %v3335_v61  ;;  %v3333_v0 = vadd.f32 %v3301_v63, %v3269_v2  ;;  %v3272_v21 = vadd.f32 %v5972_v23, %v2872_v20  ;;  %v7326_v50 = vpop.f32.mrf.mxu0  ;;  %v3311_v63 = vld [vmem:[#allocation3 + $0xd0] sm:$0xff] }
 0x1c4   : > { %v3193_v60 = vpop.f32.mrf.mxu1 }
 0x1c5   : > { %3365 = vst.msk [vmem:[#allocation3 + $0x80] sm:$0xff] %vm1345_vm2, %v3333_v0  ;;  %v3336_v33 = vadd.f32 %v3304_v52, %v3272_v21  ;;  %v3270_v24 = vadd.f32 %v3193_v60, %v2864_v37  ;;  %v7331_v17 = vpop.f32.mrf.mxu0  ;;  %v2904_v37 = vadd.f32 %v7892_v43, %v7891_v32  ;;  %v3309_v60 = vld [vmem:[#allocation3 + $0xc0] sm:$0xff]  ;;  %v7901_v43 = vld [vmem:[#allocation17_spill] sm:$0xff] }
 0x1c6   : > { %v5975_v16 = vpop.f32.mrf.mxu1 }
 0x1c7   : > { %3368 = vst.msk [vmem:[#allocation3 + $0x98] sm:$0xff] %vm1345_vm2, %v3336_v33  ;;  %v3334_v56 = vadd.f32 %v3302_v59, %v3270_v24  ;;  %v3275_v54 = vadd.f32 %v5975_v16, %v2885_v36  ;;  %v7336_v14 = vpop.f32.mrf.mxu0  ;;  %v7894_v33 = vld [vmem:[#allocation8_spill] sm:$0xff] }
 0x1c8   : > { %v3206_v3 = vpop.f32.mrf.mxu1  ;;  %v2896_v24 = vadd.f32 %v7894_v33, %v7893_v40  ;;  %v3316_v40 = vld [vmem:[#allocation3 + $0xf8] sm:$0xff] }
 0x1c9   : > { %3366 = vst.msk [vmem:[#allocation3 + $0x88] sm:$0xff] %vm1345_vm2, %v3334_v56  ;;  %v3339_v34 = vadd.f32 %v3307_v47, %v3275_v54  ;;  %v3273_v15 = vadd.f32 %v3206_v3, %v2877_v46  ;;  %v7341_v31 = vpop.f32.mrf.mxu0  ;;  %v3312_v56 = vld [vmem:[#allocation3 + $0xd8] sm:$0xff]  ;;  %v7896_v3 = vld [vmem:[#allocation9_spill] sm:$0xff] }
 0x1ca   : > { %v5976_v1 = vpop.f32.mrf.mxu1  ;;  %v7895_v47 = vld [vmem:[#allocation11_spill] sm:$0xff] }
 0x1cb   : > { %3371 = vst.msk [vmem:[#allocation3 + $0xb0] sm:$0xff] %vm1345_vm2, %v3339_v34  ;;  %v3337_v51 = vadd.f32 %v3305_v42, %v3273_v15  ;;  %v3276_v12 = vadd.f32 %v5976_v1, %v2888_v38  ;;  %v7346_v18 = vpop.f32.mrf.mxu0  ;;  %v2917_v38 = vadd.f32 %v7896_v3, %v7895_v47  ;;  %v3310_v1 = vld [vmem:[#allocation3 + $0xc8] sm:$0xff] }
 0x1cc   : > { %v3209_v58 = vpop.f32.mrf.mxu1  ;;  %v3314_v47 = vld [vmem:[#allocation3 + $0xe8] sm:$0xff] }
 0x1cd   : > { %3369 = vst.msk [vmem:[#allocation3 + $0xa0] sm:$0xff] %vm1345_vm2, %v3337_v51  ;;  %v3340_v28 = vadd.f32 %v3308_v49, %v3276_v12  ;;  %v3274_v9 = vadd.f32 %v3209_v58, %v2880_v11  ;;  %v7351_v44 = vpop.f32.mrf.mxu0  ;;  %v7897_v51 = vld [vmem:[#allocation13_spill] sm:$0xff]  ;;  %v7898_v12 = vld [vmem:[#allocation12_spill] sm:$0xff] }
 0x1ce   : > { %v5979_v62 = vpop.f32.mrf.mxu1  ;;  %v2909_v49 = vadd.f32 %v7898_v12, %v7897_v51 }
 0x1cf   : > { %3372 = vst.msk [vmem:[#allocation3 + $0xb8] sm:$0xff] %vm1345_vm2, %v3340_v28  ;;  %v3338_v20 = vadd.f32 %v3306_v5, %v3274_v9  ;;  %v3279_v61 = vadd.f32 %v5979_v62, %v2901_v29  ;;  %v7356_v2 = vpop.f32.mrf.mxu0  ;;  %v3315_v9 = vld [vmem:[#allocation3 + $0xf0] sm:$0xff]  ;;  %v7899_v62 = vld [vmem:[#allocation15_spill] sm:$0xff] }
 0x1d0   : > { %v3222_v23 = vpop.f32.mrf.mxu1 }
 0x1d1   : > { %3370 = vst.msk [vmem:[#allocation3 + $0xa8] sm:$0xff] %vm1345_vm2, %v3338_v20  ;;  %v3343_v0 = vadd.f32 %v3311_v63, %v3279_v61  ;;  %v3277_v21 = vadd.f32 %v3222_v23, %v2893_v53  ;;  %v7361_v52 = vpop.f32.mrf.mxu0  ;;  %v2920_v53 = vadd.f32 %v7900_v30, %v7899_v62  ;;  %v3313_v23 = vld [vmem:[#allocation3 + $0xe0] sm:$0xff] }
 0x1d2   : > { %v5980_v36 = vpop.f32.mrf.mxu1 }
 0x1d3   : > { %3375 = vst.msk [vmem:[#allocation3 + $0xd0] sm:$0xff] %vm1345_vm2, %v3343_v0  ;;  %v3341_v59 = vadd.f32 %v3309_v60, %v3277_v21  ;;  %v3280_v16 = vadd.f32 %v5980_v36, %v2904_v37  ;;  %v7366_v46 = vpop.f32.mrf.mxu0  ;;  %v7902_v37 = vld [vmem:[#allocation16_spill] sm:$0xff] }
 0x1d4   : > { %v3225_v54 = vpop.f32.mrf.mxu1  ;;  %v2912_v0 = vadd.f32 %v7902_v37, %v7901_v43  ;;  %v4546_v37 = vld [vmem:[#allocation3] sm:$0xff] }
 0x1d5   : > { %3373 = vst.msk [vmem:[#allocation3 + $0xc0] sm:$0xff] %vm1345_vm2, %v3341_v59  ;;  %v3344_v34 = vadd.f32 %v3312_v56, %v3280_v16  ;;  %v3278_v15 = vadd.f32 %v3225_v54, %v2896_v24  ;;  %v7371_v42 = vpop.f32.mrf.mxu0  ;;  %v7904_v24 = vld [vmem:[#allocation10_spill] sm:$0xff] }
 0x1d6   : > { %v5983_v11 = vpop.f32.mrf.mxu1  ;;  %v276_v59 = vadd.s32 24, %v7904_v24 }
 0x1d7   : > { %3376 = vst.msk [vmem:[#allocation3 + $0xd8] sm:$0xff] %vm1345_vm2, %v3344_v34  ;;  %v3342_v58 = vadd.f32 %v3310_v1, %v3278_v15  ;;  %v3283_v29 = vadd.f32 %v5983_v11, %v2917_v38  ;;  %v7376_v28 = vpop.f32.mrf.mxu0  ;;  %v274_v38 = vadd.s32 8, %v7904_v24  ;;  %v280_v34 = vadd.s32 56, %v7904_v24 }
 0x1d8   : > { %v3238_v5 = vpop.f32.mrf.mxu1  ;;  %v330_v12 = vand.u32 15, %v276_v59 }
 0x1d9   : > { %3374 = vst.msk [vmem:[#allocation3 + $0xc8] sm:$0xff] %vm1345_vm2, %v3342_v58  ;;  %v3347_v20 = vadd.f32 %v3315_v9, %v3283_v29  ;;  %v3281_v61 = vadd.f32 %v3238_v5, %v2909_v49  ;;  %v7381_v63 = vpop.f32.mrf.mxu0  ;;  %v7905_v58 = vld [vmem:[#allocation18_spill] sm:$0xff]  ;;  %v316_v30 = vand.u32 15, %v274_v38 }
 0x1da   : > { %v5984_v32 = vpop.f32.mrf.mxu1  ;;  %v4548_v5 = vld [vmem:[#allocation3 + $0x10] sm:$0xff]  ;;  %vm7399_vm6 = vcmp.ne.s32.totalorder %v330_v12, 15  ;;  %v7421_v12 = vadd.s32 120, %v7904_v24 }
 0x1db   : > { %3379 = vst.msk [vmem:[#allocation3 + $0xf0] sm:$0xff] %vm1345_vm2, %v3347_v20  ;;  %v3345_v21 = vadd.f32 %v3313_v23, %v3281_v61  ;;  %v3284_v60 = vadd.f32 %v5984_v32, %v2920_v53  ;;  %v7386_v36 = vpop.f32.mrf.mxu0  ;;  %v358_v53 = vand.u32 15, %v280_v34  ;;  %v278_v20 = vadd.s32 40, %v7904_v24 }
 0x1dc   : > { %7903 = vst [vmem:[#allocation6_spill] sm:$0xff] %v7386_v36  ;;  %v3241_v33 = vpop.f32.mrf.mxu1  ;;  %v284_v61 = vadd.s32 88, %v7904_v24  ;;  %vm7405_vm7 = vcmp.ne.s32.totalorder %v316_v30, 15  ;;  %v7434_v30 = vadd.s32 136, %v7904_v24 }
 0x1dd   : > { %3377 = vst.msk [vmem:[#allocation3 + $0xe0] sm:$0xff] %vm1345_vm2, %v3345_v21  ;;  %v3348_v16 = vadd.f32 %v3316_v40, %v3284_v60  ;;  %v3282_v56 = vadd.f32 %v3241_v33, %v2912_v0  ;;  %v6057_v54 = vpop.f32.mrf.mxu0  ;;  %vm7409_vm8 = vcmp.ne.s32.totalorder %v358_v53, 15 }
 0x1de   : > { %v6023_v3 = vpop.f32.mrf.mxu1 }
 0x1df   : > { %3380 = vst.msk [vmem:[#allocation3 + $0xf8] sm:$0xff] %vm1345_vm2, %v3348_v16  ;;  %v3346_v15 = vadd.f32 %v3314_v47, %v3282_v56  ;;  %v3930_v1 = vadd.f32 %v6023_v3, %v7233_v57  ;;  %v4387_v11 = vpop.f32.mrf.mxu0  ;;  %v386_v47 = vand.u32 15, %v284_v61  ;;  %v4549_v3 = vld [vmem:[#allocation3 + $0x18] sm:$0xff] }
 0x1e0   : > { %v3921_v51 = vpop.f32.mrf.mxu1 }
 0x1e1   : > { %3378 = vst.msk [vmem:[#allocation3 + $0xe8] sm:$0xff] %vm1345_vm2, %v3346_v15  ;;  %v4516_v49 = vadd.f32 %v6057_v54, %v3930_v1  ;;  %v3922_v29 = vadd.f32 %v3921_v51, %v7905_v58  ;;  %v6058_v9 = vpop.f32.mrf.mxu0  ;;  %v344_v54 = vand.u32 15, %v278_v20  ;;  %v7418_v1 = vadd.s32 72, %v7904_v24  ;;  %v4552_v20 = vld [vmem:[#allocation3 + $0x30] sm:$0xff] }
 0x1e2   : > { %v6024_v62 = vpop.f32.mrf.mxu1  ;;  %v7427_v58 = vadd.s32 152, %v7904_v24  ;;  %vm7466_vm10 = vcmp.ne.s32.totalorder %v386_v47, 15 }
 0x1e3   : > { %v4676_v23 = vadd.f32 %v4548_v5, %v4516_v49  ;;  %v4514_v32 = vadd.f32 %v4387_v11, %v3922_v29  ;;  %v3933_v57 = vadd.f32 %v6024_v62, %v7241_v19  ;;  %v4390_v43 = vpop.f32.mrf.mxu0  ;;  %v7424_v49 = vadd.s32 104, %v7904_v24  ;;  %v4547_v29 = vld [vmem:[#allocation3 + $0x8] sm:$0xff] }
 0x1e4   : > { %v3924_v21 = vpop.f32.mrf.mxu1  ;;  %vm7456_vm9 = vcmp.ne.s32.totalorder %v344_v54, 15  ;;  %v7493_v19 = vadd.s32 232, %v7904_v24 }
 0x1e5   : > { %4708 = vst.msk [vmem:[#allocation3 + $0x10] sm:$0xff] %vm1345_vm2, %v4676_v23  ;;  %v4674_v60 = vadd.f32 %v4546_v37, %v4514_v32  ;;  %v4517_v40 = vadd.f32 %v6058_v9, %v3933_v57  ;;  %v3925_v33 = vadd.f32 %v3924_v21, %v7246_v35  ;;  %v6061_v59 = vpop.f32.mrf.mxu0  ;;  %v7438_v23 = vadd.s32 184, %v7904_v24 }
 0x1e6   : > { %v6027_v56 = vpop.f32.mrf.mxu1  ;;  %v7441_v32 = vadd.s32 168, %v7904_v24  ;;  %v7444_v57 = vadd.s32 216, %v7904_v24  ;;  %v7448_v21 = vadd.s32 200, %v7904_v24 }
 0x1e7   : > { %4706 = vst.msk [vmem:[#allocation3] sm:$0xff] %vm1345_vm2, %v4674_v60  ;;  %v4645_v38 = vsel %vm7399_vm6, %v4517_v40, 0.0  ;;  %v4515_v35 = vadd.f32 %v4390_v43, %v3925_v33  ;;  %v3946_v34 = vadd.f32 %v6027_v56, %v7251_v55  ;;  %v4403_v15 = vpop.f32.mrf.mxu0  ;;  %v4550_v40 = vld [vmem:[#allocation3 + $0x20] sm:$0xff]  ;;  %v7463_v56 = vadd.s32 248, %v7904_v24 }
 0x1e8   : > { %v4677_v11 = vadd.f32 %v4645_v38, %v4549_v3  ;;  %v3937_v51 = vpop.f32.mrf.mxu1 }
 0x1e9   : > { %v4643_v55 = vsel %vm7405_vm7, %v4515_v35, 0.0  ;;  %v4520_v9 = vadd.f32 %v6061_v59, %v3946_v34  ;;  %v3938_v5 = vadd.f32 %v3937_v51, %v7256_v8  ;;  %v6062_v62 = vpop.f32.mrf.mxu0 }
 0x1ea   : > { %4709 = vst.msk [vmem:[#allocation3 + $0x18] sm:$0xff] %vm1345_vm2, %v4677_v11  ;;  %v4675_v53 = vadd.f32 %v4643_v55, %v4547_v29  ;;  %v6028_v61 = vpop.f32.mrf.mxu1 }
 0x1eb   : > { %v4680_v43 = vadd.f32 %v4552_v20, %v4520_v9  ;;  %v4518_v8 = vadd.f32 %v4403_v15, %v3938_v5  ;;  %v3949_v37 = vadd.f32 %v6028_v61, %v7261_v41  ;;  %v4406_v0 = vpop.f32.mrf.mxu0  ;;  %v372_v41 = vand.u32 15, %v7418_v1  ;;  %v4553_v61 = vld [vmem:[#allocation3 + $0x38] sm:$0xff] }
 0x1ec   : > { %v4740_v60 = vld [vmem:[#allocation3 + $0x10] sm:$0xff]  ;;  %4707 = vst.msk [vmem:[#allocation3 + $0x8] sm:$0xff] %vm1345_vm2, %v4675_v53  ;;  %v3940_v33 = vpop.f32.mrf.mxu1 }
 0x1ed   : > { %v5598_v3 = vpack.c.bf16 %v4740_v60, %v4740_v60  ;;  %4712 = vst.msk [vmem:[#allocation3 + $0x30] sm:$0xff] %vm1345_vm2, %v4680_v43  ;;  %v4678_v38 = vadd.f32 %v4550_v40, %v4518_v8  ;;  %v6065_v35 = vpop.f32.mrf.mxu0  ;;  %v4521_v11 = vadd.f32 %v6062_v62, %v3949_v37  ;;  %v3941_v51 = vadd.f32 %v3940_v33, %v7266_v4 }
 0x1ee   : > { %v4738_v1 = vld [vmem:[#allocation3] sm:$0xff]  ;;  %v6031_v29 = vpop.f32.mrf.mxu1  ;;  %vm7488_vm11 = vcmp.ne.s32.totalorder %v372_v41, 15 }
 0x1ef   : > { %5072 = vst.msk [vmem:[%s7453_s30 + $0x8] sm:$0xf] %vm753_vm0, %v5598_v3  ;;  %v5596_v47 = vpack.c.bf16 %v4738_v1, %v4738_v1  ;;  %v4419_v5 = vpop.f32.mrf.mxu0  ;;  %v4649_v4 = vsel %vm7409_vm8, %v4521_v11, 0.0  ;;  %v4519_v43 = vadd.f32 %v4406_v0, %v3941_v51  ;;  %v3962_v8 = vadd.f32 %v6031_v29, %v7271_v48  ;;  %v4551_v51 = vld [vmem:[#allocation3 + $0x28] sm:$0xff] }
 0x1f0   : > { %4710 = vst.msk [vmem:[#allocation3 + $0x20] sm:$0xff] %vm1345_vm2, %v4678_v38  ;;  %v3953_v37 = vpop.f32.mrf.mxu1  ;;  %v4840_v33 = vmul.f32 %v4738_v1, %v4738_v1  ;;  %v4681_v38 = vadd.f32 %v4649_v4, %v4553_v61  ;;  %v4773_v48 = vsel %vm1345_vm2, %v4740_v60, 0.0  ;;  %v4842_v0 = vmul.f32 %v4740_v60, %v4740_v60 }
 0x1f1   : > { %5070 = vst.msk [vmem:[%s7453_s30] sm:$0xf] %vm753_vm0, %v5596_v47  ;;  %v4741_v3 = vld [vmem:[#allocation3 + $0x18] sm:$0xff]  ;;  %v3954_v53 = vadd.f32 %v3953_v37, %v7276_v45  ;;  %v6066_v20 = vpop.f32.mrf.mxu0  ;;  %v4647_v29 = vsel %vm7456_vm9, %v4519_v43, 0.0  ;;  %v4524_v41 = vadd.f32 %v6065_v35, %v3962_v8  ;;  %v4770_v24 = vsel %vm1345_vm2, %v4738_v1, 0.0  ;;  %v4556_v1 = vld [vmem:[#allocation3 + $0x50] sm:$0xff] }
 0x1f2   : > { %v5599_v11 = vpack.c.bf16 %v4741_v3, %v4741_v3  ;;  %v6032_v47 = vpop.f32.mrf.mxu1  ;;  %4713 = vst.msk [vmem:[#allocation3 + $0x38] sm:$0xff] %vm1345_vm2, %v4681_v38  ;;  %v4679_v45 = vadd.f32 %v4647_v29, %v4551_v51  ;;  %v4872_v38 = vsel %vm1345_vm2, %v4840_v33, 0.0  ;;  %v4843_v51 = vmul.f32 %v4741_v3, %v4741_v3 }
 0x1f3   : > { %v4739_v61 = vld [vmem:[#allocation3 + $0x8] sm:$0xff]  ;;  %v4522_v4 = vadd.f32 %v4419_v5, %v3954_v53  ;;  %v3965_v37 = vadd.f32 %v6032_v47, %v7281_v39  ;;  %v4422_v40 = vpop.f32.mrf.mxu0  ;;  %v4554_v5 = vld [vmem:[#allocation3 + $0x40] sm:$0xff]  ;;  %v4684_v29 = vadd.f32 %v4556_v1, %v4524_v41 }
 0x1f4   : > { %5073 = vst.msk [vmem:[%s7453_s30 + $0xc] sm:$0xf] %vm753_vm0, %v5599_v11  ;;  %v4771_v60 = vsel %vm1345_vm2, %v4739_v61, 0.0  ;;  %v4841_v9 = vmul.f32 %v4739_v61, %v4739_v61  ;;  %v5597_v59 = vpack.c.bf16 %v4739_v61, %v4739_v61  ;;  %v7504_v43 = vld [vmem:[#allocation3 + $0x30] sm:$0xff]  ;;  %v3956_v55 = vpop.f32.mrf.mxu1 }
 0x1f5   : > { %v4772_v35 = vadd.f32 %v4771_v60, %v4770_v24  ;;  %v5602_v39 = vpack.c.bf16 %v7504_v43, %v7504_v43  ;;  %4711 = vst.msk [vmem:[#allocation3 + $0x28] sm:$0xff] %vm1345_vm2, %v4679_v45  ;;  %v6069_v53 = vpop.f32.mrf.mxu0  ;;  %v4682_v47 = vadd.f32 %v4554_v5, %v4522_v4  ;;  %v4525_v61 = vadd.f32 %v6066_v20, %v3965_v37 }
 0x1f6   : > { %v4873_v8 = vsel %vm1345_vm2, %v4841_v9, 0.0  ;;  %5071 = vst.msk [vmem:[%s7453_s30 + $0x4] sm:$0xf] %vm753_vm0, %v5597_v59  ;;  %v6035_v33 = vpop.f32.mrf.mxu1  ;;  %v4875_v24 = vsel %vm1345_vm2, %v4842_v0, 0.0  ;;  %v4775_v60 = vsel %vm1345_vm2, %v4741_v3, 0.0  ;;  %v4557_v9 = vld [vmem:[#allocation3 + $0x58] sm:$0xff]  ;;  %v3957_v0 = vadd.f32 %v3956_v55, %v7286_v25 }
 0x1f7   : > { %v4742_v11 = vld [vmem:[#allocation3 + $0x20] sm:$0xff]  ;;  %v4774_v15 = vadd.f32 %v4773_v48, %v4772_v35  ;;  %v4874_v54 = vadd.f32 %v4873_v8, %v4872_v38  ;;  %5076 = vst.msk [vmem:[%s7453_s30 + $0x18] sm:$0xf] %vm753_vm0, %v5602_v39  ;;  %v4435_v45 = vpop.f32.mrf.mxu0  ;;  %v4653_v20 = vsel %vm7466_vm10, %v4525_v61, 0.0  ;;  %v3978_v37 = vadd.f32 %v6035_v33, %v7291_v7 }
 0x1f8   : > { %v4844_v16 = vmul.f32 %v4742_v11, %v4742_v11  ;;  %v5600_v36 = vpack.c.bf16 %v4742_v11, %v4742_v11  ;;  %4716 = vst.msk [vmem:[#allocation3 + $0x50] sm:$0xff] %vm1345_vm2, %v4684_v29  ;;  %4714 = vst.msk [vmem:[#allocation3 + $0x40] sm:$0xff] %vm1345_vm2, %v4682_v47  ;;  %v3969_v41 = vpop.f32.mrf.mxu1  ;;  %v4685_v4 = vadd.f32 %v4653_v20, %v4557_v9  ;;  %v7918_v59 = vand.u32 15, %v7421_v12  ;;  %v4560_v9 = vld [vmem:[#allocation3 + $0x70] sm:$0xff] }
 0x1f9   : > { %v4876_v3 = vadd.f32 %v4875_v24, %v4874_v54  ;;  %v4776_v48 = vadd.f32 %v4775_v60, %v4774_v15  ;;  %v6070_v35 = vpop.f32.mrf.mxu0  ;;  %v4877_v39 = vsel %vm1345_vm2, %v4843_v51, 0.0  ;;  %v4777_v34 = vsel %vm1345_vm2, %v4742_v11, 0.0  ;;  %v4745_v25 = vld [vmem:[#allocation3 + $0x38] sm:$0xff] }
 0x1fa   : > { %vm7525_vm12 = vcmp.ne.s32.totalorder %v7918_v59, 15  ;;  %5074 = vst.msk [vmem:[%s7453_s30 + $0x10] sm:$0xf] %vm753_vm0, %v5600_v36  ;;  %v4523_v55 = vadd.f32 %v4422_v40, %v3957_v0  ;;  %v3970_v54 = vadd.f32 %v3969_v41, %v7296_v27  ;;  %v6036_v15 = vpop.f32.mrf.mxu1  ;;  %v4846_v7 = vmul.f32 %v7504_v43, %v7504_v43 }
 0x1fb   : > { %v4778_v12 = vadd.f32 %v4777_v34, %v4776_v48  ;;  %v4878_v1 = vadd.f32 %v4877_v39, %v4876_v3  ;;  %v4879_v5 = vsel %vm1345_vm2, %v4844_v16, 0.0  ;;  %4717 = vst.msk [vmem:[#allocation3 + $0x58] sm:$0xff] %vm1345_vm2, %v4685_v4  ;;  %v7921_v51 = vand.u32 15, %v7424_v49  ;;  %v4438_v36 = vpop.f32.mrf.mxu0  ;;  %v4555_v49 = vld [vmem:[#allocation3 + $0x48] sm:$0xff]  ;;  %v4558_v48 = vld [vmem:[#allocation3 + $0x60] sm:$0xff] }
 0x1fc   : > { %v5603_v40 = vpack.c.bf16 %v4745_v25, %v4745_v25  ;;  %v4743_v27 = vld [vmem:[#allocation3 + $0x28] sm:$0xff]  ;;  %v4651_v11 = vsel %vm7488_vm11, %v4523_v55, 0.0  ;;  %v4528_v29 = vadd.f32 %v6069_v53, %v3978_v37  ;;  %v4526_v47 = vadd.f32 %v4435_v45, %v3970_v54  ;;  %v3972_v61 = vpop.f32.mrf.mxu1 }
 0x1fd   : > { %vm7540_vm13 = vcmp.ne.s32.totalorder %v7921_v51, 15  ;;  %v4880_v33 = vadd.f32 %v4879_v5, %v4878_v1  ;;  %v4847_v16 = vmul.f32 %v4745_v25, %v4745_v25  ;;  %v4779_v24 = vsel %vm1345_vm2, %v4743_v27, 0.0  ;;  %v7547_v20 = vpop.f32.mrf.mxu0 }
 0x1fe   : > { %v4845_v60 = vmul.f32 %v4743_v27, %v4743_v27  ;;  %5077 = vst.msk [vmem:[%s7453_s30 + $0x1c] sm:$0xf] %vm753_vm0, %v5603_v40  ;;  %v4780_v0 = vadd.f32 %v4779_v24, %v4778_v12  ;;  %v5601_v41 = vpack.c.bf16 %v4743_v27, %v4743_v27  ;;  %v4683_v3 = vadd.f32 %v4651_v11, %v4555_v49  ;;  %v6039_v53 = vpop.f32.mrf.mxu1 }
 0x1ff   : > { %v4688_v62 = vadd.f32 %v4560_v9, %v4528_v29  ;;  %v4781_v45 = vsel %vm1345_vm2, %v7504_v43, 0.0  ;;  %v4748_v37 = vld [vmem:[#allocation3 + $0x50] sm:$0xff]  ;;  %v4746_v59 = vld [vmem:[#allocation3 + $0x40] sm:$0xff]  ;;  %v4686_v39 = vadd.f32 %v4558_v48, %v4526_v47  ;;  %v3981_v34 = vadd.f32 %v6036_v15, %v7301_v6  ;;  %v4451_v55 = vpop.f32.mrf.mxu0 }
 0x200   : > { %v4881_v4 = vsel %vm1345_vm2, %v4845_v60, 0.0  ;;  %v4883_v54 = vsel %vm1345_vm2, %v4846_v7, 0.0  ;;  %v4782_v12 = vadd.f32 %v4781_v45, %v4780_v0  ;;  %5075 = vst.msk [vmem:[%s7453_s30 + $0x14] sm:$0xf] %vm753_vm0, %v5601_v41  ;;  %v3973_v43 = vadd.f32 %v3972_v61, %v7306_v22  ;;  %v3985_v5 = vpop.f32.mrf.mxu1 }
 0x201   : > { %v4882_v1 = vadd.f32 %v4881_v4, %v4880_v33  ;;  %4715 = vst.msk [vmem:[#allocation3 + $0x48] sm:$0xff] %vm1345_vm2, %v4683_v3  ;;  %4720 = vst.msk [vmem:[#allocation3 + $0x70] sm:$0xff] %vm1345_vm2, %v4688_v62  ;;  %v4783_v51 = vsel %vm1345_vm2, %v4745_v25, 0.0  ;;  %v5606_v40 = vpack.c.bf16 %v4748_v37, %v4748_v37  ;;  %v4848_v6 = vmul.f32 %v4746_v59, %v4746_v59  ;;  %v7563_v7 = vpop.f32.mrf.mxu0  ;;  %v4561_v62 = vld [vmem:[#allocation3 + $0x78] sm:$0xff] }
 0x202   : > { %v5604_v15 = vpack.c.bf16 %v4746_v59, %v4746_v59  ;;  %4718 = vst.msk [vmem:[#allocation3 + $0x60] sm:$0xff] %vm1345_vm2, %v4686_v39  ;;  %v4885_v27 = vsel %vm1345_vm2, %v4847_v16, 0.0  ;;  %v4784_v29 = vadd.f32 %v4783_v51, %v4782_v12  ;;  %v4749_v47 = vld [vmem:[#allocation3 + $0x58] sm:$0xff]  ;;  %v4529_v33 = vadd.f32 %v6070_v35, %v3981_v34  ;;  %v6040_v24 = vpop.f32.mrf.mxu1  ;;  %v4559_v12 = vld [vmem:[#allocation3 + $0x68] sm:$0xff] }
 0x203   : > { %v4884_v11 = vadd.f32 %v4883_v54, %v4882_v1  ;;  %v4789_v22 = vsel %vm1345_vm2, %v4748_v37, 0.0  ;;  %v4850_v61 = vmul.f32 %v4748_v37, %v4748_v37  ;;  %5080 = vst.msk [vmem:[%s7453_s30 + $0x28] sm:$0xf] %vm753_vm0, %v5606_v40  ;;  %v4785_v25 = vsel %vm1345_vm2, %v4746_v59, 0.0  ;;  %v4454_v0 = vpop.f32.mrf.mxu0 }
 0x204   : > { %5078 = vst.msk [vmem:[%s7453_s30 + $0x20] sm:$0xf] %vm753_vm0, %v5604_v15  ;;  %v5607_v60 = vpack.c.bf16 %v4749_v47, %v4749_v47  ;;  %v7924_v49 = vand.u32 15, %v7427_v58  ;;  %v7927_v35 = vand.u32 15, %v7434_v30  ;;  %v4887_v3 = vsel %vm1345_vm2, %v4848_v6, 0.0  ;;  %v3988_v58 = vpop.f32.mrf.mxu1 }
 0x205   : > { %v4886_v41 = vadd.f32 %v4885_v27, %v4884_v11  ;;  %v4657_v48 = vsel %vm7525_vm12, %v4529_v33, 0.0  ;;  %v4527_v45 = vadd.f32 %v4438_v36, %v3973_v43  ;;  %v4786_v4 = vadd.f32 %v4785_v25, %v4784_v29  ;;  %v6077_v39 = vpop.f32.mrf.mxu0 }
 0x206   : > { %vm7574_vm14 = vcmp.ne.s32.totalorder %v7924_v49, 15  ;;  %vm7580_vm15 = vcmp.ne.s32.totalorder %v7927_v35, 15  ;;  %5081 = vst.msk [vmem:[%s7453_s30 + $0x2c] sm:$0xf] %vm753_vm0, %v5607_v60  ;;  %v4689_v37 = vadd.f32 %v4657_v48, %v4561_v62  ;;  %v3994_v30 = vadd.f32 %v6039_v53, %v7311_v13  ;;  %v6043_v51 = vpop.f32.mrf.mxu1  ;;  %v4562_v49 = vld [vmem:[#allocation3 + $0x80] sm:$0xff] }
 0x207   : > { %v3986_v59 = vadd.f32 %v3985_v5, %v7316_v26  ;;  %v4888_v34 = vadd.f32 %v4887_v3, %v4886_v41  ;;  %v4851_v54 = vmul.f32 %v4749_v47, %v4749_v47  ;;  %v4655_v1 = vsel %vm7540_vm13, %v4527_v45, 0.0  ;;  %v4467_v5 = vpop.f32.mrf.mxu0 }
 0x208   : > { %v3997_v38 = vadd.f32 %v6040_v24, %v7321_v10  ;;  %v4747_v36 = vld [vmem:[#allocation3 + $0x48] sm:$0xff]  ;;  %v7594_v43 = vld [vmem:[#allocation3 + $0x70] sm:$0xff]  ;;  %4721 = vst.msk [vmem:[#allocation3 + $0x78] sm:$0xff] %vm1345_vm2, %v4689_v37  ;;  %v4687_v40 = vadd.f32 %v4655_v1, %v4559_v12  ;;  %v4532_v13 = vadd.f32 %v7547_v20, %v3994_v30  ;;  %v3989_v26 = vadd.f32 %v3988_v58, %v7326_v50  ;;  %v4001_v11 = vpop.f32.mrf.mxu1 }
 0x209   : > { %v4530_v53 = vadd.f32 %v4451_v55, %v3986_v59  ;;  %v4787_v6 = vsel %vm1345_vm2, %v4747_v36, 0.0  ;;  %v4849_v8 = vmul.f32 %v4747_v36, %v4747_v36  ;;  %v5605_v15 = vpack.c.bf16 %v4747_v36, %v4747_v36  ;;  %v4750_v27 = vld [vmem:[#allocation3 + $0x60] sm:$0xff]  ;;  %v4564_v50 = vld [vmem:[#allocation3 + $0x90] sm:$0xff]  ;;  %v6078_v55 = vpop.f32.mrf.mxu0 }
 0x20a   : > { %v4010_v10 = vadd.f32 %v6043_v51, %v7331_v17  ;;  %v4891_v29 = vsel %vm1345_vm2, %v4850_v61, 0.0  ;;  %v4791_v33 = vsel %vm1345_vm2, %v4749_v47, 0.0  ;;  %v4788_v24 = vadd.f32 %v4787_v6, %v4786_v4  ;;  %4719 = vst.msk [vmem:[#allocation3 + $0x68] sm:$0xff] %vm1345_vm2, %v4687_v40  ;;  %v6044_v35 = vpop.f32.mrf.mxu1  ;;  %v4568_v51 = vld [vmem:[#allocation3 + $0xb0] sm:$0xff] }
 0x20b   : > { %v5610_v20 = vpack.c.bf16 %v7594_v43, %v7594_v43  ;;  %v4893_v25 = vsel %vm1345_vm2, %v4851_v54, 0.0  ;;  %v4889_v60 = vsel %vm1345_vm2, %v4849_v8, 0.0  ;;  %5079 = vst.msk [vmem:[%s7453_s30 + $0x24] sm:$0xf] %vm753_vm0, %v5605_v15  ;;  %v5608_v17 = vpack.c.bf16 %v4750_v27, %v4750_v27  ;;  %v4470_v58 = vpop.f32.mrf.mxu0  ;;  %v4565_v8 = vld [vmem:[#allocation3 + $0x98] sm:$0xff] }
 0x20c   : > { %v4692_v61 = vadd.f32 %v4564_v50, %v4532_v13  ;;  %v4790_v47 = vadd.f32 %v4789_v22, %v4788_v24  ;;  %v4890_v41 = vadd.f32 %v4889_v60, %v4888_v34  ;;  %v4852_v3 = vmul.f32 %v4750_v27, %v4750_v27  ;;  %v4004_v59 = vpop.f32.mrf.mxu1 }
 0x20d   : > { %5084 = vst.msk [vmem:[%s7453_s30 + $0x38] sm:$0xf] %vm753_vm0, %v5610_v20  ;;  %v4690_v62 = vadd.f32 %v4562_v49, %v4530_v53  ;;  %v7930_v48 = vand.u32 15, %v7438_v23  ;;  %v4854_v4 = vmul.f32 %v7594_v43, %v7594_v43  ;;  %5082 = vst.msk [vmem:[%s7453_s30 + $0x30] sm:$0xf] %vm753_vm0, %v5608_v17  ;;  %v4533_v22 = vadd.f32 %v7563_v7, %v3997_v38  ;;  %v7633_v40 = vpop.f32.mrf.mxu0 }
 0x20e   : > { %4724 = vst.msk [vmem:[#allocation3 + $0x90] sm:$0xff] %vm1345_vm2, %v4692_v61  ;;  %v4531_v37 = vadd.f32 %v4454_v0, %v3989_v26  ;;  %v4536_v30 = vadd.f32 %v6077_v39, %v4010_v10  ;;  %v7933_v34 = vand.u32 15, %v7441_v32  ;;  %v4892_v54 = vadd.f32 %v4891_v29, %v4890_v41  ;;  %v6047_v13 = vpop.f32.mrf.mxu1 }
 0x20f   : > { %vm7614_vm1 = vcmp.ne.s32.totalorder %v7930_v48, 15  ;;  %v4792_v12 = vadd.f32 %v4791_v33, %v4790_v47  ;;  %v4793_v1 = vsel %vm1345_vm2, %v4750_v27, 0.0  ;;  %4722 = vst.msk [vmem:[#allocation3 + $0x80] sm:$0xff] %vm1345_vm2, %v4690_v62  ;;  %v4002_v36 = vadd.f32 %v4001_v11, %v7336_v14  ;;  %v4753_v7 = vld [vmem:[#allocation3 + $0x78] sm:$0xff]  ;;  %v4563_v14 = vld [vmem:[#allocation3 + $0x88] sm:$0xff]  ;;  %v7642_v27 = vpop.f32.mrf.mxu0 }
 0x210   : > { %vm7626_vm4 = vcmp.ne.s32.totalorder %v7933_v34, 15  ;;  %v4661_v0 = vsel %vm7574_vm14, %v4533_v22, 0.0  ;;  %v4659_v32 = vsel %vm7580_vm15, %v4531_v37, 0.0  ;;  %v4696_v39 = vadd.f32 %v4568_v51, %v4536_v30 }
 0x211   : > { %v4013_v38 = vadd.f32 %v6044_v35, %v7341_v31  ;;  %v4794_v53 = vadd.f32 %v4793_v1, %v4792_v12  ;;  %v4894_v26 = vadd.f32 %v4893_v25, %v4892_v54  ;;  %v4895_v6 = vsel %vm1345_vm2, %v4852_v3, 0.0  ;;  %v4751_v10 = vld [vmem:[#allocation3 + $0x68] sm:$0xff]  ;;  %v4017_v31 = vpop.f32.mrf.mxu1  ;;  %v4566_v25 = vld [vmem:[#allocation3 + $0xa0] sm:$0xff]  ;;  %v4569_v1 = vld [vmem:[#allocation3 + $0xb8] sm:$0xff] }
 0x212   : > { %v4005_v15 = vadd.f32 %v4004_v59, %v7346_v18  ;;  %v5611_v16 = vpack.c.bf16 %v4753_v7, %v4753_v7  ;;  %v4693_v11 = vadd.f32 %v4661_v0, %v4565_v8  ;;  %v4691_v9 = vadd.f32 %v4659_v32, %v4563_v14  ;;  %4728 = vst.msk [vmem:[#allocation3 + $0xb0] sm:$0xff] %vm1345_vm2, %v4696_v39 }
 0x213   : > { %v4534_v29 = vadd.f32 %v4467_v5, %v4002_v36  ;;  %v4896_v33 = vadd.f32 %v4895_v6, %v4894_v26  ;;  %v4855_v24 = vmul.f32 %v4753_v7, %v4753_v7  ;;  %v4795_v20 = vsel %vm1345_vm2, %v4751_v10, 0.0  ;;  %v7650_v49 = vpop.f32.mrf.mxu1  ;;  %v7652_v5 = vpop.f32.mrf.mxu0 }
 0x214   : > { %v4853_v50 = vmul.f32 %v4751_v10, %v4751_v10  ;;  %5085 = vst.msk [vmem:[%s7453_s30 + $0x3c] sm:$0xf] %vm753_vm0, %v5611_v16  ;;  %v4796_v60 = vadd.f32 %v4795_v20, %v4794_v53  ;;  %v5609_v18 = vpack.c.bf16 %v4751_v10, %v4751_v10  ;;  %v4537_v61 = vadd.f32 %v6078_v55, %v4013_v38  ;;  %v4572_v16 = vld [vmem:[#allocation3 + $0xd0] sm:$0xff] }
 0x215   : > { %4725 = vst.msk [vmem:[#allocation3 + $0x98] sm:$0xff] %vm1345_vm2, %v4693_v11  ;;  %4723 = vst.msk [vmem:[#allocation3 + $0x88] sm:$0xff] %vm1345_vm2, %v4691_v9  ;;  %v4694_v17 = vadd.f32 %v4566_v25, %v4534_v29  ;;  %v4797_v35 = vsel %vm1345_vm2, %v7594_v43, 0.0  ;;  %v4756_v41 = vld [vmem:[#allocation3 + $0x90] sm:$0xff]  ;;  %v4535_v3 = vadd.f32 %v4470_v58, %v4005_v15  ;;  %v4026_v62 = vadd.f32 %v6047_v13, %v7351_v44  ;;  %v7663_v43 = vpop.f32.mrf.mxu1  ;;  %v7675_v0 = vpop.f32.mrf.mxu0  ;;  %v4567_v15 = vld [vmem:[#allocation3 + $0xa8] sm:$0xff] }
 0x216   : > { %v4897_v47 = vsel %vm1345_vm2, %v4853_v50, 0.0  ;;  %v4899_v48 = vsel %vm1345_vm2, %v4854_v4, 0.0  ;;  %v4799_v22 = vsel %vm1345_vm2, %v4753_v7, 0.0  ;;  %v4798_v37 = vadd.f32 %v4797_v35, %v4796_v60  ;;  %5083 = vst.msk [vmem:[%s7453_s30 + $0x34] sm:$0xf] %vm753_vm0, %v5609_v18  ;;  %v4754_v55 = vld [vmem:[#allocation3 + $0x80] sm:$0xff] }
 0x217   : > { %v4898_v30 = vadd.f32 %v4897_v47, %v4896_v33  ;;  %4726 = vst.msk [vmem:[#allocation3 + $0xa0] sm:$0xff] %vm1345_vm2, %v4694_v17  ;;  %v5614_v59 = vpack.c.bf16 %v4756_v41, %v4756_v41  ;;  %v4856_v34 = vmul.f32 %v4754_v55, %v4754_v55  ;;  %v5612_v58 = vpack.c.bf16 %v4754_v55, %v4754_v55  ;;  %v7677_v32 = vpop.f32.mrf.mxu1  ;;  %v7697_v20 = vpop.f32.mrf.mxu0 }
 0x218   : > { %v4018_v44 = vadd.f32 %v4017_v31, %v7356_v2  ;;  %v4901_v4 = vsel %vm1345_vm2, %v4855_v24, 0.0  ;;  %v4800_v12 = vadd.f32 %v4799_v22, %v4798_v37  ;;  %v4665_v51 = vsel %vm7614_vm1, %v4537_v61, 0.0 }
 0x219   : > { %v4900_v54 = vadd.f32 %v4899_v48, %v4898_v30  ;;  %v7936_v36 = vand.u32 15, %v7444_v57  ;;  %5088 = vst.msk [vmem:[%s7453_s30 + $0x48] sm:$0xf] %vm753_vm0, %v5614_v59  ;;  %v4801_v2 = vsel %vm1345_vm2, %v4754_v55, 0.0  ;;  %5086 = vst.msk [vmem:[%s7453_s30 + $0x40] sm:$0xf] %vm753_vm0, %v5612_v58  ;;  %v4697_v38 = vadd.f32 %v4665_v51, %v4569_v1  ;;  %v4033_v29 = vpop.f32.mrf.mxu1 }
 0x21a   : > { %v4760_v39 = vld [vmem:[#allocation3 + $0xb0] sm:$0xff]  ;;  %v4663_v45 = vsel %vm7626_vm4, %v4535_v3, 0.0  ;;  %v4540_v57 = vadd.f32 %v7633_v40, %v4026_v62  ;;  %v7939_v13 = vand.u32 15, %v7448_v21  ;;  %v4858_v26 = vmul.f32 %v4756_v41, %v4756_v41  ;;  %v4570_v3 = vld [vmem:[#allocation3 + $0xc0] sm:$0xff] }
 0x21b   : > { %vm7671_vm3 = vcmp.ne.s32.totalorder %v7936_v36, 15  ;;  %v4802_v6 = vadd.f32 %v4801_v2, %v4800_v12  ;;  %v4902_v8 = vadd.f32 %v4901_v4, %v4900_v54  ;;  %v4903_v14 = vsel %vm1345_vm2, %v4856_v34, 0.0  ;;  %4729 = vst.msk [vmem:[#allocation3 + $0xb8] sm:$0xff] %vm1345_vm2, %v4697_v38  ;;  %v6052_v30 = vpop.f32.mrf.mxu1  ;;  %v4573_v38 = vld [vmem:[#allocation3 + $0xd8] sm:$0xff] }
 0x21c   : > { %vm7689_vm5 = vcmp.ne.s32.totalorder %v7939_v13, 15  ;;  %v4757_v10 = vld [vmem:[#allocation3 + $0x98] sm:$0xff]  ;;  %v4755_v11 = vld [vmem:[#allocation3 + $0x88] sm:$0xff]  ;;  %v5618_v23 = vpack.c.bf16 %v4760_v39, %v4760_v39  ;;  %v4695_v40 = vadd.f32 %v4663_v45, %v4567_v15  ;;  %v4700_v9 = vadd.f32 %v4572_v16, %v4540_v57 }
 0x21d   : > { %v4538_v21 = vadd.f32 %v7642_v27, %v4018_v44  ;;  %v4805_v31 = vsel %vm1345_vm2, %v4756_v41, 0.0  ;;  %v4904_v33 = vadd.f32 %v4903_v14, %v4902_v8  ;;  %v5615_v24 = vpack.c.bf16 %v4757_v10, %v4757_v10  ;;  %v4499_v44 = vpop.f32.mrf.mxu0  ;;  %v4036_v57 = vpop.f32.mrf.mxu1 }
 0x21e   : > { %v512_v50 = vand.u32 15, %v7493_v19  ;;  %v4859_v25 = vmul.f32 %v4757_v10, %v4757_v10  ;;  %v4803_v60 = vsel %vm1345_vm2, %v4755_v11, 0.0  ;;  %v4857_v18 = vmul.f32 %v4755_v11, %v4755_v11  ;;  %5092 = vst.msk [vmem:[%s7453_s30 + $0x58] sm:$0xf] %vm753_vm0, %v5618_v23  ;;  %v4758_v61 = vld [vmem:[#allocation3 + $0xa0] sm:$0xff]  ;;  %v4571_v23 = vld [vmem:[#allocation3 + $0xc8] sm:$0xff] }
 0x21f   : > { %v5613_v17 = vpack.c.bf16 %v4755_v11, %v4755_v11  ;;  %4727 = vst.msk [vmem:[#allocation3 + $0xa8] sm:$0xff] %vm1345_vm2, %v4695_v40  ;;  %4732 = vst.msk [vmem:[#allocation3 + $0xd0] sm:$0xff] %vm1345_vm2, %v4700_v9  ;;  %v4907_v27 = vsel %vm1345_vm2, %v4858_v26, 0.0  ;;  %v4804_v35 = vadd.f32 %v4803_v60, %v4802_v6  ;;  %v4813_v47 = vsel %vm1345_vm2, %v4760_v39, 0.0  ;;  %v6086_v15 = vpop.f32.mrf.mxu0  ;;  %v7945_v40 = vld [vmem:[#allocation6_spill] sm:$0xff] }
 0x220   : > { %5089 = vst.msk [vmem:[%s7453_s30 + $0x4c] sm:$0xf] %vm753_vm0, %v5615_v24  ;;  %v4860_v41 = vmul.f32 %v4758_v61, %v4758_v61  ;;  %v4905_v62 = vsel %vm1345_vm2, %v4857_v18, 0.0  ;;  %v5616_v48 = vpack.c.bf16 %v4758_v61, %v4758_v61  ;;  %v4698_v22 = vadd.f32 %v4570_v3, %v4538_v21 }
 0x221   : > { %5087 = vst.msk [vmem:[%s7453_s30 + $0x44] sm:$0xf] %vm753_vm0, %v5613_v17  ;;  %v4029_v37 = vadd.f32 %v7650_v49, %v7361_v52  ;;  %v4806_v55 = vadd.f32 %v4805_v31, %v4804_v35  ;;  %v4906_v59 = vadd.f32 %v4905_v62, %v4904_v33  ;;  %v4862_v34 = vmul.f32 %v4760_v39, %v4760_v39  ;;  %v4502_v17 = vpop.f32.mrf.mxu0 }
 0x222   : > { %v4021_v58 = vadd.f32 %v7663_v43, %v7366_v46  ;;  %v4807_v4 = vsel %vm1345_vm2, %v4757_v10, 0.0  ;;  %v4909_v54 = vsel %vm1345_vm2, %v4859_v25, 0.0  ;;  %v4809_v12 = vsel %vm1345_vm2, %v4758_v61, 0.0  ;;  %5090 = vst.msk [vmem:[%s7453_s30 + $0x50] sm:$0xf] %vm753_vm0, %v5616_v48  ;;  %v4761_v36 = vld [vmem:[#allocation3 + $0xb8] sm:$0xff] }
 0x223   : > { %4730 = vst.msk [vmem:[#allocation3 + $0xc0] sm:$0xff] %vm1345_vm2, %v4698_v22  ;;  %v4541_v52 = vadd.f32 %v7652_v5, %v4029_v37  ;;  %v7942_v49 = vand.u32 15, %v7463_v56  ;;  %v4908_v46 = vadd.f32 %v4907_v27, %v4906_v59  ;;  %v4808_v43 = vadd.f32 %v4807_v4, %v4806_v55  ;;  %v4576_v25 = vld [vmem:[#allocation3 + $0xf0] sm:$0xff] }
 0x224   : > { %v4911_v51 = vsel %vm1345_vm2, %v4860_v41, 0.0  ;;  %v4539_v2 = vadd.f32 %v7675_v0, %v4021_v58  ;;  %v5619_v39 = vpack.c.bf16 %v4761_v36, %v4761_v36  ;;  %v4042_v56 = vadd.f32 %v7677_v32, %v7371_v42 }
 0x225   : > { %vm7725_vm6 = vcmp.ne.s32.totalorder %v7942_v49, 15  ;;  %v4669_v45 = vsel %vm7671_vm3, %v4541_v52, 0.0  ;;  %v4034_v5 = vadd.f32 %v4033_v29, %v7376_v28  ;;  %v4810_v13 = vadd.f32 %v4809_v12, %v4808_v43  ;;  %v4575_v12 = vld [vmem:[#allocation3 + $0xe8] sm:$0xff] }
 0x226   : > { %v4910_v26 = vadd.f32 %v4909_v54, %v4908_v46  ;;  %v4759_v6 = vld [vmem:[#allocation3 + $0xa8] sm:$0xff]  ;;  %v7736_v8 = vld [vmem:[#allocation3 + $0xd0] sm:$0xff]  ;;  %v4701_v14 = vadd.f32 %v4669_v45, %v4573_v38  ;;  %v4667_v0 = vsel %vm7689_vm5, %v4539_v2, 0.0  ;;  %5093 = vst.msk [vmem:[%s7453_s30 + $0x5c] sm:$0xf] %vm753_vm0, %v5619_v39  ;;  %v4045_v28 = vadd.f32 %v6052_v30, %v7381_v63  ;;  %v4577_v30 = vld [vmem:[#allocation3 + $0xf8] sm:$0xff] }
 0x227   : > { %v4811_v7 = vsel %vm1345_vm2, %v4759_v6, 0.0  ;;  %v4861_v16 = vmul.f32 %v4759_v6, %v4759_v6  ;;  %v5617_v42 = vpack.c.bf16 %v4759_v6, %v4759_v6  ;;  %v4863_v10 = vmul.f32 %v4761_v36, %v4761_v36 }
 0x228   : > { %v4912_v32 = vadd.f32 %v4911_v51, %v4910_v26  ;;  %v4812_v11 = vadd.f32 %v4811_v7, %v4810_v13  ;;  %4733 = vst.msk [vmem:[#allocation3 + $0xd8] sm:$0xff] %vm1345_vm2, %v4701_v14  ;;  %v4037_v9 = vadd.f32 %v4036_v57, %v7945_v40  ;;  %v5622_v21 = vpack.c.bf16 %v7736_v8, %v7736_v8 }
 0x229   : > { %v4913_v53 = vsel %vm1345_vm2, %v4861_v16, 0.0  ;;  %5091 = vst.msk [vmem:[%s7453_s30 + $0x54] sm:$0xf] %vm753_vm0, %v5617_v42  ;;  %v4699_v29 = vadd.f32 %v4667_v0, %v4571_v23  ;;  %v4544_v31 = vadd.f32 %v7697_v20, %v4042_v56  ;;  %v4542_v60 = vadd.f32 %v4499_v44, %v4034_v5 }
 0x22a   : > { %v4814_v63 = vadd.f32 %v4813_v47, %v4812_v11  ;;  %v4914_v33 = vadd.f32 %v4913_v53, %v4912_v32  ;;  %v4762_v24 = vld [vmem:[#allocation3 + $0xc0] sm:$0xff]  ;;  %vm7754_vm7 = vcmp.ne.s32.totalorder %v512_v50, 15  ;;  %v4915_v61 = vsel %vm1345_vm2, %v4862_v34, 0.0  ;;  %5096 = vst.msk [vmem:[%s7453_s30 + $0x68] sm:$0xf] %vm753_vm0, %v5622_v21 }
 0x22b   : > { %v4815_v27 = vsel %vm1345_vm2, %v4761_v36, 0.0  ;;  %v5620_v20 = vpack.c.bf16 %v4762_v24, %v4762_v24  ;;  %4731 = vst.msk [vmem:[#allocation3 + $0xc8] sm:$0xff] %vm1345_vm2, %v4699_v29  ;;  %v4704_v35 = vadd.f32 %v4576_v25, %v4544_v31  ;;  %v4574_v47 = vld [vmem:[#allocation3 + $0xe0] sm:$0xff]  ;;  %v4545_v62 = vadd.f32 %v6086_v15, %v4045_v28 }
 0x22c   : > { %v4916_v41 = vadd.f32 %v4915_v61, %v4914_v33  ;;  %v4816_v3 = vadd.f32 %v4815_v27, %v4814_v63  ;;  %v4702_v19 = vadd.f32 %v4574_v47, %v4542_v60  ;;  %v4917_v50 = vsel %vm1345_vm2, %v4863_v10, 0.0 }
 0x22d   : > { %v4864_v48 = vmul.f32 %v4762_v24, %v4762_v24  ;;  %5094 = vst.msk [vmem:[%s7453_s30 + $0x60] sm:$0xf] %vm753_vm0, %v5620_v20  ;;  %v4543_v22 = vadd.f32 %v4502_v17, %v4037_v9  ;;  %v4673_v55 = vsel %vm7725_vm6, %v4545_v62, 0.0  ;;  %v4817_v59 = vsel %vm1345_vm2, %v4762_v24, 0.0 }
 0x22e   : > { %4736 = vst.msk [vmem:[#allocation3 + $0xf0] sm:$0xff] %vm1345_vm2, %v4704_v35  ;;  %v4918_v37 = vadd.f32 %v4917_v50, %v4916_v41  ;;  %4734 = vst.msk [vmem:[#allocation3 + $0xe0] sm:$0xff] %vm1345_vm2, %v4702_v19  ;;  %v4705_v58 = vadd.f32 %v4673_v55, %v4577_v30  ;;  %v4818_v4 = vadd.f32 %v4817_v59, %v4816_v3  ;;  %v4821_v45 = vsel %vm1345_vm2, %v7736_v8, 0.0 }
 0x22f   : > { %v4765_v34 = vld [vmem:[#allocation3 + $0xd8] sm:$0xff]  ;;  %v4671_v44 = vsel %vm7754_vm7, %v4543_v22, 0.0  ;;  %v4919_v52 = vsel %vm1345_vm2, %v4864_v48, 0.0  ;;  %v4866_v43 = vmul.f32 %v7736_v8, %v7736_v8 }
 0x230   : > { %v5623_v54 = vpack.c.bf16 %v4765_v34, %v4765_v34  ;;  %4737 = vst.msk [vmem:[#allocation3 + $0xf8] sm:$0xff] %vm1345_vm2, %v4705_v58  ;;  %v4703_v49 = vadd.f32 %v4671_v44, %v4575_v12  ;;  %v4920_v46 = vadd.f32 %v4919_v52, %v4918_v37  ;;  %v4867_v56 = vmul.f32 %v4765_v34, %v4765_v34 }
 0x231   : > { %v4923_v14 = vsel %vm1345_vm2, %v4866_v43, 0.0  ;;  %v4823_v0 = vsel %vm1345_vm2, %v4765_v34, 0.0 }
 0x232   : > { %5097 = vst.msk [vmem:[%s7453_s30 + $0x6c] sm:$0xf] %vm753_vm0, %v5623_v54  ;;  %v4763_v1 = vld [vmem:[#allocation3 + $0xc8] sm:$0xff]  ;;  %v4925_v28 = vsel %vm1345_vm2, %v4867_v56, 0.0 }
 0x233   : > { %v4819_v51 = vsel %vm1345_vm2, %v4763_v1, 0.0  ;;  %v4865_v36 = vmul.f32 %v4763_v1, %v4763_v1  ;;  %v5621_v2 = vpack.c.bf16 %v4763_v1, %v4763_v1  ;;  %4735 = vst.msk [vmem:[#allocation3 + $0xe8] sm:$0xff] %vm1345_vm2, %v4703_v49 }
 0x234   : > { %v4820_v39 = vadd.f32 %v4819_v51, %v4818_v4 }
 0x235   : > { %v4768_v38 = vld [vmem:[#allocation3 + $0xf0] sm:$0xff]  ;;  %v4921_v5 = vsel %vm1345_vm2, %v4865_v36, 0.0  ;;  %5095 = vst.msk [vmem:[%s7453_s30 + $0x64] sm:$0xf] %vm753_vm0, %v5621_v2  ;;  %v4766_v13 = vld [vmem:[#allocation3 + $0xe0] sm:$0xff] }
 0x236   : > { %v5626_v57 = vpack.c.bf16 %v4768_v38, %v4768_v38  ;;  %v4822_v26 = vadd.f32 %v4821_v45, %v4820_v39  ;;  %v4922_v6 = vadd.f32 %v4921_v5, %v4920_v46  ;;  %v4868_v15 = vmul.f32 %v4766_v13, %v4766_v13 }
 0x237   : > { %v5624_v7 = vpack.c.bf16 %v4766_v13, %v4766_v13  ;;  %v4769_v42 = vld [vmem:[#allocation3 + $0xf8] sm:$0xff]  ;;  %v4825_v32 = vsel %vm1345_vm2, %v4766_v13, 0.0  ;;  %v4870_v11 = vmul.f32 %v4768_v38, %v4768_v38  ;;  %v4829_v24 = vsel %vm1345_vm2, %v4768_v38, 0.0 }
 0x238   : > { %5100 = vst.msk [vmem:[%s7453_s30 + $0x78] sm:$0xf] %vm753_vm0, %v5626_v57  ;;  %v4924_v8 = vadd.f32 %v4923_v14, %v4922_v6  ;;  %v4824_v16 = vadd.f32 %v4823_v0, %v4822_v26  ;;  %v5627_v10 = vpack.c.bf16 %v4769_v42, %v4769_v42  ;;  %v4927_v53 = vsel %vm1345_vm2, %v4868_v15, 0.0 }
 0x239   : > { %5098 = vst.msk [vmem:[%s7453_s30 + $0x70] sm:$0xf] %vm753_vm0, %v5624_v7  ;;  %v4871_v25 = vmul.f32 %v4769_v42, %v4769_v42  ;;  %v4931_v61 = vsel %vm1345_vm2, %v4870_v11, 0.0  ;;  %v4831_v27 = vsel %vm1345_vm2, %v4769_v42, 0.0 }
 0x23a   : > { %v4826_v23 = vadd.f32 %v4825_v32, %v4824_v16  ;;  %v4926_v40 = vadd.f32 %v4925_v28, %v4924_v8  ;;  %v4767_v9 = vld [vmem:[#allocation3 + $0xe8] sm:$0xff]  ;;  %5101 = vst.msk [vmem:[%s7453_s30 + $0x7c] sm:$0xf] %vm753_vm0, %v5627_v10 }
 0x23b   : > { %v4827_v21 = vsel %vm1345_vm2, %v4767_v9, 0.0  ;;  %v4869_v29 = vmul.f32 %v4767_v9, %v4767_v9  ;;  %v5625_v31 = vpack.c.bf16 %v4767_v9, %v4767_v9  ;;  %v4933_v47 = vsel %vm1345_vm2, %v4871_v25, 0.0 }
 0x23c   : > { %v4928_v63 = vadd.f32 %v4927_v53, %v4926_v40  ;;  %v4828_v33 = vadd.f32 %v4827_v21, %v4826_v23 }
 0x23d   : > { %v4929_v60 = vsel %vm1345_vm2, %v4869_v29, 0.0  ;;  %5099 = vst.msk [vmem:[%s7453_s30 + $0x74] sm:$0xf] %vm753_vm0, %v5625_v31  ;;  %vm5102_vm0 = vcmask 122880  }
 0x23e   : > { %v4830_v18 = vadd.f32 %v4829_v24, %v4828_v33  ;;  %v4930_v17 = vadd.f32 %v4929_v60, %v4928_v63 }
 0x240   : > { %v4832_v20 = vadd.f32 %v4831_v27, %v4830_v18  ;;  %v4932_v35 = vadd.f32 %v4931_v61, %v4930_v17 }
 0x242   : > { %v4833_v41 = vrot.slane %v4832_v20, 4  ;;  %v4934_v3 = vadd.f32 %v4933_v47, %v4932_v35 }
 0x244   : > { %v4834_v19 = vadd.f32 %v4833_v41, %v4832_v20  ;;  %v4935_v62 = vrot.slane %v4934_v3, 4 }
 0x246   : > { %v4835_v50 = vrot.slane %v4834_v19, 2  ;;  %v4936_v48 = vadd.f32 %v4935_v62, %v4934_v3 }
 0x248   : > { %v4836_v22 = vadd.f32 %v4835_v50, %v4834_v19  ;;  %v4937_v37 = vrot.slane %v4936_v48, 2 }
 0x24a   : > { %v4837_v30 = vrot.slane %v4836_v22, 1  ;;  %v4938_v55 = vadd.f32 %v4937_v37, %v4936_v48 }
 0x24c   : > { %v4838_v59 = vadd.f32 %v4837_v30, %v4836_v22  ;;  %v4939_v34 = vrot.slane %v4938_v55, 1 }
 0x24e   : > { %v4940_v58 = vadd.f32 %v4939_v34, %v4938_v55  ;;  %5103 = vst.msk [vmem:[%s265_s9] sm:$0x1] %vm5102_vm0, %v4838_v59 }
 0x250   : > { %5104 = vst.msk [vmem:[%s268_s12] sm:$0x1] %vm5102_vm0, %v4940_v58 }
 0x251 PF: > { %s17_s21 = sadd.s32 1, %s6218_s21  }
 0x252   : > { %p14_p4 = scmp.ge.s32.totalorder %s17_s21, 4  }
 0x254   :  { %16 = sbr.rel (!%p14_p4) target bundleno = 1 (0x1), region = 98 }

</bundles_post_ra>
